<compile_context>
chip_gen: v6e
topology: v6e:2x2x1
jax: 0.10.0
libtpu: 0.0.40
codegen_flags: <defaults>
</compile_context>

<pallas_src>
import functools
import math

import jax
import jax.numpy as jnp
from jax.experimental import pallas as pl
from jax.experimental.pallas import tpu as pltpu

HIDDEN = 128   # Actor.hidden_size
D_FEAT = 6     # GRUModel.d_feat


def _gru_gates(gi, gh, h, bn):
    """PyTorch-convention GRU gate math.

    gi already contains b_ih (+ b_hh for the r/z gates); gh has NO bias;
    bn is the hidden-side bias of the n-gate (it sits inside r * (...)).
    """
    H = HIDDEN
    r = jax.nn.sigmoid(gi[:, 0:H] + gh[:, 0:H])
    z = jax.nn.sigmoid(gi[:, H:2 * H] + gh[:, H:2 * H])
    n = jnp.tanh(gi[:, 2 * H:3 * H] + r * (gh[:, 2 * H:3 * H] + bn))
    return (1.0 - z) * n + z * h


def actor_kernel(feat_ref, xt_ref, *rest,
                 seq_len, deterministic, with_logprob, action_dim, pad_width):
    if deterministic:
        noise_ref = None
        (w_ih0_ref, w_hh0_ref, bg0_ref, bn0_ref,
         w_ih1_ref, w_hh1_ref, bg1_ref, bn1_ref,
         w1a_ref, w1b_ref, b1_ref,
         w23_ref, b23_ref,
         out_ref) = rest
    else:
        (noise_ref,
         w_ih0_ref, w_hh0_ref, bg0_ref, bn0_ref,
         w_ih1_ref, w_hh1_ref, bg1_ref, bn1_ref,
         w1a_ref, w1b_ref, b1_ref,
         w23_ref, b23_ref,
         out_ref) = rest

    T = seq_len
    H = HIDDEN
    A = action_dim
    B = xt_ref.shape[0]

    w_hh0 = w_hh0_ref[...]
    bn0 = bn0_ref[...]
    w_ih1 = w_ih1_ref[...]
    w_hh1 = w_hh1_ref[...]
    bg1 = bg1_ref[...]
    bn1 = bn1_ref[...]

    # ---- Hoisted layer-0 input projection: one matmul for ALL timesteps. ----
    # feat_ref is (T*B, D_FEAT); result is (T*B, 3H), timestep t lives in rows
    # [t*B, (t+1)*B).  This is off the recurrence's critical path.
    gi0_all = (jnp.dot(feat_ref[...], w_ih0_ref[...],
                       preferred_element_type=jnp.float32) + bg0_ref[...])

    h0 = jnp.zeros((B, H), jnp.float32)
    h1 = jnp.zeros((B, H), jnp.float32)

    def step(gi0, h0, h1):
        gh0 = jnp.dot(h0, w_hh0, preferred_element_type=jnp.float32)
        h0 = _gru_gates(gi0, gh0, h0, bn0)
        gi1 = jnp.dot(h0, w_ih1, preferred_element_type=jnp.float32) + bg1
        gh1 = jnp.dot(h1, w_hh1, preferred_element_type=jnp.float32)
        h1 = _gru_gates(gi1, gh1, h1, bn1)
        return h0, h1

    if T <= 16:
        # Small sequence: static unroll (LLO scheduler sees the whole chain).
        for t in range(T):
            h0, h1 = step(gi0_all[t * B:(t + 1) * B, :], h0, h1)
    else:
        # Long sequence: bounded code size / register pressure via fori_loop.
        def body(t, carry):
            h0, h1 = carry
            gi0 = jax.lax.dynamic_slice_in_dim(gi0_all, t * B, B, axis=0)
            return step(gi0, h0, h1)
        h0, h1 = jax.lax.fori_loop(0, T, body, (h0, h1), unroll=2)

    xt = xt_ref[...]                             # (B, 1)  last state column

    # l1: Linear(hidden+1 -> 256); concat folded into two terms, then ReLU.
    pre1 = (jnp.dot(h1, w1a_ref[...], preferred_element_type=jnp.float32)
            + xt * w1b_ref[...] + b1_ref[...])
    x = jnp.maximum(pre1, 0.0)

    # Fused heads: one (256, 2A) matmul producing [mu_pre | logstd_pre].
    head = jnp.dot(x, w23_ref[...],
                   preferred_element_type=jnp.float32) + b23_ref[...]
    mu = jnp.tanh(head[:, :A])
    log_std = jnp.tanh(head[:, A:2 * A])
    std = jnp.exp(log_std)

    if deterministic:
        u = mu
        a = u                                    # matches PyTorch: a = u (no tanh)
    else:
        eps = noise_ref[...]
        u = mu + std * eps                       # reparameterized sample
        a = jnp.tanh(u)

    if with_logprob:
        # Normal(mu, std).log_prob(u).sum(1) minus tanh-squash correction.
        # (u - mu)/std == eps exactly, so no divide is needed.
        log_2pi = math.log(2.0 * math.pi)
        if deterministic:
            logpdf = -log_std - 0.5 * log_2pi
        else:
            logpdf = -0.5 * jnp.square(eps) - log_std - 0.5 * log_2pi
        corr = 2.0 * (math.log(2.0) - u - jnp.logaddexp(0.0, -2.0 * u))
        logp = jnp.sum(logpdf - corr, axis=1, keepdims=True)
        payload = jnp.concatenate([a, logp], axis=1)     # (B, A+1)
        width = A + 1
    else:
        payload = a
        width = A

    # Lane-dense output slab: [ payload | zero-pad ] with last dim = pad_width.
    pad = pad_width - width
    out_ref[...] = jnp.concatenate(
        [payload, jnp.zeros((B, pad), jnp.float32)], axis=1)


def init_params(key, action_dim):
    """Deterministic synthetic parameters (PyTorch-style uniform fan-in init)."""
    H = HIDDEN
    ks = jax.random.split(key, 15)

    def u(k, shape, bound):
        return jax.random.uniform(k, shape, jnp.float32, -bound, bound)

    kg = 1.0 / math.sqrt(H)
    p = {
        "w_ih0": u(ks[0], (D_FEAT, 3 * H), kg),
        "w_hh0": u(ks[1], (H, 3 * H), kg),
        "b_ih0": u(ks[2], (1, 3 * H), kg),
        "b_hh0": u(ks[3], (1, 3 * H), kg),
        "w_ih1": u(ks[4], (H, 3 * H), kg),
        "w_hh1": u(ks[5], (H, 3 * H), kg),
        "b_ih1": u(ks[6], (1, 3 * H), kg),
        "b_hh1": u(ks[7], (1, 3 * H), kg),
    }
    k1 = 1.0 / math.sqrt(H + 1)
    p["w1a"] = u(ks[8], (H, 256), k1)        # rows of l1.weight for the GRU part
    p["w1b"] = u(ks[9], (1, 256), k1)        # row of l1.weight for the x_t column
    p["b1"] = u(ks[10], (1, 256), k1)
    k2 = 1.0 / math.sqrt(256)
    p["w2"] = u(ks[11], (256, action_dim), k2)
    p["b2"] = u(ks[12], (1, action_dim), k2)
    p["w3"] = u(ks[13], (256, action_dim), k2)
    p["b3"] = u(ks[14], (1, action_dim), k2)
    return p


def _combine_gru_biases(b_ih, b_hh):
    """Fold b_hh for the r/z gates into the input-projection bias; keep the
    n-gate hidden bias separate (it sits inside r * (...))."""
    H = HIDDEN
    bg = jnp.concatenate(
        [b_ih[:, :2 * H] + b_hh[:, :2 * H], b_ih[:, 2 * H:]], axis=1)
    bn = b_hh[:, 2 * H:]
    return bg, bn


@functools.partial(jax.jit, static_argnames=("deterministic", "with_logprob"))
def actor_forward(params, state, noise=None, *, deterministic, with_logprob):
    """state: (B, d_feat*T + 1) float32, same convention as the PyTorch module."""
    B, S = state.shape
    T = (S - 1) // D_FEAT
    A = params["w2"].shape[1]

    # GRUModel glue: split off x_t, reshape/permute features, go time-major,
    # then flatten to (T*B, d_feat) so the layer-0 input projection is one matmul.
    feature = state[:, :-1].reshape(B, D_FEAT, T).transpose(2, 0, 1)   # (T, B, d_feat)
    feature = feature.reshape(T * B, D_FEAT)
    xt = state[:, -1:]                                                 # (B, 1)

    # Wrapper-side weight packing (cheap; constant-folds / fuses under jit).
    bg0, bn0 = _combine_gru_biases(params["b_ih0"], params["b_hh0"])
    bg1, bn1 = _combine_gru_biases(params["b_ih1"], params["b_hh1"])
    w23 = jnp.concatenate([params["w2"], params["w3"]], axis=1)        # (256, 2A)
    b23 = jnp.concatenate([params["b2"], params["b3"]], axis=1)        # (1, 2A)

    out_width = (A + 1) if with_logprob else A
    pad_width = max(128, ((out_width + 127) // 128) * 128)

    weights = (params["w_ih0"], params["w_hh0"], bg0, bn0,
               params["w_ih1"], params["w_hh1"], bg1, bn1,
               params["w1a"], params["w1b"], params["b1"],
               w23, b23)

    if deterministic:
        inputs = (feature, xt) + weights          # no noise DMA at all
    else:
        if noise is None:
            noise = jnp.zeros((B, A), jnp.float32)
        inputs = (feature, xt, noise) + weights

    kernel = functools.partial(actor_kernel, seq_len=T,
                               deterministic=bool(deterministic),
                               with_logprob=bool(with_logprob),
                               action_dim=A, pad_width=pad_width)
    vmem = pl.BlockSpec(memory_space=pltpu.MemorySpace.VMEM)
    out = pl.pallas_call(
        kernel,
        out_shape=jax.ShapeDtypeStruct((B, pad_width), jnp.float32),
        in_specs=[vmem] * len(inputs),
        out_specs=vmem,
    )(*inputs)

    a = out[:, :A]
    logp = out[:, A:A + 1] if with_logprob else None
    return a, logp


def _reference_forward(params, state, noise, *, deterministic):
    """Pure-JAX reference with PyTorch GRU/Actor semantics (for checking)."""
    B, S = state.shape
    T = (S - 1) // D_FEAT
    H = HIDDEN
    x_seq = state[:, :-1].reshape(B, D_FEAT, T).transpose(2, 0, 1)     # (T, B, d)
    xt = state[:, -1:]

    def gru_layer(seq, w_ih, w_hh, b_ih, b_hh):
        def step(h, x_t):
            gi = x_t @ w_ih + b_ih
            gh = h @ w_hh + b_hh
            r = jax.nn.sigmoid(gi[:, :H] + gh[:, :H])
            z = jax.nn.sigmoid(gi[:, H:2 * H] + gh[:, H:2 * H])
            n = jnp.tanh(gi[:, 2 * H:] + r * gh[:, 2 * H:])
            h_new = (1.0 - z) * n + z * h
            return h_new, h_new
        h_init = jnp.zeros((B, H), jnp.float32)
        _, ys = jax.lax.scan(step, h_init, seq)
        return ys

    out0 = gru_layer(x_seq, params["w_ih0"], params["w_hh0"],
                     params["b_ih0"], params["b_hh0"])
    out1 = gru_layer(out0, params["w_ih1"], params["w_hh1"],
                     params["b_ih1"], params["b_hh1"])
    g = jnp.concatenate([out1[-1], xt], axis=1)                        # (B, H+1)
    w1 = jnp.concatenate([params["w1a"], params["w1b"]], axis=0)       # (H+1, 256)
    x = jax.nn.relu(g @ w1 + params["b1"])
    mu = jnp.tanh(x @ params["w2"] + params["b2"])
    log_std = jnp.tanh(x @ params["w3"] + params["b3"])
    std = jnp.exp(log_std)
    if deterministic:
        u = mu
        a = u
    else:
        u = mu + std * noise
        a = jnp.tanh(u)
    logpdf = (-0.5 * jnp.square((u - mu) / std) - log_std
              - 0.5 * math.log(2.0 * math.pi))
    corr = 2.0 * (math.log(2.0) - u - jax.nn.softplus(-2.0 * u))
    logp = jnp.sum(logpdf - corr, axis=1, keepdims=True)
    return a, logp


if __name__ == "__main__":
    B, T, A = 8, 8, 4                       # batch, seq-len, action_dim
    state_dim = D_FEAT * T + 1              # = 49, matches GRUModel's reshape

    key = jax.random.PRNGKey(0)
    kp, ks, kn = jax.random.split(key, 3)
    params = init_params(kp, A)
    state = jax.random.normal(ks, (B, state_dim), jnp.float32)
    eps = jax.random.normal(kn, (B, A), jnp.float32)

    # Deterministic path (u = mu, a = u) — no noise input is passed/DMA'd.
    a_det, logp_det = actor_forward(params, state,
                                    deterministic=True, with_logprob=True)
    # Stochastic path (u = mu + std * eps, a = tanh(u)); eps supplied from JAX RNG.
    a_sto, logp_sto = actor_forward(params, state, eps,
                                    deterministic=False, with_logprob=True)
    # with_logprob=False path (logp math is skipped in-kernel).
    a_nolog, logp_none = actor_forward(params, state, eps,
                                       deterministic=False, with_logprob=False)

    jax.block_until_ready((a_det, logp_det, a_sto, logp_sto, a_nolog))
    assert a_det.shape == (B, A) and logp_det.shape == (B, 1)
    assert a_sto.shape == (B, A) and logp_sto.shape == (B, 1)
    assert logp_none is None

    # Pure-JAX reference check (loose tolerance: XLA's default f32 matmul
    # precision on TPU differs slightly from the in-kernel MXU path).
    ra_det, rl_det = _reference_forward(params, state, None, deterministic=True)
    ra_sto, rl_sto = _reference_forward(params, state, eps, deterministic=False)
    for got, ref in ((a_det, ra_det), (logp_det, rl_det),
                     (a_sto, ra_sto), (logp_sto, rl_sto),
                     (a_nolog, ra_sto)):
        assert jnp.allclose(got, ref, atol=5e-2, rtol=5e-2), \
            float(jnp.max(jnp.abs(got - ref)))

    print("KERNEL_OK")
</pallas_src>

<mosaic_0001>
module attributes {stable_mosaic.version = 11 : i64} {
  func.func @actor_kernel(%arg0: memref<64x6xf32, #tpu.memory_space<vmem>>, %arg1: memref<8x1xf32, #tpu.memory_space<vmem>>, %arg2: memref<6x384xf32, #tpu.memory_space<vmem>>, %arg3: memref<128x384xf32, #tpu.memory_space<vmem>>, %arg4: memref<1x384xf32, #tpu.memory_space<vmem>>, %arg5: memref<1x128xf32, #tpu.memory_space<vmem>>, %arg6: memref<128x384xf32, #tpu.memory_space<vmem>>, %arg7: memref<128x384xf32, #tpu.memory_space<vmem>>, %arg8: memref<1x384xf32, #tpu.memory_space<vmem>>, %arg9: memref<1x128xf32, #tpu.memory_space<vmem>>, %arg10: memref<128x256xf32, #tpu.memory_space<vmem>>, %arg11: memref<1x256xf32, #tpu.memory_space<vmem>>, %arg12: memref<1x256xf32, #tpu.memory_space<vmem>>, %arg13: memref<256x8xf32, #tpu.memory_space<vmem>>, %arg14: memref<1x8xf32, #tpu.memory_space<vmem>>, %arg15: memref<8x128xf32, #tpu.memory_space<vmem>>) attributes {dimension_semantics = [], scalar_prefetch = 0 : i64, scratch_operands = 0 : i64, tpu.core_type = #tpu.core_type<tc>} {
    %c0 = arith.constant 0 : index
    %c0_0 = arith.constant 0 : index
    %0 = vector.load %arg3[%c0, %c0_0] : memref<128x384xf32, #tpu.memory_space<vmem>>, vector<128x384xf32>
    %c0_1 = arith.constant 0 : index
    %c0_2 = arith.constant 0 : index
    %1 = vector.load %arg5[%c0_1, %c0_2] : memref<1x128xf32, #tpu.memory_space<vmem>>, vector<1x128xf32>
    %c0_3 = arith.constant 0 : index
    %c0_4 = arith.constant 0 : index
    %2 = vector.load %arg6[%c0_3, %c0_4] : memref<128x384xf32, #tpu.memory_space<vmem>>, vector<128x384xf32>
    %c0_5 = arith.constant 0 : index
    %c0_6 = arith.constant 0 : index
    %3 = vector.load %arg7[%c0_5, %c0_6] : memref<128x384xf32, #tpu.memory_space<vmem>>, vector<128x384xf32>
    %c0_7 = arith.constant 0 : index
    %c0_8 = arith.constant 0 : index
    %4 = vector.load %arg8[%c0_7, %c0_8] : memref<1x384xf32, #tpu.memory_space<vmem>>, vector<1x384xf32>
    %c0_9 = arith.constant 0 : index
    %c0_10 = arith.constant 0 : index
    %5 = vector.load %arg9[%c0_9, %c0_10] : memref<1x128xf32, #tpu.memory_space<vmem>>, vector<1x128xf32>
    %c0_11 = arith.constant 0 : index
    %c0_12 = arith.constant 0 : index
    %6 = vector.load %arg0[%c0_11, %c0_12] : memref<64x6xf32, #tpu.memory_space<vmem>>, vector<64x6xf32>
    %c0_13 = arith.constant 0 : index
    %c0_14 = arith.constant 0 : index
    %7 = vector.load %arg2[%c0_13, %c0_14] : memref<6x384xf32, #tpu.memory_space<vmem>>, vector<6x384xf32>
    %cst = arith.constant dense<0.000000e+00> : vector<64x384xf32>
    %8 = tpu.matmul %6, %7, %cst {dimension_numbers = #tpu.dot_dimension_numbers<[1], [0], [0], [1], [0, 0, 1, 1], [], []>} : vector<64x6xf32>, vector<6x384xf32>, vector<64x384xf32> -> vector<64x384xf32>
    %c0_15 = arith.constant 0 : index
    %c0_16 = arith.constant 0 : index
    %9 = vector.load %arg4[%c0_15, %c0_16] : memref<1x384xf32, #tpu.memory_space<vmem>>, vector<1x384xf32>
    %10 = vector.broadcast %9 : vector<1x384xf32> to vector<64x384xf32>
    %11 = arith.addf %8, %10 : vector<64x384xf32>
    %cst_17 = arith.constant 0.000000e+00 : f32
    %12 = vector.broadcast %cst_17 : f32 to vector<8x128xf32>
    %cst_18 = arith.constant 0.000000e+00 : f32
    %13 = vector.broadcast %cst_18 : f32 to vector<8x128xf32>
    %14 = vector.extract_strided_slice %11 {offsets = [0, 0], sizes = [8, 384], strides = [1, 1]} : vector<64x384xf32> to vector<8x384xf32>
    %cst_19 = arith.constant dense<0.000000e+00> : vector<8x384xf32>
    %15 = tpu.matmul %12, %0, %cst_19 {dimension_numbers = #tpu.dot_dimension_numbers<[1], [0], [0], [1], [0, 0, 1, 1], [], []>} : vector<8x128xf32>, vector<128x384xf32>, vector<8x384xf32> -> vector<8x384xf32>
    %16 = vector.extract_strided_slice %14 {offsets = [0, 0], sizes = [8, 128], strides = [1, 1]} : vector<8x384xf32> to vector<8x128xf32>
    %17 = vector.extract_strided_slice %15 {offsets = [0, 0], sizes = [8, 128], strides = [1, 1]} : vector<8x384xf32> to vector<8x128xf32>
    %18 = arith.addf %16, %17 : vector<8x128xf32>
    %19 = arith.negf %18 : vector<8x128xf32>
    %20 = math.exp %19 : vector<8x128xf32>
    %cst_20 = arith.constant 1.000000e+00 : f32
    %21 = vector.broadcast %cst_20 : f32 to vector<8x128xf32>
    %22 = arith.addf %21, %20 : vector<8x128xf32>
    %23 = arith.divf %21, %22 : vector<8x128xf32>
    %24 = vector.extract_strided_slice %14 {offsets = [0, 128], sizes = [8, 128], strides = [1, 1]} : vector<8x384xf32> to vector<8x128xf32>
    %25 = vector.extract_strided_slice %15 {offsets = [0, 128], sizes = [8, 128], strides = [1, 1]} : vector<8x384xf32> to vector<8x128xf32>
    %26 = arith.addf %24, %25 : vector<8x128xf32>
    %27 = arith.negf %26 : vector<8x128xf32>
    %28 = math.exp %27 : vector<8x128xf32>
    %cst_21 = arith.constant 1.000000e+00 : f32
    %29 = vector.broadcast %cst_21 : f32 to vector<8x128xf32>
    %30 = arith.addf %29, %28 : vector<8x128xf32>
    %31 = arith.divf %29, %30 : vector<8x128xf32>
    %32 = vector.extract_strided_slice %14 {offsets = [0, 256], sizes = [8, 128], strides = [1, 1]} : vector<8x384xf32> to vector<8x128xf32>
    %33 = vector.extract_strided_slice %15 {offsets = [0, 256], sizes = [8, 128], strides = [1, 1]} : vector<8x384xf32> to vector<8x128xf32>
    %34 = vector.broadcast %1 : vector<1x128xf32> to vector<8x128xf32>
    %35 = arith.addf %33, %34 : vector<8x128xf32>
    %36 = arith.mulf %23, %35 : vector<8x128xf32>
    %37 = arith.addf %32, %36 : vector<8x128xf32>
    %38 = math.tanh %37 : vector<8x128xf32>
    %cst_22 = arith.constant 1.000000e+00 : f32
    %39 = vector.broadcast %cst_22 : f32 to vector<8x128xf32>
    %40 = arith.subf %39, %31 : vector<8x128xf32>
    %41 = arith.mulf %40, %38 : vector<8x128xf32>
    %42 = arith.mulf %31, %12 : vector<8x128xf32>
    %43 = arith.addf %41, %42 : vector<8x128xf32>
    %cst_23 = arith.constant dense<0.000000e+00> : vector<8x384xf32>
    %44 = tpu.matmul %43, %2, %cst_23 {dimension_numbers = #tpu.dot_dimension_numbers<[1], [0], [0], [1], [0, 0, 1, 1], [], []>} : vector<8x128xf32>, vector<128x384xf32>, vector<8x384xf32> -> vector<8x384xf32>
    %45 = vector.broadcast %4 : vector<1x384xf32> to vector<8x384xf32>
    %46 = arith.addf %44, %45 : vector<8x384xf32>
    %cst_24 = arith.constant dense<0.000000e+00> : vector<8x384xf32>
    %47 = tpu.matmul %13, %3, %cst_24 {dimension_numbers = #tpu.dot_dimension_numbers<[1], [0], [0], [1], [0, 0, 1, 1], [], []>} : vector<8x128xf32>, vector<128x384xf32>, vector<8x384xf32> -> vector<8x384xf32>
    %48 = vector.extract_strided_slice %46 {offsets = [0, 0], sizes = [8, 128], strides = [1, 1]} : vector<8x384xf32> to vector<8x128xf32>
    %49 = vector.extract_strided_slice %47 {offsets = [0, 0], sizes = [8, 128], strides = [1, 1]} : vector<8x384xf32> to vector<8x128xf32>
    %50 = arith.addf %48, %49 : vector<8x128xf32>
    %51 = arith.negf %50 : vector<8x128xf32>
    %52 = math.exp %51 : vector<8x128xf32>
    %cst_25 = arith.constant 1.000000e+00 : f32
    %53 = vector.broadcast %cst_25 : f32 to vector<8x128xf32>
    %54 = arith.addf %53, %52 : vector<8x128xf32>
    %55 = arith.divf %53, %54 : vector<8x128xf32>
    %56 = vector.extract_strided_slice %46 {offsets = [0, 128], sizes = [8, 128], strides = [1, 1]} : vector<8x384xf32> to vector<8x128xf32>
    %57 = vector.extract_strided_slice %47 {offsets = [0, 128], sizes = [8, 128], strides = [1, 1]} : vector<8x384xf32> to vector<8x128xf32>
    %58 = arith.addf %56, %57 : vector<8x128xf32>
    %59 = arith.negf %58 : vector<8x128xf32>
    %60 = math.exp %59 : vector<8x128xf32>
    %cst_26 = arith.constant 1.000000e+00 : f32
    %61 = vector.broadcast %cst_26 : f32 to vector<8x128xf32>
    %62 = arith.addf %61, %60 : vector<8x128xf32>
    %63 = arith.divf %61, %62 : vector<8x128xf32>
    %64 = vector.extract_strided_slice %46 {offsets = [0, 256], sizes = [8, 128], strides = [1, 1]} : vector<8x384xf32> to vector<8x128xf32>
    %65 = vector.extract_strided_slice %47 {offsets = [0, 256], sizes = [8, 128], strides = [1, 1]} : vector<8x384xf32> to vector<8x128xf32>
    %66 = vector.broadcast %5 : vector<1x128xf32> to vector<8x128xf32>
    %67 = arith.addf %65, %66 : vector<8x128xf32>
    %68 = arith.mulf %55, %67 : vector<8x128xf32>
    %69 = arith.addf %64, %68 : vector<8x128xf32>
    %70 = math.tanh %69 : vector<8x128xf32>
    %cst_27 = arith.constant 1.000000e+00 : f32
    %71 = vector.broadcast %cst_27 : f32 to vector<8x128xf32>
    %72 = arith.subf %71, %63 : vector<8x128xf32>
    %73 = arith.mulf %72, %70 : vector<8x128xf32>
    %74 = arith.mulf %63, %13 : vector<8x128xf32>
    %75 = arith.addf %73, %74 : vector<8x128xf32>
    %76 = vector.extract_strided_slice %11 {offsets = [8, 0], sizes = [8, 384], strides = [1, 1]} : vector<64x384xf32> to vector<8x384xf32>
    %cst_28 = arith.constant dense<0.000000e+00> : vector<8x384xf32>
    %77 = tpu.matmul %43, %0, %cst_28 {dimension_numbers = #tpu.dot_dimension_numbers<[1], [0], [0], [1], [0, 0, 1, 1], [], []>} : vector<8x128xf32>, vector<128x384xf32>, vector<8x384xf32> -> vector<8x384xf32>
    %78 = vector.extract_strided_slice %76 {offsets = [0, 0], sizes = [8, 128], strides = [1, 1]} : vector<8x384xf32> to vector<8x128xf32>
    %79 = vector.extract_strided_slice %77 {offsets = [0, 0], sizes = [8, 128], strides = [1, 1]} : vector<8x384xf32> to vector<8x128xf32>
    %80 = arith.addf %78, %79 : vector<8x128xf32>
    %81 = arith.negf %80 : vector<8x128xf32>
    %82 = math.exp %81 : vector<8x128xf32>
    %cst_29 = arith.constant 1.000000e+00 : f32
    %83 = vector.broadcast %cst_29 : f32 to vector<8x128xf32>
    %84 = arith.addf %83, %82 : vector<8x128xf32>
    %85 = arith.divf %83, %84 : vector<8x128xf32>
    %86 = vector.extract_strided_slice %76 {offsets = [0, 128], sizes = [8, 128], strides = [1, 1]} : vector<8x384xf32> to vector<8x128xf32>
    %87 = vector.extract_strided_slice %77 {offsets = [0, 128], sizes = [8, 128], strides = [1, 1]} : vector<8x384xf32> to vector<8x128xf32>
    %88 = arith.addf %86, %87 : vector<8x128xf32>
    %89 = arith.negf %88 : vector<8x128xf32>
    %90 = math.exp %89 : vector<8x128xf32>
    %cst_30 = arith.constant 1.000000e+00 : f32
    %91 = vector.broadcast %cst_30 : f32 to vector<8x128xf32>
    %92 = arith.addf %91, %90 : vector<8x128xf32>
    %93 = arith.divf %91, %92 : vector<8x128xf32>
    %94 = vector.extract_strided_slice %76 {offsets = [0, 256], sizes = [8, 128], strides = [1, 1]} : vector<8x384xf32> to vector<8x128xf32>
    %95 = vector.extract_strided_slice %77 {offsets = [0, 256], sizes = [8, 128], strides = [1, 1]} : vector<8x384xf32> to vector<8x128xf32>
    %96 = vector.broadcast %1 : vector<1x128xf32> to vector<8x128xf32>
    %97 = arith.addf %95, %96 : vector<8x128xf32>
    %98 = arith.mulf %85, %97 : vector<8x128xf32>
    %99 = arith.addf %94, %98 : vector<8x128xf32>
    %100 = math.tanh %99 : vector<8x128xf32>
    %cst_31 = arith.constant 1.000000e+00 : f32
    %101 = vector.broadcast %cst_31 : f32 to vector<8x128xf32>
    %102 = arith.subf %101, %93 : vector<8x128xf32>
    %103 = arith.mulf %102, %100 : vector<8x128xf32>
    %104 = arith.mulf %93, %43 : vector<8x128xf32>
    %105 = arith.addf %103, %104 : vector<8x128xf32>
    %cst_32 = arith.constant dense<0.000000e+00> : vector<8x384xf32>
    %106 = tpu.matmul %105, %2, %cst_32 {dimension_numbers = #tpu.dot_dimension_numbers<[1], [0], [0], [1], [0, 0, 1, 1], [], []>} : vector<8x128xf32>, vector<128x384xf32>, vector<8x384xf32> -> vector<8x384xf32>
    %107 = vector.broadcast %4 : vector<1x384xf32> to vector<8x384xf32>
    %108 = arith.addf %106, %107 : vector<8x384xf32>
    %cst_33 = arith.constant dense<0.000000e+00> : vector<8x384xf32>
    %109 = tpu.matmul %75, %3, %cst_33 {dimension_numbers = #tpu.dot_dimension_numbers<[1], [0], [0], [1], [0, 0, 1, 1], [], []>} : vector<8x128xf32>, vector<128x384xf32>, vector<8x384xf32> -> vector<8x384xf32>
    %110 = vector.extract_strided_slice %108 {offsets = [0, 0], sizes = [8, 128], strides = [1, 1]} : vector<8x384xf32> to vector<8x128xf32>
    %111 = vector.extract_strided_slice %109 {offsets = [0, 0], sizes = [8, 128], strides = [1, 1]} : vector<8x384xf32> to vector<8x128xf32>
    %112 = arith.addf %110, %111 : vector<8x128xf32>
    %113 = arith.negf %112 : vector<8x128xf32>
    %114 = math.exp %113 : vector<8x128xf32>
    %cst_34 = arith.constant 1.000000e+00 : f32
    %115 = vector.broadcast %cst_34 : f32 to vector<8x128xf32>
    %116 = arith.addf %115, %114 : vector<8x128xf32>
    %117 = arith.divf %115, %116 : vector<8x128xf32>
    %118 = vector.extract_strided_slice %108 {offsets = [0, 128], sizes = [8, 128], strides = [1, 1]} : vector<8x384xf32> to vector<8x128xf32>
    %119 = vector.extract_strided_slice %109 {offsets = [0, 128], sizes = [8, 128], strides = [1, 1]} : vector<8x384xf32> to vector<8x128xf32>
    %120 = arith.addf %118, %119 : vector<8x128xf32>
    %121 = arith.negf %120 : vector<8x128xf32>
    %122 = math.exp %121 : vector<8x128xf32>
    %cst_35 = arith.constant 1.000000e+00 : f32
    %123 = vector.broadcast %cst_35 : f32 to vector<8x128xf32>
    %124 = arith.addf %123, %122 : vector<8x128xf32>
    %125 = arith.divf %123, %124 : vector<8x128xf32>
    %126 = vector.extract_strided_slice %108 {offsets = [0, 256], sizes = [8, 128], strides = [1, 1]} : vector<8x384xf32> to vector<8x128xf32>
    %127 = vector.extract_strided_slice %109 {offsets = [0, 256], sizes = [8, 128], strides = [1, 1]} : vector<8x384xf32> to vector<8x128xf32>
    %128 = vector.broadcast %5 : vector<1x128xf32> to vector<8x128xf32>
    %129 = arith.addf %127, %128 : vector<8x128xf32>
    %130 = arith.mulf %117, %129 : vector<8x128xf32>
    %131 = arith.addf %126, %130 : vector<8x128xf32>
    %132 = math.tanh %131 : vector<8x128xf32>
    %cst_36 = arith.constant 1.000000e+00 : f32
    %133 = vector.broadcast %cst_36 : f32 to vector<8x128xf32>
    %134 = arith.subf %133, %125 : vector<8x128xf32>
    %135 = arith.mulf %134, %132 : vector<8x128xf32>
    %136 = arith.mulf %125, %75 : vector<8x128xf32>
    %137 = arith.addf %135, %136 : vector<8x128xf32>
    %138 = vector.extract_strided_slice %11 {offsets = [16, 0], sizes = [8, 384], strides = [1, 1]} : vector<64x384xf32> to vector<8x384xf32>
    %cst_37 = arith.constant dense<0.000000e+00> : vector<8x384xf32>
    %139 = tpu.matmul %105, %0, %cst_37 {dimension_numbers = #tpu.dot_dimension_numbers<[1], [0], [0], [1], [0, 0, 1, 1], [], []>} : vector<8x128xf32>, vector<128x384xf32>, vector<8x384xf32> -> vector<8x384xf32>
    %140 = vector.extract_strided_slice %138 {offsets = [0, 0], sizes = [8, 128], strides = [1, 1]} : vector<8x384xf32> to vector<8x128xf32>
    %141 = vector.extract_strided_slice %139 {offsets = [0, 0], sizes = [8, 128], strides = [1, 1]} : vector<8x384xf32> to vector<8x128xf32>
    %142 = arith.addf %140, %141 : vector<8x128xf32>
    %143 = arith.negf %142 : vector<8x128xf32>
    %144 = math.exp %143 : vector<8x128xf32>
    %cst_38 = arith.constant 1.000000e+00 : f32
    %145 = vector.broadcast %cst_38 : f32 to vector<8x128xf32>
    %146 = arith.addf %145, %144 : vector<8x128xf32>
    %147 = arith.divf %145, %146 : vector<8x128xf32>
    %148 = vector.extract_strided_slice %138 {offsets = [0, 128], sizes = [8, 128], strides = [1, 1]} : vector<8x384xf32> to vector<8x128xf32>
    %149 = vector.extract_strided_slice %139 {offsets = [0, 128], sizes = [8, 128], strides = [1, 1]} : vector<8x384xf32> to vector<8x128xf32>
    %150 = arith.addf %148, %149 : vector<8x128xf32>
    %151 = arith.negf %150 : vector<8x128xf32>
    %152 = math.exp %151 : vector<8x128xf32>
    %cst_39 = arith.constant 1.000000e+00 : f32
    %153 = vector.broadcast %cst_39 : f32 to vector<8x128xf32>
    %154 = arith.addf %153, %152 : vector<8x128xf32>
    %155 = arith.divf %153, %154 : vector<8x128xf32>
    %156 = vector.extract_strided_slice %138 {offsets = [0, 256], sizes = [8, 128], strides = [1, 1]} : vector<8x384xf32> to vector<8x128xf32>
    %157 = vector.extract_strided_slice %139 {offsets = [0, 256], sizes = [8, 128], strides = [1, 1]} : vector<8x384xf32> to vector<8x128xf32>
    %158 = vector.broadcast %1 : vector<1x128xf32> to vector<8x128xf32>
    %159 = arith.addf %157, %158 : vector<8x128xf32>
    %160 = arith.mulf %147, %159 : vector<8x128xf32>
    %161 = arith.addf %156, %160 : vector<8x128xf32>
    %162 = math.tanh %161 : vector<8x128xf32>
    %cst_40 = arith.constant 1.000000e+00 : f32
    %163 = vector.broadcast %cst_40 : f32 to vector<8x128xf32>
    %164 = arith.subf %163, %155 : vector<8x128xf32>
    %165 = arith.mulf %164, %162 : vector<8x128xf32>
    %166 = arith.mulf %155, %105 : vector<8x128xf32>
    %167 = arith.addf %165, %166 : vector<8x128xf32>
    %cst_41 = arith.constant dense<0.000000e+00> : vector<8x384xf32>
    %168 = tpu.matmul %167, %2, %cst_41 {dimension_numbers = #tpu.dot_dimension_numbers<[1], [0], [0], [1], [0, 0, 1, 1], [], []>} : vector<8x128xf32>, vector<128x384xf32>, vector<8x384xf32> -> vector<8x384xf32>
    %169 = vector.broadcast %4 : vector<1x384xf32> to vector<8x384xf32>
    %170 = arith.addf %168, %169 : vector<8x384xf32>
    %cst_42 = arith.constant dense<0.000000e+00> : vector<8x384xf32>
    %171 = tpu.matmul %137, %3, %cst_42 {dimension_numbers = #tpu.dot_dimension_numbers<[1], [0], [0], [1], [0, 0, 1, 1], [], []>} : vector<8x128xf32>, vector<128x384xf32>, vector<8x384xf32> -> vector<8x384xf32>
    %172 = vector.extract_strided_slice %170 {offsets = [0, 0], sizes = [8, 128], strides = [1, 1]} : vector<8x384xf32> to vector<8x128xf32>
    %173 = vector.extract_strided_slice %171 {offsets = [0, 0], sizes = [8, 128], strides = [1, 1]} : vector<8x384xf32> to vector<8x128xf32>
    %174 = arith.addf %172, %173 : vector<8x128xf32>
    %175 = arith.negf %174 : vector<8x128xf32>
    %176 = math.exp %175 : vector<8x128xf32>
    %cst_43 = arith.constant 1.000000e+00 : f32
    %177 = vector.broadcast %cst_43 : f32 to vector<8x128xf32>
    %178 = arith.addf %177, %176 : vector<8x128xf32>
    %179 = arith.divf %177, %178 : vector<8x128xf32>
    %180 = vector.extract_strided_slice %170 {offsets = [0, 128], sizes = [8, 128], strides = [1, 1]} : vector<8x384xf32> to vector<8x128xf32>
    %181 = vector.extract_strided_slice %171 {offsets = [0, 128], sizes = [8, 128], strides = [1, 1]} : vector<8x384xf32> to vector<8x128xf32>
    %182 = arith.addf %180, %181 : vector<8x128xf32>
    %183 = arith.negf %182 : vector<8x128xf32>
    %184 = math.exp %183 : vector<8x128xf32>
    %cst_44 = arith.constant 1.000000e+00 : f32
    %185 = vector.broadcast %cst_44 : f32 to vector<8x128xf32>
    %186 = arith.addf %185, %184 : vector<8x128xf32>
    %187 = arith.divf %185, %186 : vector<8x128xf32>
    %188 = vector.extract_strided_slice %170 {offsets = [0, 256], sizes = [8, 128], strides = [1, 1]} : vector<8x384xf32> to vector<8x128xf32>
    %189 = vector.extract_strided_slice %171 {offsets = [0, 256], sizes = [8, 128], strides = [1, 1]} : vector<8x384xf32> to vector<8x128xf32>
    %190 = vector.broadcast %5 : vector<1x128xf32> to vector<8x128xf32>
    %191 = arith.addf %189, %190 : vector<8x128xf32>
    %192 = arith.mulf %179, %191 : vector<8x128xf32>
    %193 = arith.addf %188, %192 : vector<8x128xf32>
    %194 = math.tanh %193 : vector<8x128xf32>
    %cst_45 = arith.constant 1.000000e+00 : f32
    %195 = vector.broadcast %cst_45 : f32 to vector<8x128xf32>
    %196 = arith.subf %195, %187 : vector<8x128xf32>
    %197 = arith.mulf %196, %194 : vector<8x128xf32>
    %198 = arith.mulf %187, %137 : vector<8x128xf32>
    %199 = arith.addf %197, %198 : vector<8x128xf32>
    %200 = vector.extract_strided_slice %11 {offsets = [24, 0], sizes = [8, 384], strides = [1, 1]} : vector<64x384xf32> to vector<8x384xf32>
    %cst_46 = arith.constant dense<0.000000e+00> : vector<8x384xf32>
    %201 = tpu.matmul %167, %0, %cst_46 {dimension_numbers = #tpu.dot_dimension_numbers<[1], [0], [0], [1], [0, 0, 1, 1], [], []>} : vector<8x128xf32>, vector<128x384xf32>, vector<8x384xf32> -> vector<8x384xf32>
    %202 = vector.extract_strided_slice %200 {offsets = [0, 0], sizes = [8, 128], strides = [1, 1]} : vector<8x384xf32> to vector<8x128xf32>
    %203 = vector.extract_strided_slice %201 {offsets = [0, 0], sizes = [8, 128], strides = [1, 1]} : vector<8x384xf32> to vector<8x128xf32>
    %204 = arith.addf %202, %203 : vector<8x128xf32>
    %205 = arith.negf %204 : vector<8x128xf32>
    %206 = math.exp %205 : vector<8x128xf32>
    %cst_47 = arith.constant 1.000000e+00 : f32
    %207 = vector.broadcast %cst_47 : f32 to vector<8x128xf32>
    %208 = arith.addf %207, %206 : vector<8x128xf32>
    %209 = arith.divf %207, %208 : vector<8x128xf32>
    %210 = vector.extract_strided_slice %200 {offsets = [0, 128], sizes = [8, 128], strides = [1, 1]} : vector<8x384xf32> to vector<8x128xf32>
    %211 = vector.extract_strided_slice %201 {offsets = [0, 128], sizes = [8, 128], strides = [1, 1]} : vector<8x384xf32> to vector<8x128xf32>
    %212 = arith.addf %210, %211 : vector<8x128xf32>
    %213 = arith.negf %212 : vector<8x128xf32>
    %214 = math.exp %213 : vector<8x128xf32>
    %cst_48 = arith.constant 1.000000e+00 : f32
    %215 = vector.broadcast %cst_48 : f32 to vector<8x128xf32>
    %216 = arith.addf %215, %214 : vector<8x128xf32>
    %217 = arith.divf %215, %216 : vector<8x128xf32>
    %218 = vector.extract_strided_slice %200 {offsets = [0, 256], sizes = [8, 128], strides = [1, 1]} : vector<8x384xf32> to vector<8x128xf32>
    %219 = vector.extract_strided_slice %201 {offsets = [0, 256], sizes = [8, 128], strides = [1, 1]} : vector<8x384xf32> to vector<8x128xf32>
    %220 = vector.broadcast %1 : vector<1x128xf32> to vector<8x128xf32>
    %221 = arith.addf %219, %220 : vector<8x128xf32>
    %222 = arith.mulf %209, %221 : vector<8x128xf32>
    %223 = arith.addf %218, %222 : vector<8x128xf32>
    %224 = math.tanh %223 : vector<8x128xf32>
    %cst_49 = arith.constant 1.000000e+00 : f32
    %225 = vector.broadcast %cst_49 : f32 to vector<8x128xf32>
    %226 = arith.subf %225, %217 : vector<8x128xf32>
    %227 = arith.mulf %226, %224 : vector<8x128xf32>
    %228 = arith.mulf %217, %167 : vector<8x128xf32>
    %229 = arith.addf %227, %228 : vector<8x128xf32>
    %cst_50 = arith.constant dense<0.000000e+00> : vector<8x384xf32>
    %230 = tpu.matmul %229, %2, %cst_50 {dimension_numbers = #tpu.dot_dimension_numbers<[1], [0], [0], [1], [0, 0, 1, 1], [], []>} : vector<8x128xf32>, vector<128x384xf32>, vector<8x384xf32> -> vector<8x384xf32>
    %231 = vector.broadcast %4 : vector<1x384xf32> to vector<8x384xf32>
    %232 = arith.addf %230, %231 : vector<8x384xf32>
    %cst_51 = arith.constant dense<0.000000e+00> : vector<8x384xf32>
    %233 = tpu.matmul %199, %3, %cst_51 {dimension_numbers = #tpu.dot_dimension_numbers<[1], [0], [0], [1], [0, 0, 1, 1], [], []>} : vector<8x128xf32>, vector<128x384xf32>, vector<8x384xf32> -> vector<8x384xf32>
    %234 = vector.extract_strided_slice %232 {offsets = [0, 0], sizes = [8, 128], strides = [1, 1]} : vector<8x384xf32> to vector<8x128xf32>
    %235 = vector.extract_strided_slice %233 {offsets = [0, 0], sizes = [8, 128], strides = [1, 1]} : vector<8x384xf32> to vector<8x128xf32>
    %236 = arith.addf %234, %235 : vector<8x128xf32>
    %237 = arith.negf %236 : vector<8x128xf32>
    %238 = math.exp %237 : vector<8x128xf32>
    %cst_52 = arith.constant 1.000000e+00 : f32
    %239 = vector.broadcast %cst_52 : f32 to vector<8x128xf32>
    %240 = arith.addf %239, %238 : vector<8x128xf32>
    %241 = arith.divf %239, %240 : vector<8x128xf32>
    %242 = vector.extract_strided_slice %232 {offsets = [0, 128], sizes = [8, 128], strides = [1, 1]} : vector<8x384xf32> to vector<8x128xf32>
    %243 = vector.extract_strided_slice %233 {offsets = [0, 128], sizes = [8, 128], strides = [1, 1]} : vector<8x384xf32> to vector<8x128xf32>
    %244 = arith.addf %242, %243 : vector<8x128xf32>
    %245 = arith.negf %244 : vector<8x128xf32>
    %246 = math.exp %245 : vector<8x128xf32>
    %cst_53 = arith.constant 1.000000e+00 : f32
    %247 = vector.broadcast %cst_53 : f32 to vector<8x128xf32>
    %248 = arith.addf %247, %246 : vector<8x128xf32>
    %249 = arith.divf %247, %248 : vector<8x128xf32>
    %250 = vector.extract_strided_slice %232 {offsets = [0, 256], sizes = [8, 128], strides = [1, 1]} : vector<8x384xf32> to vector<8x128xf32>
    %251 = vector.extract_strided_slice %233 {offsets = [0, 256], sizes = [8, 128], strides = [1, 1]} : vector<8x384xf32> to vector<8x128xf32>
    %252 = vector.broadcast %5 : vector<1x128xf32> to vector<8x128xf32>
    %253 = arith.addf %251, %252 : vector<8x128xf32>
    %254 = arith.mulf %241, %253 : vector<8x128xf32>
    %255 = arith.addf %250, %254 : vector<8x128xf32>
    %256 = math.tanh %255 : vector<8x128xf32>
    %cst_54 = arith.constant 1.000000e+00 : f32
    %257 = vector.broadcast %cst_54 : f32 to vector<8x128xf32>
    %258 = arith.subf %257, %249 : vector<8x128xf32>
    %259 = arith.mulf %258, %256 : vector<8x128xf32>
    %260 = arith.mulf %249, %199 : vector<8x128xf32>
    %261 = arith.addf %259, %260 : vector<8x128xf32>
    %262 = vector.extract_strided_slice %11 {offsets = [32, 0], sizes = [8, 384], strides = [1, 1]} : vector<64x384xf32> to vector<8x384xf32>
    %cst_55 = arith.constant dense<0.000000e+00> : vector<8x384xf32>
    %263 = tpu.matmul %229, %0, %cst_55 {dimension_numbers = #tpu.dot_dimension_numbers<[1], [0], [0], [1], [0, 0, 1, 1], [], []>} : vector<8x128xf32>, vector<128x384xf32>, vector<8x384xf32> -> vector<8x384xf32>
    %264 = vector.extract_strided_slice %262 {offsets = [0, 0], sizes = [8, 128], strides = [1, 1]} : vector<8x384xf32> to vector<8x128xf32>
    %265 = vector.extract_strided_slice %263 {offsets = [0, 0], sizes = [8, 128], strides = [1, 1]} : vector<8x384xf32> to vector<8x128xf32>
    %266 = arith.addf %264, %265 : vector<8x128xf32>
    %267 = arith.negf %266 : vector<8x128xf32>
    %268 = math.exp %267 : vector<8x128xf32>
    %cst_56 = arith.constant 1.000000e+00 : f32
    %269 = vector.broadcast %cst_56 : f32 to vector<8x128xf32>
    %270 = arith.addf %269, %268 : vector<8x128xf32>
    %271 = arith.divf %269, %270 : vector<8x128xf32>
    %272 = vector.extract_strided_slice %262 {offsets = [0, 128], sizes = [8, 128], strides = [1, 1]} : vector<8x384xf32> to vector<8x128xf32>
    %273 = vector.extract_strided_slice %263 {offsets = [0, 128], sizes = [8, 128], strides = [1, 1]} : vector<8x384xf32> to vector<8x128xf32>
    %274 = arith.addf %272, %273 : vector<8x128xf32>
    %275 = arith.negf %274 : vector<8x128xf32>
    %276 = math.exp %275 : vector<8x128xf32>
    %cst_57 = arith.constant 1.000000e+00 : f32
    %277 = vector.broadcast %cst_57 : f32 to vector<8x128xf32>
    %278 = arith.addf %277, %276 : vector<8x128xf32>
    %279 = arith.divf %277, %278 : vector<8x128xf32>
    %280 = vector.extract_strided_slice %262 {offsets = [0, 256], sizes = [8, 128], strides = [1, 1]} : vector<8x384xf32> to vector<8x128xf32>
    %281 = vector.extract_strided_slice %263 {offsets = [0, 256], sizes = [8, 128], strides = [1, 1]} : vector<8x384xf32> to vector<8x128xf32>
    %282 = vector.broadcast %1 : vector<1x128xf32> to vector<8x128xf32>
    %283 = arith.addf %281, %282 : vector<8x128xf32>
    %284 = arith.mulf %271, %283 : vector<8x128xf32>
    %285 = arith.addf %280, %284 : vector<8x128xf32>
    %286 = math.tanh %285 : vector<8x128xf32>
    %cst_58 = arith.constant 1.000000e+00 : f32
    %287 = vector.broadcast %cst_58 : f32 to vector<8x128xf32>
    %288 = arith.subf %287, %279 : vector<8x128xf32>
    %289 = arith.mulf %288, %286 : vector<8x128xf32>
    %290 = arith.mulf %279, %229 : vector<8x128xf32>
    %291 = arith.addf %289, %290 : vector<8x128xf32>
    %cst_59 = arith.constant dense<0.000000e+00> : vector<8x384xf32>
    %292 = tpu.matmul %291, %2, %cst_59 {dimension_numbers = #tpu.dot_dimension_numbers<[1], [0], [0], [1], [0, 0, 1, 1], [], []>} : vector<8x128xf32>, vector<128x384xf32>, vector<8x384xf32> -> vector<8x384xf32>
    %293 = vector.broadcast %4 : vector<1x384xf32> to vector<8x384xf32>
    %294 = arith.addf %292, %293 : vector<8x384xf32>
    %cst_60 = arith.constant dense<0.000000e+00> : vector<8x384xf32>
    %295 = tpu.matmul %261, %3, %cst_60 {dimension_numbers = #tpu.dot_dimension_numbers<[1], [0], [0], [1], [0, 0, 1, 1], [], []>} : vector<8x128xf32>, vector<128x384xf32>, vector<8x384xf32> -> vector<8x384xf32>
    %296 = vector.extract_strided_slice %294 {offsets = [0, 0], sizes = [8, 128], strides = [1, 1]} : vector<8x384xf32> to vector<8x128xf32>
    %297 = vector.extract_strided_slice %295 {offsets = [0, 0], sizes = [8, 128], strides = [1, 1]} : vector<8x384xf32> to vector<8x128xf32>
    %298 = arith.addf %296, %297 : vector<8x128xf32>
    %299 = arith.negf %298 : vector<8x128xf32>
    %300 = math.exp %299 : vector<8x128xf32>
    %cst_61 = arith.constant 1.000000e+00 : f32
    %301 = vector.broadcast %cst_61 : f32 to vector<8x128xf32>
    %302 = arith.addf %301, %300 : vector<8x128xf32>
    %303 = arith.divf %301, %302 : vector<8x128xf32>
    %304 = vector.extract_strided_slice %294 {offsets = [0, 128], sizes = [8, 128], strides = [1, 1]} : vector<8x384xf32> to vector<8x128xf32>
    %305 = vector.extract_strided_slice %295 {offsets = [0, 128], sizes = [8, 128], strides = [1, 1]} : vector<8x384xf32> to vector<8x128xf32>
    %306 = arith.addf %304, %305 : vector<8x128xf32>
    %307 = arith.negf %306 : vector<8x128xf32>
    %308 = math.exp %307 : vector<8x128xf32>
    %cst_62 = arith.constant 1.000000e+00 : f32
    %309 = vector.broadcast %cst_62 : f32 to vector<8x128xf32>
    %310 = arith.addf %309, %308 : vector<8x128xf32>
    %311 = arith.divf %309, %310 : vector<8x128xf32>
    %312 = vector.extract_strided_slice %294 {offsets = [0, 256], sizes = [8, 128], strides = [1, 1]} : vector<8x384xf32> to vector<8x128xf32>
    %313 = vector.extract_strided_slice %295 {offsets = [0, 256], sizes = [8, 128], strides = [1, 1]} : vector<8x384xf32> to vector<8x128xf32>
    %314 = vector.broadcast %5 : vector<1x128xf32> to vector<8x128xf32>
    %315 = arith.addf %313, %314 : vector<8x128xf32>
    %316 = arith.mulf %303, %315 : vector<8x128xf32>
    %317 = arith.addf %312, %316 : vector<8x128xf32>
    %318 = math.tanh %317 : vector<8x128xf32>
    %cst_63 = arith.constant 1.000000e+00 : f32
    %319 = vector.broadcast %cst_63 : f32 to vector<8x128xf32>
    %320 = arith.subf %319, %311 : vector<8x128xf32>
    %321 = arith.mulf %320, %318 : vector<8x128xf32>
    %322 = arith.mulf %311, %261 : vector<8x128xf32>
    %323 = arith.addf %321, %322 : vector<8x128xf32>
    %324 = vector.extract_strided_slice %11 {offsets = [40, 0], sizes = [8, 384], strides = [1, 1]} : vector<64x384xf32> to vector<8x384xf32>
    %cst_64 = arith.constant dense<0.000000e+00> : vector<8x384xf32>
    %325 = tpu.matmul %291, %0, %cst_64 {dimension_numbers = #tpu.dot_dimension_numbers<[1], [0], [0], [1], [0, 0, 1, 1], [], []>} : vector<8x128xf32>, vector<128x384xf32>, vector<8x384xf32> -> vector<8x384xf32>
    %326 = vector.extract_strided_slice %324 {offsets = [0, 0], sizes = [8, 128], strides = [1, 1]} : vector<8x384xf32> to vector<8x128xf32>
    %327 = vector.extract_strided_slice %325 {offsets = [0, 0], sizes = [8, 128], strides = [1, 1]} : vector<8x384xf32> to vector<8x128xf32>
    %328 = arith.addf %326, %327 : vector<8x128xf32>
    %329 = arith.negf %328 : vector<8x128xf32>
    %330 = math.exp %329 : vector<8x128xf32>
    %cst_65 = arith.constant 1.000000e+00 : f32
    %331 = vector.broadcast %cst_65 : f32 to vector<8x128xf32>
    %332 = arith.addf %331, %330 : vector<8x128xf32>
    %333 = arith.divf %331, %332 : vector<8x128xf32>
    %334 = vector.extract_strided_slice %324 {offsets = [0, 128], sizes = [8, 128], strides = [1, 1]} : vector<8x384xf32> to vector<8x128xf32>
    %335 = vector.extract_strided_slice %325 {offsets = [0, 128], sizes = [8, 128], strides = [1, 1]} : vector<8x384xf32> to vector<8x128xf32>
    %336 = arith.addf %334, %335 : vector<8x128xf32>
    %337 = arith.negf %336 : vector<8x128xf32>
    %338 = math.exp %337 : vector<8x128xf32>
    %cst_66 = arith.constant 1.000000e+00 : f32
    %339 = vector.broadcast %cst_66 : f32 to vector<8x128xf32>
    %340 = arith.addf %339, %338 : vector<8x128xf32>
    %341 = arith.divf %339, %340 : vector<8x128xf32>
    %342 = vector.extract_strided_slice %324 {offsets = [0, 256], sizes = [8, 128], strides = [1, 1]} : vector<8x384xf32> to vector<8x128xf32>
    %343 = vector.extract_strided_slice %325 {offsets = [0, 256], sizes = [8, 128], strides = [1, 1]} : vector<8x384xf32> to vector<8x128xf32>
    %344 = vector.broadcast %1 : vector<1x128xf32> to vector<8x128xf32>
    %345 = arith.addf %343, %344 : vector<8x128xf32>
    %346 = arith.mulf %333, %345 : vector<8x128xf32>
    %347 = arith.addf %342, %346 : vector<8x128xf32>
    %348 = math.tanh %347 : vector<8x128xf32>
    %cst_67 = arith.constant 1.000000e+00 : f32
    %349 = vector.broadcast %cst_67 : f32 to vector<8x128xf32>
    %350 = arith.subf %349, %341 : vector<8x128xf32>
    %351 = arith.mulf %350, %348 : vector<8x128xf32>
    %352 = arith.mulf %341, %291 : vector<8x128xf32>
    %353 = arith.addf %351, %352 : vector<8x128xf32>
    %cst_68 = arith.constant dense<0.000000e+00> : vector<8x384xf32>
    %354 = tpu.matmul %353, %2, %cst_68 {dimension_numbers = #tpu.dot_dimension_numbers<[1], [0], [0], [1], [0, 0, 1, 1], [], []>} : vector<8x128xf32>, vector<128x384xf32>, vector<8x384xf32> -> vector<8x384xf32>
    %355 = vector.broadcast %4 : vector<1x384xf32> to vector<8x384xf32>
    %356 = arith.addf %354, %355 : vector<8x384xf32>
    %cst_69 = arith.constant dense<0.000000e+00> : vector<8x384xf32>
    %357 = tpu.matmul %323, %3, %cst_69 {dimension_numbers = #tpu.dot_dimension_numbers<[1], [0], [0], [1], [0, 0, 1, 1], [], []>} : vector<8x128xf32>, vector<128x384xf32>, vector<8x384xf32> -> vector<8x384xf32>
    %358 = vector.extract_strided_slice %356 {offsets = [0, 0], sizes = [8, 128], strides = [1, 1]} : vector<8x384xf32> to vector<8x128xf32>
    %359 = vector.extract_strided_slice %357 {offsets = [0, 0], sizes = [8, 128], strides = [1, 1]} : vector<8x384xf32> to vector<8x128xf32>
    %360 = arith.addf %358, %359 : vector<8x128xf32>
    %361 = arith.negf %360 : vector<8x128xf32>
    %362 = math.exp %361 : vector<8x128xf32>
    %cst_70 = arith.constant 1.000000e+00 : f32
    %363 = vector.broadcast %cst_70 : f32 to vector<8x128xf32>
    %364 = arith.addf %363, %362 : vector<8x128xf32>
    %365 = arith.divf %363, %364 : vector<8x128xf32>
    %366 = vector.extract_strided_slice %356 {offsets = [0, 128], sizes = [8, 128], strides = [1, 1]} : vector<8x384xf32> to vector<8x128xf32>
    %367 = vector.extract_strided_slice %357 {offsets = [0, 128], sizes = [8, 128], strides = [1, 1]} : vector<8x384xf32> to vector<8x128xf32>
    %368 = arith.addf %366, %367 : vector<8x128xf32>
    %369 = arith.negf %368 : vector<8x128xf32>
    %370 = math.exp %369 : vector<8x128xf32>
    %cst_71 = arith.constant 1.000000e+00 : f32
    %371 = vector.broadcast %cst_71 : f32 to vector<8x128xf32>
    %372 = arith.addf %371, %370 : vector<8x128xf32>
    %373 = arith.divf %371, %372 : vector<8x128xf32>
    %374 = vector.extract_strided_slice %356 {offsets = [0, 256], sizes = [8, 128], strides = [1, 1]} : vector<8x384xf32> to vector<8x128xf32>
    %375 = vector.extract_strided_slice %357 {offsets = [0, 256], sizes = [8, 128], strides = [1, 1]} : vector<8x384xf32> to vector<8x128xf32>
    %376 = vector.broadcast %5 : vector<1x128xf32> to vector<8x128xf32>
    %377 = arith.addf %375, %376 : vector<8x128xf32>
    %378 = arith.mulf %365, %377 : vector<8x128xf32>
    %379 = arith.addf %374, %378 : vector<8x128xf32>
    %380 = math.tanh %379 : vector<8x128xf32>
    %cst_72 = arith.constant 1.000000e+00 : f32
    %381 = vector.broadcast %cst_72 : f32 to vector<8x128xf32>
    %382 = arith.subf %381, %373 : vector<8x128xf32>
    %383 = arith.mulf %382, %380 : vector<8x128xf32>
    %384 = arith.mulf %373, %323 : vector<8x128xf32>
    %385 = arith.addf %383, %384 : vector<8x128xf32>
    %386 = vector.extract_strided_slice %11 {offsets = [48, 0], sizes = [8, 384], strides = [1, 1]} : vector<64x384xf32> to vector<8x384xf32>
    %cst_73 = arith.constant dense<0.000000e+00> : vector<8x384xf32>
    %387 = tpu.matmul %353, %0, %cst_73 {dimension_numbers = #tpu.dot_dimension_numbers<[1], [0], [0], [1], [0, 0, 1, 1], [], []>} : vector<8x128xf32>, vector<128x384xf32>, vector<8x384xf32> -> vector<8x384xf32>
    %388 = vector.extract_strided_slice %386 {offsets = [0, 0], sizes = [8, 128], strides = [1, 1]} : vector<8x384xf32> to vector<8x128xf32>
    %389 = vector.extract_strided_slice %387 {offsets = [0, 0], sizes = [8, 128], strides = [1, 1]} : vector<8x384xf32> to vector<8x128xf32>
    %390 = arith.addf %388, %389 : vector<8x128xf32>
    %391 = arith.negf %390 : vector<8x128xf32>
    %392 = math.exp %391 : vector<8x128xf32>
    %cst_74 = arith.constant 1.000000e+00 : f32
    %393 = vector.broadcast %cst_74 : f32 to vector<8x128xf32>
    %394 = arith.addf %393, %392 : vector<8x128xf32>
    %395 = arith.divf %393, %394 : vector<8x128xf32>
    %396 = vector.extract_strided_slice %386 {offsets = [0, 128], sizes = [8, 128], strides = [1, 1]} : vector<8x384xf32> to vector<8x128xf32>
    %397 = vector.extract_strided_slice %387 {offsets = [0, 128], sizes = [8, 128], strides = [1, 1]} : vector<8x384xf32> to vector<8x128xf32>
    %398 = arith.addf %396, %397 : vector<8x128xf32>
    %399 = arith.negf %398 : vector<8x128xf32>
    %400 = math.exp %399 : vector<8x128xf32>
    %cst_75 = arith.constant 1.000000e+00 : f32
    %401 = vector.broadcast %cst_75 : f32 to vector<8x128xf32>
    %402 = arith.addf %401, %400 : vector<8x128xf32>
    %403 = arith.divf %401, %402 : vector<8x128xf32>
    %404 = vector.extract_strided_slice %386 {offsets = [0, 256], sizes = [8, 128], strides = [1, 1]} : vector<8x384xf32> to vector<8x128xf32>
    %405 = vector.extract_strided_slice %387 {offsets = [0, 256], sizes = [8, 128], strides = [1, 1]} : vector<8x384xf32> to vector<8x128xf32>
    %406 = vector.broadcast %1 : vector<1x128xf32> to vector<8x128xf32>
    %407 = arith.addf %405, %406 : vector<8x128xf32>
    %408 = arith.mulf %395, %407 : vector<8x128xf32>
    %409 = arith.addf %404, %408 : vector<8x128xf32>
    %410 = math.tanh %409 : vector<8x128xf32>
    %cst_76 = arith.constant 1.000000e+00 : f32
    %411 = vector.broadcast %cst_76 : f32 to vector<8x128xf32>
    %412 = arith.subf %411, %403 : vector<8x128xf32>
    %413 = arith.mulf %412, %410 : vector<8x128xf32>
    %414 = arith.mulf %403, %353 : vector<8x128xf32>
    %415 = arith.addf %413, %414 : vector<8x128xf32>
    %cst_77 = arith.constant dense<0.000000e+00> : vector<8x384xf32>
    %416 = tpu.matmul %415, %2, %cst_77 {dimension_numbers = #tpu.dot_dimension_numbers<[1], [0], [0], [1], [0, 0, 1, 1], [], []>} : vector<8x128xf32>, vector<128x384xf32>, vector<8x384xf32> -> vector<8x384xf32>
    %417 = vector.broadcast %4 : vector<1x384xf32> to vector<8x384xf32>
    %418 = arith.addf %416, %417 : vector<8x384xf32>
    %cst_78 = arith.constant dense<0.000000e+00> : vector<8x384xf32>
    %419 = tpu.matmul %385, %3, %cst_78 {dimension_numbers = #tpu.dot_dimension_numbers<[1], [0], [0], [1], [0, 0, 1, 1], [], []>} : vector<8x128xf32>, vector<128x384xf32>, vector<8x384xf32> -> vector<8x384xf32>
    %420 = vector.extract_strided_slice %418 {offsets = [0, 0], sizes = [8, 128], strides = [1, 1]} : vector<8x384xf32> to vector<8x128xf32>
    %421 = vector.extract_strided_slice %419 {offsets = [0, 0], sizes = [8, 128], strides = [1, 1]} : vector<8x384xf32> to vector<8x128xf32>
    %422 = arith.addf %420, %421 : vector<8x128xf32>
    %423 = arith.negf %422 : vector<8x128xf32>
    %424 = math.exp %423 : vector<8x128xf32>
    %cst_79 = arith.constant 1.000000e+00 : f32
    %425 = vector.broadcast %cst_79 : f32 to vector<8x128xf32>
    %426 = arith.addf %425, %424 : vector<8x128xf32>
    %427 = arith.divf %425, %426 : vector<8x128xf32>
    %428 = vector.extract_strided_slice %418 {offsets = [0, 128], sizes = [8, 128], strides = [1, 1]} : vector<8x384xf32> to vector<8x128xf32>
    %429 = vector.extract_strided_slice %419 {offsets = [0, 128], sizes = [8, 128], strides = [1, 1]} : vector<8x384xf32> to vector<8x128xf32>
    %430 = arith.addf %428, %429 : vector<8x128xf32>
    %431 = arith.negf %430 : vector<8x128xf32>
    %432 = math.exp %431 : vector<8x128xf32>
    %cst_80 = arith.constant 1.000000e+00 : f32
    %433 = vector.broadcast %cst_80 : f32 to vector<8x128xf32>
    %434 = arith.addf %433, %432 : vector<8x128xf32>
    %435 = arith.divf %433, %434 : vector<8x128xf32>
    %436 = vector.extract_strided_slice %418 {offsets = [0, 256], sizes = [8, 128], strides = [1, 1]} : vector<8x384xf32> to vector<8x128xf32>
    %437 = vector.extract_strided_slice %419 {offsets = [0, 256], sizes = [8, 128], strides = [1, 1]} : vector<8x384xf32> to vector<8x128xf32>
    %438 = vector.broadcast %5 : vector<1x128xf32> to vector<8x128xf32>
    %439 = arith.addf %437, %438 : vector<8x128xf32>
    %440 = arith.mulf %427, %439 : vector<8x128xf32>
    %441 = arith.addf %436, %440 : vector<8x128xf32>
    %442 = math.tanh %441 : vector<8x128xf32>
    %cst_81 = arith.constant 1.000000e+00 : f32
    %443 = vector.broadcast %cst_81 : f32 to vector<8x128xf32>
    %444 = arith.subf %443, %435 : vector<8x128xf32>
    %445 = arith.mulf %444, %442 : vector<8x128xf32>
    %446 = arith.mulf %435, %385 : vector<8x128xf32>
    %447 = arith.addf %445, %446 : vector<8x128xf32>
    %448 = vector.extract_strided_slice %11 {offsets = [56, 0], sizes = [8, 384], strides = [1, 1]} : vector<64x384xf32> to vector<8x384xf32>
    %cst_82 = arith.constant dense<0.000000e+00> : vector<8x384xf32>
    %449 = tpu.matmul %415, %0, %cst_82 {dimension_numbers = #tpu.dot_dimension_numbers<[1], [0], [0], [1], [0, 0, 1, 1], [], []>} : vector<8x128xf32>, vector<128x384xf32>, vector<8x384xf32> -> vector<8x384xf32>
    %450 = vector.extract_strided_slice %448 {offsets = [0, 0], sizes = [8, 128], strides = [1, 1]} : vector<8x384xf32> to vector<8x128xf32>
    %451 = vector.extract_strided_slice %449 {offsets = [0, 0], sizes = [8, 128], strides = [1, 1]} : vector<8x384xf32> to vector<8x128xf32>
    %452 = arith.addf %450, %451 : vector<8x128xf32>
    %453 = arith.negf %452 : vector<8x128xf32>
    %454 = math.exp %453 : vector<8x128xf32>
    %cst_83 = arith.constant 1.000000e+00 : f32
    %455 = vector.broadcast %cst_83 : f32 to vector<8x128xf32>
    %456 = arith.addf %455, %454 : vector<8x128xf32>
    %457 = arith.divf %455, %456 : vector<8x128xf32>
    %458 = vector.extract_strided_slice %448 {offsets = [0, 128], sizes = [8, 128], strides = [1, 1]} : vector<8x384xf32> to vector<8x128xf32>
    %459 = vector.extract_strided_slice %449 {offsets = [0, 128], sizes = [8, 128], strides = [1, 1]} : vector<8x384xf32> to vector<8x128xf32>
    %460 = arith.addf %458, %459 : vector<8x128xf32>
    %461 = arith.negf %460 : vector<8x128xf32>
    %462 = math.exp %461 : vector<8x128xf32>
    %cst_84 = arith.constant 1.000000e+00 : f32
    %463 = vector.broadcast %cst_84 : f32 to vector<8x128xf32>
    %464 = arith.addf %463, %462 : vector<8x128xf32>
    %465 = arith.divf %463, %464 : vector<8x128xf32>
    %466 = vector.extract_strided_slice %448 {offsets = [0, 256], sizes = [8, 128], strides = [1, 1]} : vector<8x384xf32> to vector<8x128xf32>
    %467 = vector.extract_strided_slice %449 {offsets = [0, 256], sizes = [8, 128], strides = [1, 1]} : vector<8x384xf32> to vector<8x128xf32>
    %468 = vector.broadcast %1 : vector<1x128xf32> to vector<8x128xf32>
    %469 = arith.addf %467, %468 : vector<8x128xf32>
    %470 = arith.mulf %457, %469 : vector<8x128xf32>
    %471 = arith.addf %466, %470 : vector<8x128xf32>
    %472 = math.tanh %471 : vector<8x128xf32>
    %cst_85 = arith.constant 1.000000e+00 : f32
    %473 = vector.broadcast %cst_85 : f32 to vector<8x128xf32>
    %474 = arith.subf %473, %465 : vector<8x128xf32>
    %475 = arith.mulf %474, %472 : vector<8x128xf32>
    %476 = arith.mulf %465, %415 : vector<8x128xf32>
    %477 = arith.addf %475, %476 : vector<8x128xf32>
    %cst_86 = arith.constant dense<0.000000e+00> : vector<8x384xf32>
    %478 = tpu.matmul %477, %2, %cst_86 {dimension_numbers = #tpu.dot_dimension_numbers<[1], [0], [0], [1], [0, 0, 1, 1], [], []>} : vector<8x128xf32>, vector<128x384xf32>, vector<8x384xf32> -> vector<8x384xf32>
    %479 = vector.broadcast %4 : vector<1x384xf32> to vector<8x384xf32>
    %480 = arith.addf %478, %479 : vector<8x384xf32>
    %cst_87 = arith.constant dense<0.000000e+00> : vector<8x384xf32>
    %481 = tpu.matmul %447, %3, %cst_87 {dimension_numbers = #tpu.dot_dimension_numbers<[1], [0], [0], [1], [0, 0, 1, 1], [], []>} : vector<8x128xf32>, vector<128x384xf32>, vector<8x384xf32> -> vector<8x384xf32>
    %482 = vector.extract_strided_slice %480 {offsets = [0, 0], sizes = [8, 128], strides = [1, 1]} : vector<8x384xf32> to vector<8x128xf32>
    %483 = vector.extract_strided_slice %481 {offsets = [0, 0], sizes = [8, 128], strides = [1, 1]} : vector<8x384xf32> to vector<8x128xf32>
    %484 = arith.addf %482, %483 : vector<8x128xf32>
    %485 = arith.negf %484 : vector<8x128xf32>
    %486 = math.exp %485 : vector<8x128xf32>
    %cst_88 = arith.constant 1.000000e+00 : f32
    %487 = vector.broadcast %cst_88 : f32 to vector<8x128xf32>
    %488 = arith.addf %487, %486 : vector<8x128xf32>
    %489 = arith.divf %487, %488 : vector<8x128xf32>
    %490 = vector.extract_strided_slice %480 {offsets = [0, 128], sizes = [8, 128], strides = [1, 1]} : vector<8x384xf32> to vector<8x128xf32>
    %491 = vector.extract_strided_slice %481 {offsets = [0, 128], sizes = [8, 128], strides = [1, 1]} : vector<8x384xf32> to vector<8x128xf32>
    %492 = arith.addf %490, %491 : vector<8x128xf32>
    %493 = arith.negf %492 : vector<8x128xf32>
    %494 = math.exp %493 : vector<8x128xf32>
    %cst_89 = arith.constant 1.000000e+00 : f32
    %495 = vector.broadcast %cst_89 : f32 to vector<8x128xf32>
    %496 = arith.addf %495, %494 : vector<8x128xf32>
    %497 = arith.divf %495, %496 : vector<8x128xf32>
    %498 = vector.extract_strided_slice %480 {offsets = [0, 256], sizes = [8, 128], strides = [1, 1]} : vector<8x384xf32> to vector<8x128xf32>
    %499 = vector.extract_strided_slice %481 {offsets = [0, 256], sizes = [8, 128], strides = [1, 1]} : vector<8x384xf32> to vector<8x128xf32>
    %500 = vector.broadcast %5 : vector<1x128xf32> to vector<8x128xf32>
    %501 = arith.addf %499, %500 : vector<8x128xf32>
    %502 = arith.mulf %489, %501 : vector<8x128xf32>
    %503 = arith.addf %498, %502 : vector<8x128xf32>
    %504 = math.tanh %503 : vector<8x128xf32>
    %cst_90 = arith.constant 1.000000e+00 : f32
    %505 = vector.broadcast %cst_90 : f32 to vector<8x128xf32>
    %506 = arith.subf %505, %497 : vector<8x128xf32>
    %507 = arith.mulf %506, %504 : vector<8x128xf32>
    %508 = arith.mulf %497, %447 : vector<8x128xf32>
    %509 = arith.addf %507, %508 : vector<8x128xf32>
    %c0_91 = arith.constant 0 : index
    %c0_92 = arith.constant 0 : index
    %510 = vector.load %arg1[%c0_91, %c0_92] : memref<8x1xf32, #tpu.memory_space<vmem>>, vector<8x1xf32>
    %c0_93 = arith.constant 0 : index
    %c0_94 = arith.constant 0 : index
    %511 = vector.load %arg10[%c0_93, %c0_94] : memref<128x256xf32, #tpu.memory_space<vmem>>, vector<128x256xf32>
    %cst_95 = arith.constant dense<0.000000e+00> : vector<8x256xf32>
    %512 = tpu.matmul %509, %511, %cst_95 {dimension_numbers = #tpu.dot_dimension_numbers<[1], [0], [0], [1], [0, 0, 1, 1], [], []>} : vector<8x128xf32>, vector<128x256xf32>, vector<8x256xf32> -> vector<8x256xf32>
    %c0_96 = arith.constant 0 : index
    %c0_97 = arith.constant 0 : index
    %513 = vector.load %arg11[%c0_96, %c0_97] : memref<1x256xf32, #tpu.memory_space<vmem>>, vector<1x256xf32>
    %514 = vector.broadcast %510 : vector<8x1xf32> to vector<8x256xf32>
    %515 = vector.broadcast %513 : vector<1x256xf32> to vector<8x256xf32>
    %516 = arith.mulf %514, %515 : vector<8x256xf32>
    %517 = arith.addf %512, %516 : vector<8x256xf32>
    %c0_98 = arith.constant 0 : index
    %c0_99 = arith.constant 0 : index
    %518 = vector.load %arg12[%c0_98, %c0_99] : memref<1x256xf32, #tpu.memory_space<vmem>>, vector<1x256xf32>
    %519 = vector.broadcast %518 : vector<1x256xf32> to vector<8x256xf32>
    %520 = arith.addf %517, %519 : vector<8x256xf32>
    %cst_100 = arith.constant 0.000000e+00 : f32
    %521 = vector.broadcast %cst_100 : f32 to vector<8x256xf32>
    %522 = arith.maximumf %520, %521 : vector<8x256xf32>
    %c0_101 = arith.constant 0 : index
    %c0_102 = arith.constant 0 : index
    %523 = vector.load %arg13[%c0_101, %c0_102] : memref<256x8xf32, #tpu.memory_space<vmem>>, vector<256x8xf32>
    %cst_103 = arith.constant dense<0.000000e+00> : vector<8x8xf32>
    %524 = tpu.matmul %522, %523, %cst_103 {dimension_numbers = #tpu.dot_dimension_numbers<[1], [0], [0], [1], [0, 0, 1, 1], [], []>} : vector<8x256xf32>, vector<256x8xf32>, vector<8x8xf32> -> vector<8x8xf32>
    %c0_104 = arith.constant 0 : index
    %c0_105 = arith.constant 0 : index
    %525 = vector.load %arg14[%c0_104, %c0_105] : memref<1x8xf32, #tpu.memory_space<vmem>>, vector<1x8xf32>
    %526 = vector.broadcast %525 : vector<1x8xf32> to vector<8x8xf32>
    %527 = arith.addf %524, %526 : vector<8x8xf32>
    %528 = vector.extract_strided_slice %527 {offsets = [0, 0], sizes = [8, 4], strides = [1, 1]} : vector<8x8xf32> to vector<8x4xf32>
    %529 = math.tanh %528 : vector<8x4xf32>
    %530 = vector.extract_strided_slice %527 {offsets = [0, 4], sizes = [8, 4], strides = [1, 1]} : vector<8x8xf32> to vector<8x4xf32>
    %531 = math.tanh %530 : vector<8x4xf32>
    %cst_106 = arith.constant 0.000000e+00 : f32
    %532 = vector.broadcast %cst_106 : f32 to vector<8x4xf32>
    %533 = arith.subf %532, %531 : vector<8x4xf32>
    %cst_107 = arith.constant 0.918938517 : f32
    %534 = vector.broadcast %cst_107 : f32 to vector<8x4xf32>
    %535 = arith.subf %533, %534 : vector<8x4xf32>
    %cst_108 = arith.constant 0.693147182 : f32
    %536 = vector.broadcast %cst_108 : f32 to vector<8x4xf32>
    %537 = arith.subf %536, %529 : vector<8x4xf32>
    %cst_109 = arith.constant -2.000000e+00 : f32
    %538 = vector.broadcast %cst_109 : f32 to vector<8x4xf32>
    %539 = arith.mulf %538, %529 : vector<8x4xf32>
    %cst_110 = arith.constant 0.000000e+00 : f32
    %540 = vector.broadcast %cst_110 : f32 to vector<8x4xf32>
    %541 = arith.maximumf %540, %539 : vector<8x4xf32>
    %542 = vector.broadcast %cst_110 : f32 to vector<8x4xf32>
    %543 = arith.subf %542, %539 : vector<8x4xf32>
    %544 = arith.cmpf one, %543, %543 : vector<8x4xf32>
    %545 = vector.broadcast %cst_110 : f32 to vector<8x4xf32>
    %546 = arith.addf %545, %539 : vector<8x4xf32>
    %547 = math.absf %543 : vector<8x4xf32>
    %cst_111 = arith.constant 0.000000e+00 : f32
    %548 = vector.broadcast %cst_111 : f32 to vector<8x4xf32>
    %549 = arith.subf %548, %547 : vector<8x4xf32>
    %550 = math.exp %549 : vector<8x4xf32>
    %551 = math.log1p %550 : vector<8x4xf32>
    %552 = arith.addf %541, %551 : vector<8x4xf32>
    %553 = arith.select %544, %546, %552 : vector<8x4xi1>, vector<8x4xf32>
    %554 = arith.subf %537, %553 : vector<8x4xf32>
    %cst_112 = arith.constant 2.000000e+00 : f32
    %555 = vector.broadcast %cst_112 : f32 to vector<8x4xf32>
    %556 = arith.mulf %555, %554 : vector<8x4xf32>
    %557 = arith.subf %535, %556 : vector<8x4xf32>
    %cst_113 = arith.constant dense<0.000000e+00> : vector<8xf32>
    %558 = vector.multi_reduction <add>, %557, %cst_113 [1] : vector<8x4xf32> to vector<8xf32>
    %559 = vector.shape_cast %558 : vector<8xf32> to vector<8x1xf32>
    %560 = tpu.concatenate %529, %559 in 1 : vector<8x4xf32>, vector<8x1xf32> -> vector<8x5xf32>
    %cst_114 = arith.constant 0.000000e+00 : f32
    %561 = vector.broadcast %cst_114 : f32 to vector<8x123xf32>
    %562 = tpu.concatenate %560, %561 in 1 : vector<8x5xf32>, vector<8x123xf32> -> vector<8x128xf32>
    %c0_115 = arith.constant 0 : index
    %c0_116 = arith.constant 0 : index
    %563 = vector.load %arg15[%c0_115, %c0_116] : memref<8x128xf32, #tpu.memory_space<vmem>>, vector<8x128xf32>
    tpu.vector_store %arg15[%c0_115, %c0_116], %562 {strides = array<i32>} : memref<8x128xf32, #tpu.memory_space<vmem>>, vector<8x128xf32>,
    return
  }
}

</mosaic_0001>

<bundles_post_ra>
// kernel: actor_forward.1
= control target key start
LH: loop header
LB: loop body
LE: loop exit
PB: predicated region body
PF: predicated region fallthrough
CT: control target
= control target key end

     0   :  { %20 = vsyncpa [#allocation3], 0  ;;  %s10521_s0 = inlined_call_operand.vmem [shape: f32[64,6], index: 0, kind: input, shape index: {}]   ;;  %s10522_s1 = inlined_call_operand.vmem [shape: f32[8,1], index: 1, kind: input, shape index: {}]   ;;  %s10523_s2 = inlined_call_operand.vmem [shape: f32[6,384], index: 2, kind: input, shape index: {}]   ;;  %s10524_s3 = inlined_call_operand.vmem [shape: f32[128,384], index: 3, kind: input, shape index: {}]   ;;  %s10525_s4 = inlined_call_operand.vmem [shape: f32[1,384], index: 4, kind: input, shape index: {}]   ;;  %s10526_s5 = inlined_call_operand.vmem [shape: f32[1,128], index: 5, kind: input, shape index: {}]   ;;  %s10527_s6 = inlined_call_operand.hbm [shape: f32[128,384], index: 6, kind: input, shape index: {}]   ;;  %s10528_s7 = inlined_call_operand.hbm [shape: f32[128,384], index: 7, kind: input, shape index: {}]   ;;  %s10529_s8 = inlined_call_operand.vmem [shape: f32[1,384], index: 8, kind: input, shape index: {}]   ;;  %s10530_s9 = inlined_call_operand.vmem [shape: f32[1,128], index: 9, kind: input, shape index: {}]   ;;  %s10531_s10 = inlined_call_operand.hbm [shape: f32[128,256], index: 10, kind: input, shape index: {}]   ;;  %s10532_s11 = inlined_call_operand.vmem [shape: f32[1,256], index: 11, kind: input, shape index: {}]   ;;  %s10533_s12 = inlined_call_operand.vmem [shape: f32[1,256], index: 12, kind: input, shape index: {}]   ;;  %s10534_s13 = inlined_call_operand.vmem [shape: f32[256,8], index: 13, kind: input, shape index: {}]   ;;  %s10535_s14 = inlined_call_operand.vmem [shape: f32[1,8], index: 14, kind: input, shape index: {}]   ;;  %s10536_s15 = inlined_call_operand.vmem [shape: f32[8,128], index: 15, kind: output, shape index: {}]  }
   0x1   :  { %21 = vsyncpa [#allocation5], 0  ;;  %s6622_s18 = smov [#allocation4]   ;;  %s6623_s20 = smov [#allocation2]  }
   0x2   :  { %s51_s19 = sshll.u32 %s6622_s18, 4  ;;  %s39_s21 = sshll.u32 %s6623_s20, 4  ;;  %s52_s19 = int_to_ptr.vmem [resolvable:$true] %s51_s19  ;;  %s40_s21 = int_to_ptr.vmem [resolvable:$true] %s39_s21 }
   0x3   :  { %s6566_s22 = scalar_lea.vmem %s52_s19, 6144  ;;  %p6571_p1 = scmp.lt.s32.totalorder %s52_s19, %s52_s19 }
   0x4   :  { %p6567_p0 = scmp.ne.s32.totalorder %s52_s19, %s6566_s22  ;;  %p6572_p2 = scmp.lt.s32.totalorder %s6566_s22, %s6566_s22 }
   0x6   :  { %p6573_p3 = por %p6572_p2, %p6571_p1 }
   0x8   :  { %p6574_p4 = pnand %p6573_p3, %p6567_p0 }
   0xa   :  { %6577 = shalt.err (!%p6574_p4)
}
   0xb   :  { %s6624_s23 = smov 384   ;;  %s6625_s24 = smov 24  }
   0xc   :  { %57 = dma.hbm_to_vmem [thread:$0]  %s10528_s7, 6144, %s52_s19, [#allocation5], %s6624_s23, %s6624_s23, %s6625_s24  }
   0xd   :  { %s6586_s27 = scalar_lea.vmem %s40_s21, 6144  ;;  %p6591_p6 = scmp.lt.s32.totalorder %s40_s21, %s40_s21 }
   0xe   :  { %p6587_p5 = scmp.ne.s32.totalorder %s40_s21, %s6586_s27  ;;  %p6592_p7 = scmp.lt.s32.totalorder %s6586_s27, %s6586_s27 }
  0x10   :  { %p6593_p8 = por %p6592_p7, %p6591_p6 }
  0x12   :  { %p6594_p9 = pnand %p6593_p8, %p6587_p5 }
  0x14   :  { %6597 = shalt.err (!%p6594_p9)
}
  0x15   :  { %45 = dma.hbm_to_vmem [thread:$0]  %s10527_s6, 6144, %s40_s21, [#allocation3], %s6624_s23, %s6624_s23, %s6625_s24  }
  0x16   :  { %s6626_s30 = smov [#allocation6]  }
  0x17   :  { %s67_s16 = sshll.u32 %s6626_s30, 4  ;;  %s68_s16 = int_to_ptr.vmem [resolvable:$true] %s67_s16 }
  0x18   :  { %s6606_s17 = scalar_lea.vmem %s68_s16, 4096  ;;  %p6611_p11 = scmp.lt.s32.totalorder %s68_s16, %s68_s16 }
  0x19   :  { %p6607_p10 = scmp.ne.s32.totalorder %s68_s16, %s6606_s17  ;;  %p6612_p12 = scmp.lt.s32.totalorder %s6606_s17, %s6606_s17 }
  0x1b   :  { %p6613_p13 = por %p6612_p12, %p6611_p11 }
  0x1d   :  { %p6614_p0 = pnand %p6613_p13, %p6607_p10 }
  0x1f   :  { %6617 = shalt.err (!%p6614_p0)
}
  0x20   :  { %s6627_s7 = smov 256   ;;  %s6628_s18 = smov 16  }
  0x21   :  { %73 = dma.hbm_to_vmem [thread:$0]  %s10531_s10, 4096, %s68_s16, [#allocation5], %s6627_s7, %s6627_s7, %s6628_s18  }
  0x22   :  { %6618 = dma.done.wait [#allocation3], 6144  }
  0x23   :  { %6619 = vsyncadd [#allocation3], 4294961152 }
  0x24   :  { %6620 = dma.done.wait [#allocation5], 10240  }
  0x25   :  { %6621 = vsyncadd [#allocation5], 4294957056  ;;  %v10580_v0 = vmov 0.0   ;;  %vm291_vm0 = vcmask 1045504   ;;  %v247_v1 = vld [vmem:[%s10523_s2 + $0x8] sm:$0x3f] }
  0x26   :  { %365 = vmatprep.mubr.f32.mxu0 %v10580_v0  ;;  %v246_v2 = vld [vmem:[%s10523_s2] sm:$0x3f]  ;;  %vm266_vm1 = vcmask 48128   ;;  %4580 = vmatprep.subr.msk.mxu0 %vm291_vm0, %v247_v1  ;;  %v6737_v4 = vld [vmem:[%s10524_s3 + $0x170] sm:$0xff]  ;;  %v6742_v5 = vld [vmem:[%s10524_s3 + $0x168] sm:$0xff]  ;;  %vm6630_vm2 = vmmov 0  }
  0x27   :  { %v238_v3 = vld [vmem:[%s10521_s0] sm:$0xff]  ;;  %4581 = vmatpush1.msk.msra.mxu0 %vm291_vm0, %v246_v2  ;;  %v6749_v6 = vld [vmem:[%s10524_s3 + $0x158] sm:$0xff]  ;;  %v6756_v7 = vld [vmem:[%s10524_s3 + $0x150] sm:$0xff]  ;;  %vm4566_vm5 = vcmask 31744   ;;  %vm4571_vm6 = vcmask 39936  }
  0x28   :  { %5089 = vmatprep.mubr.msk.f32.mxu1 %vm266_vm1, %v238_v3  ;;  %4582 = vmatmul.mubr.msk.f32.vlgmr.msra.gmra.mxu0 %vm266_vm1, %v238_v3  ;;  %v239_v8 = vld [vmem:[%s10521_s0 + $0x8] sm:$0xff]  ;;  %v6766_v9 = vld [vmem:[%s10524_s3 + $0x140] sm:$0xff]  ;;  %v6772_v10 = vld [vmem:[%s10524_s3 + $0x138] sm:$0xff] }
  0x29   :  { %519 = vmatprep.subr.mxu0 %v6737_v4  ;;  %371 = vmatprep.mubr.f32.mxu0 %v10580_v0  ;;  %v6778_v11 = vld [vmem:[%s10524_s3 + $0x128] sm:$0xff]  ;;  %v6785_v12 = vld [vmem:[%s10524_s3 + $0x120] sm:$0xff]  ;;  %v6792_v13 = vld [vmem:[%s10521_s0 + $0x10] sm:$0xff] }
  0x2a   :  { %520 = vmatpush1.msra.mxu0 %v6742_v5  ;;  %v6797_v14 = vld [vmem:[%s10524_s3 + $0x110] sm:$0xff]  ;;  %v6803_v15 = vld [vmem:[%s10524_s3 + $0x108] sm:$0xff]  ;;  %v6809_v16 = vld [vmem:[%s10524_s3 + $0xf8] sm:$0xff] }
  0x2b   :  { %521 = vmatprep.subr.mxu0 %v6749_v6  ;;  %v6817_v17 = vld [vmem:[%s10524_s3 + $0xf0] sm:$0xff]  ;;  %v6824_v18 = vld [vmem:[%s10521_s0 + $0x18] sm:$0xff]  ;;  %v6829_v19 = vld [vmem:[%s10524_s3 + $0xe0] sm:$0xff] }
  0x2c   :  { %522 = vmatpush1.msra.mxu0 %v6756_v7  ;;  %v6835_v20 = vld [vmem:[%s10524_s3 + $0xd8] sm:$0xff]  ;;  %v248_v21 = vld [vmem:[%s10523_s2 + $0x10] sm:$0x3f]  ;;  %v6844_v22 = vld [vmem:[%s10524_s3 + $0xc8] sm:$0xff] }
  0x2d   :  { %4583 = vmatmul.mubr.msk.f32.gmra.mxu0 %vm266_vm1, %v239_v8  ;;  %523 = vmatprep.subr.mxu0 %v6766_v9  ;;  %v6853_v23 = vld [vmem:[%s10524_s3 + $0xc0] sm:$0xff]  ;;  %v6865_v25 = vld [vmem:[%s10524_s3 + $0xb0] sm:$0xff]  ;;  %v6871_v26 = vld [vmem:[%s10524_s3 + $0xa8] sm:$0xff] }
  0x2e   :  { %524 = vmatpush1.msra.mxu0 %v6772_v10  ;;  %377 = vmatprep.mubr.f32.mxu0 %v10580_v0  ;;  %v6860_v24 = vld [vmem:[%s10521_s0 + $0x20] sm:$0xff]  ;;  %v6878_v27 = vld [vmem:[%s10524_s3 + $0x98] sm:$0xff]  ;;  %v6887_v28 = vld [vmem:[%s10524_s3 + $0x90] sm:$0xff] }
  0x2f   :  { %525 = vmatprep.subr.mxu0 %v6778_v11  ;;  %5087 = vmatprep.subr.msk.mxu1 %vm291_vm0, %v248_v21  ;;  %v6892_v29 = vld [vmem:[%s10524_s3 + $0x178] sm:$0xff]  ;;  %v6899_v30 = vld [vmem:[%s10521_s0 + $0x28] sm:$0xff]  ;;  %v6904_v31 = vld [vmem:[%s10524_s3 + $0x80] sm:$0xff] }
  0x30   :  { %526 = vmatpush1.msra.mxu0 %v6785_v12  ;;  %5088 = vmatpush3.msk.msra.mxu1 %vm291_vm0, %v248_v21  ;;  %v6910_v32 = vld [vmem:[%s10524_s3 + $0x78] sm:$0xff]  ;;  %v6917_v33 = vld [vmem:[%s10524_s3 + $0x68] sm:$0xff]  ;;  %v6926_v34 = vld [vmem:[%s10524_s3 + $0x60] sm:$0xff] }
  0x31   :  { %4584 = vmatmul.mubr.msk.f32.gmra.mxu0 %vm266_vm1, %v6792_v13  ;;  %527 = vmatprep.subr.mxu0 %v6797_v14  ;;  %v6931_v35 = vld [vmem:[%s10524_s3 + $0x160] sm:$0xff]  ;;  %v244_v36 = vld [vmem:[%s10521_s0 + $0x30] sm:$0xff]  ;;  %v6947_v38 = vld [vmem:[%s10524_s3 + $0x48] sm:$0xff] }
  0x32   :  { %528 = vmatpush1.msra.mxu0 %v6803_v15  ;;  %383 = vmatprep.mubr.f32.mxu0 %v10580_v0  ;;  %v6941_v37 = vld [vmem:[%s10524_s3 + $0x50] sm:$0xff]  ;;  %v6954_v39 = vld [vmem:[%s10524_s3 + $0x38] sm:$0xff]  ;;  %v6967_v41 = vld [vmem:[%s10524_s3 + $0x148] sm:$0xff] }
  0x33   :  { %529 = vmatprep.subr.mxu0 %v6809_v16  ;;  %5101 = vmatprep.subr.mxu1 %v10580_v0  ;;  %v6962_v40 = vld [vmem:[%s10524_s3 + $0x30] sm:$0xff]  ;;  %v245_v42 = vld [vmem:[%s10521_s0 + $0x38] sm:$0xff]  ;;  %v6977_v43 = vld [vmem:[%s10524_s3 + $0x20] sm:$0xff] }
  0x34   :  { %530 = vmatpush1.msra.mxu0 %v6817_v17  ;;  %5090 = vmatmul.mubr.msk.f32.vlgmr.msra.gmra.mxu1 %vm266_vm1, %v239_v8  ;;  %v6983_v44 = vld [vmem:[%s10524_s3 + $0x18] sm:$0xff]  ;;  %v6990_v45 = vld [vmem:[%s10524_s3 + $0x8] sm:$0xff]  ;;  %v6998_v46 = vld [vmem:[%s10524_s3] sm:$0xff] }
  0x35   :  { %4585 = vmatmul.mubr.msk.f32.gmra.mxu0 %vm266_vm1, %v6824_v18  ;;  %531 = vmatprep.subr.mxu0 %v6829_v19  ;;  %10902 = vst [vmem:[#allocation9_spill] sm:$0xff] %v6983_v44  ;;  %10903 = vst [vmem:[#allocation10_spill] sm:$0xff] %v6990_v45  ;;  %v7003_v47 = vld [vmem:[%s10524_s3 + $0x130] sm:$0xff]  ;;  %v7012_v48 = vld [vmem:[%s10524_s3 + $0x118] sm:$0xff] }
  0x36   :  { %532 = vmatpush1.msra.mxu0 %v6835_v20  ;;  %389 = vmatprep.mubr.f32.mxu0 %v10580_v0  ;;  %10904 = vst [vmem:[#allocation11_spill] sm:$0xff] %v6998_v46  ;;  %v7021_v49 = vld [vmem:[%s10524_s3 + $0x100] sm:$0xff]  ;;  %v7030_v50 = vld [vmem:[%s10524_s3 + $0xe8] sm:$0xff]  ;;  %v7041_v51 = vld [vmem:[%s10524_s3 + $0xd0] sm:$0xff] }
  0x37   :  { %533 = vmatprep.subr.mxu0 %v6844_v22  ;;  %5102 = vmatpush3.msra.mxu1 %v6892_v29  ;;  %v7049_v52 = vld [vmem:[%s10524_s3 + $0xb8] sm:$0xff]  ;;  %v7059_v53 = vld [vmem:[%s10524_s3 + $0xa0] sm:$0xff]  ;;  %v7066_v54 = vld [vmem:[%s10524_s3 + $0x88] sm:$0xff] }
  0x38   :  { %534 = vmatpush1.msra.mxu0 %v6853_v23  ;;  %5103 = vmatprep.subr.mxu1 %v10580_v0  ;;  %v7076_v55 = vld [vmem:[%s10524_s3 + $0x70] sm:$0xff]  ;;  %v7083_v56 = vld [vmem:[%s10524_s3 + $0x58] sm:$0xff]  ;;  %v7090_v57 = vld [vmem:[%s10524_s3 + $0x40] sm:$0xff] }
  0x39   :  { %4586 = vmatmul.mubr.msk.f32.gmra.mxu0 %vm266_vm1, %v6860_v24  ;;  %535 = vmatprep.subr.mxu0 %v6865_v25  ;;  %v7097_v58 = vld [vmem:[%s10524_s3 + $0x28] sm:$0xff]  ;;  %v7104_v59 = vld [vmem:[%s10524_s3 + $0x10] sm:$0xff]  ;;  %v7117_v62 = vld [vmem:[#allocation2 + $0x178] sm:$0xff] }
  0x3a   :  { %536 = vmatpush1.msra.mxu0 %v6871_v26  ;;  %395 = vmatprep.mubr.f32.mxu0 %v10580_v0  ;;  %10905 = vst [vmem:[#allocation12_spill] sm:$0xff] %v7097_v58  ;;  %10906 = vst [vmem:[#allocation13_spill] sm:$0xff] %v7104_v59  ;;  %v7113_v60 = vld [vmem:[#allocation2 + $0x170] sm:$0xff]  ;;  %v7115_v61 = vld [vmem:[#allocation2 + $0x168] sm:$0xff] }
  0x3b   :  { %537 = vmatprep.subr.mxu0 %v6878_v27  ;;  %5104 = vmatpush3.msra.mxu1 %v6931_v35  ;;  %10907 = vst [vmem:[#allocation14_spill] sm:$0xff] %v7113_v60  ;;  %10908 = vst [vmem:[#allocation15_spill] sm:$0xff] %v7115_v61  ;;  %v7121_v63 = vld [vmem:[#allocation2 + $0x158] sm:$0xff]  ;;  %v7123_v1 = vld [vmem:[#allocation2 + $0x150] sm:$0xff] }
  0x3c   :  { %538 = vmatpush1.msra.mxu0 %v6887_v28  ;;  %5105 = vmatprep.subr.mxu1 %v10580_v0  ;;  %10909 = vst [vmem:[#allocation16_spill] sm:$0xff] %v7117_v62  ;;  %10910 = vst [vmem:[#allocation17_spill] sm:$0xff] %v7121_v63  ;;  %v7125_v2 = vld [vmem:[#allocation2 + $0x160] sm:$0xff]  ;;  %v7131_v8 = vld [vmem:[#allocation2 + $0x148] sm:$0xff] }
  0x3d   :  { %4587 = vmatmul.mubr.msk.f32.gmra.mxu0 %vm266_vm1, %v6899_v30  ;;  %539 = vmatprep.subr.mxu0 %v6904_v31  ;;  %10911 = vst [vmem:[#allocation18_spill] sm:$0xff] %v7123_v1  ;;  %10912 = vst [vmem:[#allocation19_spill] sm:$0xff] %v7125_v2  ;;  %v7129_v3 = vld [vmem:[#allocation2 + $0x140] sm:$0xff] }
  0x3e   :  { %540 = vmatpush1.msra.mxu0 %v6910_v32  ;;  %401 = vmatprep.mubr.f32.mxu0 %v10580_v0  ;;  %10913 = vst [vmem:[#allocation20_spill] sm:$0xff] %v7129_v3  ;;  %10914 = vst [vmem:[#allocation21_spill] sm:$0xff] %v7131_v8  ;;  %v7146_v21 = vld [vmem:[#allocation2 + $0x120] sm:$0xff] }
  0x3f   :  { %541 = vmatprep.subr.mxu0 %v6917_v33  ;;  %5106 = vmatpush3.msra.mxu1 %v6967_v41  ;;  %10917 = vst [vmem:[#allocation24_spill] sm:$0xff] %v7146_v21 }
  0x40   :  { %542 = vmatpush1.msra.mxu0 %v6926_v34  ;;  %5107 = vmatprep.subr.mxu1 %v10580_v0 }
  0x41   :  { %4588 = vmatmul.mubr.msk.f32.gmra.mxu0 %vm266_vm1, %v244_v36  ;;  %543 = vmatprep.subr.mxu0 %v6941_v37 }
  0x42   :  { %544 = vmatpush1.msra.mxu0 %v6947_v38  ;;  %407 = vmatprep.mubr.f32.mxu0 %v10580_v0 }
  0x43   :  { %545 = vmatprep.subr.mxu0 %v6954_v39  ;;  %5108 = vmatpush3.msra.mxu1 %v7003_v47 }
  0x44   :  { %546 = vmatpush1.msra.mxu0 %v6962_v40  ;;  %5109 = vmatprep.subr.mxu1 %v10580_v0 }
  0x45   :  { %4589 = vmatmul.mubr.msk.f32.gmra.mxu0 %vm266_vm1, %v245_v42  ;;  %547 = vmatprep.subr.mxu0 %v6977_v43 }
  0x46   :  { %548 = vmatpush1.msra.mxu0 %v6983_v44  ;;  %583 = vmatprep.mubr.f32.mxu0 %v10580_v0 }
  0x47   :  { %549 = vmatprep.subr.mxu0 %v6990_v45  ;;  %5110 = vmatpush3.msra.mxu1 %v7012_v48 }
  0x48   :  { %550 = vmatpush1.msra.mxu0 %v6998_v46  ;;  %5092 = vmatprep.mubr.msk.f32.mxu1 %vm266_vm1, %v6792_v13  ;;  %v7135_v13 = vld [vmem:[#allocation2 + $0x138] sm:$0xff] }
  0x49   :  { %584 = vmatmul.mubr.f32.vlgmr.msra.gmra.mxu0 %v10580_v0  ;;  %5111 = vmatprep.subr.mxu1 %v10580_v0  ;;  %10915 = vst [vmem:[#allocation22_spill] sm:$0xff] %v7135_v13 }
  0x4a   :  { %5093 = vmatmul.mubr.msk.f32.gmra.mxu1 %vm266_vm1, %v6824_v18  ;;  %768 = vmatprep.mubr.f32.mxu0 %v10580_v0  ;;  %v7139_v18 = vld [vmem:[#allocation2 + $0x128] sm:$0xff] }
  0x4b   :  { %5112 = vmatpush3.msra.mxu1 %v7021_v49  ;;  %5095 = vmatprep.mubr.msk.f32.mxu1 %vm266_vm1, %v6860_v24  ;;  %10916 = vst [vmem:[#allocation23_spill] sm:$0xff] %v7139_v18  ;;  %v7148_v24 = vld [vmem:[#allocation2 + $0x130] sm:$0xff] }
  0x4c   :  { %5113 = vmatprep.subr.mxu1 %v10580_v0  ;;  %704 = vmatprep.subr.mxu0 %v7113_v60  ;;  %10918 = vst [vmem:[#allocation25_spill] sm:$0xff] %v7148_v24 }
  0x4d   :  { %5114 = vmatpush3.msra.mxu1 %v7030_v50  ;;  %705 = vmatpush1.msra.mxu0 %v7115_v61 }
  0x4e   :  { %5115 = vmatprep.subr.mxu1 %v10580_v0  ;;  %5096 = vmatmul.mubr.msk.f32.gmra.mxu1 %vm266_vm1, %v6899_v30  ;;  %v7152_v30 = vld [vmem:[#allocation2 + $0x110] sm:$0xff] }
  0x4f   :  { %5116 = vmatpush3.msra.mxu1 %v7041_v51  ;;  %5098 = vmatprep.mubr.msk.f32.mxu1 %vm266_vm1, %v244_v36  ;;  %10919 = vst [vmem:[#allocation26_spill] sm:$0xff] %v7152_v30  ;;  %v7156_v36 = vld [vmem:[#allocation2 + $0x108] sm:$0xff] }
  0x50   :  { %5117 = vmatprep.subr.mxu1 %v10580_v0  ;;  %706 = vmatprep.subr.mxu0 %v7121_v63  ;;  %10920 = vst [vmem:[#allocation27_spill] sm:$0xff] %v7156_v36 }
  0x51   :  { %5118 = vmatpush3.msra.mxu1 %v7049_v52  ;;  %707 = vmatpush1.msra.mxu0 %v7123_v1 }
  0x52   :  { %5119 = vmatprep.subr.mxu1 %v10580_v0  ;;  %5099 = vmatmul.mubr.msk.f32.gmra.mxu1 %vm266_vm1, %v245_v42  ;;  %v7158_v42 = vld [vmem:[#allocation2 + $0x118] sm:$0xff] }
  0x53   :  { %5120 = vmatpush3.msra.mxu1 %v7059_v53  ;;  %5133 = vmatprep.mubr.msk.f32.mxu1 %vm6630_vm2, %v10580_v0  ;;  %10921 = vst [vmem:[#allocation28_spill] sm:$0xff] %v7158_v42 }
  0x54   :  { %5121 = vmatprep.subr.mxu1 %v10580_v0  ;;  %708 = vmatprep.subr.mxu0 %v7129_v3  ;;  %v7218_v3 = vld [vmem:[#allocation2 + $0x68] sm:$0xff] }
  0x55   :  { %5122 = vmatpush3.msra.mxu1 %v7066_v54  ;;  %709 = vmatpush1.msra.mxu0 %v7135_v13  ;;  %v7204_v13 = vld [vmem:[#allocation2 + $0xa0] sm:$0xff]  ;;  %10940 = vst [vmem:[#allocation47_spill] sm:$0xff] %v7218_v3 }
  0x56   :  { %5123 = vmatprep.subr.mxu1 %v10580_v0  ;;  %710 = vmatprep.subr.mxu0 %v7139_v18  ;;  %v7162_v18 = vld [vmem:[#allocation2 + $0xf8] sm:$0xff]  ;;  %10936 = vst [vmem:[#allocation43_spill] sm:$0xff] %v7204_v13 }
  0x57   :  { %5124 = vmatpush3.msra.mxu1 %v7076_v55  ;;  %711 = vmatpush1.msra.mxu0 %v7146_v21  ;;  %10922 = vst [vmem:[#allocation29_spill] sm:$0xff] %v7162_v18  ;;  %v7168_v21 = vld [vmem:[#allocation2 + $0x100] sm:$0xff] }
  0x58   :  { %5125 = vmatprep.subr.mxu1 %v10580_v0  ;;  %712 = vmatprep.subr.mxu0 %v7152_v30  ;;  %10924 = vst [vmem:[#allocation31_spill] sm:$0xff] %v7168_v21  ;;  %v7172_v30 = vld [vmem:[#allocation2 + $0xe0] sm:$0xff] }
  0x59   :  { %5126 = vmatpush3.msra.mxu1 %v7083_v56  ;;  %713 = vmatpush1.msra.mxu0 %v7156_v36  ;;  %10925 = vst [vmem:[#allocation32_spill] sm:$0xff] %v7172_v30  ;;  %v7178_v36 = vld [vmem:[#allocation2 + $0xe8] sm:$0xff] }
  0x5a   :  { %5127 = vmatprep.subr.mxu1 %v10580_v0  ;;  %714 = vmatprep.subr.mxu0 %v7162_v18  ;;  %10927 = vst [vmem:[#allocation34_spill] sm:$0xff] %v7178_v36  ;;  %v7182_v18 = vld [vmem:[#allocation2 + $0xc8] sm:$0xff] }
  0x5b   :  { %5128 = vmatpush3.msra.mxu1 %v7090_v57  ;;  %10928 = vst [vmem:[#allocation35_spill] sm:$0xff] %v7182_v18 }
  0x5c   :  { %5129 = vmatprep.subr.mxu1 %v10580_v0 }
  0x5d   :  { %5130 = vmatpush3.msra.mxu1 %v7097_v58 }
  0x5e   :  { %5131 = vmatprep.subr.mxu1 %v10580_v0 }
  0x5f   :  { %5132 = vmatpush3.msra.mxu1 %v7104_v59 }
  0x60   :  { %5134 = vmatmul.mubr.f32.vlgmr.msra.gmra.mxu1 %v10580_v0  ;;  %5136 = vmatprep.subr.mxu1 %v10580_v0 }
  0x61   :  { %5168 = vmatprep.mubr.msk.f32.mxu1 %vm6630_vm2, %v10580_v0  ;;  %5137 = vmatpush3.msra.mxu1 %v7117_v62 }
  0x62   :  { %5138 = vmatprep.subr.mxu1 %v10580_v0 }
  0x63   :  { %5139 = vmatpush3.msra.mxu1 %v7125_v2 }
  0x64   :  { %5140 = vmatprep.subr.mxu1 %v10580_v0 }
  0x65   :  { %5141 = vmatpush3.msra.mxu1 %v7131_v8  ;;  %v7194_v8 = vld [vmem:[#allocation2 + $0xa8] sm:$0xff] }
  0x66   :  { %5142 = vmatprep.subr.mxu1 %v10580_v0  ;;  %10932 = vst [vmem:[#allocation39_spill] sm:$0xff] %v7194_v8 }
  0x67   :  { %5143 = vmatpush3.msra.mxu1 %v7148_v24  ;;  %v7166_v24 = vld [vmem:[#allocation2 + $0xf0] sm:$0xff] }
  0x68   :  { %5144 = vmatprep.subr.mxu1 %v10580_v0  ;;  %10923 = vst [vmem:[#allocation30_spill] sm:$0xff] %v7166_v24  ;;  %715 = vmatpush1.msra.mxu0 %v7166_v24  ;;  %v7188_v24 = vld [vmem:[#allocation2 + $0xd0] sm:$0xff] }
  0x69   :  { %5145 = vmatpush3.msra.mxu1 %v7158_v42  ;;  %716 = vmatprep.subr.mxu0 %v7172_v30  ;;  %v7176_v42 = vld [vmem:[#allocation2 + $0xd8] sm:$0xff]  ;;  %10930 = vst [vmem:[#allocation37_spill] sm:$0xff] %v7188_v24  ;;  %v7192_v30 = vld [vmem:[#allocation2 + $0xb0] sm:$0xff] }
  0x6a   :  { %5146 = vmatprep.subr.mxu1 %v10580_v0  ;;  %10926 = vst [vmem:[#allocation33_spill] sm:$0xff] %v7176_v42  ;;  %717 = vmatpush1.msra.mxu0 %v7176_v42  ;;  %10931 = vst [vmem:[#allocation38_spill] sm:$0xff] %v7192_v30  ;;  %v7196_v42 = vld [vmem:[#allocation2 + $0xb8] sm:$0xff] }
  0x6b   :  { %5147 = vmatpush3.msra.mxu1 %v7168_v21  ;;  %718 = vmatprep.subr.mxu0 %v7182_v18  ;;  %v7186_v21 = vld [vmem:[#allocation2 + $0xc0] sm:$0xff]  ;;  %10933 = vst [vmem:[#allocation40_spill] sm:$0xff] %v7196_v42  ;;  %v7200_v18 = vld [vmem:[#allocation2 + $0x98] sm:$0xff] }
  0x6c   :  { %5148 = vmatprep.subr.mxu1 %v10580_v0  ;;  %10929 = vst [vmem:[#allocation36_spill] sm:$0xff] %v7186_v21  ;;  %719 = vmatpush1.msra.mxu0 %v7186_v21  ;;  %10934 = vst [vmem:[#allocation41_spill] sm:$0xff] %v7200_v18  ;;  %v7212_v21 = vld [vmem:[#allocation2 + $0x78] sm:$0xff] }
  0x6d   :  { %5149 = vmatpush3.msra.mxu1 %v7178_v36  ;;  %720 = vmatprep.subr.mxu0 %v7192_v30  ;;  %v7202_v36 = vld [vmem:[#allocation2 + $0x90] sm:$0xff]  ;;  %10938 = vst [vmem:[#allocation45_spill] sm:$0xff] %v7212_v21  ;;  %v7214_v30 = vld [vmem:[#allocation2 + $0x88] sm:$0xff] }
  0x6e   :  { %5150 = vmatprep.subr.mxu1 %v10580_v0  ;;  %10935 = vst [vmem:[#allocation42_spill] sm:$0xff] %v7202_v36  ;;  %721 = vmatpush1.msra.mxu0 %v7194_v8  ;;  %10939 = vst [vmem:[#allocation46_spill] sm:$0xff] %v7214_v30  ;;  %v7224_v8 = vld [vmem:[#allocation2 + $0x70] sm:$0xff] }
  0x6f   :  { %5151 = vmatpush3.msra.mxu1 %v7188_v24  ;;  %v7208_v24 = vld [vmem:[#allocation2 + $0x80] sm:$0xff]  ;;  %722 = vmatprep.subr.mxu0 %v7200_v18  ;;  %10942 = vst [vmem:[#allocation49_spill] sm:$0xff] %v7224_v8  ;;  %v7228_v18 = vld [vmem:[#allocation2 + $0x50] sm:$0xff] }
  0x70   :  { %5152 = vmatprep.subr.mxu1 %v10580_v0  ;;  %10937 = vst [vmem:[#allocation44_spill] sm:$0xff] %v7208_v24  ;;  %723 = vmatpush1.msra.mxu0 %v7202_v36  ;;  %10943 = vst [vmem:[#allocation50_spill] sm:$0xff] %v7228_v18  ;;  %v7234_v36 = vld [vmem:[#allocation2 + $0x58] sm:$0xff] }
  0x71   :  { %5153 = vmatpush3.msra.mxu1 %v7196_v42  ;;  %724 = vmatprep.subr.mxu0 %v7208_v24  ;;  %v7222_v42 = vld [vmem:[#allocation2 + $0x60] sm:$0xff]  ;;  %10945 = vst [vmem:[#allocation52_spill] sm:$0xff] %v7234_v36  ;;  %v7238_v24 = vld [vmem:[#allocation2 + $0x38] sm:$0xff] }
  0x72   :  { %5154 = vmatprep.subr.mxu1 %v10580_v0  ;;  %10941 = vst [vmem:[#allocation48_spill] sm:$0xff] %v7222_v42  ;;  %725 = vmatpush1.msra.mxu0 %v7212_v21  ;;  %10946 = vst [vmem:[#allocation53_spill] sm:$0xff] %v7238_v24  ;;  %v7244_v21 = vld [vmem:[#allocation2 + $0x40] sm:$0xff] }
  0x73   :  { %5155 = vmatpush3.msra.mxu1 %v7204_v13  ;;  %726 = vmatprep.subr.mxu0 %v7218_v3  ;;  %v7232_v13 = vld [vmem:[#allocation2 + $0x48] sm:$0xff]  ;;  %10948 = vst [vmem:[#allocation55_spill] sm:$0xff] %v7244_v21  ;;  %v7248_v3 = vld [vmem:[#allocation2 + $0x20] sm:$0xff] }
  0x74   :  { %5156 = vmatprep.subr.mxu1 %v10580_v0  ;;  %10944 = vst [vmem:[#allocation51_spill] sm:$0xff] %v7232_v13  ;;  %727 = vmatpush1.msra.mxu0 %v7222_v42  ;;  %10949 = vst [vmem:[#allocation56_spill] sm:$0xff] %v7248_v3  ;;  %v7254_v42 = vld [vmem:[#allocation2 + $0x28] sm:$0xff] }
  0x75   :  { %5157 = vmatpush3.msra.mxu1 %v7214_v30  ;;  %728 = vmatprep.subr.mxu0 %v7228_v18  ;;  %v7242_v30 = vld [vmem:[#allocation2 + $0x30] sm:$0xff]  ;;  %10951 = vst [vmem:[#allocation58_spill] sm:$0xff] %v7254_v42  ;;  %v7258_v18 = vld [vmem:[#allocation2 + $0x8] sm:$0xff] }
  0x76   :  { %5158 = vmatprep.subr.mxu1 %v10580_v0  ;;  %10947 = vst [vmem:[#allocation54_spill] sm:$0xff] %v7242_v30  ;;  %729 = vmatpush1.msra.mxu0 %v7232_v13  ;;  %10952 = vst [vmem:[#allocation59_spill] sm:$0xff] %v7258_v18  ;;  %v7264_v13 = vld [vmem:[#allocation2 + $0x10] sm:$0xff] }
  0x77   :  { %5159 = vmatpush3.msra.mxu1 %v7224_v8  ;;  %730 = vmatprep.subr.mxu0 %v7238_v24  ;;  %v7252_v8 = vld [vmem:[#allocation2 + $0x18] sm:$0xff]  ;;  %10954 = vst [vmem:[#allocation61_spill] sm:$0xff] %v7264_v13  ;;  %v7268_v24 = vld [vmem:[#allocation4 + $0x170] sm:$0xff] }
  0x78   :  { %5160 = vmatprep.subr.mxu1 %v10580_v0  ;;  %10950 = vst [vmem:[#allocation57_spill] sm:$0xff] %v7252_v8  ;;  %731 = vmatpush1.msra.mxu0 %v7242_v30  ;;  %10955 = vst [vmem:[#allocation62_spill] sm:$0xff] %v7268_v24 }
  0x79   :  { %5161 = vmatpush3.msra.mxu1 %v7234_v36  ;;  %732 = vmatprep.subr.mxu0 %v7248_v3  ;;  %v7262_v36 = vld [vmem:[#allocation2] sm:$0xff]  ;;  %v251_v3 = vlaneseq }
  0x7a   :  { %5162 = vmatprep.subr.mxu1 %v10580_v0  ;;  %10953 = vst [vmem:[#allocation60_spill] sm:$0xff] %v7262_v36  ;;  %733 = vmatpush1.msra.mxu0 %v7252_v8 }
  0x7b   :  { %5163 = vmatpush3.msra.mxu1 %v7244_v21  ;;  %734 = vmatprep.subr.mxu0 %v7258_v18  ;;  %v7276_v21 = vshrl.u32 %v251_v3, 7  ;;  %v249_v18 = vld [vmem:[%s10525_s4] sm:$0x7] }
  0x7c   :  { %5164 = vmatprep.subr.mxu1 %v10580_v0  ;;  %735 = vmatpush1.msra.mxu0 %v7262_v36 }
  0x7d   :  { %5165 = vmatpush3.msra.mxu1 %v7254_v42  ;;  %845 = vmatprep.subr.mxu0 %v7268_v24  ;;  %10956 = vst [vmem:[#allocation63_spill] sm:$0xff] %v7276_v21  ;;  %v7279_v8 = vsub.s32 0, %v7276_v21  ;;  %v7285_v30 = vsub.s32 1, %v7276_v21  ;;  %v10597_v59 = vsub.s32 2, %v7276_v21 }
  0x7e   :  { %5166 = vmatprep.subr.mxu1 %v10580_v0 }
  0x7f   :  { %5167 = vmatpush3.msra.mxu1 %v7264_v13  ;;  %10957 = vst [vmem:[#allocation64_spill] sm:$0xff] %v7279_v8  ;;  %10958 = vst [vmem:[#allocation65_spill] sm:$0xff] %v7285_v30  ;;  %v254_v13 = vrot.slane %v249_v18, %v7279_v8 }
  0x80   :  { %5171 = vmatprep.subr.mxu1 %v10580_v0  ;;  %v258_v0 = vrot.slane %v249_v18, %v7285_v30 }
  0xe8   :  { %v367_v42 = vpop.f32.mrf.mxu0 }
  0xea   :  { %v369_v36 = vpop.f32.mrf.mxu0 }
  0xed   :  { %v373_v24 = vpop.f32.mrf.mxu0 }
  0xee   :  { %v7289_v2 = vadd.f32 %v373_v24, %v254_v13  ;;  %v262_v24 = vrot.slane %v249_v18, %v10597_v59 }
  0xef   :  { %v375_v3 = vpop.f32.mrf.mxu0 }
  0xf0   :  { %10959 = vst [vmem:[#allocation66_spill] sm:$0xff] %v7289_v2  ;;  %v7291_v1 = vadd.f32 %v375_v3, %v258_v0 }
  0xf1   :  { %v379_v63 = vpop.f32.mrf.mxu0 }
  0xf2   :  { %10960 = vst [vmem:[#allocation67_spill] sm:$0xff] %v7291_v1  ;;  %v7293_v62 = vadd.f32 %v379_v63, %v254_v13 }
  0xf3   :  { %v381_v61 = vpop.f32.mrf.mxu0 }
  0xf4   :  { %10961 = vst [vmem:[#allocation68_spill] sm:$0xff] %v7293_v62  ;;  %v7295_v60 = vadd.f32 %v381_v61, %v258_v0  ;;  %v5091_v63 = vpop.f32.mrf.mxu1 }
  0xf5   :  { %v385_v46 = vpop.f32.mrf.mxu0  ;;  %v7308_v61 = vadd.f32 %v5091_v63, %v262_v24 }
  0xf6   :  { %10962 = vst [vmem:[#allocation69_spill] sm:$0xff] %v7295_v60  ;;  %v7298_v45 = vadd.f32 %v385_v46, %v254_v13 }
  0xf7   :  { %v387_v8 = vpop.f32.mrf.mxu0  ;;  %10967 = vst [vmem:[#allocation74_spill] sm:$0xff] %v7308_v61  ;;  %v480_v61 = vpop.f32.mrf.mxu1 }
  0xf8   :  { %10963 = vst [vmem:[#allocation70_spill] sm:$0xff] %v7298_v45  ;;  %v7300_v58 = vadd.f32 %v387_v8, %v258_v0 }
  0xf9   :  { %v391_v30 = vpop.f32.mrf.mxu0 }
  0xfa   :  { %10964 = vst [vmem:[#allocation71_spill] sm:$0xff] %v7300_v58  ;;  %v7304_v3 = vadd.f32 %v391_v30, %v254_v13 }
  0xfb   :  { %v393_v1 = vpop.f32.mrf.mxu0 }
  0xfc   :  { %10965 = vst [vmem:[#allocation72_spill] sm:$0xff] %v7304_v3  ;;  %v7306_v62 = vadd.f32 %v393_v1, %v258_v0  ;;  %v368_v1 = vadd.f32 %v367_v42, %v254_v13 }
  0xfd   :  { %v397_v60 = vpop.f32.mrf.mxu0 }
  0xfe   :  { %10966 = vst [vmem:[#allocation73_spill] sm:$0xff] %v7306_v62  ;;  %v7310_v2 = vadd.f32 %v397_v60, %v254_v13 }
  0xff   :  { %v399_v46 = vpop.f32.mrf.mxu0 }
 0x100   :  { %10968 = vst [vmem:[#allocation75_spill] sm:$0xff] %v7310_v2  ;;  %v7312_v45 = vadd.f32 %v399_v46, %v258_v0 }
 0x101   :  { %v403_v8 = vpop.f32.mrf.mxu0 }
 0x102   :  { %10969 = vst [vmem:[#allocation76_spill] sm:$0xff] %v7312_v45  ;;  %v7314_v58 = vadd.f32 %v403_v8, %v254_v13 }
 0x103   :  { %v405_v21 = vpop.f32.mrf.mxu0 }
 0x104   :  { %10970 = vst [vmem:[#allocation77_spill] sm:$0xff] %v7314_v58  ;;  %v7316_v18 = vadd.f32 %v405_v21, %v258_v0  ;;  %v370_v58 = vadd.f32 %v369_v36, %v258_v0 }
 0x105   :  { %v409_v30 = vpop.f32.mrf.mxu0 }
 0x106   :  { %10971 = vst [vmem:[#allocation78_spill] sm:$0xff] %v7316_v18  ;;  %v7318_v59 = vadd.f32 %v409_v30, %v254_v13 }
 0x107   :  { %v411_v3 = vpop.f32.mrf.mxu0 }
 0x108   :  { %10972 = vst [vmem:[#allocation79_spill] sm:$0xff] %v7318_v59  ;;  %v7320_v62 = vadd.f32 %v411_v3, %v258_v0 }
 0x109   :  { %v585_v63 = vpop.f32.mrf.mxu0 }
 0x10a   :  { %10973 = vst [vmem:[#allocation80_spill] sm:$0xff] %v7320_v62  ;;  %v660_v60 = vadd.f32 %v585_v63, %v368_v1  ;;  %v5094_v2 = vpop.f32.mrf.mxu1 }
 0x10b   :  { %v7322_v46 = vadd.f32 %v5094_v2, %v262_v24  ;;  %v587_v45 = vpop.f32.mrf.mxu0 }
 0x10c   :  { %v4599_v44 = vmul.f32 -1.442695, %v660_v60  ;;  %v490_v8 = vpop.f32.mrf.mxu1  ;;  %v667_v30 = vadd.f32 %v587_v45, %v370_v58  ;;  %v7337_v45 = vld [vmem:[%s10526_s5] ss:$0 sm:$0xff] }
 0x10d   :  { %10974 = vst [vmem:[#allocation81_spill] sm:$0xff] %v7322_v46  ;;  %v7324_v21 = vadd.f32 %v490_v8, %v262_v24  ;;  %v7392_v46 = vld [vmem:[#allocation4 + $0x100] sm:$0xff] }
 0x10e   :  { %5954 = vpow2.f32 %v4599_v44  ;;  %v5097_v18 = vpop.f32.mrf.mxu1  ;;  %v4600_v62 = vmul.f32 -1.442695, %v667_v30  ;;  %10988 = vst [vmem:[#allocation94_spill] sm:$0xff] %v7392_v46 }
 0x10f   :  { %10975 = vst [vmem:[#allocation82_spill] sm:$0xff] %v7324_v21  ;;  %v7326_v59 = vadd.f32 %v5097_v18, %v262_v24  ;;  %v7396_v21 = vld [vmem:[#allocation4 + $0xe0] sm:$0xff] }
 0x110   :  { %v500_v13 = vpop.f32.mrf.mxu1  ;;  %5956 = vpow2.f32 %v4600_v62  ;;  %10989 = vst [vmem:[#allocation95_spill] sm:$0xff] %v7396_v21 }
 0x111   :  { %10976 = vst [vmem:[#allocation83_spill] sm:$0xff] %v7326_v59  ;;  %v7328_v42 = vadd.f32 %v500_v13, %v262_v24  ;;  %v481_v13 = vadd.f32 %v480_v61, %v262_v24  ;;  %v7342_v59 = vld [vmem:[#allocation4 + $0x168] sm:$0xff]  ;;  %v7352_v61 = vld [vmem:[#allocation4 + $0x160] sm:$0xff] }
 0x112   :  { %v5100_v3 = vpop.f32.mrf.mxu1 }
 0x113   :  { %10977 = vst [vmem:[#allocation84_spill] sm:$0xff] %v7328_v42  ;;  %v7330_v1 = vadd.f32 %v5100_v3, %v262_v24  ;;  %v7344_v42 = vld [vmem:[#allocation4 + $0x178] sm:$0xff] }
 0x114   :  { %v510_v63 = vpop.f32.mrf.mxu1 }
 0x115   :  { %10978 = vst [vmem:[#allocation85_spill] sm:$0xff] %v7330_v1  ;;  %v7332_v2 = vadd.f32 %v510_v63, %v262_v24  ;;  %v7350_v24 = vld [vmem:[#allocation4 + $0x150] sm:$0xff] }
 0x117   :  { %10979 = vst [vmem:[#allocation86_spill] sm:$0xff] %v7332_v2 }
 0x11b   :  { %v5955_v60 = vpop.eup %5954 }
 0x11c   :  { %v664_v0 = vadd.f32 1.0, %v5955_v60 }
 0x11d   :  { %v5957_v8 = vpop.eup %5956 }
 0x11e   :  { %5958 = vrcp.f32 %v664_v0  ;;  %v671_v58 = vadd.f32 1.0, %v5957_v8  ;;  %v7346_v8 = vld [vmem:[#allocation4 + $0x158] sm:$0xff] }
 0x120   :  { %v656_v44 = vpop.f32.mrf.mxu1  ;;  %5960 = vrcp.f32 %v671_v58  ;;  %v7360_v58 = vld [vmem:[#allocation4 + $0x138] sm:$0xff] }
 0x121   :  { %v680_v18 = vadd.f32 %v7337_v45, %v656_v44  ;;  %v10980_v44 = vmov 0.0  }
 0x122   :  { %v5135_v36 = vpop.f32.mrf.mxu1 }
 0x12b   :  { %v5959_v30 = vpop.eup %5958 }
 0x12c   :  { %v681_v3 = vmul.f32 %v5959_v30, %v680_v18  ;;  %v7362_v18 = vld [vmem:[#allocation4 + $0x148] sm:$0xff] }
 0x12d   :  { %v5961_v62 = vpop.eup %5960  ;;  %v7366_v30 = vld [vmem:[#allocation4 + $0x128] sm:$0xff] }
 0x12e   :  { %v682_v63 = vadd.f32 %v681_v3, %v481_v13  ;;  %v684_v60 = vsub.f32 1.0, %v5961_v62  ;;  %v686_v36 = vmul.f32 0.0, %v5961_v62  ;;  %v7370_v13 = vld [vmem:[#allocation4 + $0x120] sm:$0xff]  ;;  %v7372_v3 = vld [vmem:[#allocation4 + $0x130] sm:$0xff]  ;;  %v7380_v62 = vld [vmem:[#allocation4 + $0x108] sm:$0xff] }
 0x12f   :  { %10981 = vst [vmem:[#allocation87_spill] sm:$0xff] %v7370_v13  ;;  %10982 = vst [vmem:[#allocation88_spill] sm:$0xff] %v7372_v3 }
 0x130   :  { %5962 = vtanh.f32 %v682_v63  ;;  %v7376_v63 = vld [vmem:[#allocation4 + $0x110] sm:$0xff]  ;;  %10984 = vst [vmem:[#allocation90_spill] sm:$0xff] %v7380_v62 }
 0x131   :  { %10983 = vst [vmem:[#allocation89_spill] sm:$0xff] %v7376_v63 }
 0x13d   :  { %v5963_v0 = vpop.eup %5962 }
 0x13e   :  { %v685_v1 = vmul.f32 %v5963_v0, %v684_v60  ;;  %v7382_v60 = vld [vmem:[#allocation4 + $0x118] sm:$0xff] }
 0x13f   :  { %10985 = vst [vmem:[#allocation91_spill] sm:$0xff] %v7382_v60  ;;  %v7386_v0 = vld [vmem:[#allocation4 + $0xf8] sm:$0xff] }
 0x140   :  { %v7340_v2 = vadd.f32 %v686_v36, %v685_v1  ;;  %v7356_v1 = vld [vmem:[#allocation4 + $0x140] sm:$0xff]  ;;  %10986 = vst [vmem:[#allocation92_spill] sm:$0xff] %v7386_v0  ;;  %v7390_v36 = vld [vmem:[#allocation4 + $0xf0] sm:$0xff] }
 0x141   :  { %10987 = vst [vmem:[#allocation93_spill] sm:$0xff] %v7390_v36 }
 0x142   :  { %769 = vmatmul.mubr.f32.vlgmr.msra.gmra.mxu0 %v7340_v2  ;;  %5169 = vmatmul.mubr.f32.vlgmr.msra.gmra.mxu1 %v7340_v2 }
 0x143   :  { %846 = vmatpush1.msra.mxu0 %v7342_v59  ;;  %5172 = vmatpush3.msra.mxu1 %v7344_v42 }
 0x144   :  { %847 = vmatprep.subr.mxu0 %v7346_v8  ;;  %5173 = vmatprep.subr.mxu1 %v10980_v44 }
 0x145   :  { %848 = vmatpush1.msra.mxu0 %v7350_v24  ;;  %5174 = vmatpush3.msra.mxu1 %v7352_v61 }
 0x146   :  { %849 = vmatprep.subr.mxu0 %v7356_v1  ;;  %5175 = vmatprep.subr.mxu1 %v10980_v44 }
 0x147   :  { %850 = vmatpush1.msra.mxu0 %v7360_v58  ;;  %5176 = vmatpush3.msra.mxu1 %v7362_v18 }
 0x148   :  { %851 = vmatprep.subr.mxu0 %v7366_v30  ;;  %5177 = vmatprep.subr.mxu1 %v10980_v44 }
 0x149   :  { %852 = vmatpush1.msra.mxu0 %v7370_v13  ;;  %5178 = vmatpush3.msra.mxu1 %v7372_v3  ;;  %v7400_v3 = vld [vmem:[#allocation4 + $0xd8] sm:$0xff]  ;;  %v7402_v13 = vld [vmem:[#allocation4 + $0xe8] sm:$0xff] }
 0x14a   :  { %853 = vmatprep.subr.mxu0 %v7376_v63  ;;  %5179 = vmatprep.subr.mxu1 %v10980_v44  ;;  %10990 = vst [vmem:[#allocation96_spill] sm:$0xff] %v7400_v3  ;;  %10991 = vst [vmem:[#allocation97_spill] sm:$0xff] %v7402_v13  ;;  %v7406_v63 = vld [vmem:[#allocation4 + $0xc8] sm:$0xff] }
 0x14b   :  { %854 = vmatpush1.msra.mxu0 %v7380_v62  ;;  %5180 = vmatpush3.msra.mxu1 %v7382_v60  ;;  %10992 = vst [vmem:[#allocation98_spill] sm:$0xff] %v7406_v63  ;;  %v7410_v60 = vld [vmem:[#allocation4 + $0xc0] sm:$0xff]  ;;  %v7412_v62 = vld [vmem:[#allocation4 + $0xd0] sm:$0xff] }
 0x14c   :  { %855 = vmatprep.subr.mxu0 %v7386_v0  ;;  %5181 = vmatprep.subr.mxu1 %v10980_v44  ;;  %10993 = vst [vmem:[#allocation99_spill] sm:$0xff] %v7410_v60  ;;  %10994 = vst [vmem:[#allocation100_spill] sm:$0xff] %v7412_v62  ;;  %v7416_v0 = vld [vmem:[#allocation4 + $0xb0] sm:$0xff] }
 0x14d   :  { %856 = vmatpush1.msra.mxu0 %v7390_v36  ;;  %5182 = vmatpush3.msra.mxu1 %v7392_v46  ;;  %10995 = vst [vmem:[#allocation101_spill] sm:$0xff] %v7416_v0  ;;  %v7420_v46 = vld [vmem:[#allocation4 + $0xa8] sm:$0xff]  ;;  %v7422_v36 = vld [vmem:[#allocation4 + $0xb8] sm:$0xff] }
 0x14e   :  { %857 = vmatprep.subr.mxu0 %v7396_v21  ;;  %5183 = vmatprep.subr.mxu1 %v10980_v44  ;;  %10996 = vst [vmem:[#allocation102_spill] sm:$0xff] %v7420_v46  ;;  %10997 = vst [vmem:[#allocation103_spill] sm:$0xff] %v7422_v36  ;;  %v7426_v21 = vld [vmem:[#allocation4 + $0x98] sm:$0xff] }
 0x14f   :  { %858 = vmatpush1.msra.mxu0 %v7400_v3  ;;  %5184 = vmatpush3.msra.mxu1 %v7402_v13  ;;  %10998 = vst [vmem:[#allocation104_spill] sm:$0xff] %v7426_v21  ;;  %v7430_v13 = vld [vmem:[#allocation4 + $0x90] sm:$0xff]  ;;  %v7432_v3 = vld [vmem:[#allocation4 + $0xa0] sm:$0xff] }
 0x150   :  { %859 = vmatprep.subr.mxu0 %v7406_v63  ;;  %5185 = vmatprep.subr.mxu1 %v10980_v44  ;;  %10999 = vst [vmem:[#allocation105_spill] sm:$0xff] %v7430_v13  ;;  %11000 = vst [vmem:[#allocation106_spill] sm:$0xff] %v7432_v3  ;;  %v7436_v63 = vld [vmem:[#allocation4 + $0x80] sm:$0xff] }
 0x151   :  { %860 = vmatpush1.msra.mxu0 %v7410_v60  ;;  %5186 = vmatpush3.msra.mxu1 %v7412_v62  ;;  %11001 = vst [vmem:[#allocation107_spill] sm:$0xff] %v7436_v63  ;;  %v7440_v62 = vld [vmem:[#allocation4 + $0x78] sm:$0xff]  ;;  %v7442_v60 = vld [vmem:[#allocation4 + $0x88] sm:$0xff] }
 0x152   :  { %861 = vmatprep.subr.mxu0 %v7416_v0  ;;  %5187 = vmatprep.subr.mxu1 %v10980_v44  ;;  %11002 = vst [vmem:[#allocation108_spill] sm:$0xff] %v7440_v62  ;;  %11003 = vst [vmem:[#allocation109_spill] sm:$0xff] %v7442_v60  ;;  %v7446_v0 = vld [vmem:[#allocation4 + $0x68] sm:$0xff] }
 0x153   :  { %862 = vmatpush1.msra.mxu0 %v7420_v46  ;;  %5188 = vmatpush3.msra.mxu1 %v7422_v36  ;;  %11004 = vst [vmem:[#allocation110_spill] sm:$0xff] %v7446_v0  ;;  %v7450_v36 = vld [vmem:[#allocation4 + $0x60] sm:$0xff]  ;;  %v7452_v46 = vld [vmem:[#allocation4 + $0x70] sm:$0xff] }
 0x154   :  { %863 = vmatprep.subr.mxu0 %v7426_v21  ;;  %5189 = vmatprep.subr.mxu1 %v10980_v44  ;;  %11005 = vst [vmem:[#allocation111_spill] sm:$0xff] %v7450_v36  ;;  %11006 = vst [vmem:[#allocation112_spill] sm:$0xff] %v7452_v46  ;;  %v7456_v21 = vld [vmem:[#allocation4 + $0x50] sm:$0xff] }
 0x155   :  { %864 = vmatpush1.msra.mxu0 %v7430_v13  ;;  %5190 = vmatpush3.msra.mxu1 %v7432_v3  ;;  %11007 = vst [vmem:[#allocation113_spill] sm:$0xff] %v7456_v21  ;;  %v7460_v3 = vld [vmem:[#allocation4 + $0x48] sm:$0xff]  ;;  %v7462_v13 = vld [vmem:[#allocation4 + $0x58] sm:$0xff] }
 0x156   :  { %865 = vmatprep.subr.mxu0 %v7436_v63  ;;  %5191 = vmatprep.subr.mxu1 %v10980_v44  ;;  %11008 = vst [vmem:[#allocation114_spill] sm:$0xff] %v7462_v13  ;;  %v7466_v63 = vld [vmem:[#allocation4 + $0x38] sm:$0xff] }
 0x157   :  { %866 = vmatpush1.msra.mxu0 %v7440_v62  ;;  %5192 = vmatpush3.msra.mxu1 %v7442_v60  ;;  %11009 = vst [vmem:[#allocation115_spill] sm:$0xff] %v7466_v63  ;;  %v7470_v60 = vld [vmem:[#allocation4 + $0x30] sm:$0xff]  ;;  %v7472_v62 = vld [vmem:[#allocation4 + $0x40] sm:$0xff] }
 0x158   :  { %867 = vmatprep.subr.mxu0 %v7446_v0  ;;  %5193 = vmatprep.subr.mxu1 %v10980_v44  ;;  %v7476_v0 = vld [vmem:[#allocation4 + $0x20] sm:$0xff] }
 0x159   :  { %868 = vmatpush1.msra.mxu0 %v7450_v36  ;;  %5194 = vmatpush3.msra.mxu1 %v7452_v46  ;;  %v7480_v46 = vld [vmem:[#allocation4 + $0x18] sm:$0xff]  ;;  %v7482_v36 = vld [vmem:[#allocation4 + $0x28] sm:$0xff] }
 0x15a   :  { %869 = vmatprep.subr.mxu0 %v7456_v21  ;;  %5195 = vmatprep.subr.mxu1 %v10980_v44  ;;  %v7486_v21 = vld [vmem:[#allocation4 + $0x8] sm:$0xff] }
 0x15b   :  { %870 = vmatpush1.msra.mxu0 %v7460_v3  ;;  %5196 = vmatpush3.msra.mxu1 %v7462_v13  ;;  %v7490_v13 = vld [vmem:[#allocation4] sm:$0xff] }
 0x15c   :  { %871 = vmatprep.subr.mxu0 %v7466_v63  ;;  %5197 = vmatprep.subr.mxu1 %v10980_v44  ;;  %v7494_v63 = vld [vmem:[#allocation4 + $0x10] sm:$0xff] }
 0x15d   :  { %872 = vmatpush1.msra.mxu0 %v7470_v60  ;;  %5198 = vmatpush3.msra.mxu1 %v7472_v62 }
 0x15e   :  { %873 = vmatprep.subr.mxu0 %v7476_v0  ;;  %5199 = vmatprep.subr.mxu1 %v10980_v44 }
 0x15f   :  { %874 = vmatpush1.msra.mxu0 %v7480_v46  ;;  %5200 = vmatpush3.msra.mxu1 %v7482_v36 }
 0x160   :  { %875 = vmatprep.subr.mxu0 %v7486_v21  ;;  %5201 = vmatprep.subr.mxu1 %v10980_v44 }
 0x161   :  { %876 = vmatpush1.msra.mxu0 %v7490_v13  ;;  %909 = vmatprep.mubr.f32.mxu0 %v10980_v44 }
 0x162   :  { %5202 = vmatpush3.msra.mxu1 %v7494_v63  ;;  %910 = vmatmul.mubr.f32.vlgmr.msra.gmra.mxu0 %v10980_v44 }
 0x163   :  { %5203 = vmatprep.mubr.msk.f32.mxu1 %vm6630_vm2, %v10980_v44  ;;  %1014 = vmatprep.subr.mxu0 %v6737_v4  ;;  %v11010_v4 = vld [vmem:[#allocation9_spill] sm:$0xff] }
 0x164   :  { %5206 = vmatprep.subr.mxu1 %v10980_v44  ;;  %5204 = vmatmul.mubr.f32.vlgmr.msra.gmra.mxu1 %v10980_v44 }
 0x165   :  { %1015 = vmatpush1.msra.mxu0 %v6742_v5  ;;  %5207 = vmatpush3.msra.mxu1 %v6892_v29  ;;  %v11011_v5 = vld [vmem:[#allocation12_spill] sm:$0xff]  ;;  %v11030_v29 = vld [vmem:[#allocation29_spill] sm:$0xff] }
 0x166   :  { %1016 = vmatprep.subr.mxu0 %v6749_v6  ;;  %5208 = vmatprep.subr.mxu1 %v10980_v44  ;;  %v11012_v6 = vld [vmem:[#allocation10_spill] sm:$0xff] }
 0x167   :  { %1017 = vmatpush1.msra.mxu0 %v6756_v7  ;;  %5209 = vmatpush3.msra.mxu1 %v6931_v35  ;;  %v11013_v7 = vld [vmem:[#allocation11_spill] sm:$0xff]  ;;  %v11035_v35 = vld [vmem:[#allocation34_spill] sm:$0xff] }
 0x168   :  { %1018 = vmatprep.subr.mxu0 %v6766_v9  ;;  %5210 = vmatprep.subr.mxu1 %v10980_v44  ;;  %v11014_v9 = vld [vmem:[#allocation13_spill] sm:$0xff] }
 0x169   :  { %1019 = vmatpush1.msra.mxu0 %v6772_v10  ;;  %5211 = vmatpush3.msra.mxu1 %v6967_v41  ;;  %v11015_v10 = vld [vmem:[#allocation14_spill] sm:$0xff]  ;;  %v11040_v41 = vld [vmem:[#allocation39_spill] sm:$0xff] }
 0x16a   :  { %1020 = vmatprep.subr.mxu0 %v6778_v11  ;;  %5212 = vmatprep.subr.mxu1 %v10980_v44  ;;  %v11016_v11 = vld [vmem:[#allocation15_spill] sm:$0xff] }
 0x16b   :  { %1021 = vmatpush1.msra.mxu0 %v6785_v12  ;;  %5213 = vmatpush3.msra.mxu1 %v7003_v47  ;;  %v11017_v12 = vld [vmem:[#allocation16_spill] sm:$0xff]  ;;  %v11042_v47 = vld [vmem:[#allocation41_spill] sm:$0xff] }
 0x16c   :  { %1022 = vmatprep.subr.mxu0 %v6797_v14  ;;  %5214 = vmatprep.subr.mxu1 %v10980_v44  ;;  %v11018_v14 = vld [vmem:[#allocation17_spill] sm:$0xff] }
 0x16d   :  { %1023 = vmatpush1.msra.mxu0 %v6803_v15  ;;  %5215 = vmatpush3.msra.mxu1 %v7012_v48  ;;  %v11019_v15 = vld [vmem:[#allocation18_spill] sm:$0xff] }
 0x16e   :  { %1024 = vmatprep.subr.mxu0 %v6809_v16  ;;  %5216 = vmatprep.subr.mxu1 %v10980_v44  ;;  %v11020_v16 = vld [vmem:[#allocation19_spill] sm:$0xff]  ;;  %v11043_v48 = vld [vmem:[#allocation42_spill] sm:$0xff] }
 0x16f   :  { %1025 = vmatpush1.msra.mxu0 %v6817_v17  ;;  %5217 = vmatpush3.msra.mxu1 %v7021_v49  ;;  %v11021_v17 = vld [vmem:[#allocation20_spill] sm:$0xff]  ;;  %v11044_v49 = vld [vmem:[#allocation43_spill] sm:$0xff] }
 0x170   :  { %1026 = vmatprep.subr.mxu0 %v6829_v19  ;;  %5218 = vmatprep.subr.mxu1 %v10980_v44  ;;  %v11022_v19 = vld [vmem:[#allocation22_spill] sm:$0xff] }
 0x171   :  { %1027 = vmatpush1.msra.mxu0 %v6835_v20  ;;  %5219 = vmatpush3.msra.mxu1 %v7030_v50  ;;  %v11023_v20 = vld [vmem:[#allocation21_spill] sm:$0xff]  ;;  %v11045_v50 = vld [vmem:[#allocation44_spill] sm:$0xff] }
 0x172   :  { %1028 = vmatprep.subr.mxu0 %v6844_v22  ;;  %5220 = vmatprep.subr.mxu1 %v10980_v44  ;;  %v11024_v22 = vld [vmem:[#allocation23_spill] sm:$0xff] }
 0x173   :  { %1029 = vmatpush1.msra.mxu0 %v6853_v23  ;;  %5221 = vmatpush3.msra.mxu1 %v7041_v51  ;;  %v11025_v23 = vld [vmem:[#allocation24_spill] sm:$0xff]  ;;  %v11046_v51 = vld [vmem:[#allocation45_spill] sm:$0xff] }
 0x174   :  { %1030 = vmatprep.subr.mxu0 %v6865_v25  ;;  %5222 = vmatprep.subr.mxu1 %v10980_v44  ;;  %v11026_v25 = vld [vmem:[#allocation25_spill] sm:$0xff] }
 0x175   :  { %1031 = vmatpush1.msra.mxu0 %v6871_v26  ;;  %5223 = vmatpush3.msra.mxu1 %v7049_v52  ;;  %v11027_v26 = vld [vmem:[#allocation26_spill] sm:$0xff] }
 0x176   :  { %1032 = vmatprep.subr.mxu0 %v6878_v27  ;;  %5224 = vmatprep.subr.mxu1 %v10980_v44  ;;  %v11028_v27 = vld [vmem:[#allocation27_spill] sm:$0xff]  ;;  %v11047_v52 = vld [vmem:[#allocation46_spill] sm:$0xff] }
 0x177   :  { %1033 = vmatpush1.msra.mxu0 %v6887_v28  ;;  %5225 = vmatpush3.msra.mxu1 %v7059_v53  ;;  %v11029_v28 = vld [vmem:[#allocation28_spill] sm:$0xff]  ;;  %v11048_v53 = vld [vmem:[#allocation47_spill] sm:$0xff] }
 0x178   :  { %1034 = vmatprep.subr.mxu0 %v6904_v31  ;;  %5226 = vmatprep.subr.mxu1 %v10980_v44  ;;  %v11031_v31 = vld [vmem:[#allocation30_spill] sm:$0xff] }
 0x179   :  { %1035 = vmatpush1.msra.mxu0 %v6910_v32  ;;  %5227 = vmatpush3.msra.mxu1 %v7066_v54  ;;  %v11032_v32 = vld [vmem:[#allocation31_spill] sm:$0xff]  ;;  %v11049_v54 = vld [vmem:[#allocation48_spill] sm:$0xff] }
 0x17a   :  { %1036 = vmatprep.subr.mxu0 %v6917_v33  ;;  %5228 = vmatprep.subr.mxu1 %v10980_v44  ;;  %v11033_v33 = vld [vmem:[#allocation32_spill] sm:$0xff] }
 0x17b   :  { %1037 = vmatpush1.msra.mxu0 %v6926_v34  ;;  %5229 = vmatpush3.msra.mxu1 %v7076_v55  ;;  %v11034_v34 = vld [vmem:[#allocation33_spill] sm:$0xff] }
 0x17c   :  { %1038 = vmatprep.subr.mxu0 %v6941_v37  ;;  %5230 = vmatprep.subr.mxu1 %v10980_v44  ;;  %v11036_v37 = vld [vmem:[#allocation35_spill] sm:$0xff]  ;;  %v11050_v55 = vld [vmem:[#allocation49_spill] sm:$0xff] }
 0x17d   :  { %1039 = vmatpush1.msra.mxu0 %v6947_v38  ;;  %5231 = vmatpush3.msra.mxu1 %v7083_v56  ;;  %v11037_v38 = vld [vmem:[#allocation36_spill] sm:$0xff]  ;;  %v11051_v56 = vld [vmem:[#allocation50_spill] sm:$0xff] }
 0x17e   :  { %1040 = vmatprep.subr.mxu0 %v6954_v39  ;;  %5232 = vmatprep.subr.mxu1 %v10980_v44  ;;  %v11038_v39 = vld [vmem:[#allocation37_spill] sm:$0xff] }
 0x17f   :  { %1041 = vmatpush1.msra.mxu0 %v6962_v40  ;;  %5233 = vmatpush3.msra.mxu1 %v7090_v57  ;;  %v11039_v40 = vld [vmem:[#allocation38_spill] sm:$0xff]  ;;  %v11052_v57 = vld [vmem:[#allocation51_spill] sm:$0xff] }
 0x180   :  { %1042 = vmatprep.subr.mxu0 %v6977_v43  ;;  %5234 = vmatprep.subr.mxu1 %v10980_v44  ;;  %v11041_v43 = vld [vmem:[#allocation40_spill] sm:$0xff] }
 0x181   :  { %1043 = vmatpush1.msra.mxu0 %v11010_v4  ;;  %5235 = vmatpush3.msra.mxu1 %v11011_v5  ;;  %v11053_v4 = vld [vmem:[#allocation52_spill] sm:$0xff]  ;;  %v11054_v5 = vld [vmem:[#allocation53_spill] sm:$0xff] }
 0x182   :  { %1044 = vmatprep.subr.mxu0 %v11012_v6  ;;  %5236 = vmatprep.subr.mxu1 %v10980_v44  ;;  %v11055_v6 = vld [vmem:[#allocation54_spill] sm:$0xff] }
 0x183   :  { %1045 = vmatpush1.msra.mxu0 %v11013_v7  ;;  %1078 = vmatprep.mubr.f32.mxu0 %v10980_v44  ;;  %v11056_v7 = vld [vmem:[#allocation55_spill] sm:$0xff] }
 0x184   :  { %5237 = vmatpush3.msra.mxu1 %v11014_v9  ;;  %5238 = vmatprep.mubr.msk.f32.mxu1 %vm6630_vm2, %v10980_v44  ;;  %v11057_v9 = vld [vmem:[#allocation56_spill] sm:$0xff] }
 0x185   :  { %1079 = vmatmul.mubr.f32.vlgmr.msra.gmra.mxu0 %v7340_v2  ;;  %5239 = vmatmul.mubr.f32.vlgmr.msra.gmra.mxu1 %v7340_v2 }
 0x186   :  { %1177 = vmatprep.subr.mxu0 %v11015_v10  ;;  %5241 = vmatprep.subr.mxu1 %v10980_v44  ;;  %v11058_v10 = vld [vmem:[#allocation57_spill] sm:$0xff] }
 0x187   :  { %1178 = vmatpush1.msra.mxu0 %v11016_v11  ;;  %5242 = vmatpush3.msra.mxu1 %v11017_v12  ;;  %v11059_v11 = vld [vmem:[#allocation58_spill] sm:$0xff]  ;;  %v11060_v12 = vld [vmem:[#allocation59_spill] sm:$0xff] }
 0x188   :  { %1179 = vmatprep.subr.mxu0 %v11018_v14  ;;  %5243 = vmatprep.subr.mxu1 %v10980_v44  ;;  %v11061_v14 = vld [vmem:[#allocation60_spill] sm:$0xff] }
 0x189   :  { %1180 = vmatpush1.msra.mxu0 %v11019_v15  ;;  %5244 = vmatpush3.msra.mxu1 %v11020_v16  ;;  %v11062_v15 = vld [vmem:[#allocation61_spill] sm:$0xff]  ;;  %v11063_v16 = vld [vmem:[#allocation62_spill] sm:$0xff] }
 0x18a   :  { %1181 = vmatprep.subr.mxu0 %v11021_v17  ;;  %5245 = vmatprep.subr.mxu1 %v10980_v44 }
 0x18b   :  { %1182 = vmatpush1.msra.mxu0 %v11022_v19  ;;  %5246 = vmatpush3.msra.mxu1 %v11023_v20  ;;  %v236_v20 = vld [vmem:[%s10529_s8] sm:$0x7] }
 0x18c   :  { %1183 = vmatprep.subr.mxu0 %v11024_v22  ;;  %5247 = vmatprep.subr.mxu1 %v10980_v44 }
 0x18d   :  { %1184 = vmatpush1.msra.mxu0 %v11025_v23  ;;  %5248 = vmatpush3.msra.mxu1 %v11026_v25  ;;  %v11064_v23 = vld [vmem:[#allocation64_spill] sm:$0xff] }
 0x18e   :  { %1185 = vmatprep.subr.mxu0 %v11027_v26  ;;  %5249 = vmatprep.subr.mxu1 %v10980_v44  ;;  %v7647_v25 = vrot.slane %v236_v20, %v11064_v23  ;;  %v8079_v23 = vld [vmem:[#allocation2 + $0x148] sm:$0xff] }
 0x18f   :  { %1186 = vmatpush1.msra.mxu0 %v11028_v27  ;;  %5250 = vmatpush3.msra.mxu1 %v11029_v28  ;;  %11120 = vst [vmem:[#allocation29_spill] sm:$0xff] %v8079_v23 }
 0x190   :  { %1187 = vmatprep.subr.mxu0 %v11030_v29  ;;  %5251 = vmatprep.subr.mxu1 %v10980_v44  ;;  %11065 = vst [vmem:[#allocation9_spill] sm:$0xff] %v7647_v25 }
 0x191   :  { %1188 = vmatpush1.msra.mxu0 %v11031_v31  ;;  %5252 = vmatpush3.msra.mxu1 %v11032_v32 }
 0x192   :  { %1189 = vmatprep.subr.mxu0 %v11033_v33  ;;  %5253 = vmatprep.subr.mxu1 %v10980_v44 }
 0x193   :  { %1190 = vmatpush1.msra.mxu0 %v11034_v34  ;;  %5254 = vmatpush3.msra.mxu1 %v11035_v35 }
 0x194   :  { %1191 = vmatprep.subr.mxu0 %v11036_v37  ;;  %5255 = vmatprep.subr.mxu1 %v10980_v44  ;;  %v7653_v37 = vld [vmem:[%s10530_s9] ss:$0 sm:$0xff] }
 0x195   :  { %1192 = vmatpush1.msra.mxu0 %v11037_v38  ;;  %5256 = vmatpush3.msra.mxu1 %v11038_v39  ;;  %v11066_v38 = vld [vmem:[#allocation63_spill] sm:$0xff] }
 0x196   :  { %1193 = vmatprep.subr.mxu0 %v11039_v40  ;;  %5257 = vmatprep.subr.mxu1 %v10980_v44  ;;  %v11067_v39 = vsub.s32 2, %v11066_v38  ;;  %v11082_v38 = vld [vmem:[#allocation97_spill] sm:$0xff] }
 0x197   :  { %1194 = vmatpush1.msra.mxu0 %v11040_v41  ;;  %5258 = vmatpush3.msra.mxu1 %v11041_v43 }
 0x198   :  { %1195 = vmatprep.subr.mxu0 %v11042_v47  ;;  %5259 = vmatprep.subr.mxu1 %v10980_v44  ;;  %v7657_v40 = vrot.slane %v236_v20, %v11067_v39  ;;  %v11083_v39 = vld [vmem:[#allocation98_spill] sm:$0xff] }
 0x199   :  { %1196 = vmatpush1.msra.mxu0 %v11043_v48  ;;  %5260 = vmatpush3.msra.mxu1 %v11044_v49 }
 0x19a   :  { %1197 = vmatprep.subr.mxu0 %v11045_v50  ;;  %5261 = vmatprep.subr.mxu1 %v10980_v44 }
 0x19b   :  { %1198 = vmatpush1.msra.mxu0 %v11046_v51  ;;  %5262 = vmatpush3.msra.mxu1 %v11047_v52  ;;  %v11068_v52 = vld [vmem:[#allocation66_spill] sm:$0xff] }
 0x19c   :  { %1199 = vmatprep.subr.mxu0 %v11048_v53  ;;  %5263 = vmatprep.subr.mxu1 %v10980_v44 }
 0x19d   :  { %1200 = vmatpush1.msra.mxu0 %v11049_v54  ;;  %5264 = vmatpush3.msra.mxu1 %v11050_v55 }
 0x19e   :  { %1201 = vmatprep.subr.mxu0 %v11051_v56  ;;  %5265 = vmatprep.subr.mxu1 %v10980_v44 }
 0x19f   :  { %1202 = vmatpush1.msra.mxu0 %v11052_v57  ;;  %5266 = vmatpush3.msra.mxu1 %v11053_v4  ;;  %v11069_v4 = vld [vmem:[#allocation67_spill] sm:$0xff] }
 0x1a0   :  { %1203 = vmatprep.subr.mxu0 %v11054_v5  ;;  %5267 = vmatprep.subr.mxu1 %v10980_v44 }
 0x1a1   :  { %1204 = vmatpush1.msra.mxu0 %v11055_v6  ;;  %5268 = vmatpush3.msra.mxu1 %v11056_v7 }
 0x1a2   :  { %1205 = vmatprep.subr.mxu0 %v11057_v9  ;;  %5269 = vmatprep.subr.mxu1 %v10980_v44 }
 0x1a3   :  { %1206 = vmatpush1.msra.mxu0 %v11058_v10  ;;  %5270 = vmatpush3.msra.mxu1 %v11059_v11 }
 0x1a4   :  { %1207 = vmatprep.subr.mxu0 %v11060_v12  ;;  %5271 = vmatprep.subr.mxu1 %v10980_v44  ;;  %v11070_v12 = vld [vmem:[#allocation65_spill] sm:$0xff] }
 0x1a5   :  { %1208 = vmatpush1.msra.mxu0 %v11061_v14  ;;  %5272 = vmatpush3.msra.mxu1 %v11062_v15  ;;  %v7664_v14 = vrot.slane %v236_v20, %v11070_v12  ;;  %v8076_v12 = vld [vmem:[#allocation2 + $0x138] sm:$0xff] }
 0x1a6   :  { %1241 = vmatprep.mubr.f32.mxu0 %v10980_v44  ;;  %5273 = vmatprep.mubr.msk.f32.mxu1 %vm6630_vm2, %v10980_v44  ;;  %11119 = vst [vmem:[#allocation28_spill] sm:$0xff] %v8076_v12 }
 0x1a7   :  { %1318 = vmatprep.subr.mxu0 %v11063_v16  ;;  %5276 = vmatprep.subr.mxu1 %v10980_v44 }
 0x202   :  { %v841_v17 = vpop.f32.mrf.mxu1  ;;  %v770_v22 = vpop.f32.mrf.mxu0 }
 0x203   :  { %v771_v27 = vadd.f32 %v770_v22, %v7647_v25  ;;  %v842_v48 = vadd.f32 %v841_v17, %v7657_v40  ;;  %v11071_v22 = vld [vmem:[#allocation74_spill] sm:$0xff] }
 0x204   :  { %v5170_v19 = vpop.f32.mrf.mxu1  ;;  %v772_v26 = vpop.f32.mrf.mxu0 }
 0x205   :  { %v773_v19 = vadd.f32 %v772_v26, %v7664_v14  ;;  %v11081_v26 = vld [vmem:[#allocation96_spill] sm:$0xff] }
 0x222   :  { %v911_v28 = vpop.f32.mrf.mxu0 }
 0x223   :  { %v986_v29 = vadd.f32 %v911_v28, %v771_v27 }
 0x224   :  { %v982_v31 = vpop.f32.mrf.mxu1  ;;  %v913_v43 = vpop.f32.mrf.mxu0 }
 0x225   :  { %v4602_v32 = vmul.f32 -1.442695, %v986_v29  ;;  %v1006_v41 = vadd.f32 %v7653_v37, %v982_v31  ;;  %v993_v28 = vadd.f32 %v913_v43, %v773_v19  ;;  %v11085_v43 = vld [vmem:[#allocation100_spill] sm:$0xff]  ;;  %v7803_v19 = vld [vmem:[%s10524_s3 + $0x128] sm:$0xff] }
 0x226   :  { %v5205_v33 = vpop.f32.mrf.mxu1 }
 0x227   :  { %5964 = vpow2.f32 %v4602_v32  ;;  %v4603_v29 = vmul.f32 -1.442695, %v993_v28  ;;  %v7822_v28 = vld [vmem:[%s10524_s3 + $0x110] sm:$0xff] }
 0x234   :  { %v5965_v34 = vpop.eup %5964 }
 0x235   :  { %v990_v35 = vadd.f32 1.0, %v5965_v34 }
 0x237   :  { %5966 = vrcp.f32 %v990_v35 }
 0x244   :  { %v5967_v47 = vpop.eup %5966 }
 0x245   :  { %v1007_v49 = vmul.f32 %v5967_v47, %v1006_v41  ;;  %v1080_v50 = vpop.f32.mrf.mxu0  ;;  %v1151_v51 = vpop.f32.mrf.mxu1  ;;  %v11084_v41 = vld [vmem:[#allocation99_spill] sm:$0xff]  ;;  %v11086_v47 = vld [vmem:[#allocation101_spill] sm:$0xff] }
 0x246   :  { %v1155_v53 = vadd.f32 %v1080_v50, %v11068_v52  ;;  %v1169_v15 = vadd.f32 %v7337_v45, %v1151_v51  ;;  %v11089_v50 = vld [vmem:[#allocation104_spill] sm:$0xff]  ;;  %v11090_v51 = vld [vmem:[#allocation105_spill] sm:$0xff]  ;;  %v11091_v52 = vld [vmem:[#allocation106_spill] sm:$0xff] }
 0x247   :  { %v1008_v54 = vadd.f32 %v1007_v49, %v842_v48  ;;  %v5240_v55 = vpop.f32.mrf.mxu1  ;;  %v1082_v57 = vpop.f32.mrf.mxu0  ;;  %v11087_v48 = vld [vmem:[#allocation102_spill] sm:$0xff]  ;;  %v11088_v49 = vld [vmem:[#allocation103_spill] sm:$0xff] }
 0x248   :  { %v4605_v56 = vmul.f32 -1.442695, %v1155_v53  ;;  %v1162_v5 = vadd.f32 %v1082_v57, %v11069_v4  ;;  %v11092_v53 = vld [vmem:[#allocation107_spill] sm:$0xff]  ;;  %v11094_v55 = vld [vmem:[#allocation109_spill] sm:$0xff]  ;;  %v11095_v57 = vld [vmem:[#allocation110_spill] sm:$0xff] }
 0x249   :  { %v11096_v4 = vld [vmem:[#allocation111_spill] sm:$0xff] }
 0x24a   :  { %5968 = vpow2.f32 %v4605_v56  ;;  %v4606_v6 = vmul.f32 -1.442695, %v1162_v5  ;;  %v11097_v5 = vld [vmem:[#allocation112_spill] sm:$0xff] }
 0x24c   :  { %5970 = vpow2.f32 %v4606_v6 }
 0x257   :  { %v5969_v7 = vpop.eup %5968 }
 0x258   :  { %v1159_v9 = vadd.f32 1.0, %v5969_v7  ;;  %v11098_v7 = vld [vmem:[#allocation113_spill] sm:$0xff] }
 0x259   :  { %v5971_v10 = vpop.eup %5970 }
 0x25a   :  { %5972 = vrcp.f32 %v1159_v9  ;;  %v1166_v11 = vadd.f32 1.0, %v5971_v10  ;;  %v11099_v9 = vld [vmem:[#allocation114_spill] sm:$0xff] }
 0x25c   :  { %5974 = vrcp.f32 %v1166_v11  ;;  %v11100_v11 = vld [vmem:[#allocation115_spill] sm:$0xff] }
 0x267   :  { %v5973_v16 = vpop.eup %5972 }
 0x268   :  { %v1170_v17 = vmul.f32 %v5973_v16, %v1169_v15  ;;  %v7791_v16 = vld [vmem:[%s10524_s3 + $0x138] sm:$0xff] }
 0x269   :  { %v5975_v31 = vpop.eup %5974 }
 0x26a   :  { %v1171_v27 = vadd.f32 %v1170_v17, %v11071_v22  ;;  %v1173_v32 = vsub.f32 1.0, %v5975_v31  ;;  %v1175_v20 = vmul.f32 %v5975_v31, %v7340_v2  ;;  %v7797_v17 = vld [vmem:[%s10524_s3 + $0x148] sm:$0xff]  ;;  %v7810_v22 = vld [vmem:[%s10524_s3 + $0x120] sm:$0xff]  ;;  %v7835_v31 = vld [vmem:[%s10524_s3 + $0x118] sm:$0xff] }
 0x26c   :  { %5976 = vtanh.f32 %v1171_v27  ;;  %v7816_v27 = vld [vmem:[%s10524_s3 + $0x130] sm:$0xff] }
 0x26d   :  { %5978 = vpow2.f32 %v4603_v29  ;;  %v7829_v29 = vld [vmem:[%s10524_s3 + $0x108] sm:$0xff] }
 0x279   :  { %v5977_v33 = vpop.eup %5976 }
 0x27a   :  { %v1174_v34 = vmul.f32 %v5977_v33, %v1173_v32  ;;  %v5979_v45 = vpop.eup %5978  ;;  %v7841_v32 = vld [vmem:[%s10524_s3 + $0xf8] sm:$0xff]  ;;  %v7848_v33 = vld [vmem:[%s10524_s3 + $0xf0] sm:$0xff] }
 0x27b   :  { %v997_v2 = vadd.f32 1.0, %v5979_v45  ;;  %v7867_v45 = vld [vmem:[%s10524_s3 + $0xd8] sm:$0xff] }
 0x27c   :  { %v7670_v35 = vadd.f32 %v1175_v20, %v1174_v34  ;;  %v7854_v34 = vld [vmem:[%s10524_s3 + $0x100] sm:$0xff] }
 0x27d   :  { %5980 = vrcp.f32 %v997_v2  ;;  %v7860_v20 = vld [vmem:[%s10524_s3 + $0xe0] sm:$0xff]  ;;  %v7873_v2 = vld [vmem:[%s10524_s3 + $0xe8] sm:$0xff] }
 0x27e   :  { %1242 = vmatmul.mubr.f32.vlgmr.msra.gmra.mxu0 %v7670_v35  ;;  %5274 = vmatmul.mubr.f32.vlgmr.msra.gmra.mxu1 %v7670_v35  ;;  %5982 = vtanh.f32 %v1008_v54  ;;  %v11093_v54 = vld [vmem:[#allocation108_spill] sm:$0xff] }
 0x27f   :  { %1319 = vmatpush1.msra.mxu0 %v7342_v59  ;;  %5277 = vmatpush3.msra.mxu1 %v7344_v42  ;;  %v11072_v59 = vld [vmem:[#allocation87_spill] sm:$0xff]  ;;  %v11073_v42 = vld [vmem:[#allocation88_spill] sm:$0xff] }
 0x280   :  { %1320 = vmatprep.subr.mxu0 %v7346_v8  ;;  %5278 = vmatprep.subr.mxu1 %v10980_v44  ;;  %v11074_v8 = vld [vmem:[#allocation89_spill] sm:$0xff] }
 0x281   :  { %1321 = vmatpush1.msra.mxu0 %v7350_v24  ;;  %5279 = vmatpush3.msra.mxu1 %v7352_v61  ;;  %v11075_v24 = vld [vmem:[#allocation90_spill] sm:$0xff]  ;;  %v11076_v61 = vld [vmem:[#allocation91_spill] sm:$0xff] }
 0x282   :  { %1322 = vmatprep.subr.mxu0 %v7356_v1  ;;  %5280 = vmatprep.subr.mxu1 %v10980_v44  ;;  %v11077_v1 = vld [vmem:[#allocation92_spill] sm:$0xff] }
 0x283   :  { %1323 = vmatpush1.msra.mxu0 %v7360_v58  ;;  %5281 = vmatpush3.msra.mxu1 %v7362_v18  ;;  %v11078_v58 = vld [vmem:[#allocation93_spill] sm:$0xff]  ;;  %v11079_v18 = vld [vmem:[#allocation94_spill] sm:$0xff] }
 0x284   :  { %1324 = vmatprep.subr.mxu0 %v7366_v30  ;;  %5282 = vmatprep.subr.mxu1 %v10980_v44  ;;  %v11080_v30 = vld [vmem:[#allocation95_spill] sm:$0xff] }
 0x285   :  { %1325 = vmatpush1.msra.mxu0 %v11072_v59  ;;  %5283 = vmatpush3.msra.mxu1 %v11073_v42  ;;  %v7879_v59 = vld [vmem:[%s10524_s3 + $0xc8] sm:$0xff]  ;;  %v7886_v42 = vld [vmem:[%s10524_s3 + $0xc0] sm:$0xff] }
 0x286   :  { %1326 = vmatprep.subr.mxu0 %v11074_v8  ;;  %5284 = vmatprep.subr.mxu1 %v10980_v44  ;;  %v7892_v8 = vld [vmem:[%s10524_s3 + $0xd0] sm:$0xff] }
 0x287   :  { %1327 = vmatpush1.msra.mxu0 %v11075_v24  ;;  %5285 = vmatpush3.msra.mxu1 %v11076_v61  ;;  %v7898_v24 = vld [vmem:[%s10524_s3 + $0xb0] sm:$0xff]  ;;  %v7905_v61 = vld [vmem:[%s10524_s3 + $0xa8] sm:$0xff] }
 0x288   :  { %1328 = vmatprep.subr.mxu0 %v11077_v1  ;;  %5286 = vmatprep.subr.mxu1 %v10980_v44  ;;  %v7911_v1 = vld [vmem:[%s10524_s3 + $0xb8] sm:$0xff] }
 0x289   :  { %1329 = vmatpush1.msra.mxu0 %v11078_v58  ;;  %5287 = vmatpush3.msra.mxu1 %v11079_v18  ;;  %v7917_v58 = vld [vmem:[%s10524_s3 + $0x98] sm:$0xff]  ;;  %v7924_v18 = vld [vmem:[%s10524_s3 + $0x90] sm:$0xff] }
 0x28a   :  { %1330 = vmatprep.subr.mxu0 %v11080_v30  ;;  %5288 = vmatprep.subr.mxu1 %v10980_v44  ;;  %v5981_v56 = vpop.eup %5980  ;;  %v7930_v30 = vld [vmem:[%s10524_s3 + $0xa0] sm:$0xff] }
 0x28b   :  { %1331 = vmatpush1.msra.mxu0 %v11081_v26  ;;  %5289 = vmatpush3.msra.mxu1 %v11082_v38  ;;  %v5983_v6 = vpop.eup %5982  ;;  %v1010_v10 = vsub.f32 1.0, %v5981_v56  ;;  %v7936_v26 = vld [vmem:[%s10524_s3 + $0x80] sm:$0xff]  ;;  %v7943_v38 = vld [vmem:[%s10524_s3 + $0x78] sm:$0xff] }
 0x28c   :  { %1332 = vmatprep.subr.mxu0 %v11083_v39  ;;  %5290 = vmatprep.subr.mxu1 %v10980_v44  ;;  %v7949_v39 = vld [vmem:[%s10524_s3 + $0x88] sm:$0xff] }
 0x28d   :  { %1333 = vmatpush1.msra.mxu0 %v11084_v41  ;;  %5291 = vmatpush3.msra.mxu1 %v11085_v43  ;;  %v1011_v15 = vmul.f32 %v5983_v6, %v1010_v10  ;;  %v7955_v41 = vld [vmem:[%s10524_s3 + $0x68] sm:$0xff]  ;;  %v7962_v43 = vld [vmem:[%s10524_s3 + $0x60] sm:$0xff]  ;;  %v8052_v6 = vld [vmem:[#allocation2 + $0x170] sm:$0xff] }
 0x28e   :  { %1334 = vmatprep.subr.mxu0 %v11086_v47  ;;  %5292 = vmatprep.subr.mxu1 %v10980_v44  ;;  %v7968_v47 = vld [vmem:[%s10524_s3 + $0x70] sm:$0xff]  ;;  %11112 = vst [vmem:[#allocation22_spill] sm:$0xff] %v8052_v6  ;;  %v8062_v10 = vld [vmem:[#allocation2 + $0x158] sm:$0xff] }
 0x28f   :  { %1335 = vmatpush1.msra.mxu0 %v11087_v48  ;;  %5293 = vmatpush3.msra.mxu1 %v11088_v49  ;;  %v7974_v48 = vld [vmem:[%s10524_s3 + $0x50] sm:$0xff]  ;;  %v7981_v49 = vld [vmem:[%s10524_s3 + $0x48] sm:$0xff]  ;;  %11115 = vst [vmem:[#allocation24_spill] sm:$0xff] %v8062_v10 }
 0x290   :  { %1336 = vmatprep.subr.mxu0 %v11089_v50  ;;  %5294 = vmatprep.subr.mxu1 %v10980_v44  ;;  %11101 = vst [vmem:[#allocation12_spill] sm:$0xff] %v7981_v49  ;;  %v7987_v50 = vld [vmem:[%s10524_s3 + $0x58] sm:$0xff] }
 0x291   :  { %1337 = vmatpush1.msra.mxu0 %v11090_v51  ;;  %5295 = vmatpush3.msra.mxu1 %v11091_v52  ;;  %11102 = vst [vmem:[#allocation10_spill] sm:$0xff] %v7987_v50  ;;  %v7993_v51 = vld [vmem:[%s10524_s3 + $0x38] sm:$0xff]  ;;  %v8000_v52 = vld [vmem:[%s10524_s3 + $0x30] sm:$0xff] }
 0x292   :  { %1338 = vmatprep.subr.mxu0 %v11092_v53  ;;  %5296 = vmatprep.subr.mxu1 %v10980_v44  ;;  %11103 = vst [vmem:[#allocation11_spill] sm:$0xff] %v7993_v51  ;;  %11104 = vst [vmem:[#allocation13_spill] sm:$0xff] %v8000_v52  ;;  %v8006_v53 = vld [vmem:[%s10524_s3 + $0x40] sm:$0xff] }
 0x293   :  { %1339 = vmatpush1.msra.mxu0 %v11093_v54  ;;  %5297 = vmatpush3.msra.mxu1 %v11094_v55  ;;  %11105 = vst [vmem:[#allocation14_spill] sm:$0xff] %v8006_v53  ;;  %v8012_v54 = vld [vmem:[%s10524_s3 + $0x20] sm:$0xff]  ;;  %v8019_v55 = vld [vmem:[%s10524_s3 + $0x18] sm:$0xff] }
 0x294   :  { %1340 = vmatprep.subr.mxu0 %v11095_v57  ;;  %5298 = vmatprep.subr.mxu1 %v10980_v44  ;;  %11106 = vst [vmem:[#allocation15_spill] sm:$0xff] %v8012_v54  ;;  %11107 = vst [vmem:[#allocation16_spill] sm:$0xff] %v8019_v55  ;;  %v8031_v57 = vld [vmem:[%s10524_s3 + $0x8] sm:$0xff] }
 0x295   :  { %1341 = vmatpush1.msra.mxu0 %v11096_v4  ;;  %5299 = vmatpush3.msra.mxu1 %v11097_v5  ;;  %11109 = vst [vmem:[#allocation18_spill] sm:$0xff] %v8031_v57  ;;  %v8038_v4 = vld [vmem:[%s10524_s3] sm:$0xff]  ;;  %v8045_v5 = vld [vmem:[%s10524_s3 + $0x10] sm:$0xff] }
 0x296   :  { %1342 = vmatprep.subr.mxu0 %v11098_v7  ;;  %5300 = vmatprep.subr.mxu1 %v10980_v44  ;;  %11110 = vst [vmem:[#allocation19_spill] sm:$0xff] %v8038_v4  ;;  %11111 = vst [vmem:[#allocation20_spill] sm:$0xff] %v8045_v5  ;;  %v8056_v7 = vld [vmem:[#allocation2 + $0x168] sm:$0xff] }
 0x297   :  { %1343 = vmatpush1.msra.mxu0 %v7460_v3  ;;  %5301 = vmatpush3.msra.mxu1 %v11099_v9  ;;  %v1012_v3 = vmul.f32 0.0, %v5981_v56  ;;  %v8025_v56 = vld [vmem:[%s10524_s3 + $0x28] sm:$0xff]  ;;  %11113 = vst [vmem:[#allocation21_spill] sm:$0xff] %v8056_v7  ;;  %v8059_v9 = vld [vmem:[#allocation2 + $0x178] sm:$0xff] }
 0x298   :  { %1344 = vmatprep.subr.mxu0 %v11100_v11  ;;  %5302 = vmatprep.subr.mxu1 %v10980_v44  ;;  %11108 = vst [vmem:[#allocation17_spill] sm:$0xff] %v8025_v56  ;;  %11114 = vst [vmem:[#allocation23_spill] sm:$0xff] %v8059_v9  ;;  %v8066_v11 = vld [vmem:[#allocation2 + $0x150] sm:$0xff] }
 0x299   :  { %1345 = vmatpush1.msra.mxu0 %v7470_v60  ;;  %5303 = vmatpush3.msra.mxu1 %v7472_v62  ;;  %v7736_v60 = vadd.f32 %v1012_v3, %v1011_v15  ;;  %v7772_v62 = vld [vmem:[%s10524_s3 + $0x150] sm:$0xff]  ;;  %11116 = vst [vmem:[#allocation25_spill] sm:$0xff] %v8066_v11  ;;  %v8069_v15 = vld [vmem:[#allocation2 + $0x160] sm:$0xff] }
 0x29a   :  { %1346 = vmatprep.subr.mxu0 %v7476_v0  ;;  %5304 = vmatprep.subr.mxu1 %v10980_v44  ;;  %v7778_v0 = vld [vmem:[%s10524_s3 + $0x160] sm:$0xff]  ;;  %11117 = vst [vmem:[#allocation26_spill] sm:$0xff] %v8069_v15 }
 0x29b   :  { %1347 = vmatpush1.msra.mxu0 %v7480_v46  ;;  %5305 = vmatpush3.msra.mxu1 %v7482_v36  ;;  %v7746_v46 = vld [vmem:[%s10524_s3 + $0x170] sm:$0xff]  ;;  %v7784_v36 = vld [vmem:[%s10524_s3 + $0x140] sm:$0xff] }
 0x29c   :  { %1348 = vmatprep.subr.mxu0 %v7486_v21  ;;  %5306 = vmatprep.subr.mxu1 %v10980_v44  ;;  %v7753_v21 = vld [vmem:[%s10524_s3 + $0x168] sm:$0xff]  ;;  %v8072_v3 = vld [vmem:[#allocation2 + $0x140] sm:$0xff] }
 0x29d   :  { %1349 = vmatpush1.msra.mxu0 %v7490_v13  ;;  %1382 = vmatprep.mubr.f32.mxu0 %v10980_v44  ;;  %v7759_v13 = vld [vmem:[%s10524_s3 + $0x178] sm:$0xff]  ;;  %11118 = vst [vmem:[#allocation27_spill] sm:$0xff] %v8072_v3 }
 0x29e   :  { %5307 = vmatpush3.msra.mxu1 %v7494_v63  ;;  %5308 = vmatprep.mubr.msk.f32.mxu1 %vm6630_vm2, %v10980_v44  ;;  %v7765_v63 = vld [vmem:[%s10524_s3 + $0x158] sm:$0xff] }
 0x29f   :  { %1383 = vmatmul.mubr.f32.vlgmr.msra.gmra.mxu0 %v7736_v60  ;;  %5309 = vmatmul.mubr.f32.vlgmr.msra.gmra.mxu1 %v7736_v60 }
 0x2a0   :  { %1481 = vmatprep.subr.mxu0 %v7746_v46  ;;  %5311 = vmatprep.subr.mxu1 %v10980_v44 }
 0x2a1   :  { %1482 = vmatpush1.msra.mxu0 %v7753_v21  ;;  %5312 = vmatpush3.msra.mxu1 %v7759_v13 }
 0x2a2   :  { %1483 = vmatprep.subr.mxu0 %v7765_v63  ;;  %5313 = vmatprep.subr.mxu1 %v10980_v44 }
 0x2a3   :  { %1484 = vmatpush1.msra.mxu0 %v7772_v62  ;;  %5314 = vmatpush3.msra.mxu1 %v7778_v0 }
 0x2a4   :  { %1485 = vmatprep.subr.mxu0 %v7784_v36  ;;  %5315 = vmatprep.subr.mxu1 %v10980_v44 }
 0x2a5   :  { %1486 = vmatpush1.msra.mxu0 %v7791_v16  ;;  %5316 = vmatpush3.msra.mxu1 %v7797_v17 }
 0x2a6   :  { %1487 = vmatprep.subr.mxu0 %v7803_v19  ;;  %5317 = vmatprep.subr.mxu1 %v10980_v44 }
 0x2a7   :  { %1488 = vmatpush1.msra.mxu0 %v7810_v22  ;;  %5318 = vmatpush3.msra.mxu1 %v7816_v27 }
 0x2a8   :  { %1489 = vmatprep.subr.mxu0 %v7822_v28  ;;  %5319 = vmatprep.subr.mxu1 %v10980_v44 }
 0x2a9   :  { %1490 = vmatpush1.msra.mxu0 %v7829_v29  ;;  %5320 = vmatpush3.msra.mxu1 %v7835_v31 }
 0x2aa   :  { %1491 = vmatprep.subr.mxu0 %v7841_v32  ;;  %5321 = vmatprep.subr.mxu1 %v10980_v44 }
 0x2ab   :  { %1492 = vmatpush1.msra.mxu0 %v7848_v33  ;;  %5322 = vmatpush3.msra.mxu1 %v7854_v34 }
 0x2ac   :  { %1493 = vmatprep.subr.mxu0 %v7860_v20  ;;  %5323 = vmatprep.subr.mxu1 %v10980_v44 }
 0x2ad   :  { %1494 = vmatpush1.msra.mxu0 %v7867_v45  ;;  %5324 = vmatpush3.msra.mxu1 %v7873_v2 }
 0x2ae   :  { %1495 = vmatprep.subr.mxu0 %v7879_v59  ;;  %5325 = vmatprep.subr.mxu1 %v10980_v44 }
 0x2af   :  { %1496 = vmatpush1.msra.mxu0 %v7886_v42  ;;  %5326 = vmatpush3.msra.mxu1 %v7892_v8 }
 0x2b0   :  { %1497 = vmatprep.subr.mxu0 %v7898_v24  ;;  %5327 = vmatprep.subr.mxu1 %v10980_v44 }
 0x2b1   :  { %1498 = vmatpush1.msra.mxu0 %v7905_v61  ;;  %5328 = vmatpush3.msra.mxu1 %v7911_v1 }
 0x2b2   :  { %1499 = vmatprep.subr.mxu0 %v7917_v58  ;;  %5329 = vmatprep.subr.mxu1 %v10980_v44 }
 0x2b3   :  { %1500 = vmatpush1.msra.mxu0 %v7924_v18  ;;  %5330 = vmatpush3.msra.mxu1 %v7930_v30 }
 0x2b4   :  { %1501 = vmatprep.subr.mxu0 %v7936_v26  ;;  %5331 = vmatprep.subr.mxu1 %v10980_v44 }
 0x2b5   :  { %1502 = vmatpush1.msra.mxu0 %v7943_v38  ;;  %5332 = vmatpush3.msra.mxu1 %v7949_v39 }
 0x2b6   :  { %1503 = vmatprep.subr.mxu0 %v7955_v41  ;;  %5333 = vmatprep.subr.mxu1 %v10980_v44 }
 0x2b7   :  { %1504 = vmatpush1.msra.mxu0 %v7962_v43  ;;  %5334 = vmatpush3.msra.mxu1 %v7968_v47 }
 0x2b8   :  { %1505 = vmatprep.subr.mxu0 %v7974_v48  ;;  %5335 = vmatprep.subr.mxu1 %v10980_v44 }
 0x2b9   :  { %1506 = vmatpush1.msra.mxu0 %v7981_v49  ;;  %5336 = vmatpush3.msra.mxu1 %v7987_v50  ;;  %v11161_v50 = vld [vmem:[#allocation68_spill] sm:$0xff] }
 0x2ba   :  { %1507 = vmatprep.subr.mxu0 %v7993_v51  ;;  %5337 = vmatprep.subr.mxu1 %v10980_v44 }
 0x2bb   :  { %1508 = vmatpush1.msra.mxu0 %v8000_v52  ;;  %5338 = vmatpush3.msra.mxu1 %v8006_v53 }
 0x2bc   :  { %1509 = vmatprep.subr.mxu0 %v8012_v54  ;;  %5339 = vmatprep.subr.mxu1 %v10980_v44 }
 0x2bd   :  { %1510 = vmatpush1.msra.mxu0 %v8019_v55  ;;  %5340 = vmatpush3.msra.mxu1 %v8025_v56 }
 0x2be   :  { %1511 = vmatprep.subr.mxu0 %v8031_v57  ;;  %5341 = vmatprep.subr.mxu1 %v10980_v44 }
 0x2bf   :  { %1512 = vmatpush1.msra.mxu0 %v8038_v4  ;;  %1545 = vmatprep.mubr.f32.mxu0 %v10980_v44 }
 0x2c0   :  { %5342 = vmatpush3.msra.mxu1 %v8045_v5  ;;  %5343 = vmatprep.mubr.msk.f32.mxu1 %vm6630_vm2, %v10980_v44 }
 0x2c1   :  { %1546 = vmatmul.mubr.f32.vlgmr.msra.gmra.mxu0 %v7670_v35  ;;  %5344 = vmatmul.mubr.f32.vlgmr.msra.gmra.mxu1 %v7670_v35 }
 0x2c2   :  { %1644 = vmatprep.subr.mxu0 %v8052_v6  ;;  %5346 = vmatprep.subr.mxu1 %v10980_v44 }
 0x2c3   :  { %1645 = vmatpush1.msra.mxu0 %v8056_v7  ;;  %5347 = vmatpush3.msra.mxu1 %v8059_v9 }
 0x2c4   :  { %1646 = vmatprep.subr.mxu0 %v8062_v10  ;;  %5348 = vmatprep.subr.mxu1 %v10980_v44  ;;  %v8082_v10 = vld [vmem:[#allocation2 + $0x128] sm:$0xff] }
 0x2c5   :  { %1647 = vmatpush1.msra.mxu0 %v8066_v11  ;;  %5349 = vmatpush3.msra.mxu1 %v8069_v15  ;;  %11121 = vst [vmem:[#allocation30_spill] sm:$0xff] %v8082_v10  ;;  %v8086_v15 = vld [vmem:[#allocation2 + $0x120] sm:$0xff]  ;;  %v8092_v11 = vld [vmem:[#allocation2 + $0x110] sm:$0xff] }
 0x2c6   :  { %1648 = vmatprep.subr.mxu0 %v8072_v3  ;;  %5350 = vmatprep.subr.mxu1 %v10980_v44  ;;  %11122 = vst [vmem:[#allocation31_spill] sm:$0xff] %v8086_v15  ;;  %v8089_v3 = vld [vmem:[#allocation2 + $0x130] sm:$0xff]  ;;  %11124 = vst [vmem:[#allocation33_spill] sm:$0xff] %v8092_v11 }
 0x2c7   :  { %1649 = vmatpush1.msra.mxu0 %v8076_v12  ;;  %5351 = vmatpush3.msra.mxu1 %v8079_v23  ;;  %11123 = vst [vmem:[#allocation32_spill] sm:$0xff] %v8089_v3  ;;  %v8096_v23 = vld [vmem:[#allocation2 + $0x108] sm:$0xff]  ;;  %v8102_v12 = vld [vmem:[#allocation2 + $0xf8] sm:$0xff] }
 0x2c8   :  { %1650 = vmatprep.subr.mxu0 %v8082_v10  ;;  %5352 = vmatprep.subr.mxu1 %v10980_v44  ;;  %11125 = vst [vmem:[#allocation34_spill] sm:$0xff] %v8096_v23  ;;  %v8099_v10 = vld [vmem:[#allocation2 + $0x118] sm:$0xff]  ;;  %11127 = vst [vmem:[#allocation36_spill] sm:$0xff] %v8102_v12 }
 0x2c9   :  { %1651 = vmatpush1.msra.mxu0 %v8086_v15  ;;  %5353 = vmatpush3.msra.mxu1 %v8089_v3  ;;  %11126 = vst [vmem:[#allocation35_spill] sm:$0xff] %v8099_v10  ;;  %v8106_v3 = vld [vmem:[#allocation2 + $0xf0] sm:$0xff]  ;;  %v8112_v15 = vld [vmem:[#allocation2 + $0xe0] sm:$0xff] }
 0x2ca   :  { %1652 = vmatprep.subr.mxu0 %v8092_v11  ;;  %5354 = vmatprep.subr.mxu1 %v10980_v44  ;;  %11128 = vst [vmem:[#allocation37_spill] sm:$0xff] %v8106_v3  ;;  %v8109_v11 = vld [vmem:[#allocation2 + $0x100] sm:$0xff]  ;;  %11130 = vst [vmem:[#allocation39_spill] sm:$0xff] %v8112_v15 }
 0x2cb   :  { %1653 = vmatpush1.msra.mxu0 %v8096_v23  ;;  %5355 = vmatpush3.msra.mxu1 %v8099_v10  ;;  %11129 = vst [vmem:[#allocation38_spill] sm:$0xff] %v8109_v11  ;;  %v8116_v10 = vld [vmem:[#allocation2 + $0xd8] sm:$0xff]  ;;  %v8122_v23 = vld [vmem:[#allocation2 + $0xc8] sm:$0xff] }
 0x2cc   :  { %1654 = vmatprep.subr.mxu0 %v8102_v12  ;;  %5356 = vmatprep.subr.mxu1 %v10980_v44  ;;  %11131 = vst [vmem:[#allocation40_spill] sm:$0xff] %v8116_v10  ;;  %v8119_v12 = vld [vmem:[#allocation2 + $0xe8] sm:$0xff]  ;;  %11133 = vst [vmem:[#allocation42_spill] sm:$0xff] %v8122_v23 }
 0x2cd   :  { %1655 = vmatpush1.msra.mxu0 %v8106_v3  ;;  %5357 = vmatpush3.msra.mxu1 %v8109_v11  ;;  %11132 = vst [vmem:[#allocation41_spill] sm:$0xff] %v8119_v12  ;;  %v8126_v11 = vld [vmem:[#allocation2 + $0xc0] sm:$0xff]  ;;  %v8132_v3 = vld [vmem:[#allocation2 + $0xb0] sm:$0xff] }
 0x2ce   :  { %1656 = vmatprep.subr.mxu0 %v8112_v15  ;;  %5358 = vmatprep.subr.mxu1 %v10980_v44  ;;  %11134 = vst [vmem:[#allocation43_spill] sm:$0xff] %v8126_v11  ;;  %v8129_v15 = vld [vmem:[#allocation2 + $0xd0] sm:$0xff]  ;;  %11136 = vst [vmem:[#allocation45_spill] sm:$0xff] %v8132_v3 }
 0x2cf   :  { %1657 = vmatpush1.msra.mxu0 %v8116_v10  ;;  %5359 = vmatpush3.msra.mxu1 %v8119_v12  ;;  %11135 = vst [vmem:[#allocation44_spill] sm:$0xff] %v8129_v15  ;;  %v8136_v12 = vld [vmem:[#allocation2 + $0xa8] sm:$0xff]  ;;  %v8142_v10 = vld [vmem:[#allocation2 + $0x98] sm:$0xff] }
 0x2d0   :  { %1658 = vmatprep.subr.mxu0 %v8122_v23  ;;  %5360 = vmatprep.subr.mxu1 %v10980_v44  ;;  %11137 = vst [vmem:[#allocation46_spill] sm:$0xff] %v8136_v12  ;;  %v8139_v23 = vld [vmem:[#allocation2 + $0xb8] sm:$0xff]  ;;  %11139 = vst [vmem:[#allocation48_spill] sm:$0xff] %v8142_v10 }
 0x2d1   :  { %1659 = vmatpush1.msra.mxu0 %v8126_v11  ;;  %5361 = vmatpush3.msra.mxu1 %v8129_v15  ;;  %11138 = vst [vmem:[#allocation47_spill] sm:$0xff] %v8139_v23  ;;  %v8146_v15 = vld [vmem:[#allocation2 + $0x90] sm:$0xff]  ;;  %v8152_v11 = vld [vmem:[#allocation2 + $0x80] sm:$0xff] }
 0x2d2   :  { %1660 = vmatprep.subr.mxu0 %v8132_v3  ;;  %5362 = vmatprep.subr.mxu1 %v10980_v44  ;;  %11140 = vst [vmem:[#allocation49_spill] sm:$0xff] %v8146_v15  ;;  %v8149_v3 = vld [vmem:[#allocation2 + $0xa0] sm:$0xff]  ;;  %11142 = vst [vmem:[#allocation51_spill] sm:$0xff] %v8152_v11 }
 0x2d3   :  { %1661 = vmatpush1.msra.mxu0 %v8136_v12  ;;  %5363 = vmatpush3.msra.mxu1 %v8139_v23  ;;  %11141 = vst [vmem:[#allocation50_spill] sm:$0xff] %v8149_v3  ;;  %v8156_v23 = vld [vmem:[#allocation2 + $0x78] sm:$0xff]  ;;  %v8162_v12 = vld [vmem:[#allocation2 + $0x68] sm:$0xff] }
 0x2d4   :  { %1662 = vmatprep.subr.mxu0 %v8142_v10  ;;  %5364 = vmatprep.subr.mxu1 %v10980_v44  ;;  %11143 = vst [vmem:[#allocation52_spill] sm:$0xff] %v8156_v23  ;;  %v8159_v10 = vld [vmem:[#allocation2 + $0x88] sm:$0xff]  ;;  %11145 = vst [vmem:[#allocation54_spill] sm:$0xff] %v8162_v12 }
 0x2d5   :  { %1663 = vmatpush1.msra.mxu0 %v8146_v15  ;;  %5365 = vmatpush3.msra.mxu1 %v8149_v3  ;;  %11144 = vst [vmem:[#allocation53_spill] sm:$0xff] %v8159_v10  ;;  %v8166_v3 = vld [vmem:[#allocation2 + $0x60] sm:$0xff]  ;;  %v8172_v15 = vld [vmem:[#allocation2 + $0x50] sm:$0xff] }
 0x2d6   :  { %1664 = vmatprep.subr.mxu0 %v8152_v11  ;;  %5366 = vmatprep.subr.mxu1 %v10980_v44  ;;  %11146 = vst [vmem:[#allocation55_spill] sm:$0xff] %v8166_v3  ;;  %v8169_v11 = vld [vmem:[#allocation2 + $0x70] sm:$0xff]  ;;  %11148 = vst [vmem:[#allocation57_spill] sm:$0xff] %v8172_v15 }
 0x2d7   :  { %1665 = vmatpush1.msra.mxu0 %v8156_v23  ;;  %5367 = vmatpush3.msra.mxu1 %v8159_v10  ;;  %11147 = vst [vmem:[#allocation56_spill] sm:$0xff] %v8169_v11  ;;  %v8176_v10 = vld [vmem:[#allocation2 + $0x48] sm:$0xff]  ;;  %v8182_v23 = vld [vmem:[#allocation2 + $0x38] sm:$0xff] }
 0x2d8   :  { %1666 = vmatprep.subr.mxu0 %v8162_v12  ;;  %5368 = vmatprep.subr.mxu1 %v10980_v44  ;;  %11149 = vst [vmem:[#allocation58_spill] sm:$0xff] %v8176_v10  ;;  %v8179_v12 = vld [vmem:[#allocation2 + $0x58] sm:$0xff]  ;;  %11151 = vst [vmem:[#allocation60_spill] sm:$0xff] %v8182_v23 }
 0x2d9   :  { %1667 = vmatpush1.msra.mxu0 %v8166_v3  ;;  %5369 = vmatpush3.msra.mxu1 %v8169_v11  ;;  %11150 = vst [vmem:[#allocation59_spill] sm:$0xff] %v8179_v12  ;;  %v8186_v11 = vld [vmem:[#allocation2 + $0x30] sm:$0xff]  ;;  %v8192_v3 = vld [vmem:[#allocation2 + $0x20] sm:$0xff] }
 0x2da   :  { %1668 = vmatprep.subr.mxu0 %v8172_v15  ;;  %5370 = vmatprep.subr.mxu1 %v10980_v44  ;;  %11152 = vst [vmem:[#allocation61_spill] sm:$0xff] %v8186_v11  ;;  %v8189_v15 = vld [vmem:[#allocation2 + $0x40] sm:$0xff]  ;;  %11154 = vst [vmem:[#allocation63_spill] sm:$0xff] %v8192_v3 }
 0x2db   :  { %1669 = vmatpush1.msra.mxu0 %v8176_v10  ;;  %5371 = vmatpush3.msra.mxu1 %v8179_v12  ;;  %11153 = vst [vmem:[#allocation62_spill] sm:$0xff] %v8189_v15  ;;  %v8196_v12 = vld [vmem:[#allocation2 + $0x18] sm:$0xff]  ;;  %v8202_v10 = vld [vmem:[#allocation2 + $0x8] sm:$0xff] }
 0x2dc   :  { %1670 = vmatprep.subr.mxu0 %v8182_v23  ;;  %5372 = vmatprep.subr.mxu1 %v10980_v44  ;;  %11155 = vst [vmem:[#allocation66_spill] sm:$0xff] %v8196_v12  ;;  %v8199_v23 = vld [vmem:[#allocation2 + $0x28] sm:$0xff]  ;;  %11157 = vst [vmem:[#allocation74_spill] sm:$0xff] %v8202_v10 }
 0x2dd   :  { %1671 = vmatpush1.msra.mxu0 %v8186_v11  ;;  %5373 = vmatpush3.msra.mxu1 %v8189_v15  ;;  %11156 = vst [vmem:[#allocation67_spill] sm:$0xff] %v8199_v23  ;;  %v8206_v15 = vld [vmem:[#allocation2] sm:$0xff] }
 0x2de   :  { %1672 = vmatprep.subr.mxu0 %v8192_v3  ;;  %5374 = vmatprep.subr.mxu1 %v10980_v44  ;;  %11158 = vst [vmem:[#allocation87_spill] sm:$0xff] %v8206_v15  ;;  %v8209_v3 = vld [vmem:[#allocation2 + $0x10] sm:$0xff] }
 0x2df   :  { %1673 = vmatpush1.msra.mxu0 %v8196_v12  ;;  %5375 = vmatpush3.msra.mxu1 %v8199_v23  ;;  %11159 = vst [vmem:[#allocation88_spill] sm:$0xff] %v8209_v3  ;;  %v8215_v23 = vld [vmem:[#allocation4 + $0x170] sm:$0xff] }
 0x2e0   :  { %1674 = vmatprep.subr.mxu0 %v8202_v10  ;;  %5376 = vmatprep.subr.mxu1 %v10980_v44  ;;  %11160 = vst [vmem:[#allocation89_spill] sm:$0xff] %v8215_v23 }
 0x2e1   :  { %1675 = vmatpush1.msra.mxu0 %v8206_v15  ;;  %5377 = vmatpush3.msra.mxu1 %v8209_v3 }
 0x2e2   :  { %1708 = vmatprep.mubr.f32.mxu0 %v10980_v44  ;;  %5378 = vmatprep.mubr.msk.f32.mxu1 %vm6630_vm2, %v10980_v44 }
 0x2e3   :  { %1785 = vmatprep.subr.mxu0 %v8215_v23  ;;  %5381 = vmatprep.subr.mxu1 %v10980_v44 }
 0x33e   :  { %v1314_v10 = vpop.f32.mrf.mxu1  ;;  %v1243_v11 = vpop.f32.mrf.mxu0 }
 0x33f   :  { %v1244_v15 = vadd.f32 %v1243_v11, %v7647_v25 }
 0x340   :  { %v5275_v12 = vpop.f32.mrf.mxu1  ;;  %v1245_v9 = vpop.f32.mrf.mxu0 }
 0x341   :  { %v1315_v12 = vadd.f32 %v1314_v10, %v7657_v40 }
 0x35f   :  { %v1384_v7 = vpop.f32.mrf.mxu0  ;;  %v1455_v6 = vpop.f32.mrf.mxu1 }
 0x360   :  { %v1459_v3 = vadd.f32 %v1384_v7, %v1244_v15  ;;  %v1473_v23 = vadd.f32 %v7653_v37, %v1455_v6 }
 0x361   :  { %v5310_v5 = vpop.f32.mrf.mxu1  ;;  %v1386_v55 = vpop.f32.mrf.mxu0 }
 0x362   :  { %v4607_v4 = vmul.f32 -1.442695, %v1459_v3 }
 0x364   :  { %5984 = vpow2.f32 %v4607_v4  ;;  %v11162_v4 = vld [vmem:[#allocation69_spill] sm:$0xff] }
 0x371   :  { %v5985_v57 = vpop.eup %5984 }
 0x372   :  { %v1463_v56 = vadd.f32 1.0, %v5985_v57 }
 0x374   :  { %5986 = vrcp.f32 %v1463_v56 }
 0x381   :  { %v5987_v54 = vpop.eup %5986  ;;  %v1547_v53 = vpop.f32.mrf.mxu0 }
 0x382   :  { %v1618_v52 = vpop.f32.mrf.mxu1  ;;  %v1474_v51 = vmul.f32 %v5987_v54, %v1473_v23  ;;  %v1622_v11 = vadd.f32 %v1547_v53, %v11161_v50  ;;  %v8229_v23 = vld [vmem:[%s10526_s5] ss:$0 sm:$0xff]  ;;  %v1246_v53 = vadd.f32 %v1245_v9, %v7664_v14  ;;  %v11163_v54 = vld [vmem:[#allocation82_spill] sm:$0xff] }
 0x383   :  { %v1549_v7 = vpop.f32.mrf.mxu0 }
 0x384   :  { %v5345_v25 = vpop.f32.mrf.mxu1  ;;  %v8223_v49 = vadd.f32 %v1474_v51, %v1315_v12  ;;  %v4609_v5 = vmul.f32 -1.442695, %v1622_v11  ;;  %v1629_v57 = vadd.f32 %v1549_v7, %v11162_v4  ;;  %v1466_v12 = vadd.f32 %v1386_v55, %v1246_v53  ;;  %v8242_v55 = vld [vmem:[#allocation4 + $0x178] sm:$0xff]  ;;  %v8265_v53 = vld [vmem:[#allocation4 + $0x128] sm:$0xff] }
 0x385   :  { %v1636_v25 = vadd.f32 %v8229_v23, %v1618_v52  ;;  %v8239_v52 = vld [vmem:[#allocation4 + $0x168] sm:$0xff] }
 0x386   :  { %5988 = vpow2.f32 %v4609_v5  ;;  %v4610_v56 = vmul.f32 -1.442695, %v1629_v57  ;;  %v4608_v11 = vmul.f32 -1.442695, %v1466_v12  ;;  %v8275_v12 = vld [vmem:[#allocation4 + $0x110] sm:$0xff] }
 0x387   :  { %11164 = vst [vmem:[#allocation90_spill] sm:$0xff] %v8275_v12 }
 0x388   :  { %5990 = vpow2.f32 %v4610_v56 }
 0x393   :  { %v5989_v15 = vpop.eup %5988 }
 0x394   :  { %v1626_v37 = vadd.f32 1.0, %v5989_v15 }
 0x395   :  { %v5991_v6 = vpop.eup %5990 }
 0x396   :  { %5992 = vrcp.f32 %v1626_v37  ;;  %v1633_v3 = vadd.f32 1.0, %v5991_v6  ;;  %v8245_v37 = vld [vmem:[#allocation4 + $0x158] sm:$0xff]  ;;  %v8252_v6 = vld [vmem:[#allocation4 + $0x160] sm:$0xff] }
 0x398   :  { %5994 = vrcp.f32 %v1633_v3  ;;  %v8255_v3 = vld [vmem:[#allocation4 + $0x140] sm:$0xff] }
 0x3a3   :  { %v5993_v50 = vpop.eup %5992 }
 0x3a4   :  { %v1637_v51 = vmul.f32 %v5993_v50, %v1636_v25  ;;  %v8259_v50 = vld [vmem:[#allocation4 + $0x138] sm:$0xff] }
 0x3a5   :  { %v5995_v5 = vpop.eup %5994 }
 0x3a6   :  { %v1638_v10 = vadd.f32 %v1637_v51, %v11163_v54  ;;  %v1640_v7 = vsub.f32 1.0, %v5995_v5  ;;  %v1642_v56 = vmul.f32 %v5995_v5, %v7670_v35  ;;  %v8249_v35 = vld [vmem:[#allocation4 + $0x150] sm:$0xff]  ;;  %v8262_v51 = vld [vmem:[#allocation4 + $0x148] sm:$0xff]  ;;  %v8269_v54 = vld [vmem:[#allocation4 + $0x120] sm:$0xff] }
 0x3a7   :  { %v8282_v5 = vld [vmem:[#allocation4 + $0x118] sm:$0xff] }
 0x3a8   :  { %5996 = vtanh.f32 %v1638_v10  ;;  %v8272_v10 = vld [vmem:[#allocation4 + $0x130] sm:$0xff]  ;;  %11166 = vst [vmem:[#allocation92_spill] sm:$0xff] %v8282_v5 }
 0x3a9   :  { %5998 = vpow2.f32 %v4608_v11  ;;  %v8279_v11 = vld [vmem:[#allocation4 + $0x108] sm:$0xff] }
 0x3aa   :  { %11165 = vst [vmem:[#allocation91_spill] sm:$0xff] %v8279_v11 }
 0x3b5   :  { %v5997_v4 = vpop.eup %5996 }
 0x3b6   :  { %v1641_v57 = vmul.f32 %v5997_v4, %v1640_v7  ;;  %v5999_v9 = vpop.eup %5998  ;;  %v8285_v7 = vld [vmem:[#allocation4 + $0xf8] sm:$0xff]  ;;  %v8290_v4 = vld [vmem:[#allocation4 + $0xf0] sm:$0xff] }
 0x3b7   :  { %v1470_v25 = vadd.f32 1.0, %v5999_v9  ;;  %11167 = vst [vmem:[#allocation93_spill] sm:$0xff] %v8285_v7  ;;  %11168 = vst [vmem:[#allocation94_spill] sm:$0xff] %v8290_v4  ;;  %v8300_v9 = vld [vmem:[#allocation4 + $0xd8] sm:$0xff] }
 0x3b8   :  { %v8235_v15 = vadd.f32 %v1642_v56, %v1641_v57  ;;  %v8293_v57 = vld [vmem:[#allocation4 + $0x100] sm:$0xff]  ;;  %11171 = vst [vmem:[#allocation97_spill] sm:$0xff] %v8300_v9 }
 0x3b9   :  { %6000 = vrcp.f32 %v1470_v25  ;;  %11169 = vst [vmem:[#allocation95_spill] sm:$0xff] %v8293_v57  ;;  %v8296_v56 = vld [vmem:[#allocation4 + $0xe0] sm:$0xff]  ;;  %v8303_v25 = vld [vmem:[#allocation4 + $0xe8] sm:$0xff] }
 0x3ba   :  { %1709 = vmatmul.mubr.f32.vlgmr.msra.gmra.mxu0 %v8235_v15  ;;  %5379 = vmatmul.mubr.f32.vlgmr.msra.gmra.mxu1 %v8235_v15  ;;  %6002 = vtanh.f32 %v8223_v49  ;;  %11170 = vst [vmem:[#allocation96_spill] sm:$0xff] %v8296_v56  ;;  %11172 = vst [vmem:[#allocation98_spill] sm:$0xff] %v8303_v25  ;;  %v8306_v49 = vld [vmem:[#allocation4 + $0xc8] sm:$0xff] }
 0x3bb   :  { %1786 = vmatpush1.msra.mxu0 %v8239_v52  ;;  %5382 = vmatpush3.msra.mxu1 %v8242_v55  ;;  %11173 = vst [vmem:[#allocation99_spill] sm:$0xff] %v8306_v49 }
 0x3bc   :  { %1787 = vmatprep.subr.mxu0 %v8245_v37  ;;  %5383 = vmatprep.subr.mxu1 %v10980_v44 }
 0x3bd   :  { %1788 = vmatpush1.msra.mxu0 %v8249_v35  ;;  %5384 = vmatpush3.msra.mxu1 %v8252_v6 }
 0x3be   :  { %1789 = vmatprep.subr.mxu0 %v8255_v3  ;;  %5385 = vmatprep.subr.mxu1 %v10980_v44 }
 0x3bf   :  { %1790 = vmatpush1.msra.mxu0 %v8259_v50  ;;  %5386 = vmatpush3.msra.mxu1 %v8262_v51 }
 0x3c0   :  { %1791 = vmatprep.subr.mxu0 %v8265_v53  ;;  %5387 = vmatprep.subr.mxu1 %v10980_v44 }
 0x3c1   :  { %1792 = vmatpush1.msra.mxu0 %v8269_v54  ;;  %5388 = vmatpush3.msra.mxu1 %v8272_v10 }
 0x3c2   :  { %1793 = vmatprep.subr.mxu0 %v8275_v12  ;;  %5389 = vmatprep.subr.mxu1 %v10980_v44  ;;  %v8387_v12 = vld [vmem:[#allocation4 + $0x8] sm:$0xff] }
 0x3c3   :  { %1794 = vmatpush1.msra.mxu0 %v8279_v11  ;;  %5390 = vmatpush3.msra.mxu1 %v8282_v5  ;;  %v8366_v5 = vld [vmem:[#allocation4 + $0x38] sm:$0xff]  ;;  %v8376_v11 = vld [vmem:[#allocation4 + $0x20] sm:$0xff] }
 0x3c4   :  { %1795 = vmatprep.subr.mxu0 %v8285_v7  ;;  %5391 = vmatprep.subr.mxu1 %v10980_v44  ;;  %v8356_v7 = vld [vmem:[#allocation4 + $0x50] sm:$0xff]  ;;  %11191 = vst [vmem:[#allocation69_spill] sm:$0xff] %v8366_v5 }
 0x3c5   :  { %1796 = vmatpush1.msra.mxu0 %v8290_v4  ;;  %5392 = vmatpush3.msra.mxu1 %v8293_v57  ;;  %v8310_v57 = vld [vmem:[#allocation4 + $0xc0] sm:$0xff]  ;;  %v8316_v4 = vld [vmem:[#allocation4 + $0xb0] sm:$0xff]  ;;  %11188 = vst [vmem:[#allocation114_spill] sm:$0xff] %v8356_v7 }
 0x3c6   :  { %1797 = vmatprep.subr.mxu0 %v8296_v56  ;;  %5393 = vmatprep.subr.mxu1 %v10980_v44  ;;  %11174 = vst [vmem:[#allocation100_spill] sm:$0xff] %v8310_v57  ;;  %v8313_v56 = vld [vmem:[#allocation4 + $0xd0] sm:$0xff]  ;;  %11176 = vst [vmem:[#allocation102_spill] sm:$0xff] %v8316_v4 }
 0x3c7   :  { %1798 = vmatpush1.msra.mxu0 %v8300_v9  ;;  %5394 = vmatpush3.msra.mxu1 %v8303_v25  ;;  %11175 = vst [vmem:[#allocation101_spill] sm:$0xff] %v8313_v56  ;;  %v8320_v25 = vld [vmem:[#allocation4 + $0xa8] sm:$0xff]  ;;  %v8326_v9 = vld [vmem:[#allocation4 + $0x98] sm:$0xff] }
 0x3c8   :  { %1799 = vmatprep.subr.mxu0 %v8306_v49  ;;  %5395 = vmatprep.subr.mxu1 %v10980_v44  ;;  %11177 = vst [vmem:[#allocation103_spill] sm:$0xff] %v8320_v25  ;;  %v8323_v49 = vld [vmem:[#allocation4 + $0xb8] sm:$0xff]  ;;  %11179 = vst [vmem:[#allocation105_spill] sm:$0xff] %v8326_v9 }
 0x3c9   :  { %1800 = vmatpush1.msra.mxu0 %v8310_v57  ;;  %5396 = vmatpush3.msra.mxu1 %v8313_v56  ;;  %11178 = vst [vmem:[#allocation104_spill] sm:$0xff] %v8323_v49  ;;  %v8330_v56 = vld [vmem:[#allocation4 + $0x90] sm:$0xff]  ;;  %v8336_v57 = vld [vmem:[#allocation4 + $0x80] sm:$0xff] }
 0x3ca   :  { %1801 = vmatprep.subr.mxu0 %v8316_v4  ;;  %5397 = vmatprep.subr.mxu1 %v10980_v44  ;;  %11180 = vst [vmem:[#allocation106_spill] sm:$0xff] %v8330_v56  ;;  %v8333_v4 = vld [vmem:[#allocation4 + $0xa0] sm:$0xff]  ;;  %11182 = vst [vmem:[#allocation108_spill] sm:$0xff] %v8336_v57 }
 0x3cb   :  { %1802 = vmatpush1.msra.mxu0 %v8320_v25  ;;  %5398 = vmatpush3.msra.mxu1 %v8323_v49  ;;  %11181 = vst [vmem:[#allocation107_spill] sm:$0xff] %v8333_v4  ;;  %v8340_v49 = vld [vmem:[#allocation4 + $0x78] sm:$0xff]  ;;  %v6001_v25 = vpop.eup %6000 }
 0x3cc   :  { %1803 = vmatprep.subr.mxu0 %v8326_v9  ;;  %5399 = vmatprep.subr.mxu1 %v10980_v44  ;;  %11183 = vst [vmem:[#allocation109_spill] sm:$0xff] %v8340_v49  ;;  %v8343_v9 = vld [vmem:[#allocation4 + $0x88] sm:$0xff] }
 0x3cd   :  { %1804 = vmatpush1.msra.mxu0 %v8330_v56  ;;  %5400 = vmatpush3.msra.mxu1 %v8333_v4  ;;  %11184 = vst [vmem:[#allocation110_spill] sm:$0xff] %v8343_v9  ;;  %v8346_v56 = vld [vmem:[#allocation4 + $0x68] sm:$0xff]  ;;  %v8350_v4 = vld [vmem:[#allocation4 + $0x60] sm:$0xff] }
 0x3ce   :  { %1805 = vmatprep.subr.mxu0 %v8336_v57  ;;  %5401 = vmatprep.subr.mxu1 %v10980_v44  ;;  %11185 = vst [vmem:[#allocation111_spill] sm:$0xff] %v8346_v56  ;;  %11186 = vst [vmem:[#allocation112_spill] sm:$0xff] %v8350_v4  ;;  %v8353_v57 = vld [vmem:[#allocation4 + $0x70] sm:$0xff] }
 0x3cf   :  { %1806 = vmatpush1.msra.mxu0 %v8340_v49  ;;  %5402 = vmatpush3.msra.mxu1 %v8343_v9  ;;  %11187 = vst [vmem:[#allocation113_spill] sm:$0xff] %v8353_v57  ;;  %v6003_v49 = vpop.eup %6002  ;;  %v8360_v9 = vld [vmem:[#allocation4 + $0x48] sm:$0xff] }
 0x3d0   :  { %1807 = vmatprep.subr.mxu0 %v8346_v56  ;;  %5403 = vmatprep.subr.mxu1 %v10980_v44  ;;  %11189 = vst [vmem:[#allocation115_spill] sm:$0xff] %v8360_v9  ;;  %v8363_v56 = vld [vmem:[#allocation4 + $0x58] sm:$0xff] }
 0x3d1   :  { %1808 = vmatpush1.msra.mxu0 %v8350_v4  ;;  %5404 = vmatpush3.msra.mxu1 %v8353_v57  ;;  %11190 = vst [vmem:[#allocation68_spill] sm:$0xff] %v8363_v56  ;;  %v1477_v4 = vsub.f32 1.0, %v6001_v25  ;;  %v8370_v57 = vld [vmem:[#allocation4 + $0x30] sm:$0xff] }
 0x3d2   :  { %1809 = vmatprep.subr.mxu0 %v8356_v7  ;;  %5405 = vmatprep.subr.mxu1 %v10980_v44  ;;  %11192 = vst [vmem:[#allocation82_spill] sm:$0xff] %v8370_v57  ;;  %v8373_v7 = vld [vmem:[#allocation4 + $0x40] sm:$0xff] }
 0x3d3   :  { %1810 = vmatpush1.msra.mxu0 %v8360_v9  ;;  %5406 = vmatpush3.msra.mxu1 %v8363_v56  ;;  %v1478_v9 = vmul.f32 %v6003_v49, %v1477_v4  ;;  %v8380_v56 = vld [vmem:[#allocation4 + $0x18] sm:$0xff]  ;;  %v8391_v4 = vld [vmem:[#allocation4] sm:$0xff] }
 0x3d4   :  { %1811 = vmatprep.subr.mxu0 %v8366_v5  ;;  %5407 = vmatprep.subr.mxu1 %v10980_v44  ;;  %11193 = vst [vmem:[#allocation116_spill] sm:$0xff] %v8380_v56  ;;  %v8383_v5 = vld [vmem:[#allocation4 + $0x28] sm:$0xff] }
 0x3d5   :  { %1812 = vmatpush1.msra.mxu0 %v8370_v57  ;;  %5408 = vmatpush3.msra.mxu1 %v8373_v7  ;;  %v1479_v57 = vmul.f32 %v6001_v25, %v7736_v60  ;;  %v11194_v60 = vld [vmem:[#allocation12_spill] sm:$0xff]  ;;  %v11234_v25 = vld [vmem:[#allocation50_spill] sm:$0xff] }
 0x3d6   :  { %1813 = vmatprep.subr.mxu0 %v8376_v11  ;;  %5409 = vmatprep.subr.mxu1 %v10980_v44 }
 0x3d7   :  { %1814 = vmatpush1.msra.mxu0 %v8380_v56  ;;  %5410 = vmatpush3.msra.mxu1 %v8383_v5  ;;  %v8395_v49 = vadd.f32 %v1479_v57, %v1478_v9  ;;  %v8397_v56 = vld [vmem:[#allocation4 + $0x10] sm:$0xff]  ;;  %v11232_v57 = vld [vmem:[#allocation48_spill] sm:$0xff]  ;;  %v11233_v9 = vld [vmem:[#allocation49_spill] sm:$0xff] }
 0x3d8   :  { %1815 = vmatprep.subr.mxu0 %v8387_v12  ;;  %5411 = vmatprep.subr.mxu1 %v10980_v44 }
 0x3d9   :  { %1816 = vmatpush1.msra.mxu0 %v8391_v4  ;;  %1849 = vmatprep.mubr.f32.mxu0 %v10980_v44 }
 0x3da   :  { %5412 = vmatpush3.msra.mxu1 %v8397_v56  ;;  %5413 = vmatprep.mubr.msk.f32.mxu1 %vm6630_vm2, %v10980_v44 }
 0x3db   :  { %1850 = vmatmul.mubr.f32.vlgmr.msra.gmra.mxu0 %v8395_v49  ;;  %5414 = vmatmul.mubr.f32.vlgmr.msra.gmra.mxu1 %v8395_v49 }
 0x3dc   :  { %1948 = vmatprep.subr.mxu0 %v7746_v46  ;;  %5416 = vmatprep.subr.mxu1 %v10980_v44  ;;  %v11195_v46 = vld [vmem:[#allocation10_spill] sm:$0xff] }
 0x3dd   :  { %1949 = vmatpush1.msra.mxu0 %v7753_v21  ;;  %5417 = vmatpush3.msra.mxu1 %v7759_v13  ;;  %v11196_v21 = vld [vmem:[#allocation11_spill] sm:$0xff]  ;;  %v11197_v13 = vld [vmem:[#allocation13_spill] sm:$0xff] }
 0x3de   :  { %1950 = vmatprep.subr.mxu0 %v7765_v63  ;;  %5418 = vmatprep.subr.mxu1 %v10980_v44  ;;  %v11198_v63 = vld [vmem:[#allocation14_spill] sm:$0xff] }
 0x3df   :  { %1951 = vmatpush1.msra.mxu0 %v7772_v62  ;;  %5419 = vmatpush3.msra.mxu1 %v7778_v0  ;;  %v11199_v62 = vld [vmem:[#allocation15_spill] sm:$0xff]  ;;  %v11200_v0 = vld [vmem:[#allocation16_spill] sm:$0xff] }
 0x3e0   :  { %1952 = vmatprep.subr.mxu0 %v7784_v36  ;;  %5420 = vmatprep.subr.mxu1 %v10980_v44  ;;  %v11201_v36 = vld [vmem:[#allocation17_spill] sm:$0xff] }
 0x3e1   :  { %1953 = vmatpush1.msra.mxu0 %v7791_v16  ;;  %5421 = vmatpush3.msra.mxu1 %v7797_v17  ;;  %v11202_v16 = vld [vmem:[#allocation18_spill] sm:$0xff]  ;;  %v11203_v17 = vld [vmem:[#allocation19_spill] sm:$0xff] }
 0x3e2   :  { %1954 = vmatprep.subr.mxu0 %v7803_v19  ;;  %5422 = vmatprep.subr.mxu1 %v10980_v44  ;;  %v11204_v19 = vld [vmem:[#allocation20_spill] sm:$0xff] }
 0x3e3   :  { %1955 = vmatpush1.msra.mxu0 %v7810_v22  ;;  %5423 = vmatpush3.msra.mxu1 %v7816_v27  ;;  %v11205_v22 = vld [vmem:[#allocation22_spill] sm:$0xff]  ;;  %v11206_v27 = vld [vmem:[#allocation21_spill] sm:$0xff] }
 0x3e4   :  { %1956 = vmatprep.subr.mxu0 %v7822_v28  ;;  %5424 = vmatprep.subr.mxu1 %v10980_v44  ;;  %v11207_v28 = vld [vmem:[#allocation23_spill] sm:$0xff] }
 0x3e5   :  { %1957 = vmatpush1.msra.mxu0 %v7829_v29  ;;  %5425 = vmatpush3.msra.mxu1 %v7835_v31  ;;  %v11208_v29 = vld [vmem:[#allocation24_spill] sm:$0xff]  ;;  %v11209_v31 = vld [vmem:[#allocation25_spill] sm:$0xff] }
 0x3e6   :  { %1958 = vmatprep.subr.mxu0 %v7841_v32  ;;  %5426 = vmatprep.subr.mxu1 %v10980_v44  ;;  %v11210_v32 = vld [vmem:[#allocation26_spill] sm:$0xff] }
 0x3e7   :  { %1959 = vmatpush1.msra.mxu0 %v7848_v33  ;;  %5427 = vmatpush3.msra.mxu1 %v7854_v34  ;;  %v11211_v33 = vld [vmem:[#allocation27_spill] sm:$0xff]  ;;  %v11212_v34 = vld [vmem:[#allocation28_spill] sm:$0xff] }
 0x3e8   :  { %1960 = vmatprep.subr.mxu0 %v7860_v20  ;;  %5428 = vmatprep.subr.mxu1 %v10980_v44  ;;  %v11213_v20 = vld [vmem:[#allocation29_spill] sm:$0xff] }
 0x3e9   :  { %1961 = vmatpush1.msra.mxu0 %v7867_v45  ;;  %5429 = vmatpush3.msra.mxu1 %v7873_v2  ;;  %v11214_v45 = vld [vmem:[#allocation30_spill] sm:$0xff]  ;;  %v11215_v2 = vld [vmem:[#allocation31_spill] sm:$0xff] }
 0x3ea   :  { %1962 = vmatprep.subr.mxu0 %v7879_v59  ;;  %5430 = vmatprep.subr.mxu1 %v10980_v44  ;;  %v11216_v59 = vld [vmem:[#allocation32_spill] sm:$0xff] }
 0x3eb   :  { %1963 = vmatpush1.msra.mxu0 %v7886_v42  ;;  %5431 = vmatpush3.msra.mxu1 %v7892_v8  ;;  %v11217_v42 = vld [vmem:[#allocation33_spill] sm:$0xff]  ;;  %v11218_v8 = vld [vmem:[#allocation34_spill] sm:$0xff] }
 0x3ec   :  { %1964 = vmatprep.subr.mxu0 %v7898_v24  ;;  %5432 = vmatprep.subr.mxu1 %v10980_v44  ;;  %v11219_v24 = vld [vmem:[#allocation35_spill] sm:$0xff] }
 0x3ed   :  { %1965 = vmatpush1.msra.mxu0 %v7905_v61  ;;  %5433 = vmatpush3.msra.mxu1 %v7911_v1  ;;  %v11220_v61 = vld [vmem:[#allocation36_spill] sm:$0xff]  ;;  %v11221_v1 = vld [vmem:[#allocation37_spill] sm:$0xff] }
 0x3ee   :  { %1966 = vmatprep.subr.mxu0 %v7917_v58  ;;  %5434 = vmatprep.subr.mxu1 %v10980_v44  ;;  %v11222_v58 = vld [vmem:[#allocation38_spill] sm:$0xff] }
 0x3ef   :  { %1967 = vmatpush1.msra.mxu0 %v7924_v18  ;;  %5435 = vmatpush3.msra.mxu1 %v7930_v30  ;;  %v11223_v18 = vld [vmem:[#allocation39_spill] sm:$0xff]  ;;  %v11224_v30 = vld [vmem:[#allocation40_spill] sm:$0xff] }
 0x3f0   :  { %1968 = vmatprep.subr.mxu0 %v7936_v26  ;;  %5436 = vmatprep.subr.mxu1 %v10980_v44  ;;  %v11225_v26 = vld [vmem:[#allocation41_spill] sm:$0xff] }
 0x3f1   :  { %1969 = vmatpush1.msra.mxu0 %v7943_v38  ;;  %5437 = vmatpush3.msra.mxu1 %v7949_v39  ;;  %v11226_v38 = vld [vmem:[#allocation42_spill] sm:$0xff]  ;;  %v11227_v39 = vld [vmem:[#allocation43_spill] sm:$0xff] }
 0x3f2   :  { %1970 = vmatprep.subr.mxu0 %v7955_v41  ;;  %5438 = vmatprep.subr.mxu1 %v10980_v44  ;;  %v11228_v41 = vld [vmem:[#allocation44_spill] sm:$0xff] }
 0x3f3   :  { %1971 = vmatpush1.msra.mxu0 %v7962_v43  ;;  %5439 = vmatpush3.msra.mxu1 %v7968_v47  ;;  %v11229_v43 = vld [vmem:[#allocation45_spill] sm:$0xff]  ;;  %v11230_v47 = vld [vmem:[#allocation46_spill] sm:$0xff] }
 0x3f4   :  { %1972 = vmatprep.subr.mxu0 %v7974_v48  ;;  %5440 = vmatprep.subr.mxu1 %v10980_v44  ;;  %v11231_v48 = vld [vmem:[#allocation47_spill] sm:$0xff] }
 0x3f5   :  { %1973 = vmatpush1.msra.mxu0 %v11194_v60  ;;  %5441 = vmatpush3.msra.mxu1 %v11195_v46  ;;  %v11235_v60 = vld [vmem:[#allocation51_spill] sm:$0xff]  ;;  %v11236_v46 = vld [vmem:[#allocation52_spill] sm:$0xff] }
 0x3f6   :  { %1974 = vmatprep.subr.mxu0 %v11196_v21  ;;  %5442 = vmatprep.subr.mxu1 %v10980_v44  ;;  %v11237_v21 = vld [vmem:[#allocation53_spill] sm:$0xff] }
 0x3f7   :  { %1975 = vmatpush1.msra.mxu0 %v11197_v13  ;;  %5443 = vmatpush3.msra.mxu1 %v11198_v63  ;;  %v11238_v13 = vld [vmem:[#allocation54_spill] sm:$0xff]  ;;  %v11239_v63 = vld [vmem:[#allocation55_spill] sm:$0xff] }
 0x3f8   :  { %1976 = vmatprep.subr.mxu0 %v11199_v62  ;;  %5444 = vmatprep.subr.mxu1 %v10980_v44  ;;  %v11240_v62 = vld [vmem:[#allocation56_spill] sm:$0xff] }
 0x3f9   :  { %1977 = vmatpush1.msra.mxu0 %v11200_v0  ;;  %5445 = vmatpush3.msra.mxu1 %v11201_v36  ;;  %v11241_v0 = vld [vmem:[#allocation57_spill] sm:$0xff]  ;;  %v11242_v36 = vld [vmem:[#allocation58_spill] sm:$0xff] }
 0x3fa   :  { %1978 = vmatprep.subr.mxu0 %v11202_v16  ;;  %5446 = vmatprep.subr.mxu1 %v10980_v44  ;;  %v11243_v16 = vld [vmem:[#allocation59_spill] sm:$0xff] }
 0x3fb   :  { %1979 = vmatpush1.msra.mxu0 %v11203_v17  ;;  %2012 = vmatprep.mubr.f32.mxu0 %v10980_v44  ;;  %v11244_v17 = vld [vmem:[#allocation60_spill] sm:$0xff] }
 0x3fc   :  { %5447 = vmatpush3.msra.mxu1 %v11204_v19  ;;  %5448 = vmatprep.mubr.msk.f32.mxu1 %vm6630_vm2, %v10980_v44  ;;  %v11245_v19 = vld [vmem:[#allocation61_spill] sm:$0xff] }
 0x3fd   :  { %2013 = vmatmul.mubr.f32.vlgmr.msra.gmra.mxu0 %v8235_v15  ;;  %5449 = vmatmul.mubr.f32.vlgmr.msra.gmra.mxu1 %v8235_v15 }
 0x3fe   :  { %2111 = vmatprep.subr.mxu0 %v11205_v22  ;;  %5451 = vmatprep.subr.mxu1 %v10980_v44  ;;  %v11246_v22 = vld [vmem:[#allocation62_spill] sm:$0xff] }
 0x3ff   :  { %2112 = vmatpush1.msra.mxu0 %v11206_v27  ;;  %5452 = vmatpush3.msra.mxu1 %v11207_v28  ;;  %v11247_v27 = vld [vmem:[#allocation63_spill] sm:$0xff]  ;;  %v11248_v28 = vld [vmem:[#allocation66_spill] sm:$0xff] }
 0x400   :  { %2113 = vmatprep.subr.mxu0 %v11208_v29  ;;  %5453 = vmatprep.subr.mxu1 %v10980_v44  ;;  %v11249_v29 = vld [vmem:[#allocation67_spill] sm:$0xff] }
 0x401   :  { %2114 = vmatpush1.msra.mxu0 %v11209_v31  ;;  %5454 = vmatpush3.msra.mxu1 %v11210_v32  ;;  %v11250_v31 = vld [vmem:[#allocation74_spill] sm:$0xff]  ;;  %v11251_v32 = vld [vmem:[#allocation87_spill] sm:$0xff] }
 0x402   :  { %2115 = vmatprep.subr.mxu0 %v11211_v33  ;;  %5455 = vmatprep.subr.mxu1 %v10980_v44  ;;  %v11252_v33 = vld [vmem:[#allocation88_spill] sm:$0xff] }
 0x403   :  { %2116 = vmatpush1.msra.mxu0 %v11212_v34  ;;  %5456 = vmatpush3.msra.mxu1 %v11213_v20  ;;  %v11253_v34 = vld [vmem:[#allocation89_spill] sm:$0xff] }
 0x404   :  { %2117 = vmatprep.subr.mxu0 %v11214_v45  ;;  %5457 = vmatprep.subr.mxu1 %v10980_v44 }
 0x405   :  { %2118 = vmatpush1.msra.mxu0 %v11215_v2  ;;  %5458 = vmatpush3.msra.mxu1 %v11216_v59 }
 0x406   :  { %2119 = vmatprep.subr.mxu0 %v11217_v42  ;;  %5459 = vmatprep.subr.mxu1 %v10980_v44  ;;  %v11254_v42 = vld [vmem:[#allocation9_spill] sm:$0xff] }
 0x407   :  { %2120 = vmatpush1.msra.mxu0 %v11218_v8  ;;  %5460 = vmatpush3.msra.mxu1 %v11219_v24 }
 0x408   :  { %2121 = vmatprep.subr.mxu0 %v11220_v61  ;;  %5461 = vmatprep.subr.mxu1 %v10980_v44 }
 0x409   :  { %2122 = vmatpush1.msra.mxu0 %v11221_v1  ;;  %5462 = vmatpush3.msra.mxu1 %v11222_v58 }
 0x40a   :  { %2123 = vmatprep.subr.mxu0 %v11223_v18  ;;  %5463 = vmatprep.subr.mxu1 %v10980_v44 }
 0x40b   :  { %2124 = vmatpush1.msra.mxu0 %v11224_v30  ;;  %5464 = vmatpush3.msra.mxu1 %v11225_v26 }
 0x40c   :  { %2125 = vmatprep.subr.mxu0 %v11226_v38  ;;  %5465 = vmatprep.subr.mxu1 %v10980_v44 }
 0x40d   :  { %2126 = vmatpush1.msra.mxu0 %v11227_v39  ;;  %5466 = vmatpush3.msra.mxu1 %v11228_v41  ;;  %v8546_v39 = vld [vmem:[%s10530_s9] ss:$0 sm:$0xff] }
 0x40e   :  { %2127 = vmatprep.subr.mxu0 %v11229_v43  ;;  %5467 = vmatprep.subr.mxu1 %v10980_v44 }
 0x40f   :  { %2128 = vmatpush1.msra.mxu0 %v11230_v47  ;;  %5468 = vmatpush3.msra.mxu1 %v11231_v48 }
 0x410   :  { %2129 = vmatprep.subr.mxu0 %v11232_v57  ;;  %5469 = vmatprep.subr.mxu1 %v10980_v44 }
 0x411   :  { %2130 = vmatpush1.msra.mxu0 %v11233_v9  ;;  %5470 = vmatpush3.msra.mxu1 %v11234_v25  ;;  %v11255_v25 = vld [vmem:[#allocation70_spill] sm:$0xff] }
 0x412   :  { %2131 = vmatprep.subr.mxu0 %v11235_v60  ;;  %5471 = vmatprep.subr.mxu1 %v10980_v44 }
 0x413   :  { %2132 = vmatpush1.msra.mxu0 %v11236_v46  ;;  %5472 = vmatpush3.msra.mxu1 %v11237_v21 }
 0x414   :  { %2133 = vmatprep.subr.mxu0 %v11238_v13  ;;  %5473 = vmatprep.subr.mxu1 %v10980_v44 }
 0x415   :  { %2134 = vmatpush1.msra.mxu0 %v11239_v63  ;;  %5474 = vmatpush3.msra.mxu1 %v11240_v62  ;;  %v11256_v62 = vld [vmem:[#allocation71_spill] sm:$0xff] }
 0x416   :  { %2135 = vmatprep.subr.mxu0 %v11241_v0  ;;  %5475 = vmatprep.subr.mxu1 %v10980_v44 }
 0x417   :  { %2136 = vmatpush1.msra.mxu0 %v11242_v36  ;;  %5476 = vmatpush3.msra.mxu1 %v11243_v16 }
 0x418   :  { %2137 = vmatprep.subr.mxu0 %v11244_v17  ;;  %5477 = vmatprep.subr.mxu1 %v10980_v44 }
 0x419   :  { %2138 = vmatpush1.msra.mxu0 %v11245_v19  ;;  %5478 = vmatpush3.msra.mxu1 %v11246_v22 }
 0x41a   :  { %2139 = vmatprep.subr.mxu0 %v11247_v27  ;;  %5479 = vmatprep.subr.mxu1 %v10980_v44 }
 0x41b   :  { %2140 = vmatpush1.msra.mxu0 %v11248_v28  ;;  %5480 = vmatpush3.msra.mxu1 %v11249_v29 }
 0x41c   :  { %2141 = vmatprep.subr.mxu0 %v11250_v31  ;;  %5481 = vmatprep.subr.mxu1 %v10980_v44 }
 0x41d   :  { %2142 = vmatpush1.msra.mxu0 %v11251_v32  ;;  %5482 = vmatpush3.msra.mxu1 %v11252_v33  ;;  %v11257_v32 = vld [vmem:[#allocation81_spill] sm:$0xff] }
 0x41e   :  { %2175 = vmatprep.mubr.f32.mxu0 %v10980_v44  ;;  %5483 = vmatprep.mubr.msk.f32.mxu1 %vm6630_vm2, %v10980_v44 }
 0x41f   :  { %2252 = vmatprep.subr.mxu0 %v11253_v34  ;;  %5486 = vmatprep.subr.mxu1 %v10980_v44 }
 0x47a   :  { %v1781_v20 = vpop.f32.mrf.mxu1  ;;  %v1710_v2 = vpop.f32.mrf.mxu0 }
 0x47b   :  { %v1711_v8 = vadd.f32 %v1710_v2, %v11254_v42  ;;  %v1782_v57 = vadd.f32 %v1781_v20, %v7657_v40 }
 0x47c   :  { %v5380_v45 = vpop.f32.mrf.mxu1  ;;  %v1712_v59 = vpop.f32.mrf.mxu0 }
 0x47d   :  { %v1713_v31 = vadd.f32 %v1712_v59, %v7664_v14  ;;  %v11269_v59 = vld [vmem:[#allocation101_spill] sm:$0xff] }
 0x49b   :  { %v1851_v24 = vpop.f32.mrf.mxu0  ;;  %v1922_v61 = vpop.f32.mrf.mxu1 }
 0x49c   :  { %v1926_v1 = vadd.f32 %v1851_v24, %v1711_v8  ;;  %v1940_v41 = vadd.f32 %v8546_v39, %v1922_v61 }
 0x49d   :  { %v5415_v58 = vpop.f32.mrf.mxu1  ;;  %v1853_v38 = vpop.f32.mrf.mxu0 }
 0x49e   :  { %v4611_v18 = vmul.f32 -1.442695, %v1926_v1  ;;  %v1933_v34 = vadd.f32 %v1853_v38, %v1713_v31  ;;  %v11270_v58 = vld [vmem:[#allocation102_spill] sm:$0xff]  ;;  %v8697_v31 = vld [vmem:[%s10524_s3 + $0x120] sm:$0xff] }
 0x49f   :  { %v11274_v38 = vld [vmem:[#allocation106_spill] sm:$0xff] }
 0x4a0   :  { %6004 = vpow2.f32 %v4611_v18  ;;  %v4612_v20 = vmul.f32 -1.442695, %v1933_v34  ;;  %v11271_v18 = vld [vmem:[#allocation103_spill] sm:$0xff]  ;;  %v8716_v34 = vld [vmem:[%s10524_s3 + $0x108] sm:$0xff] }
 0x4ad   :  { %v6005_v30 = vpop.eup %6004 }
 0x4ae   :  { %v1930_v26 = vadd.f32 1.0, %v6005_v30  ;;  %v11272_v30 = vld [vmem:[#allocation104_spill] sm:$0xff] }
 0x4b0   :  { %6006 = vrcp.f32 %v1930_v26  ;;  %v11273_v26 = vld [vmem:[#allocation105_spill] sm:$0xff] }
 0x4bd   :  { %v6007_v43 = vpop.eup %6006  ;;  %v2014_v47 = vpop.f32.mrf.mxu0 }
 0x4be   :  { %v2085_v48 = vpop.f32.mrf.mxu1  ;;  %v1941_v9 = vmul.f32 %v6007_v43, %v1940_v41  ;;  %v2089_v60 = vadd.f32 %v2014_v47, %v11255_v25  ;;  %v11275_v41 = vld [vmem:[#allocation107_spill] sm:$0xff]  ;;  %v11276_v43 = vld [vmem:[#allocation108_spill] sm:$0xff]  ;;  %v11277_v47 = vld [vmem:[#allocation109_spill] sm:$0xff] }
 0x4bf   :  { %v2016_v63 = vpop.f32.mrf.mxu0  ;;  %v2103_v27 = vadd.f32 %v8229_v23, %v2085_v48  ;;  %v11278_v48 = vld [vmem:[#allocation110_spill] sm:$0xff]  ;;  %v11280_v25 = vld [vmem:[#allocation112_spill] sm:$0xff] }
 0x4c0   :  { %v5450_v46 = vpop.f32.mrf.mxu1  ;;  %v1942_v21 = vadd.f32 %v1941_v9, %v1782_v57  ;;  %v4613_v13 = vmul.f32 -1.442695, %v2089_v60  ;;  %v2096_v0 = vadd.f32 %v2016_v63, %v11256_v62  ;;  %v11279_v9 = vld [vmem:[#allocation111_spill] sm:$0xff]  ;;  %v11281_v60 = vld [vmem:[#allocation113_spill] sm:$0xff]  ;;  %v11284_v63 = vld [vmem:[#allocation68_spill] sm:$0xff] }
 0x4c2   :  { %6008 = vpow2.f32 %v4613_v13  ;;  %v4614_v36 = vmul.f32 -1.442695, %v2096_v0  ;;  %v11283_v13 = vld [vmem:[#allocation115_spill] sm:$0xff]  ;;  %v11285_v0 = vld [vmem:[#allocation69_spill] sm:$0xff] }
 0x4c4   :  { %6010 = vpow2.f32 %v4614_v36  ;;  %v11286_v36 = vld [vmem:[#allocation82_spill] sm:$0xff] }
 0x4cf   :  { %v6009_v16 = vpop.eup %6008 }
 0x4d0   :  { %v2093_v17 = vadd.f32 1.0, %v6009_v16 }
 0x4d1   :  { %v6011_v19 = vpop.eup %6010 }
 0x4d2   :  { %6012 = vrcp.f32 %v2093_v17  ;;  %v2100_v22 = vadd.f32 1.0, %v6011_v19  ;;  %v11287_v17 = vld [vmem:[#allocation116_spill] sm:$0xff] }
 0x4d4   :  { %6014 = vrcp.f32 %v2100_v22  ;;  %v8671_v22 = vld [vmem:[%s10524_s3 + $0x140] sm:$0xff] }
 0x4df   :  { %v6013_v28 = vpop.eup %6012 }
 0x4e0   :  { %v2104_v29 = vmul.f32 %v6013_v28, %v2103_v27  ;;  %v8678_v27 = vld [vmem:[%s10524_s3 + $0x138] sm:$0xff]  ;;  %v8684_v28 = vld [vmem:[%s10524_s3 + $0x148] sm:$0xff] }
 0x4e1   :  { %v6015_v45 = vpop.eup %6014 }
 0x4e2   :  { %v2105_v33 = vadd.f32 %v2104_v29, %v11257_v32  ;;  %v2107_v2 = vsub.f32 1.0, %v6015_v45  ;;  %v2109_v61 = vmul.f32 %v6015_v45, %v8235_v15  ;;  %v8690_v29 = vld [vmem:[%s10524_s3 + $0x128] sm:$0xff]  ;;  %v8703_v32 = vld [vmem:[%s10524_s3 + $0x130] sm:$0xff]  ;;  %v8728_v45 = vld [vmem:[%s10524_s3 + $0xf8] sm:$0xff] }
 0x4e4   :  { %6016 = vtanh.f32 %v2105_v33  ;;  %v8709_v33 = vld [vmem:[%s10524_s3 + $0x110] sm:$0xff] }
 0x4e5   :  { %6018 = vpow2.f32 %v4612_v20  ;;  %v8722_v20 = vld [vmem:[%s10524_s3 + $0x118] sm:$0xff] }
 0x4f1   :  { %v6017_v8 = vpop.eup %6016 }
 0x4f2   :  { %v2108_v24 = vmul.f32 %v6017_v8, %v2107_v2  ;;  %v6019_v23 = vpop.eup %6018  ;;  %v8735_v2 = vld [vmem:[%s10524_s3 + $0xf0] sm:$0xff]  ;;  %v8741_v8 = vld [vmem:[%s10524_s3 + $0x100] sm:$0xff] }
 0x4f3   :  { %v1937_v15 = vadd.f32 1.0, %v6019_v23  ;;  %v8760_v23 = vld [vmem:[%s10524_s3 + $0xe8] sm:$0xff] }
 0x4f4   :  { %v8556_v1 = vadd.f32 %v2109_v61, %v2108_v24  ;;  %v8747_v24 = vld [vmem:[%s10524_s3 + $0xe0] sm:$0xff]  ;;  %v8754_v61 = vld [vmem:[%s10524_s3 + $0xd8] sm:$0xff] }
 0x4f5   :  { %6020 = vrcp.f32 %v1937_v15  ;;  %v8766_v15 = vld [vmem:[%s10524_s3 + $0xc8] sm:$0xff] }
 0x4f6   :  { %2176 = vmatmul.mubr.f32.vlgmr.msra.gmra.mxu0 %v8556_v1  ;;  %5484 = vmatmul.mubr.f32.vlgmr.msra.gmra.mxu1 %v8556_v1  ;;  %6022 = vtanh.f32 %v1942_v21  ;;  %v11282_v21 = vld [vmem:[#allocation114_spill] sm:$0xff] }
 0x4f7   :  { %2253 = vmatpush1.msra.mxu0 %v8239_v52  ;;  %5487 = vmatpush3.msra.mxu1 %v8242_v55  ;;  %v11258_v52 = vld [vmem:[#allocation90_spill] sm:$0xff]  ;;  %v11259_v55 = vld [vmem:[#allocation91_spill] sm:$0xff] }
 0x4f8   :  { %2254 = vmatprep.subr.mxu0 %v8245_v37  ;;  %5488 = vmatprep.subr.mxu1 %v10980_v44  ;;  %v11260_v37 = vld [vmem:[#allocation92_spill] sm:$0xff] }
 0x4f9   :  { %2255 = vmatpush1.msra.mxu0 %v8249_v35  ;;  %5489 = vmatpush3.msra.mxu1 %v8252_v6  ;;  %v11261_v35 = vld [vmem:[#allocation93_spill] sm:$0xff]  ;;  %v11262_v6 = vld [vmem:[#allocation94_spill] sm:$0xff] }
 0x4fa   :  { %2256 = vmatprep.subr.mxu0 %v8255_v3  ;;  %5490 = vmatprep.subr.mxu1 %v10980_v44  ;;  %v11263_v3 = vld [vmem:[#allocation95_spill] sm:$0xff] }
 0x4fb   :  { %2257 = vmatpush1.msra.mxu0 %v8259_v50  ;;  %5491 = vmatpush3.msra.mxu1 %v8262_v51  ;;  %v11264_v50 = vld [vmem:[#allocation96_spill] sm:$0xff]  ;;  %v11265_v51 = vld [vmem:[#allocation97_spill] sm:$0xff] }
 0x4fc   :  { %2258 = vmatprep.subr.mxu0 %v8265_v53  ;;  %5492 = vmatprep.subr.mxu1 %v10980_v44  ;;  %v11266_v53 = vld [vmem:[#allocation98_spill] sm:$0xff] }
 0x4fd   :  { %2259 = vmatpush1.msra.mxu0 %v8269_v54  ;;  %5493 = vmatpush3.msra.mxu1 %v8272_v10  ;;  %v11267_v54 = vld [vmem:[#allocation99_spill] sm:$0xff]  ;;  %v11268_v10 = vld [vmem:[#allocation100_spill] sm:$0xff] }
 0x4fe   :  { %2260 = vmatprep.subr.mxu0 %v11258_v52  ;;  %5494 = vmatprep.subr.mxu1 %v10980_v44  ;;  %v8773_v52 = vld [vmem:[%s10524_s3 + $0xc0] sm:$0xff] }
 0x4ff   :  { %2261 = vmatpush1.msra.mxu0 %v11259_v55  ;;  %5495 = vmatpush3.msra.mxu1 %v11260_v37  ;;  %v8779_v55 = vld [vmem:[%s10524_s3 + $0xd0] sm:$0xff] }
 0x500   :  { %2262 = vmatprep.subr.mxu0 %v11261_v35  ;;  %5496 = vmatprep.subr.mxu1 %v10980_v44  ;;  %v8785_v37 = vld [vmem:[%s10524_s3 + $0xb0] sm:$0xff]  ;;  %v8792_v35 = vld [vmem:[%s10524_s3 + $0xa8] sm:$0xff] }
 0x501   :  { %2263 = vmatpush1.msra.mxu0 %v11262_v6  ;;  %5497 = vmatpush3.msra.mxu1 %v11263_v3  ;;  %v8798_v6 = vld [vmem:[%s10524_s3 + $0xb8] sm:$0xff] }
 0x502   :  { %2264 = vmatprep.subr.mxu0 %v11264_v50  ;;  %5498 = vmatprep.subr.mxu1 %v10980_v44  ;;  %v6021_v57 = vpop.eup %6020  ;;  %v8804_v3 = vld [vmem:[%s10524_s3 + $0x98] sm:$0xff]  ;;  %v8811_v50 = vld [vmem:[%s10524_s3 + $0x90] sm:$0xff] }
 0x503   :  { %2265 = vmatpush1.msra.mxu0 %v11265_v51  ;;  %5499 = vmatpush3.msra.mxu1 %v11266_v53  ;;  %v6023_v46 = vpop.eup %6022  ;;  %v1944_v62 = vsub.f32 1.0, %v6021_v57  ;;  %v1946_v19 = vmul.f32 %v6021_v57, %v8395_v49  ;;  %v8665_v49 = vld [vmem:[%s10524_s3 + $0x160] sm:$0xff]  ;;  %v8906_v57 = vld [vmem:[%s10524_s3 + $0x18] sm:$0xff] }
 0x504   :  { %2266 = vmatprep.subr.mxu0 %v11267_v54  ;;  %5500 = vmatprep.subr.mxu1 %v10980_v44  ;;  %v8817_v51 = vld [vmem:[%s10524_s3 + $0xa0] sm:$0xff]  ;;  %v8830_v54 = vld [vmem:[%s10524_s3 + $0x78] sm:$0xff]  ;;  %11294 = vst [vmem:[#allocation16_spill] sm:$0xff] %v8906_v57 }
 0x505   :  { %2267 = vmatpush1.msra.mxu0 %v11268_v10  ;;  %5501 = vmatpush3.msra.mxu1 %v11269_v59  ;;  %v1945_v16 = vmul.f32 %v6023_v46, %v1944_v62  ;;  %v8823_v53 = vld [vmem:[%s10524_s3 + $0x80] sm:$0xff]  ;;  %v8836_v10 = vld [vmem:[%s10524_s3 + $0x88] sm:$0xff]  ;;  %v8932_v46 = vld [vmem:[%s10524_s3 + $0x10] sm:$0xff] }
 0x506   :  { %2268 = vmatprep.subr.mxu0 %v11270_v58  ;;  %5502 = vmatprep.subr.mxu1 %v10980_v44  ;;  %v8842_v59 = vld [vmem:[%s10524_s3 + $0x68] sm:$0xff]  ;;  %v8849_v58 = vld [vmem:[%s10524_s3 + $0x60] sm:$0xff]  ;;  %11298 = vst [vmem:[#allocation20_spill] sm:$0xff] %v8932_v46  ;;  %v8949_v62 = vld [vmem:[#allocation2 + $0x158] sm:$0xff] }
 0x507   :  { %2269 = vmatpush1.msra.mxu0 %v11271_v18  ;;  %5503 = vmatpush3.msra.mxu1 %v11272_v30  ;;  %v8855_v18 = vld [vmem:[%s10524_s3 + $0x70] sm:$0xff]  ;;  %11302 = vst [vmem:[#allocation24_spill] sm:$0xff] %v8949_v62 }
 0x508   :  { %2270 = vmatprep.subr.mxu0 %v11273_v26  ;;  %5504 = vmatprep.subr.mxu1 %v10980_v44  ;;  %v8861_v30 = vld [vmem:[%s10524_s3 + $0x50] sm:$0xff]  ;;  %v8868_v26 = vld [vmem:[%s10524_s3 + $0x48] sm:$0xff] }
 0x509   :  { %2271 = vmatpush1.msra.mxu0 %v11274_v38  ;;  %5505 = vmatpush3.msra.mxu1 %v11275_v41  ;;  %11288 = vst [vmem:[#allocation12_spill] sm:$0xff] %v8868_v26  ;;  %v8874_v38 = vld [vmem:[%s10524_s3 + $0x58] sm:$0xff] }
 0x50a   :  { %2272 = vmatprep.subr.mxu0 %v11276_v43  ;;  %5506 = vmatprep.subr.mxu1 %v10980_v44  ;;  %11289 = vst [vmem:[#allocation10_spill] sm:$0xff] %v8874_v38  ;;  %v8880_v41 = vld [vmem:[%s10524_s3 + $0x38] sm:$0xff]  ;;  %v8887_v43 = vld [vmem:[%s10524_s3 + $0x30] sm:$0xff] }
 0x50b   :  { %2273 = vmatpush1.msra.mxu0 %v11277_v47  ;;  %5507 = vmatpush3.msra.mxu1 %v11278_v48  ;;  %11290 = vst [vmem:[#allocation11_spill] sm:$0xff] %v8880_v41  ;;  %11291 = vst [vmem:[#allocation13_spill] sm:$0xff] %v8887_v43  ;;  %v8893_v47 = vld [vmem:[%s10524_s3 + $0x40] sm:$0xff] }
 0x50c   :  { %2274 = vmatprep.subr.mxu0 %v11279_v9  ;;  %5508 = vmatprep.subr.mxu1 %v10980_v44  ;;  %11292 = vst [vmem:[#allocation14_spill] sm:$0xff] %v8893_v47  ;;  %v8899_v48 = vld [vmem:[%s10524_s3 + $0x20] sm:$0xff]  ;;  %v8912_v9 = vld [vmem:[%s10524_s3 + $0x28] sm:$0xff] }
 0x50d   :  { %2275 = vmatpush1.msra.mxu0 %v11280_v25  ;;  %5509 = vmatpush3.msra.mxu1 %v11281_v60  ;;  %11293 = vst [vmem:[#allocation15_spill] sm:$0xff] %v8899_v48  ;;  %11295 = vst [vmem:[#allocation17_spill] sm:$0xff] %v8912_v9  ;;  %v8918_v25 = vld [vmem:[%s10524_s3 + $0x8] sm:$0xff]  ;;  %v8925_v60 = vld [vmem:[%s10524_s3] sm:$0xff] }
 0x50e   :  { %2276 = vmatprep.subr.mxu0 %v11282_v21  ;;  %5510 = vmatprep.subr.mxu1 %v10980_v44  ;;  %11296 = vst [vmem:[#allocation18_spill] sm:$0xff] %v8918_v25  ;;  %11297 = vst [vmem:[#allocation19_spill] sm:$0xff] %v8925_v60  ;;  %v8939_v21 = vld [vmem:[#allocation2 + $0x170] sm:$0xff] }
 0x50f   :  { %2277 = vmatpush1.msra.mxu0 %v11283_v13  ;;  %5511 = vmatpush3.msra.mxu1 %v11284_v63  ;;  %11299 = vst [vmem:[#allocation22_spill] sm:$0xff] %v8939_v21  ;;  %v8943_v13 = vld [vmem:[#allocation2 + $0x168] sm:$0xff]  ;;  %v8946_v63 = vld [vmem:[#allocation2 + $0x178] sm:$0xff] }
 0x510   :  { %2278 = vmatprep.subr.mxu0 %v11285_v0  ;;  %5512 = vmatprep.subr.mxu1 %v10980_v44  ;;  %11300 = vst [vmem:[#allocation21_spill] sm:$0xff] %v8943_v13  ;;  %11301 = vst [vmem:[#allocation23_spill] sm:$0xff] %v8946_v63  ;;  %v8953_v0 = vld [vmem:[#allocation2 + $0x150] sm:$0xff] }
 0x511   :  { %2279 = vmatpush1.msra.mxu0 %v11286_v36  ;;  %5513 = vmatpush3.msra.mxu1 %v8373_v7  ;;  %v8623_v7 = vadd.f32 %v1946_v19, %v1945_v16  ;;  %11303 = vst [vmem:[#allocation25_spill] sm:$0xff] %v8953_v0  ;;  %v8956_v36 = vld [vmem:[#allocation2 + $0x160] sm:$0xff]  ;;  %v8966_v19 = vld [vmem:[#allocation2 + $0x148] sm:$0xff] }
 0x512   :  { %2280 = vmatprep.subr.mxu0 %v8376_v11  ;;  %5514 = vmatprep.subr.mxu1 %v10980_v44  ;;  %v8640_v11 = vld [vmem:[%s10524_s3 + $0x168] sm:$0xff]  ;;  %11304 = vst [vmem:[#allocation26_spill] sm:$0xff] %v8956_v36  ;;  %v8959_v16 = vld [vmem:[#allocation2 + $0x140] sm:$0xff]  ;;  %11307 = vst [vmem:[#allocation29_spill] sm:$0xff] %v8966_v19 }
 0x513   :  { %2281 = vmatpush1.msra.mxu0 %v11287_v17  ;;  %5515 = vmatpush3.msra.mxu1 %v8383_v5  ;;  %v8646_v5 = vld [vmem:[%s10524_s3 + $0x178] sm:$0xff]  ;;  %11305 = vst [vmem:[#allocation27_spill] sm:$0xff] %v8959_v16 }
 0x514   :  { %2282 = vmatprep.subr.mxu0 %v8387_v12  ;;  %5516 = vmatprep.subr.mxu1 %v10980_v44  ;;  %v8633_v12 = vld [vmem:[%s10524_s3 + $0x170] sm:$0xff]  ;;  %v8963_v17 = vld [vmem:[#allocation2 + $0x138] sm:$0xff] }
 0x515   :  { %2283 = vmatpush1.msra.mxu0 %v8391_v4  ;;  %2316 = vmatprep.mubr.f32.mxu0 %v10980_v44  ;;  %v8659_v4 = vld [vmem:[%s10524_s3 + $0x150] sm:$0xff]  ;;  %11306 = vst [vmem:[#allocation28_spill] sm:$0xff] %v8963_v17 }
 0x516   :  { %5517 = vmatpush3.msra.mxu1 %v8397_v56  ;;  %5518 = vmatprep.mubr.msk.f32.mxu1 %vm6630_vm2, %v10980_v44  ;;  %v8652_v56 = vld [vmem:[%s10524_s3 + $0x158] sm:$0xff] }
 0x517   :  { %2317 = vmatmul.mubr.f32.vlgmr.msra.gmra.mxu0 %v8623_v7  ;;  %5519 = vmatmul.mubr.f32.vlgmr.msra.gmra.mxu1 %v8623_v7 }
 0x518   :  { %2415 = vmatprep.subr.mxu0 %v8633_v12  ;;  %5521 = vmatprep.subr.mxu1 %v10980_v44 }
 0x519   :  { %2416 = vmatpush1.msra.mxu0 %v8640_v11  ;;  %5522 = vmatpush3.msra.mxu1 %v8646_v5 }
 0x51a   :  { %2417 = vmatprep.subr.mxu0 %v8652_v56  ;;  %5523 = vmatprep.subr.mxu1 %v10980_v44 }
 0x51b   :  { %2418 = vmatpush1.msra.mxu0 %v8659_v4  ;;  %5524 = vmatpush3.msra.mxu1 %v8665_v49 }
 0x51c   :  { %2419 = vmatprep.subr.mxu0 %v8671_v22  ;;  %5525 = vmatprep.subr.mxu1 %v10980_v44 }
 0x51d   :  { %2420 = vmatpush1.msra.mxu0 %v8678_v27  ;;  %5526 = vmatpush3.msra.mxu1 %v8684_v28 }
 0x51e   :  { %2421 = vmatprep.subr.mxu0 %v8690_v29  ;;  %5527 = vmatprep.subr.mxu1 %v10980_v44 }
 0x51f   :  { %2422 = vmatpush1.msra.mxu0 %v8697_v31  ;;  %5528 = vmatpush3.msra.mxu1 %v8703_v32 }
 0x520   :  { %2423 = vmatprep.subr.mxu0 %v8709_v33  ;;  %5529 = vmatprep.subr.mxu1 %v10980_v44 }
 0x521   :  { %2424 = vmatpush1.msra.mxu0 %v8716_v34  ;;  %5530 = vmatpush3.msra.mxu1 %v8722_v20 }
 0x522   :  { %2425 = vmatprep.subr.mxu0 %v8728_v45  ;;  %5531 = vmatprep.subr.mxu1 %v10980_v44 }
 0x523   :  { %2426 = vmatpush1.msra.mxu0 %v8735_v2  ;;  %5532 = vmatpush3.msra.mxu1 %v8741_v8 }
 0x524   :  { %2427 = vmatprep.subr.mxu0 %v8747_v24  ;;  %5533 = vmatprep.subr.mxu1 %v10980_v44 }
 0x525   :  { %2428 = vmatpush1.msra.mxu0 %v8754_v61  ;;  %5534 = vmatpush3.msra.mxu1 %v8760_v23 }
 0x526   :  { %2429 = vmatprep.subr.mxu0 %v8766_v15  ;;  %5535 = vmatprep.subr.mxu1 %v10980_v44 }
 0x527   :  { %2430 = vmatpush1.msra.mxu0 %v8773_v52  ;;  %5536 = vmatpush3.msra.mxu1 %v8779_v55 }
 0x528   :  { %2431 = vmatprep.subr.mxu0 %v8785_v37  ;;  %5537 = vmatprep.subr.mxu1 %v10980_v44 }
 0x529   :  { %2432 = vmatpush1.msra.mxu0 %v8792_v35  ;;  %5538 = vmatpush3.msra.mxu1 %v8798_v6 }
 0x52a   :  { %2433 = vmatprep.subr.mxu0 %v8804_v3  ;;  %5539 = vmatprep.subr.mxu1 %v10980_v44 }
 0x52b   :  { %2434 = vmatpush1.msra.mxu0 %v8811_v50  ;;  %5540 = vmatpush3.msra.mxu1 %v8817_v51 }
 0x52c   :  { %2435 = vmatprep.subr.mxu0 %v8823_v53  ;;  %5541 = vmatprep.subr.mxu1 %v10980_v44 }
 0x52d   :  { %2436 = vmatpush1.msra.mxu0 %v8830_v54  ;;  %5542 = vmatpush3.msra.mxu1 %v8836_v10 }
 0x52e   :  { %2437 = vmatprep.subr.mxu0 %v8842_v59  ;;  %5543 = vmatprep.subr.mxu1 %v10980_v44 }
 0x52f   :  { %2438 = vmatpush1.msra.mxu0 %v8849_v58  ;;  %5544 = vmatpush3.msra.mxu1 %v8855_v18 }
 0x530   :  { %2439 = vmatprep.subr.mxu0 %v8861_v30  ;;  %5545 = vmatprep.subr.mxu1 %v10980_v44 }
 0x531   :  { %2440 = vmatpush1.msra.mxu0 %v8868_v26  ;;  %5546 = vmatpush3.msra.mxu1 %v8874_v38  ;;  %v11348_v38 = vld [vmem:[#allocation72_spill] sm:$0xff] }
 0x532   :  { %2441 = vmatprep.subr.mxu0 %v8880_v41  ;;  %5547 = vmatprep.subr.mxu1 %v10980_v44 }
 0x533   :  { %2442 = vmatpush1.msra.mxu0 %v8887_v43  ;;  %5548 = vmatpush3.msra.mxu1 %v8893_v47 }
 0x534   :  { %2443 = vmatprep.subr.mxu0 %v8899_v48  ;;  %5549 = vmatprep.subr.mxu1 %v10980_v44 }
 0x535   :  { %2444 = vmatpush1.msra.mxu0 %v8906_v57  ;;  %5550 = vmatpush3.msra.mxu1 %v8912_v9 }
 0x536   :  { %2445 = vmatprep.subr.mxu0 %v8918_v25  ;;  %5551 = vmatprep.subr.mxu1 %v10980_v44 }
 0x537   :  { %2446 = vmatpush1.msra.mxu0 %v8925_v60  ;;  %2479 = vmatprep.mubr.f32.mxu0 %v10980_v44 }
 0x538   :  { %5552 = vmatpush3.msra.mxu1 %v8932_v46  ;;  %5553 = vmatprep.mubr.msk.f32.mxu1 %vm6630_vm2, %v10980_v44 }
 0x539   :  { %2480 = vmatmul.mubr.f32.vlgmr.msra.gmra.mxu0 %v8556_v1  ;;  %5554 = vmatmul.mubr.f32.vlgmr.msra.gmra.mxu1 %v8556_v1 }
 0x53a   :  { %2578 = vmatprep.subr.mxu0 %v8939_v21  ;;  %5556 = vmatprep.subr.mxu1 %v10980_v44 }
 0x53b   :  { %2579 = vmatpush1.msra.mxu0 %v8943_v13  ;;  %5557 = vmatpush3.msra.mxu1 %v8946_v63 }
 0x53c   :  { %2580 = vmatprep.subr.mxu0 %v8949_v62  ;;  %5558 = vmatprep.subr.mxu1 %v10980_v44  ;;  %v8969_v62 = vld [vmem:[#allocation2 + $0x128] sm:$0xff] }
 0x53d   :  { %2581 = vmatpush1.msra.mxu0 %v8953_v0  ;;  %5559 = vmatpush3.msra.mxu1 %v8956_v36  ;;  %11308 = vst [vmem:[#allocation30_spill] sm:$0xff] %v8969_v62  ;;  %v8973_v36 = vld [vmem:[#allocation2 + $0x120] sm:$0xff]  ;;  %v8979_v0 = vld [vmem:[#allocation2 + $0x110] sm:$0xff] }
 0x53e   :  { %2582 = vmatprep.subr.mxu0 %v8959_v16  ;;  %5560 = vmatprep.subr.mxu1 %v10980_v44  ;;  %11309 = vst [vmem:[#allocation31_spill] sm:$0xff] %v8973_v36  ;;  %v8976_v16 = vld [vmem:[#allocation2 + $0x130] sm:$0xff]  ;;  %11311 = vst [vmem:[#allocation33_spill] sm:$0xff] %v8979_v0 }
 0x53f   :  { %2583 = vmatpush1.msra.mxu0 %v8963_v17  ;;  %5561 = vmatpush3.msra.mxu1 %v8966_v19  ;;  %11310 = vst [vmem:[#allocation32_spill] sm:$0xff] %v8976_v16  ;;  %v8983_v19 = vld [vmem:[#allocation2 + $0x108] sm:$0xff]  ;;  %v8989_v17 = vld [vmem:[#allocation2 + $0xf8] sm:$0xff] }
 0x540   :  { %2584 = vmatprep.subr.mxu0 %v8969_v62  ;;  %5562 = vmatprep.subr.mxu1 %v10980_v44  ;;  %11312 = vst [vmem:[#allocation34_spill] sm:$0xff] %v8983_v19  ;;  %v8986_v62 = vld [vmem:[#allocation2 + $0x118] sm:$0xff]  ;;  %11314 = vst [vmem:[#allocation36_spill] sm:$0xff] %v8989_v17 }
 0x541   :  { %2585 = vmatpush1.msra.mxu0 %v8973_v36  ;;  %5563 = vmatpush3.msra.mxu1 %v8976_v16  ;;  %11313 = vst [vmem:[#allocation35_spill] sm:$0xff] %v8986_v62  ;;  %v8993_v16 = vld [vmem:[#allocation2 + $0xf0] sm:$0xff]  ;;  %v8999_v36 = vld [vmem:[#allocation2 + $0xe0] sm:$0xff] }
 0x542   :  { %2586 = vmatprep.subr.mxu0 %v8979_v0  ;;  %5564 = vmatprep.subr.mxu1 %v10980_v44  ;;  %11315 = vst [vmem:[#allocation37_spill] sm:$0xff] %v8993_v16  ;;  %v8996_v0 = vld [vmem:[#allocation2 + $0x100] sm:$0xff]  ;;  %11317 = vst [vmem:[#allocation39_spill] sm:$0xff] %v8999_v36 }
 0x543   :  { %2587 = vmatpush1.msra.mxu0 %v8983_v19  ;;  %5565 = vmatpush3.msra.mxu1 %v8986_v62  ;;  %11316 = vst [vmem:[#allocation38_spill] sm:$0xff] %v8996_v0  ;;  %v9003_v62 = vld [vmem:[#allocation2 + $0xd8] sm:$0xff]  ;;  %v9009_v19 = vld [vmem:[#allocation2 + $0xc8] sm:$0xff] }
 0x544   :  { %2588 = vmatprep.subr.mxu0 %v8989_v17  ;;  %5566 = vmatprep.subr.mxu1 %v10980_v44  ;;  %11318 = vst [vmem:[#allocation40_spill] sm:$0xff] %v9003_v62  ;;  %v9006_v17 = vld [vmem:[#allocation2 + $0xe8] sm:$0xff]  ;;  %11320 = vst [vmem:[#allocation42_spill] sm:$0xff] %v9009_v19 }
 0x545   :  { %2589 = vmatpush1.msra.mxu0 %v8993_v16  ;;  %5567 = vmatpush3.msra.mxu1 %v8996_v0  ;;  %11319 = vst [vmem:[#allocation41_spill] sm:$0xff] %v9006_v17  ;;  %v9013_v0 = vld [vmem:[#allocation2 + $0xc0] sm:$0xff]  ;;  %v9019_v16 = vld [vmem:[#allocation2 + $0xb0] sm:$0xff] }
 0x546   :  { %2590 = vmatprep.subr.mxu0 %v8999_v36  ;;  %5568 = vmatprep.subr.mxu1 %v10980_v44  ;;  %11321 = vst [vmem:[#allocation43_spill] sm:$0xff] %v9013_v0  ;;  %v9016_v36 = vld [vmem:[#allocation2 + $0xd0] sm:$0xff]  ;;  %11323 = vst [vmem:[#allocation45_spill] sm:$0xff] %v9019_v16 }
 0x547   :  { %2591 = vmatpush1.msra.mxu0 %v9003_v62  ;;  %5569 = vmatpush3.msra.mxu1 %v9006_v17  ;;  %11322 = vst [vmem:[#allocation44_spill] sm:$0xff] %v9016_v36  ;;  %v9023_v17 = vld [vmem:[#allocation2 + $0xa8] sm:$0xff]  ;;  %v9029_v62 = vld [vmem:[#allocation2 + $0x98] sm:$0xff] }
 0x548   :  { %2592 = vmatprep.subr.mxu0 %v9009_v19  ;;  %5570 = vmatprep.subr.mxu1 %v10980_v44  ;;  %11324 = vst [vmem:[#allocation46_spill] sm:$0xff] %v9023_v17  ;;  %v9026_v19 = vld [vmem:[#allocation2 + $0xb8] sm:$0xff]  ;;  %11326 = vst [vmem:[#allocation48_spill] sm:$0xff] %v9029_v62 }
 0x549   :  { %2593 = vmatpush1.msra.mxu0 %v9013_v0  ;;  %5571 = vmatpush3.msra.mxu1 %v9016_v36  ;;  %11325 = vst [vmem:[#allocation47_spill] sm:$0xff] %v9026_v19  ;;  %v9033_v36 = vld [vmem:[#allocation2 + $0x90] sm:$0xff]  ;;  %v9039_v0 = vld [vmem:[#allocation2 + $0x80] sm:$0xff] }
 0x54a   :  { %2594 = vmatprep.subr.mxu0 %v9019_v16  ;;  %5572 = vmatprep.subr.mxu1 %v10980_v44  ;;  %11327 = vst [vmem:[#allocation49_spill] sm:$0xff] %v9033_v36  ;;  %v9036_v16 = vld [vmem:[#allocation2 + $0xa0] sm:$0xff]  ;;  %11329 = vst [vmem:[#allocation51_spill] sm:$0xff] %v9039_v0 }
 0x54b   :  { %2595 = vmatpush1.msra.mxu0 %v9023_v17  ;;  %5573 = vmatpush3.msra.mxu1 %v9026_v19  ;;  %11328 = vst [vmem:[#allocation50_spill] sm:$0xff] %v9036_v16  ;;  %v9043_v19 = vld [vmem:[#allocation2 + $0x78] sm:$0xff]  ;;  %v9049_v17 = vld [vmem:[#allocation2 + $0x68] sm:$0xff] }
 0x54c   :  { %2596 = vmatprep.subr.mxu0 %v9029_v62  ;;  %5574 = vmatprep.subr.mxu1 %v10980_v44  ;;  %11330 = vst [vmem:[#allocation52_spill] sm:$0xff] %v9043_v19  ;;  %v9046_v62 = vld [vmem:[#allocation2 + $0x88] sm:$0xff]  ;;  %11332 = vst [vmem:[#allocation54_spill] sm:$0xff] %v9049_v17 }
 0x54d   :  { %2597 = vmatpush1.msra.mxu0 %v9033_v36  ;;  %5575 = vmatpush3.msra.mxu1 %v9036_v16  ;;  %11331 = vst [vmem:[#allocation53_spill] sm:$0xff] %v9046_v62  ;;  %v9053_v16 = vld [vmem:[#allocation2 + $0x60] sm:$0xff]  ;;  %v9059_v36 = vld [vmem:[#allocation2 + $0x50] sm:$0xff] }
 0x54e   :  { %2598 = vmatprep.subr.mxu0 %v9039_v0  ;;  %5576 = vmatprep.subr.mxu1 %v10980_v44  ;;  %11333 = vst [vmem:[#allocation55_spill] sm:$0xff] %v9053_v16  ;;  %v9056_v0 = vld [vmem:[#allocation2 + $0x70] sm:$0xff]  ;;  %11335 = vst [vmem:[#allocation57_spill] sm:$0xff] %v9059_v36 }
 0x54f   :  { %2599 = vmatpush1.msra.mxu0 %v9043_v19  ;;  %5577 = vmatpush3.msra.mxu1 %v9046_v62  ;;  %11334 = vst [vmem:[#allocation56_spill] sm:$0xff] %v9056_v0  ;;  %v9063_v62 = vld [vmem:[#allocation2 + $0x48] sm:$0xff]  ;;  %v9069_v19 = vld [vmem:[#allocation2 + $0x38] sm:$0xff] }
 0x550   :  { %2600 = vmatprep.subr.mxu0 %v9049_v17  ;;  %5578 = vmatprep.subr.mxu1 %v10980_v44  ;;  %11336 = vst [vmem:[#allocation58_spill] sm:$0xff] %v9063_v62  ;;  %v9066_v17 = vld [vmem:[#allocation2 + $0x58] sm:$0xff]  ;;  %11338 = vst [vmem:[#allocation60_spill] sm:$0xff] %v9069_v19 }
 0x551   :  { %2601 = vmatpush1.msra.mxu0 %v9053_v16  ;;  %5579 = vmatpush3.msra.mxu1 %v9056_v0  ;;  %11337 = vst [vmem:[#allocation59_spill] sm:$0xff] %v9066_v17  ;;  %v9073_v0 = vld [vmem:[#allocation2 + $0x30] sm:$0xff]  ;;  %v9079_v16 = vld [vmem:[#allocation2 + $0x20] sm:$0xff] }
 0x552   :  { %2602 = vmatprep.subr.mxu0 %v9059_v36  ;;  %5580 = vmatprep.subr.mxu1 %v10980_v44  ;;  %11339 = vst [vmem:[#allocation61_spill] sm:$0xff] %v9073_v0  ;;  %v9076_v36 = vld [vmem:[#allocation2 + $0x40] sm:$0xff]  ;;  %11341 = vst [vmem:[#allocation63_spill] sm:$0xff] %v9079_v16 }
 0x553   :  { %2603 = vmatpush1.msra.mxu0 %v9063_v62  ;;  %5581 = vmatpush3.msra.mxu1 %v9066_v17  ;;  %11340 = vst [vmem:[#allocation62_spill] sm:$0xff] %v9076_v36  ;;  %v9083_v17 = vld [vmem:[#allocation2 + $0x18] sm:$0xff]  ;;  %v9089_v62 = vld [vmem:[#allocation2 + $0x8] sm:$0xff] }
 0x554   :  { %2604 = vmatprep.subr.mxu0 %v9069_v19  ;;  %5582 = vmatprep.subr.mxu1 %v10980_v44  ;;  %11342 = vst [vmem:[#allocation66_spill] sm:$0xff] %v9083_v17  ;;  %v9086_v19 = vld [vmem:[#allocation2 + $0x28] sm:$0xff]  ;;  %11344 = vst [vmem:[#allocation74_spill] sm:$0xff] %v9089_v62 }
 0x555   :  { %2605 = vmatpush1.msra.mxu0 %v9073_v0  ;;  %5583 = vmatpush3.msra.mxu1 %v9076_v36  ;;  %11343 = vst [vmem:[#allocation67_spill] sm:$0xff] %v9086_v19  ;;  %v9093_v36 = vld [vmem:[#allocation2] sm:$0xff] }
 0x556   :  { %2606 = vmatprep.subr.mxu0 %v9079_v16  ;;  %5584 = vmatprep.subr.mxu1 %v10980_v44  ;;  %11345 = vst [vmem:[#allocation87_spill] sm:$0xff] %v9093_v36  ;;  %v9096_v16 = vld [vmem:[#allocation2 + $0x10] sm:$0xff] }
 0x557   :  { %2607 = vmatpush1.msra.mxu0 %v9083_v17  ;;  %5585 = vmatpush3.msra.mxu1 %v9086_v19  ;;  %11346 = vst [vmem:[#allocation88_spill] sm:$0xff] %v9096_v16  ;;  %v9102_v19 = vld [vmem:[#allocation4 + $0x170] sm:$0xff] }
 0x558   :  { %2608 = vmatprep.subr.mxu0 %v9089_v62  ;;  %5586 = vmatprep.subr.mxu1 %v10980_v44  ;;  %11347 = vst [vmem:[#allocation89_spill] sm:$0xff] %v9102_v19 }
 0x559   :  { %2609 = vmatpush1.msra.mxu0 %v9093_v36  ;;  %5587 = vmatpush3.msra.mxu1 %v9096_v16 }
 0x55a   :  { %2642 = vmatprep.mubr.f32.mxu0 %v10980_v44  ;;  %5588 = vmatprep.mubr.msk.f32.mxu1 %vm6630_vm2, %v10980_v44 }
 0x55b   :  { %2719 = vmatprep.subr.mxu0 %v9102_v19  ;;  %5591 = vmatprep.subr.mxu1 %v10980_v44 }
 0x5b6   :  { %v2248_v62 = vpop.f32.mrf.mxu1  ;;  %v2177_v0 = vpop.f32.mrf.mxu0 }
 0x5b7   :  { %v2178_v36 = vadd.f32 %v2177_v0, %v11254_v42 }
 0x5b8   :  { %v5485_v17 = vpop.f32.mrf.mxu1  ;;  %v2179_v63 = vpop.f32.mrf.mxu0 }
 0x5b9   :  { %v2249_v17 = vadd.f32 %v2248_v62, %v7657_v40  ;;  %v11350_v62 = vld [vmem:[#allocation84_spill] sm:$0xff] }
 0x5d7   :  { %v2318_v13 = vpop.f32.mrf.mxu0  ;;  %v2389_v21 = vpop.f32.mrf.mxu1 }
 0x5d8   :  { %v2393_v16 = vadd.f32 %v2318_v13, %v2178_v36  ;;  %v2407_v19 = vadd.f32 %v8546_v39, %v2389_v21 }
 0x5d9   :  { %v5520_v46 = vpop.f32.mrf.mxu1  ;;  %v2320_v57 = vpop.f32.mrf.mxu0 }
 0x5da   :  { %v4615_v60 = vmul.f32 -1.442695, %v2393_v16 }
 0x5dc   :  { %6024 = vpow2.f32 %v4615_v60  ;;  %v11349_v60 = vld [vmem:[#allocation73_spill] sm:$0xff] }
 0x5e9   :  { %v6025_v25 = vpop.eup %6024 }
 0x5ea   :  { %v2397_v9 = vadd.f32 1.0, %v6025_v25 }
 0x5ec   :  { %6026 = vrcp.f32 %v2397_v9 }
 0x5f9   :  { %v6027_v48 = vpop.eup %6026  ;;  %v2481_v47 = vpop.f32.mrf.mxu0 }
 0x5fa   :  { %v2552_v43 = vpop.f32.mrf.mxu1  ;;  %v2408_v41 = vmul.f32 %v6027_v48, %v2407_v19  ;;  %v2556_v0 = vadd.f32 %v2481_v47, %v11348_v38  ;;  %v9116_v48 = vld [vmem:[%s10526_s5] ss:$0 sm:$0xff]  ;;  %v2180_v47 = vadd.f32 %v2179_v63, %v7664_v14 }
 0x5fb   :  { %v2483_v13 = vpop.f32.mrf.mxu0 }
 0x5fc   :  { %v5555_v42 = vpop.f32.mrf.mxu1  ;;  %v9110_v26 = vadd.f32 %v2408_v41, %v2249_v17  ;;  %v4617_v46 = vmul.f32 -1.442695, %v2556_v0  ;;  %v2563_v25 = vadd.f32 %v2483_v13, %v11349_v60  ;;  %v2400_v17 = vadd.f32 %v2320_v57, %v2180_v47  ;;  %v9129_v57 = vld [vmem:[#allocation4 + $0x178] sm:$0xff]  ;;  %v9152_v47 = vld [vmem:[#allocation4 + $0x128] sm:$0xff] }
 0x5fd   :  { %v2570_v42 = vadd.f32 %v9116_v48, %v2552_v43  ;;  %v9126_v43 = vld [vmem:[#allocation4 + $0x168] sm:$0xff] }
 0x5fe   :  { %6028 = vpow2.f32 %v4617_v46  ;;  %v4618_v9 = vmul.f32 -1.442695, %v2563_v25  ;;  %v4616_v0 = vmul.f32 -1.442695, %v2400_v17  ;;  %v9162_v17 = vld [vmem:[#allocation4 + $0x110] sm:$0xff] }
 0x5ff   :  { %11351 = vst [vmem:[#allocation70_spill] sm:$0xff] %v9162_v17 }
 0x600   :  { %6030 = vpow2.f32 %v4618_v9 }
 0x60b   :  { %v6029_v36 = vpop.eup %6028 }
 0x60c   :  { %v2560_v39 = vadd.f32 1.0, %v6029_v36 }
 0x60d   :  { %v6031_v21 = vpop.eup %6030 }
 0x60e   :  { %6032 = vrcp.f32 %v2560_v39  ;;  %v2567_v16 = vadd.f32 1.0, %v6031_v21  ;;  %v9132_v39 = vld [vmem:[#allocation4 + $0x158] sm:$0xff]  ;;  %v9139_v21 = vld [vmem:[#allocation4 + $0x160] sm:$0xff] }
 0x610   :  { %6034 = vrcp.f32 %v2567_v16  ;;  %v9142_v16 = vld [vmem:[#allocation4 + $0x140] sm:$0xff] }
 0x61b   :  { %v6033_v38 = vpop.eup %6032 }
 0x61c   :  { %v2571_v41 = vmul.f32 %v6033_v38, %v2570_v42  ;;  %v9146_v38 = vld [vmem:[#allocation4 + $0x138] sm:$0xff] }
 0x61d   :  { %v6035_v46 = vpop.eup %6034 }
 0x61e   :  { %v2572_v19 = vadd.f32 %v2571_v41, %v11350_v62  ;;  %v2574_v13 = vsub.f32 1.0, %v6035_v46  ;;  %v2576_v9 = vmul.f32 %v6035_v46, %v8556_v1  ;;  %v9136_v1 = vld [vmem:[#allocation4 + $0x150] sm:$0xff]  ;;  %v9149_v41 = vld [vmem:[#allocation4 + $0x148] sm:$0xff]  ;;  %v9156_v62 = vld [vmem:[#allocation4 + $0x120] sm:$0xff] }
 0x61f   :  { %v9169_v46 = vld [vmem:[#allocation4 + $0x118] sm:$0xff] }
 0x620   :  { %6036 = vtanh.f32 %v2572_v19  ;;  %v9159_v19 = vld [vmem:[#allocation4 + $0x130] sm:$0xff]  ;;  %11353 = vst [vmem:[#allocation81_spill] sm:$0xff] %v9169_v46 }
 0x621   :  { %6038 = vpow2.f32 %v4616_v0  ;;  %v9166_v0 = vld [vmem:[#allocation4 + $0x108] sm:$0xff] }
 0x622   :  { %11352 = vst [vmem:[#allocation71_spill] sm:$0xff] %v9166_v0 }
 0x62d   :  { %v6037_v60 = vpop.eup %6036 }
 0x62e   :  { %v2575_v25 = vmul.f32 %v6037_v60, %v2574_v13  ;;  %v6039_v63 = vpop.eup %6038  ;;  %v9172_v13 = vld [vmem:[#allocation4 + $0xf8] sm:$0xff]  ;;  %v9177_v60 = vld [vmem:[#allocation4 + $0xf0] sm:$0xff] }
 0x62f   :  { %v2404_v42 = vadd.f32 1.0, %v6039_v63  ;;  %11354 = vst [vmem:[#allocation90_spill] sm:$0xff] %v9172_v13  ;;  %11355 = vst [vmem:[#allocation91_spill] sm:$0xff] %v9177_v60  ;;  %v9187_v63 = vld [vmem:[#allocation4 + $0xd8] sm:$0xff] }
 0x630   :  { %v9122_v36 = vadd.f32 %v2576_v9, %v2575_v25  ;;  %v9180_v25 = vld [vmem:[#allocation4 + $0x100] sm:$0xff]  ;;  %11358 = vst [vmem:[#allocation94_spill] sm:$0xff] %v9187_v63 }
 0x631   :  { %6040 = vrcp.f32 %v2404_v42  ;;  %11356 = vst [vmem:[#allocation92_spill] sm:$0xff] %v9180_v25  ;;  %v9183_v9 = vld [vmem:[#allocation4 + $0xe0] sm:$0xff]  ;;  %v9190_v42 = vld [vmem:[#allocation4 + $0xe8] sm:$0xff] }
 0x632   :  { %2643 = vmatmul.mubr.f32.vlgmr.msra.gmra.mxu0 %v9122_v36  ;;  %5589 = vmatmul.mubr.f32.vlgmr.msra.gmra.mxu1 %v9122_v36  ;;  %6042 = vtanh.f32 %v9110_v26  ;;  %11357 = vst [vmem:[#allocation93_spill] sm:$0xff] %v9183_v9  ;;  %11359 = vst [vmem:[#allocation95_spill] sm:$0xff] %v9190_v42  ;;  %v9193_v26 = vld [vmem:[#allocation4 + $0xc8] sm:$0xff] }
 0x633   :  { %2720 = vmatpush1.msra.mxu0 %v9126_v43  ;;  %5592 = vmatpush3.msra.mxu1 %v9129_v57  ;;  %11360 = vst [vmem:[#allocation96_spill] sm:$0xff] %v9193_v26 }
 0x634   :  { %2721 = vmatprep.subr.mxu0 %v9132_v39  ;;  %5593 = vmatprep.subr.mxu1 %v10980_v44 }
 0x635   :  { %2722 = vmatpush1.msra.mxu0 %v9136_v1  ;;  %5594 = vmatpush3.msra.mxu1 %v9139_v21 }
 0x636   :  { %2723 = vmatprep.subr.mxu0 %v9142_v16  ;;  %5595 = vmatprep.subr.mxu1 %v10980_v44 }
 0x637   :  { %2724 = vmatpush1.msra.mxu0 %v9146_v38  ;;  %5596 = vmatpush3.msra.mxu1 %v9149_v41 }
 0x638   :  { %2725 = vmatprep.subr.mxu0 %v9152_v47  ;;  %5597 = vmatprep.subr.mxu1 %v10980_v44 }
 0x639   :  { %2726 = vmatpush1.msra.mxu0 %v9156_v62  ;;  %5598 = vmatpush3.msra.mxu1 %v9159_v19 }
 0x63a   :  { %2727 = vmatprep.subr.mxu0 %v9162_v17  ;;  %5599 = vmatprep.subr.mxu1 %v10980_v44  ;;  %v9274_v17 = vld [vmem:[#allocation4 + $0x8] sm:$0xff] }
 0x63b   :  { %2728 = vmatpush1.msra.mxu0 %v9166_v0  ;;  %5600 = vmatpush3.msra.mxu1 %v9169_v46  ;;  %v9253_v46 = vld [vmem:[#allocation4 + $0x38] sm:$0xff]  ;;  %v9263_v0 = vld [vmem:[#allocation4 + $0x20] sm:$0xff] }
 0x63c   :  { %2729 = vmatprep.subr.mxu0 %v9172_v13  ;;  %5601 = vmatprep.subr.mxu1 %v10980_v44  ;;  %v9243_v13 = vld [vmem:[#allocation4 + $0x50] sm:$0xff]  ;;  %11378 = vst [vmem:[#allocation114_spill] sm:$0xff] %v9253_v46 }
 0x63d   :  { %2730 = vmatpush1.msra.mxu0 %v9177_v60  ;;  %5602 = vmatpush3.msra.mxu1 %v9180_v25  ;;  %v9197_v25 = vld [vmem:[#allocation4 + $0xc0] sm:$0xff]  ;;  %v9203_v60 = vld [vmem:[#allocation4 + $0xb0] sm:$0xff]  ;;  %11375 = vst [vmem:[#allocation111_spill] sm:$0xff] %v9243_v13 }
 0x63e   :  { %2731 = vmatprep.subr.mxu0 %v9183_v9  ;;  %5603 = vmatprep.subr.mxu1 %v10980_v44  ;;  %11361 = vst [vmem:[#allocation97_spill] sm:$0xff] %v9197_v25  ;;  %v9200_v9 = vld [vmem:[#allocation4 + $0xd0] sm:$0xff]  ;;  %11363 = vst [vmem:[#allocation99_spill] sm:$0xff] %v9203_v60 }
 0x63f   :  { %2732 = vmatpush1.msra.mxu0 %v9187_v63  ;;  %5604 = vmatpush3.msra.mxu1 %v9190_v42  ;;  %11362 = vst [vmem:[#allocation98_spill] sm:$0xff] %v9200_v9  ;;  %v9207_v42 = vld [vmem:[#allocation4 + $0xa8] sm:$0xff]  ;;  %v9213_v63 = vld [vmem:[#allocation4 + $0x98] sm:$0xff] }
 0x640   :  { %2733 = vmatprep.subr.mxu0 %v9193_v26  ;;  %5605 = vmatprep.subr.mxu1 %v10980_v44  ;;  %11364 = vst [vmem:[#allocation100_spill] sm:$0xff] %v9207_v42  ;;  %v9210_v26 = vld [vmem:[#allocation4 + $0xb8] sm:$0xff]  ;;  %11366 = vst [vmem:[#allocation102_spill] sm:$0xff] %v9213_v63 }
 0x641   :  { %2734 = vmatpush1.msra.mxu0 %v9197_v25  ;;  %5606 = vmatpush3.msra.mxu1 %v9200_v9  ;;  %11365 = vst [vmem:[#allocation101_spill] sm:$0xff] %v9210_v26  ;;  %v9217_v9 = vld [vmem:[#allocation4 + $0x90] sm:$0xff]  ;;  %v9223_v25 = vld [vmem:[#allocation4 + $0x80] sm:$0xff] }
 0x642   :  { %2735 = vmatprep.subr.mxu0 %v9203_v60  ;;  %5607 = vmatprep.subr.mxu1 %v10980_v44  ;;  %11367 = vst [vmem:[#allocation103_spill] sm:$0xff] %v9217_v9  ;;  %v9220_v60 = vld [vmem:[#allocation4 + $0xa0] sm:$0xff]  ;;  %11369 = vst [vmem:[#allocation105_spill] sm:$0xff] %v9223_v25 }
 0x643   :  { %2736 = vmatpush1.msra.mxu0 %v9207_v42  ;;  %5608 = vmatpush3.msra.mxu1 %v9210_v26  ;;  %11368 = vst [vmem:[#allocation104_spill] sm:$0xff] %v9220_v60  ;;  %v9227_v26 = vld [vmem:[#allocation4 + $0x78] sm:$0xff]  ;;  %v6041_v42 = vpop.eup %6040 }
 0x644   :  { %2737 = vmatprep.subr.mxu0 %v9213_v63  ;;  %5609 = vmatprep.subr.mxu1 %v10980_v44  ;;  %11370 = vst [vmem:[#allocation106_spill] sm:$0xff] %v9227_v26  ;;  %v9230_v63 = vld [vmem:[#allocation4 + $0x88] sm:$0xff] }
 0x645   :  { %2738 = vmatpush1.msra.mxu0 %v9217_v9  ;;  %5610 = vmatpush3.msra.mxu1 %v9220_v60  ;;  %11371 = vst [vmem:[#allocation107_spill] sm:$0xff] %v9230_v63  ;;  %v9233_v9 = vld [vmem:[#allocation4 + $0x68] sm:$0xff]  ;;  %v9237_v60 = vld [vmem:[#allocation4 + $0x60] sm:$0xff] }
 0x646   :  { %2739 = vmatprep.subr.mxu0 %v9223_v25  ;;  %5611 = vmatprep.subr.mxu1 %v10980_v44  ;;  %11372 = vst [vmem:[#allocation108_spill] sm:$0xff] %v9233_v9  ;;  %11373 = vst [vmem:[#allocation109_spill] sm:$0xff] %v9237_v60  ;;  %v9240_v25 = vld [vmem:[#allocation4 + $0x70] sm:$0xff] }
 0x647   :  { %2740 = vmatpush1.msra.mxu0 %v9227_v26  ;;  %5612 = vmatpush3.msra.mxu1 %v9230_v63  ;;  %11374 = vst [vmem:[#allocation110_spill] sm:$0xff] %v9240_v25  ;;  %v6043_v26 = vpop.eup %6042  ;;  %v9247_v63 = vld [vmem:[#allocation4 + $0x48] sm:$0xff] }
 0x648   :  { %2741 = vmatprep.subr.mxu0 %v9233_v9  ;;  %5613 = vmatprep.subr.mxu1 %v10980_v44  ;;  %11376 = vst [vmem:[#allocation112_spill] sm:$0xff] %v9247_v63  ;;  %v9250_v9 = vld [vmem:[#allocation4 + $0x58] sm:$0xff] }
 0x649   :  { %2742 = vmatpush1.msra.mxu0 %v9237_v60  ;;  %5614 = vmatpush3.msra.mxu1 %v9240_v25  ;;  %11377 = vst [vmem:[#allocation113_spill] sm:$0xff] %v9250_v9  ;;  %v2411_v60 = vsub.f32 1.0, %v6041_v42  ;;  %v9257_v25 = vld [vmem:[#allocation4 + $0x30] sm:$0xff] }
 0x64a   :  { %2743 = vmatprep.subr.mxu0 %v9243_v13  ;;  %5615 = vmatprep.subr.mxu1 %v10980_v44  ;;  %11379 = vst [vmem:[#allocation115_spill] sm:$0xff] %v9257_v25  ;;  %v9260_v13 = vld [vmem:[#allocation4 + $0x40] sm:$0xff] }
 0x64b   :  { %2744 = vmatpush1.msra.mxu0 %v9247_v63  ;;  %5616 = vmatpush3.msra.mxu1 %v9250_v9  ;;  %v2412_v63 = vmul.f32 %v6043_v26, %v2411_v60  ;;  %v9267_v9 = vld [vmem:[#allocation4 + $0x18] sm:$0xff]  ;;  %v9278_v60 = vld [vmem:[#allocation4] sm:$0xff] }
 0x64c   :  { %2745 = vmatprep.subr.mxu0 %v9253_v46  ;;  %5617 = vmatprep.subr.mxu1 %v10980_v44  ;;  %11380 = vst [vmem:[#allocation68_spill] sm:$0xff] %v9267_v9  ;;  %v9270_v46 = vld [vmem:[#allocation4 + $0x28] sm:$0xff] }
 0x64d   :  { %2746 = vmatpush1.msra.mxu0 %v9257_v25  ;;  %5618 = vmatpush3.msra.mxu1 %v9260_v13  ;;  %v2413_v25 = vmul.f32 %v6041_v42, %v8623_v7  ;;  %v11381_v7 = vld [vmem:[#allocation12_spill] sm:$0xff]  ;;  %v11421_v42 = vld [vmem:[#allocation50_spill] sm:$0xff] }
 0x64e   :  { %2747 = vmatprep.subr.mxu0 %v9263_v0  ;;  %5619 = vmatprep.subr.mxu1 %v10980_v44 }
 0x64f   :  { %2748 = vmatpush1.msra.mxu0 %v9267_v9  ;;  %5620 = vmatpush3.msra.mxu1 %v9270_v46  ;;  %v9282_v26 = vadd.f32 %v2413_v25, %v2412_v63  ;;  %v9284_v9 = vld [vmem:[#allocation4 + $0x10] sm:$0xff]  ;;  %v11419_v25 = vld [vmem:[#allocation48_spill] sm:$0xff]  ;;  %v11420_v63 = vld [vmem:[#allocation49_spill] sm:$0xff] }
 0x650   :  { %2749 = vmatprep.subr.mxu0 %v9274_v17  ;;  %5621 = vmatprep.subr.mxu1 %v10980_v44 }
 0x651   :  { %2750 = vmatpush1.msra.mxu0 %v9278_v60  ;;  %2783 = vmatprep.mubr.f32.mxu0 %v10980_v44 }
 0x652   :  { %5622 = vmatpush3.msra.mxu1 %v9284_v9  ;;  %5623 = vmatprep.mubr.msk.f32.mxu1 %vm6630_vm2, %v10980_v44 }
 0x653   :  { %2784 = vmatmul.mubr.f32.vlgmr.msra.gmra.mxu0 %v9282_v26  ;;  %5624 = vmatmul.mubr.f32.vlgmr.msra.gmra.mxu1 %v9282_v26 }
 0x654   :  { %2882 = vmatprep.subr.mxu0 %v8633_v12  ;;  %5626 = vmatprep.subr.mxu1 %v10980_v44  ;;  %v11382_v12 = vld [vmem:[#allocation10_spill] sm:$0xff] }
 0x655   :  { %2883 = vmatpush1.msra.mxu0 %v8640_v11  ;;  %5627 = vmatpush3.msra.mxu1 %v8646_v5  ;;  %v11383_v11 = vld [vmem:[#allocation11_spill] sm:$0xff]  ;;  %v11384_v5 = vld [vmem:[#allocation13_spill] sm:$0xff] }
 0x656   :  { %2884 = vmatprep.subr.mxu0 %v8652_v56  ;;  %5628 = vmatprep.subr.mxu1 %v10980_v44  ;;  %v11385_v56 = vld [vmem:[#allocation14_spill] sm:$0xff] }
 0x657   :  { %2885 = vmatpush1.msra.mxu0 %v8659_v4  ;;  %5629 = vmatpush3.msra.mxu1 %v8665_v49  ;;  %v11386_v4 = vld [vmem:[#allocation15_spill] sm:$0xff]  ;;  %v11387_v49 = vld [vmem:[#allocation16_spill] sm:$0xff] }
 0x658   :  { %2886 = vmatprep.subr.mxu0 %v8671_v22  ;;  %5630 = vmatprep.subr.mxu1 %v10980_v44  ;;  %v11388_v22 = vld [vmem:[#allocation17_spill] sm:$0xff] }
 0x659   :  { %2887 = vmatpush1.msra.mxu0 %v8678_v27  ;;  %5631 = vmatpush3.msra.mxu1 %v8684_v28  ;;  %v11389_v27 = vld [vmem:[#allocation18_spill] sm:$0xff]  ;;  %v11390_v28 = vld [vmem:[#allocation19_spill] sm:$0xff] }
 0x65a   :  { %2888 = vmatprep.subr.mxu0 %v8690_v29  ;;  %5632 = vmatprep.subr.mxu1 %v10980_v44  ;;  %v11391_v29 = vld [vmem:[#allocation20_spill] sm:$0xff] }
 0x65b   :  { %2889 = vmatpush1.msra.mxu0 %v8697_v31  ;;  %5633 = vmatpush3.msra.mxu1 %v8703_v32  ;;  %v11392_v31 = vld [vmem:[#allocation22_spill] sm:$0xff]  ;;  %v11393_v32 = vld [vmem:[#allocation21_spill] sm:$0xff] }
 0x65c   :  { %2890 = vmatprep.subr.mxu0 %v8709_v33  ;;  %5634 = vmatprep.subr.mxu1 %v10980_v44  ;;  %v11394_v33 = vld [vmem:[#allocation23_spill] sm:$0xff] }
 0x65d   :  { %2891 = vmatpush1.msra.mxu0 %v8716_v34  ;;  %5635 = vmatpush3.msra.mxu1 %v8722_v20  ;;  %v11395_v34 = vld [vmem:[#allocation24_spill] sm:$0xff]  ;;  %v11396_v20 = vld [vmem:[#allocation25_spill] sm:$0xff] }
 0x65e   :  { %2892 = vmatprep.subr.mxu0 %v8728_v45  ;;  %5636 = vmatprep.subr.mxu1 %v10980_v44  ;;  %v11397_v45 = vld [vmem:[#allocation26_spill] sm:$0xff] }
 0x65f   :  { %2893 = vmatpush1.msra.mxu0 %v8735_v2  ;;  %5637 = vmatpush3.msra.mxu1 %v8741_v8  ;;  %v11398_v2 = vld [vmem:[#allocation27_spill] sm:$0xff]  ;;  %v11399_v8 = vld [vmem:[#allocation28_spill] sm:$0xff] }
 0x660   :  { %2894 = vmatprep.subr.mxu0 %v8747_v24  ;;  %5638 = vmatprep.subr.mxu1 %v10980_v44  ;;  %v11400_v24 = vld [vmem:[#allocation29_spill] sm:$0xff] }
 0x661   :  { %2895 = vmatpush1.msra.mxu0 %v8754_v61  ;;  %5639 = vmatpush3.msra.mxu1 %v8760_v23  ;;  %v11401_v61 = vld [vmem:[#allocation30_spill] sm:$0xff]  ;;  %v11402_v23 = vld [vmem:[#allocation31_spill] sm:$0xff] }
 0x662   :  { %2896 = vmatprep.subr.mxu0 %v8766_v15  ;;  %5640 = vmatprep.subr.mxu1 %v10980_v44  ;;  %v11403_v15 = vld [vmem:[#allocation32_spill] sm:$0xff] }
 0x663   :  { %2897 = vmatpush1.msra.mxu0 %v8773_v52  ;;  %5641 = vmatpush3.msra.mxu1 %v8779_v55  ;;  %v11404_v52 = vld [vmem:[#allocation33_spill] sm:$0xff]  ;;  %v11405_v55 = vld [vmem:[#allocation34_spill] sm:$0xff] }
 0x664   :  { %2898 = vmatprep.subr.mxu0 %v8785_v37  ;;  %5642 = vmatprep.subr.mxu1 %v10980_v44  ;;  %v11406_v37 = vld [vmem:[#allocation35_spill] sm:$0xff] }
 0x665   :  { %2899 = vmatpush1.msra.mxu0 %v8792_v35  ;;  %5643 = vmatpush3.msra.mxu1 %v8798_v6  ;;  %v11407_v35 = vld [vmem:[#allocation36_spill] sm:$0xff]  ;;  %v11408_v6 = vld [vmem:[#allocation37_spill] sm:$0xff] }
 0x666   :  { %2900 = vmatprep.subr.mxu0 %v8804_v3  ;;  %5644 = vmatprep.subr.mxu1 %v10980_v44  ;;  %v11409_v3 = vld [vmem:[#allocation38_spill] sm:$0xff] }
 0x667   :  { %2901 = vmatpush1.msra.mxu0 %v8811_v50  ;;  %5645 = vmatpush3.msra.mxu1 %v8817_v51  ;;  %v11410_v50 = vld [vmem:[#allocation39_spill] sm:$0xff]  ;;  %v11411_v51 = vld [vmem:[#allocation40_spill] sm:$0xff] }
 0x668   :  { %2902 = vmatprep.subr.mxu0 %v8823_v53  ;;  %5646 = vmatprep.subr.mxu1 %v10980_v44  ;;  %v11412_v53 = vld [vmem:[#allocation41_spill] sm:$0xff] }
 0x669   :  { %2903 = vmatpush1.msra.mxu0 %v8830_v54  ;;  %5647 = vmatpush3.msra.mxu1 %v8836_v10  ;;  %v11413_v54 = vld [vmem:[#allocation42_spill] sm:$0xff]  ;;  %v11414_v10 = vld [vmem:[#allocation43_spill] sm:$0xff] }
 0x66a   :  { %2904 = vmatprep.subr.mxu0 %v8842_v59  ;;  %5648 = vmatprep.subr.mxu1 %v10980_v44  ;;  %v11415_v59 = vld [vmem:[#allocation44_spill] sm:$0xff] }
 0x66b   :  { %2905 = vmatpush1.msra.mxu0 %v8849_v58  ;;  %5649 = vmatpush3.msra.mxu1 %v8855_v18  ;;  %v11416_v58 = vld [vmem:[#allocation45_spill] sm:$0xff]  ;;  %v11417_v18 = vld [vmem:[#allocation46_spill] sm:$0xff] }
 0x66c   :  { %2906 = vmatprep.subr.mxu0 %v8861_v30  ;;  %5650 = vmatprep.subr.mxu1 %v10980_v44  ;;  %v11418_v30 = vld [vmem:[#allocation47_spill] sm:$0xff] }
 0x66d   :  { %2907 = vmatpush1.msra.mxu0 %v11381_v7  ;;  %5651 = vmatpush3.msra.mxu1 %v11382_v12  ;;  %v11422_v7 = vld [vmem:[#allocation51_spill] sm:$0xff]  ;;  %v11423_v12 = vld [vmem:[#allocation52_spill] sm:$0xff] }
 0x66e   :  { %2908 = vmatprep.subr.mxu0 %v11383_v11  ;;  %5652 = vmatprep.subr.mxu1 %v10980_v44  ;;  %v11424_v11 = vld [vmem:[#allocation53_spill] sm:$0xff] }
 0x66f   :  { %2909 = vmatpush1.msra.mxu0 %v11384_v5  ;;  %5653 = vmatpush3.msra.mxu1 %v11385_v56  ;;  %v11425_v5 = vld [vmem:[#allocation54_spill] sm:$0xff]  ;;  %v11426_v56 = vld [vmem:[#allocation55_spill] sm:$0xff] }
 0x670   :  { %2910 = vmatprep.subr.mxu0 %v11386_v4  ;;  %5654 = vmatprep.subr.mxu1 %v10980_v44  ;;  %v11427_v4 = vld [vmem:[#allocation56_spill] sm:$0xff] }
 0x671   :  { %2911 = vmatpush1.msra.mxu0 %v11387_v49  ;;  %5655 = vmatpush3.msra.mxu1 %v11388_v22  ;;  %v11428_v49 = vld [vmem:[#allocation57_spill] sm:$0xff]  ;;  %v11429_v22 = vld [vmem:[#allocation58_spill] sm:$0xff] }
 0x672   :  { %2912 = vmatprep.subr.mxu0 %v11389_v27  ;;  %5656 = vmatprep.subr.mxu1 %v10980_v44  ;;  %v11430_v27 = vld [vmem:[#allocation59_spill] sm:$0xff] }
 0x673   :  { %2913 = vmatpush1.msra.mxu0 %v11390_v28  ;;  %2946 = vmatprep.mubr.f32.mxu0 %v10980_v44  ;;  %v11431_v28 = vld [vmem:[#allocation60_spill] sm:$0xff] }
 0x674   :  { %5657 = vmatpush3.msra.mxu1 %v11391_v29  ;;  %5658 = vmatprep.mubr.msk.f32.mxu1 %vm6630_vm2, %v10980_v44  ;;  %v11432_v29 = vld [vmem:[#allocation61_spill] sm:$0xff] }
 0x675   :  { %2947 = vmatmul.mubr.f32.vlgmr.msra.gmra.mxu0 %v9122_v36  ;;  %5659 = vmatmul.mubr.f32.vlgmr.msra.gmra.mxu1 %v9122_v36 }
 0x676   :  { %3045 = vmatprep.subr.mxu0 %v11392_v31  ;;  %5661 = vmatprep.subr.mxu1 %v10980_v44  ;;  %v11433_v31 = vld [vmem:[#allocation62_spill] sm:$0xff] }
 0x677   :  { %3046 = vmatpush1.msra.mxu0 %v11393_v32  ;;  %5662 = vmatpush3.msra.mxu1 %v11394_v33  ;;  %v11434_v32 = vld [vmem:[#allocation63_spill] sm:$0xff]  ;;  %v11435_v33 = vld [vmem:[#allocation66_spill] sm:$0xff] }
 0x678   :  { %3047 = vmatprep.subr.mxu0 %v11395_v34  ;;  %5663 = vmatprep.subr.mxu1 %v10980_v44  ;;  %v11436_v34 = vld [vmem:[#allocation67_spill] sm:$0xff] }
 0x679   :  { %3048 = vmatpush1.msra.mxu0 %v11396_v20  ;;  %5664 = vmatpush3.msra.mxu1 %v11397_v45  ;;  %v11437_v20 = vld [vmem:[#allocation74_spill] sm:$0xff]  ;;  %v11438_v45 = vld [vmem:[#allocation87_spill] sm:$0xff] }
 0x67a   :  { %3049 = vmatprep.subr.mxu0 %v11398_v2  ;;  %5665 = vmatprep.subr.mxu1 %v10980_v44  ;;  %v11439_v2 = vld [vmem:[#allocation88_spill] sm:$0xff] }
 0x67b   :  { %3050 = vmatpush1.msra.mxu0 %v11399_v8  ;;  %5666 = vmatpush3.msra.mxu1 %v11400_v24  ;;  %v11440_v8 = vld [vmem:[#allocation89_spill] sm:$0xff] }
 0x67c   :  { %3051 = vmatprep.subr.mxu0 %v11401_v61  ;;  %5667 = vmatprep.subr.mxu1 %v10980_v44 }
 0x67d   :  { %3052 = vmatpush1.msra.mxu0 %v11402_v23  ;;  %5668 = vmatpush3.msra.mxu1 %v11403_v15 }
 0x67e   :  { %3053 = vmatprep.subr.mxu0 %v11404_v52  ;;  %5669 = vmatprep.subr.mxu1 %v10980_v44  ;;  %v11441_v52 = vld [vmem:[#allocation9_spill] sm:$0xff] }
 0x67f   :  { %3054 = vmatpush1.msra.mxu0 %v11405_v55  ;;  %5670 = vmatpush3.msra.mxu1 %v11406_v37 }
 0x680   :  { %3055 = vmatprep.subr.mxu0 %v11407_v35  ;;  %5671 = vmatprep.subr.mxu1 %v10980_v44 }
 0x681   :  { %3056 = vmatpush1.msra.mxu0 %v11408_v6  ;;  %5672 = vmatpush3.msra.mxu1 %v11409_v3 }
 0x682   :  { %3057 = vmatprep.subr.mxu0 %v11410_v50  ;;  %5673 = vmatprep.subr.mxu1 %v10980_v44 }
 0x683   :  { %3058 = vmatpush1.msra.mxu0 %v11411_v51  ;;  %5674 = vmatpush3.msra.mxu1 %v11412_v53 }
 0x684   :  { %3059 = vmatprep.subr.mxu0 %v11413_v54  ;;  %5675 = vmatprep.subr.mxu1 %v10980_v44 }
 0x685   :  { %3060 = vmatpush1.msra.mxu0 %v11414_v10  ;;  %5676 = vmatpush3.msra.mxu1 %v11415_v59  ;;  %v9433_v10 = vld [vmem:[%s10530_s9] ss:$0 sm:$0xff] }
 0x686   :  { %3061 = vmatprep.subr.mxu0 %v11416_v58  ;;  %5677 = vmatprep.subr.mxu1 %v10980_v44 }
 0x687   :  { %3062 = vmatpush1.msra.mxu0 %v11417_v18  ;;  %5678 = vmatpush3.msra.mxu1 %v11418_v30 }
 0x688   :  { %3063 = vmatprep.subr.mxu0 %v11419_v25  ;;  %5679 = vmatprep.subr.mxu1 %v10980_v44 }
 0x689   :  { %3064 = vmatpush1.msra.mxu0 %v11420_v63  ;;  %5680 = vmatpush3.msra.mxu1 %v11421_v42  ;;  %v11442_v42 = vld [vmem:[#allocation75_spill] sm:$0xff] }
 0x68a   :  { %3065 = vmatprep.subr.mxu0 %v11422_v7  ;;  %5681 = vmatprep.subr.mxu1 %v10980_v44 }
 0x68b   :  { %3066 = vmatpush1.msra.mxu0 %v11423_v12  ;;  %5682 = vmatpush3.msra.mxu1 %v11424_v11 }
 0x68c   :  { %3067 = vmatprep.subr.mxu0 %v11425_v5  ;;  %5683 = vmatprep.subr.mxu1 %v10980_v44 }
 0x68d   :  { %3068 = vmatpush1.msra.mxu0 %v11426_v56  ;;  %5684 = vmatpush3.msra.mxu1 %v11427_v4  ;;  %v11443_v4 = vld [vmem:[#allocation76_spill] sm:$0xff] }
 0x68e   :  { %3069 = vmatprep.subr.mxu0 %v11428_v49  ;;  %5685 = vmatprep.subr.mxu1 %v10980_v44 }
 0x68f   :  { %3070 = vmatpush1.msra.mxu0 %v11429_v22  ;;  %5686 = vmatpush3.msra.mxu1 %v11430_v27 }
 0x690   :  { %3071 = vmatprep.subr.mxu0 %v11431_v28  ;;  %5687 = vmatprep.subr.mxu1 %v10980_v44 }
 0x691   :  { %3072 = vmatpush1.msra.mxu0 %v11432_v29  ;;  %5688 = vmatpush3.msra.mxu1 %v11433_v31 }
 0x692   :  { %3073 = vmatprep.subr.mxu0 %v11434_v32  ;;  %5689 = vmatprep.subr.mxu1 %v10980_v44 }
 0x693   :  { %3074 = vmatpush1.msra.mxu0 %v11435_v33  ;;  %5690 = vmatpush3.msra.mxu1 %v11436_v34 }
 0x694   :  { %3075 = vmatprep.subr.mxu0 %v11437_v20  ;;  %5691 = vmatprep.subr.mxu1 %v10980_v44 }
 0x695   :  { %3076 = vmatpush1.msra.mxu0 %v11438_v45  ;;  %5692 = vmatpush3.msra.mxu1 %v11439_v2  ;;  %v11444_v45 = vld [vmem:[#allocation83_spill] sm:$0xff] }
 0x696   :  { %3109 = vmatprep.mubr.f32.mxu0 %v10980_v44  ;;  %5693 = vmatprep.mubr.msk.f32.mxu1 %vm6630_vm2, %v10980_v44 }
 0x697   :  { %3186 = vmatprep.subr.mxu0 %v11440_v8  ;;  %5696 = vmatprep.subr.mxu1 %v10980_v44 }
 0x6f2   :  { %v2715_v24 = vpop.f32.mrf.mxu1  ;;  %v2644_v23 = vpop.f32.mrf.mxu0 }
 0x6f3   :  { %v2645_v55 = vadd.f32 %v2644_v23, %v11441_v52  ;;  %v2716_v25 = vadd.f32 %v2715_v24, %v7657_v40 }
 0x6f4   :  { %v5590_v61 = vpop.f32.mrf.mxu1  ;;  %v2646_v15 = vpop.f32.mrf.mxu0 }
 0x6f5   :  { %v2647_v20 = vadd.f32 %v2646_v15, %v7664_v14  ;;  %v11456_v15 = vld [vmem:[#allocation98_spill] sm:$0xff] }
 0x713   :  { %v2785_v37 = vpop.f32.mrf.mxu0  ;;  %v2856_v35 = vpop.f32.mrf.mxu1 }
 0x714   :  { %v2860_v6 = vadd.f32 %v2785_v37, %v2645_v55  ;;  %v2874_v59 = vadd.f32 %v9433_v10, %v2856_v35 }
 0x715   :  { %v5625_v3 = vpop.f32.mrf.mxu1  ;;  %v2787_v54 = vpop.f32.mrf.mxu0 }
 0x716   :  { %v4619_v50 = vmul.f32 -1.442695, %v2860_v6  ;;  %v2867_v8 = vadd.f32 %v2787_v54, %v2647_v20  ;;  %v11457_v3 = vld [vmem:[#allocation99_spill] sm:$0xff]  ;;  %v9584_v20 = vld [vmem:[%s10524_s3 + $0x120] sm:$0xff] }
 0x717   :  { %v11461_v54 = vld [vmem:[#allocation103_spill] sm:$0xff] }
 0x718   :  { %6044 = vpow2.f32 %v4619_v50  ;;  %v4620_v24 = vmul.f32 -1.442695, %v2867_v8  ;;  %v11458_v50 = vld [vmem:[#allocation100_spill] sm:$0xff]  ;;  %v9603_v8 = vld [vmem:[%s10524_s3 + $0x108] sm:$0xff] }
 0x725   :  { %v6045_v51 = vpop.eup %6044 }
 0x726   :  { %v2864_v53 = vadd.f32 1.0, %v6045_v51  ;;  %v11459_v51 = vld [vmem:[#allocation101_spill] sm:$0xff] }
 0x728   :  { %6046 = vrcp.f32 %v2864_v53  ;;  %v11460_v53 = vld [vmem:[#allocation102_spill] sm:$0xff] }
 0x735   :  { %v6047_v58 = vpop.eup %6046  ;;  %v2948_v18 = vpop.f32.mrf.mxu0 }
 0x736   :  { %v3019_v30 = vpop.f32.mrf.mxu1  ;;  %v2875_v63 = vmul.f32 %v6047_v58, %v2874_v59  ;;  %v3023_v7 = vadd.f32 %v2948_v18, %v11442_v42  ;;  %v11462_v59 = vld [vmem:[#allocation104_spill] sm:$0xff]  ;;  %v11463_v58 = vld [vmem:[#allocation105_spill] sm:$0xff]  ;;  %v11464_v18 = vld [vmem:[#allocation106_spill] sm:$0xff] }
 0x737   :  { %v2950_v56 = vpop.f32.mrf.mxu0  ;;  %v3037_v32 = vadd.f32 %v9116_v48, %v3019_v30  ;;  %v11465_v30 = vld [vmem:[#allocation107_spill] sm:$0xff]  ;;  %v11467_v42 = vld [vmem:[#allocation109_spill] sm:$0xff] }
 0x738   :  { %v5660_v12 = vpop.f32.mrf.mxu1  ;;  %v2876_v11 = vadd.f32 %v2875_v63, %v2716_v25  ;;  %v4621_v5 = vmul.f32 -1.442695, %v3023_v7  ;;  %v3030_v49 = vadd.f32 %v2950_v56, %v11443_v4  ;;  %v11466_v63 = vld [vmem:[#allocation108_spill] sm:$0xff]  ;;  %v11468_v7 = vld [vmem:[#allocation110_spill] sm:$0xff]  ;;  %v11471_v56 = vld [vmem:[#allocation113_spill] sm:$0xff] }
 0x73a   :  { %6048 = vpow2.f32 %v4621_v5  ;;  %v4622_v22 = vmul.f32 -1.442695, %v3030_v49  ;;  %v11470_v5 = vld [vmem:[#allocation112_spill] sm:$0xff]  ;;  %v11472_v49 = vld [vmem:[#allocation114_spill] sm:$0xff] }
 0x73c   :  { %6050 = vpow2.f32 %v4622_v22  ;;  %v11473_v22 = vld [vmem:[#allocation115_spill] sm:$0xff] }
 0x747   :  { %v6049_v27 = vpop.eup %6048 }
 0x748   :  { %v3027_v28 = vadd.f32 1.0, %v6049_v27 }
 0x749   :  { %v6051_v29 = vpop.eup %6050 }
 0x74a   :  { %6052 = vrcp.f32 %v3027_v28  ;;  %v3034_v31 = vadd.f32 1.0, %v6051_v29  ;;  %v11474_v28 = vld [vmem:[#allocation68_spill] sm:$0xff] }
 0x74c   :  { %6054 = vrcp.f32 %v3034_v31  ;;  %v9558_v31 = vld [vmem:[%s10524_s3 + $0x140] sm:$0xff] }
 0x757   :  { %v6053_v33 = vpop.eup %6052 }
 0x758   :  { %v3038_v34 = vmul.f32 %v6053_v33, %v3037_v32  ;;  %v9565_v32 = vld [vmem:[%s10524_s3 + $0x138] sm:$0xff]  ;;  %v9571_v33 = vld [vmem:[%s10524_s3 + $0x148] sm:$0xff] }
 0x759   :  { %v6055_v61 = vpop.eup %6054 }
 0x75a   :  { %v3039_v2 = vadd.f32 %v3038_v34, %v11444_v45  ;;  %v3041_v23 = vsub.f32 1.0, %v6055_v61  ;;  %v3043_v35 = vmul.f32 %v6055_v61, %v9122_v36  ;;  %v9577_v34 = vld [vmem:[%s10524_s3 + $0x128] sm:$0xff]  ;;  %v9590_v45 = vld [vmem:[%s10524_s3 + $0x130] sm:$0xff]  ;;  %v9615_v61 = vld [vmem:[%s10524_s3 + $0xf8] sm:$0xff] }
 0x75c   :  { %6056 = vtanh.f32 %v3039_v2  ;;  %v9596_v2 = vld [vmem:[%s10524_s3 + $0x110] sm:$0xff] }
 0x75d   :  { %6058 = vpow2.f32 %v4620_v24  ;;  %v9609_v24 = vld [vmem:[%s10524_s3 + $0x118] sm:$0xff] }
 0x769   :  { %v6057_v55 = vpop.eup %6056 }
 0x76a   :  { %v3042_v37 = vmul.f32 %v6057_v55, %v3041_v23  ;;  %v6059_v48 = vpop.eup %6058  ;;  %v9622_v23 = vld [vmem:[%s10524_s3 + $0xf0] sm:$0xff]  ;;  %v9628_v55 = vld [vmem:[%s10524_s3 + $0x100] sm:$0xff] }
 0x76b   :  { %v2871_v36 = vadd.f32 1.0, %v6059_v48  ;;  %v9647_v48 = vld [vmem:[%s10524_s3 + $0xe8] sm:$0xff] }
 0x76c   :  { %v9443_v6 = vadd.f32 %v3043_v35, %v3042_v37  ;;  %v9634_v37 = vld [vmem:[%s10524_s3 + $0xe0] sm:$0xff]  ;;  %v9641_v35 = vld [vmem:[%s10524_s3 + $0xd8] sm:$0xff] }
 0x76d   :  { %6060 = vrcp.f32 %v2871_v36  ;;  %v9653_v36 = vld [vmem:[%s10524_s3 + $0xc8] sm:$0xff] }
 0x76e   :  { %3110 = vmatmul.mubr.f32.vlgmr.msra.gmra.mxu0 %v9443_v6  ;;  %5694 = vmatmul.mubr.f32.vlgmr.msra.gmra.mxu1 %v9443_v6  ;;  %6062 = vtanh.f32 %v2876_v11  ;;  %v11469_v11 = vld [vmem:[#allocation111_spill] sm:$0xff] }
 0x76f   :  { %3187 = vmatpush1.msra.mxu0 %v9126_v43  ;;  %5697 = vmatpush3.msra.mxu1 %v9129_v57  ;;  %v11445_v43 = vld [vmem:[#allocation70_spill] sm:$0xff]  ;;  %v11446_v57 = vld [vmem:[#allocation71_spill] sm:$0xff] }
 0x770   :  { %3188 = vmatprep.subr.mxu0 %v9132_v39  ;;  %5698 = vmatprep.subr.mxu1 %v10980_v44  ;;  %v11447_v39 = vld [vmem:[#allocation81_spill] sm:$0xff] }
 0x771   :  { %3189 = vmatpush1.msra.mxu0 %v9136_v1  ;;  %5699 = vmatpush3.msra.mxu1 %v9139_v21  ;;  %v11448_v1 = vld [vmem:[#allocation90_spill] sm:$0xff]  ;;  %v11449_v21 = vld [vmem:[#allocation91_spill] sm:$0xff] }
 0x772   :  { %3190 = vmatprep.subr.mxu0 %v9142_v16  ;;  %5700 = vmatprep.subr.mxu1 %v10980_v44  ;;  %v11450_v16 = vld [vmem:[#allocation92_spill] sm:$0xff] }
 0x773   :  { %3191 = vmatpush1.msra.mxu0 %v9146_v38  ;;  %5701 = vmatpush3.msra.mxu1 %v9149_v41  ;;  %v11451_v38 = vld [vmem:[#allocation93_spill] sm:$0xff]  ;;  %v11452_v41 = vld [vmem:[#allocation94_spill] sm:$0xff] }
 0x774   :  { %3192 = vmatprep.subr.mxu0 %v9152_v47  ;;  %5702 = vmatprep.subr.mxu1 %v10980_v44  ;;  %v11453_v47 = vld [vmem:[#allocation95_spill] sm:$0xff] }
 0x775   :  { %3193 = vmatpush1.msra.mxu0 %v9156_v62  ;;  %5703 = vmatpush3.msra.mxu1 %v9159_v19  ;;  %v11454_v62 = vld [vmem:[#allocation96_spill] sm:$0xff]  ;;  %v11455_v19 = vld [vmem:[#allocation97_spill] sm:$0xff] }
 0x776   :  { %3194 = vmatprep.subr.mxu0 %v11445_v43  ;;  %5704 = vmatprep.subr.mxu1 %v10980_v44  ;;  %v9660_v43 = vld [vmem:[%s10524_s3 + $0xc0] sm:$0xff] }
 0x777   :  { %3195 = vmatpush1.msra.mxu0 %v11446_v57  ;;  %5705 = vmatpush3.msra.mxu1 %v11447_v39  ;;  %v9666_v57 = vld [vmem:[%s10524_s3 + $0xd0] sm:$0xff] }
 0x778   :  { %3196 = vmatprep.subr.mxu0 %v11448_v1  ;;  %5706 = vmatprep.subr.mxu1 %v10980_v44  ;;  %v9672_v39 = vld [vmem:[%s10524_s3 + $0xb0] sm:$0xff]  ;;  %v9679_v1 = vld [vmem:[%s10524_s3 + $0xa8] sm:$0xff] }
 0x779   :  { %3197 = vmatpush1.msra.mxu0 %v11449_v21  ;;  %5707 = vmatpush3.msra.mxu1 %v11450_v16  ;;  %v9685_v21 = vld [vmem:[%s10524_s3 + $0xb8] sm:$0xff] }
 0x77a   :  { %3198 = vmatprep.subr.mxu0 %v11451_v38  ;;  %5708 = vmatprep.subr.mxu1 %v10980_v44  ;;  %v6061_v25 = vpop.eup %6060  ;;  %v9691_v16 = vld [vmem:[%s10524_s3 + $0x98] sm:$0xff]  ;;  %v9698_v38 = vld [vmem:[%s10524_s3 + $0x90] sm:$0xff] }
 0x77b   :  { %3199 = vmatpush1.msra.mxu0 %v11452_v41  ;;  %5709 = vmatpush3.msra.mxu1 %v11453_v47  ;;  %v6063_v12 = vpop.eup %6062  ;;  %v2878_v4 = vsub.f32 1.0, %v6061_v25  ;;  %v2880_v29 = vmul.f32 %v6061_v25, %v9282_v26  ;;  %v9552_v26 = vld [vmem:[%s10524_s3 + $0x160] sm:$0xff]  ;;  %v9793_v25 = vld [vmem:[%s10524_s3 + $0x18] sm:$0xff] }
 0x77c   :  { %3200 = vmatprep.subr.mxu0 %v11454_v62  ;;  %5710 = vmatprep.subr.mxu1 %v10980_v44  ;;  %v9704_v41 = vld [vmem:[%s10524_s3 + $0xa0] sm:$0xff]  ;;  %v9717_v62 = vld [vmem:[%s10524_s3 + $0x78] sm:$0xff]  ;;  %11481 = vst [vmem:[#allocation12_spill] sm:$0xff] %v9793_v25 }
 0x77d   :  { %3201 = vmatpush1.msra.mxu0 %v11455_v19  ;;  %5711 = vmatpush3.msra.mxu1 %v11456_v15  ;;  %v2879_v27 = vmul.f32 %v6063_v12, %v2878_v4  ;;  %v9710_v47 = vld [vmem:[%s10524_s3 + $0x80] sm:$0xff]  ;;  %v9723_v19 = vld [vmem:[%s10524_s3 + $0x88] sm:$0xff]  ;;  %v9819_v12 = vld [vmem:[%s10524_s3 + $0x10] sm:$0xff] }
 0x77e   :  { %3202 = vmatprep.subr.mxu0 %v11457_v3  ;;  %5712 = vmatprep.subr.mxu1 %v10980_v44  ;;  %v9729_v15 = vld [vmem:[%s10524_s3 + $0x68] sm:$0xff]  ;;  %v9736_v3 = vld [vmem:[%s10524_s3 + $0x60] sm:$0xff]  ;;  %11485 = vst [vmem:[#allocation14_spill] sm:$0xff] %v9819_v12  ;;  %v9836_v4 = vld [vmem:[#allocation2 + $0x158] sm:$0xff] }
 0x77f   :  { %3203 = vmatpush1.msra.mxu0 %v11458_v50  ;;  %5713 = vmatpush3.msra.mxu1 %v11459_v51  ;;  %v9742_v50 = vld [vmem:[%s10524_s3 + $0x70] sm:$0xff]  ;;  %11489 = vst [vmem:[#allocation18_spill] sm:$0xff] %v9836_v4 }
 0x780   :  { %3204 = vmatprep.subr.mxu0 %v11460_v53  ;;  %5714 = vmatprep.subr.mxu1 %v10980_v44  ;;  %v9748_v51 = vld [vmem:[%s10524_s3 + $0x50] sm:$0xff]  ;;  %v9755_v53 = vld [vmem:[%s10524_s3 + $0x48] sm:$0xff] }
 0x781   :  { %3205 = vmatpush1.msra.mxu0 %v11461_v54  ;;  %5715 = vmatpush3.msra.mxu1 %v11462_v59  ;;  %11475 = vst [vmem:[#allocation69_spill] sm:$0xff] %v9755_v53  ;;  %v9761_v54 = vld [vmem:[%s10524_s3 + $0x58] sm:$0xff] }
 0x782   :  { %3206 = vmatprep.subr.mxu0 %v11463_v58  ;;  %5716 = vmatprep.subr.mxu1 %v10980_v44  ;;  %11476 = vst [vmem:[#allocation82_spill] sm:$0xff] %v9761_v54  ;;  %v9767_v59 = vld [vmem:[%s10524_s3 + $0x38] sm:$0xff]  ;;  %v9774_v58 = vld [vmem:[%s10524_s3 + $0x30] sm:$0xff] }
 0x783   :  { %3207 = vmatpush1.msra.mxu0 %v11464_v18  ;;  %5717 = vmatpush3.msra.mxu1 %v11465_v30  ;;  %11477 = vst [vmem:[#allocation116_spill] sm:$0xff] %v9767_v59  ;;  %11478 = vst [vmem:[#allocation72_spill] sm:$0xff] %v9774_v58  ;;  %v9780_v18 = vld [vmem:[%s10524_s3 + $0x40] sm:$0xff] }
 0x784   :  { %3208 = vmatprep.subr.mxu0 %v11466_v63  ;;  %5718 = vmatprep.subr.mxu1 %v10980_v44  ;;  %11479 = vst [vmem:[#allocation73_spill] sm:$0xff] %v9780_v18  ;;  %v9786_v30 = vld [vmem:[%s10524_s3 + $0x20] sm:$0xff]  ;;  %v9799_v63 = vld [vmem:[%s10524_s3 + $0x28] sm:$0xff] }
 0x785   :  { %3209 = vmatpush1.msra.mxu0 %v11467_v42  ;;  %5719 = vmatpush3.msra.mxu1 %v11468_v7  ;;  %11480 = vst [vmem:[#allocation84_spill] sm:$0xff] %v9786_v30  ;;  %11482 = vst [vmem:[#allocation10_spill] sm:$0xff] %v9799_v63  ;;  %v9805_v42 = vld [vmem:[%s10524_s3 + $0x8] sm:$0xff]  ;;  %v9812_v7 = vld [vmem:[%s10524_s3] sm:$0xff] }
 0x786   :  { %3210 = vmatprep.subr.mxu0 %v11469_v11  ;;  %5720 = vmatprep.subr.mxu1 %v10980_v44  ;;  %11483 = vst [vmem:[#allocation11_spill] sm:$0xff] %v9805_v42  ;;  %11484 = vst [vmem:[#allocation13_spill] sm:$0xff] %v9812_v7  ;;  %v9826_v11 = vld [vmem:[#allocation2 + $0x170] sm:$0xff] }
 0x787   :  { %3211 = vmatpush1.msra.mxu0 %v11470_v5  ;;  %5721 = vmatpush3.msra.mxu1 %v11471_v56  ;;  %11486 = vst [vmem:[#allocation15_spill] sm:$0xff] %v9826_v11  ;;  %v9830_v5 = vld [vmem:[#allocation2 + $0x168] sm:$0xff]  ;;  %v9833_v56 = vld [vmem:[#allocation2 + $0x178] sm:$0xff] }
 0x788   :  { %3212 = vmatprep.subr.mxu0 %v11472_v49  ;;  %5722 = vmatprep.subr.mxu1 %v10980_v44  ;;  %11487 = vst [vmem:[#allocation16_spill] sm:$0xff] %v9830_v5  ;;  %11488 = vst [vmem:[#allocation17_spill] sm:$0xff] %v9833_v56  ;;  %v9840_v49 = vld [vmem:[#allocation2 + $0x150] sm:$0xff] }
 0x789   :  { %3213 = vmatpush1.msra.mxu0 %v11473_v22  ;;  %5723 = vmatpush3.msra.mxu1 %v9260_v13  ;;  %v9510_v13 = vadd.f32 %v2880_v29, %v2879_v27  ;;  %11490 = vst [vmem:[#allocation19_spill] sm:$0xff] %v9840_v49  ;;  %v9843_v22 = vld [vmem:[#allocation2 + $0x160] sm:$0xff]  ;;  %v9853_v29 = vld [vmem:[#allocation2 + $0x148] sm:$0xff] }
 0x78a   :  { %3214 = vmatprep.subr.mxu0 %v9263_v0  ;;  %5724 = vmatprep.subr.mxu1 %v10980_v44  ;;  %v9527_v0 = vld [vmem:[%s10524_s3 + $0x168] sm:$0xff]  ;;  %11491 = vst [vmem:[#allocation20_spill] sm:$0xff] %v9843_v22  ;;  %v9846_v27 = vld [vmem:[#allocation2 + $0x140] sm:$0xff]  ;;  %11494 = vst [vmem:[#allocation23_spill] sm:$0xff] %v9853_v29 }
 0x78b   :  { %3215 = vmatpush1.msra.mxu0 %v11474_v28  ;;  %5725 = vmatpush3.msra.mxu1 %v9270_v46  ;;  %v9533_v46 = vld [vmem:[%s10524_s3 + $0x178] sm:$0xff]  ;;  %11492 = vst [vmem:[#allocation22_spill] sm:$0xff] %v9846_v27 }
 0x78c   :  { %3216 = vmatprep.subr.mxu0 %v9274_v17  ;;  %5726 = vmatprep.subr.mxu1 %v10980_v44  ;;  %v9520_v17 = vld [vmem:[%s10524_s3 + $0x170] sm:$0xff]  ;;  %v9850_v28 = vld [vmem:[#allocation2 + $0x138] sm:$0xff] }
 0x78d   :  { %3217 = vmatpush1.msra.mxu0 %v9278_v60  ;;  %3250 = vmatprep.mubr.f32.mxu0 %v10980_v44  ;;  %v9546_v60 = vld [vmem:[%s10524_s3 + $0x150] sm:$0xff]  ;;  %11493 = vst [vmem:[#allocation21_spill] sm:$0xff] %v9850_v28 }
 0x78e   :  { %5727 = vmatpush3.msra.mxu1 %v9284_v9  ;;  %5728 = vmatprep.mubr.msk.f32.mxu1 %vm6630_vm2, %v10980_v44  ;;  %v9539_v9 = vld [vmem:[%s10524_s3 + $0x158] sm:$0xff] }
 0x78f   :  { %3251 = vmatmul.mubr.f32.vlgmr.msra.gmra.mxu0 %v9510_v13  ;;  %5729 = vmatmul.mubr.f32.vlgmr.msra.gmra.mxu1 %v9510_v13 }
 0x790   :  { %3349 = vmatprep.subr.mxu0 %v9520_v17  ;;  %5731 = vmatprep.subr.mxu1 %v10980_v44 }
 0x791   :  { %3350 = vmatpush1.msra.mxu0 %v9527_v0  ;;  %5732 = vmatpush3.msra.mxu1 %v9533_v46 }
 0x792   :  { %3351 = vmatprep.subr.mxu0 %v9539_v9  ;;  %5733 = vmatprep.subr.mxu1 %v10980_v44 }
 0x793   :  { %3352 = vmatpush1.msra.mxu0 %v9546_v60  ;;  %5734 = vmatpush3.msra.mxu1 %v9552_v26 }
 0x794   :  { %3353 = vmatprep.subr.mxu0 %v9558_v31  ;;  %5735 = vmatprep.subr.mxu1 %v10980_v44 }
 0x795   :  { %3354 = vmatpush1.msra.mxu0 %v9565_v32  ;;  %5736 = vmatpush3.msra.mxu1 %v9571_v33 }
 0x796   :  { %3355 = vmatprep.subr.mxu0 %v9577_v34  ;;  %5737 = vmatprep.subr.mxu1 %v10980_v44 }
 0x797   :  { %3356 = vmatpush1.msra.mxu0 %v9584_v20  ;;  %5738 = vmatpush3.msra.mxu1 %v9590_v45 }
 0x798   :  { %3357 = vmatprep.subr.mxu0 %v9596_v2  ;;  %5739 = vmatprep.subr.mxu1 %v10980_v44 }
 0x799   :  { %3358 = vmatpush1.msra.mxu0 %v9603_v8  ;;  %5740 = vmatpush3.msra.mxu1 %v9609_v24 }
 0x79a   :  { %3359 = vmatprep.subr.mxu0 %v9615_v61  ;;  %5741 = vmatprep.subr.mxu1 %v10980_v44 }
 0x79b   :  { %3360 = vmatpush1.msra.mxu0 %v9622_v23  ;;  %5742 = vmatpush3.msra.mxu1 %v9628_v55 }
 0x79c   :  { %3361 = vmatprep.subr.mxu0 %v9634_v37  ;;  %5743 = vmatprep.subr.mxu1 %v10980_v44 }
 0x79d   :  { %3362 = vmatpush1.msra.mxu0 %v9641_v35  ;;  %5744 = vmatpush3.msra.mxu1 %v9647_v48 }
 0x79e   :  { %3363 = vmatprep.subr.mxu0 %v9653_v36  ;;  %5745 = vmatprep.subr.mxu1 %v10980_v44 }
 0x79f   :  { %3364 = vmatpush1.msra.mxu0 %v9660_v43  ;;  %5746 = vmatpush3.msra.mxu1 %v9666_v57 }
 0x7a0   :  { %3365 = vmatprep.subr.mxu0 %v9672_v39  ;;  %5747 = vmatprep.subr.mxu1 %v10980_v44 }
 0x7a1   :  { %3366 = vmatpush1.msra.mxu0 %v9679_v1  ;;  %5748 = vmatpush3.msra.mxu1 %v9685_v21 }
 0x7a2   :  { %3367 = vmatprep.subr.mxu0 %v9691_v16  ;;  %5749 = vmatprep.subr.mxu1 %v10980_v44 }
 0x7a3   :  { %3368 = vmatpush1.msra.mxu0 %v9698_v38  ;;  %5750 = vmatpush3.msra.mxu1 %v9704_v41 }
 0x7a4   :  { %3369 = vmatprep.subr.mxu0 %v9710_v47  ;;  %5751 = vmatprep.subr.mxu1 %v10980_v44 }
 0x7a5   :  { %3370 = vmatpush1.msra.mxu0 %v9717_v62  ;;  %5752 = vmatpush3.msra.mxu1 %v9723_v19 }
 0x7a6   :  { %3371 = vmatprep.subr.mxu0 %v9729_v15  ;;  %5753 = vmatprep.subr.mxu1 %v10980_v44 }
 0x7a7   :  { %3372 = vmatpush1.msra.mxu0 %v9736_v3  ;;  %5754 = vmatpush3.msra.mxu1 %v9742_v50 }
 0x7a8   :  { %3373 = vmatprep.subr.mxu0 %v9748_v51  ;;  %5755 = vmatprep.subr.mxu1 %v10980_v44 }
 0x7a9   :  { %3374 = vmatpush1.msra.mxu0 %v9755_v53  ;;  %5756 = vmatpush3.msra.mxu1 %v9761_v54  ;;  %v11535_v54 = vld [vmem:[#allocation77_spill] sm:$0xff] }
 0x7aa   :  { %3375 = vmatprep.subr.mxu0 %v9767_v59  ;;  %5757 = vmatprep.subr.mxu1 %v10980_v44 }
 0x7ab   :  { %3376 = vmatpush1.msra.mxu0 %v9774_v58  ;;  %5758 = vmatpush3.msra.mxu1 %v9780_v18 }
 0x7ac   :  { %3377 = vmatprep.subr.mxu0 %v9786_v30  ;;  %5759 = vmatprep.subr.mxu1 %v10980_v44 }
 0x7ad   :  { %3378 = vmatpush1.msra.mxu0 %v9793_v25  ;;  %5760 = vmatpush3.msra.mxu1 %v9799_v63 }
 0x7ae   :  { %3379 = vmatprep.subr.mxu0 %v9805_v42  ;;  %5761 = vmatprep.subr.mxu1 %v10980_v44 }
 0x7af   :  { %3380 = vmatpush1.msra.mxu0 %v9812_v7  ;;  %3413 = vmatprep.mubr.f32.mxu0 %v10980_v44 }
 0x7b0   :  { %5762 = vmatpush3.msra.mxu1 %v9819_v12  ;;  %5763 = vmatprep.mubr.msk.f32.mxu1 %vm6630_vm2, %v10980_v44 }
 0x7b1   :  { %3414 = vmatmul.mubr.f32.vlgmr.msra.gmra.mxu0 %v9443_v6  ;;  %5764 = vmatmul.mubr.f32.vlgmr.msra.gmra.mxu1 %v9443_v6 }
 0x7b2   :  { %3512 = vmatprep.subr.mxu0 %v9826_v11  ;;  %5766 = vmatprep.subr.mxu1 %v10980_v44 }
 0x7b3   :  { %3513 = vmatpush1.msra.mxu0 %v9830_v5  ;;  %5767 = vmatpush3.msra.mxu1 %v9833_v56 }
 0x7b4   :  { %3514 = vmatprep.subr.mxu0 %v9836_v4  ;;  %5768 = vmatprep.subr.mxu1 %v10980_v44  ;;  %v9856_v4 = vld [vmem:[#allocation2 + $0x128] sm:$0xff] }
 0x7b5   :  { %3515 = vmatpush1.msra.mxu0 %v9840_v49  ;;  %5769 = vmatpush3.msra.mxu1 %v9843_v22  ;;  %11495 = vst [vmem:[#allocation24_spill] sm:$0xff] %v9856_v4  ;;  %v9860_v22 = vld [vmem:[#allocation2 + $0x120] sm:$0xff]  ;;  %v9866_v49 = vld [vmem:[#allocation2 + $0x110] sm:$0xff] }
 0x7b6   :  { %3516 = vmatprep.subr.mxu0 %v9846_v27  ;;  %5770 = vmatprep.subr.mxu1 %v10980_v44  ;;  %11496 = vst [vmem:[#allocation25_spill] sm:$0xff] %v9860_v22  ;;  %v9863_v27 = vld [vmem:[#allocation2 + $0x130] sm:$0xff]  ;;  %11498 = vst [vmem:[#allocation27_spill] sm:$0xff] %v9866_v49 }
 0x7b7   :  { %3517 = vmatpush1.msra.mxu0 %v9850_v28  ;;  %5771 = vmatpush3.msra.mxu1 %v9853_v29  ;;  %11497 = vst [vmem:[#allocation26_spill] sm:$0xff] %v9863_v27  ;;  %v9870_v29 = vld [vmem:[#allocation2 + $0x108] sm:$0xff]  ;;  %v9876_v28 = vld [vmem:[#allocation2 + $0xf8] sm:$0xff] }
 0x7b8   :  { %3518 = vmatprep.subr.mxu0 %v9856_v4  ;;  %5772 = vmatprep.subr.mxu1 %v10980_v44  ;;  %11499 = vst [vmem:[#allocation28_spill] sm:$0xff] %v9870_v29  ;;  %v9873_v4 = vld [vmem:[#allocation2 + $0x118] sm:$0xff]  ;;  %11501 = vst [vmem:[#allocation30_spill] sm:$0xff] %v9876_v28 }
 0x7b9   :  { %3519 = vmatpush1.msra.mxu0 %v9860_v22  ;;  %5773 = vmatpush3.msra.mxu1 %v9863_v27  ;;  %11500 = vst [vmem:[#allocation29_spill] sm:$0xff] %v9873_v4  ;;  %v9880_v27 = vld [vmem:[#allocation2 + $0xf0] sm:$0xff]  ;;  %v9886_v22 = vld [vmem:[#allocation2 + $0xe0] sm:$0xff] }
 0x7ba   :  { %3520 = vmatprep.subr.mxu0 %v9866_v49  ;;  %5774 = vmatprep.subr.mxu1 %v10980_v44  ;;  %11502 = vst [vmem:[#allocation31_spill] sm:$0xff] %v9880_v27  ;;  %v9883_v49 = vld [vmem:[#allocation2 + $0x100] sm:$0xff]  ;;  %11504 = vst [vmem:[#allocation33_spill] sm:$0xff] %v9886_v22 }
 0x7bb   :  { %3521 = vmatpush1.msra.mxu0 %v9870_v29  ;;  %5775 = vmatpush3.msra.mxu1 %v9873_v4  ;;  %11503 = vst [vmem:[#allocation32_spill] sm:$0xff] %v9883_v49  ;;  %v9890_v4 = vld [vmem:[#allocation2 + $0xd8] sm:$0xff]  ;;  %v9896_v29 = vld [vmem:[#allocation2 + $0xc8] sm:$0xff] }
 0x7bc   :  { %3522 = vmatprep.subr.mxu0 %v9876_v28  ;;  %5776 = vmatprep.subr.mxu1 %v10980_v44  ;;  %11505 = vst [vmem:[#allocation34_spill] sm:$0xff] %v9890_v4  ;;  %v9893_v28 = vld [vmem:[#allocation2 + $0xe8] sm:$0xff]  ;;  %11507 = vst [vmem:[#allocation36_spill] sm:$0xff] %v9896_v29 }
 0x7bd   :  { %3523 = vmatpush1.msra.mxu0 %v9880_v27  ;;  %5777 = vmatpush3.msra.mxu1 %v9883_v49  ;;  %11506 = vst [vmem:[#allocation35_spill] sm:$0xff] %v9893_v28  ;;  %v9900_v49 = vld [vmem:[#allocation2 + $0xc0] sm:$0xff]  ;;  %v9906_v27 = vld [vmem:[#allocation2 + $0xb0] sm:$0xff] }
 0x7be   :  { %3524 = vmatprep.subr.mxu0 %v9886_v22  ;;  %5778 = vmatprep.subr.mxu1 %v10980_v44  ;;  %11508 = vst [vmem:[#allocation37_spill] sm:$0xff] %v9900_v49  ;;  %v9903_v22 = vld [vmem:[#allocation2 + $0xd0] sm:$0xff]  ;;  %11510 = vst [vmem:[#allocation39_spill] sm:$0xff] %v9906_v27 }
 0x7bf   :  { %3525 = vmatpush1.msra.mxu0 %v9890_v4  ;;  %5779 = vmatpush3.msra.mxu1 %v9893_v28  ;;  %11509 = vst [vmem:[#allocation38_spill] sm:$0xff] %v9903_v22  ;;  %v9910_v28 = vld [vmem:[#allocation2 + $0xa8] sm:$0xff]  ;;  %v9916_v4 = vld [vmem:[#allocation2 + $0x98] sm:$0xff] }
 0x7c0   :  { %3526 = vmatprep.subr.mxu0 %v9896_v29  ;;  %5780 = vmatprep.subr.mxu1 %v10980_v44  ;;  %11511 = vst [vmem:[#allocation40_spill] sm:$0xff] %v9910_v28  ;;  %v9913_v29 = vld [vmem:[#allocation2 + $0xb8] sm:$0xff]  ;;  %11513 = vst [vmem:[#allocation42_spill] sm:$0xff] %v9916_v4 }
 0x7c1   :  { %3527 = vmatpush1.msra.mxu0 %v9900_v49  ;;  %5781 = vmatpush3.msra.mxu1 %v9903_v22  ;;  %11512 = vst [vmem:[#allocation41_spill] sm:$0xff] %v9913_v29  ;;  %v9920_v22 = vld [vmem:[#allocation2 + $0x90] sm:$0xff]  ;;  %v9926_v49 = vld [vmem:[#allocation2 + $0x80] sm:$0xff] }
 0x7c2   :  { %3528 = vmatprep.subr.mxu0 %v9906_v27  ;;  %5782 = vmatprep.subr.mxu1 %v10980_v44  ;;  %11514 = vst [vmem:[#allocation43_spill] sm:$0xff] %v9920_v22  ;;  %v9923_v27 = vld [vmem:[#allocation2 + $0xa0] sm:$0xff]  ;;  %11516 = vst [vmem:[#allocation45_spill] sm:$0xff] %v9926_v49 }
 0x7c3   :  { %3529 = vmatpush1.msra.mxu0 %v9910_v28  ;;  %5783 = vmatpush3.msra.mxu1 %v9913_v29  ;;  %11515 = vst [vmem:[#allocation44_spill] sm:$0xff] %v9923_v27  ;;  %v9930_v29 = vld [vmem:[#allocation2 + $0x78] sm:$0xff]  ;;  %v9936_v28 = vld [vmem:[#allocation2 + $0x68] sm:$0xff] }
 0x7c4   :  { %3530 = vmatprep.subr.mxu0 %v9916_v4  ;;  %5784 = vmatprep.subr.mxu1 %v10980_v44  ;;  %11517 = vst [vmem:[#allocation46_spill] sm:$0xff] %v9930_v29  ;;  %v9933_v4 = vld [vmem:[#allocation2 + $0x88] sm:$0xff]  ;;  %11519 = vst [vmem:[#allocation48_spill] sm:$0xff] %v9936_v28 }
 0x7c5   :  { %3531 = vmatpush1.msra.mxu0 %v9920_v22  ;;  %5785 = vmatpush3.msra.mxu1 %v9923_v27  ;;  %11518 = vst [vmem:[#allocation47_spill] sm:$0xff] %v9933_v4  ;;  %v9940_v27 = vld [vmem:[#allocation2 + $0x60] sm:$0xff]  ;;  %v9946_v22 = vld [vmem:[#allocation2 + $0x50] sm:$0xff] }
 0x7c6   :  { %3532 = vmatprep.subr.mxu0 %v9926_v49  ;;  %5786 = vmatprep.subr.mxu1 %v10980_v44  ;;  %11520 = vst [vmem:[#allocation49_spill] sm:$0xff] %v9940_v27  ;;  %v9943_v49 = vld [vmem:[#allocation2 + $0x70] sm:$0xff]  ;;  %11522 = vst [vmem:[#allocation51_spill] sm:$0xff] %v9946_v22 }
 0x7c7   :  { %3533 = vmatpush1.msra.mxu0 %v9930_v29  ;;  %5787 = vmatpush3.msra.mxu1 %v9933_v4  ;;  %11521 = vst [vmem:[#allocation50_spill] sm:$0xff] %v9943_v49  ;;  %v9950_v4 = vld [vmem:[#allocation2 + $0x48] sm:$0xff]  ;;  %v9956_v29 = vld [vmem:[#allocation2 + $0x38] sm:$0xff] }
 0x7c8   :  { %3534 = vmatprep.subr.mxu0 %v9936_v28  ;;  %5788 = vmatprep.subr.mxu1 %v10980_v44  ;;  %11523 = vst [vmem:[#allocation52_spill] sm:$0xff] %v9950_v4  ;;  %v9953_v28 = vld [vmem:[#allocation2 + $0x58] sm:$0xff]  ;;  %11525 = vst [vmem:[#allocation54_spill] sm:$0xff] %v9956_v29 }
 0x7c9   :  { %3535 = vmatpush1.msra.mxu0 %v9940_v27  ;;  %5789 = vmatpush3.msra.mxu1 %v9943_v49  ;;  %11524 = vst [vmem:[#allocation53_spill] sm:$0xff] %v9953_v28  ;;  %v9960_v49 = vld [vmem:[#allocation2 + $0x30] sm:$0xff]  ;;  %v9966_v27 = vld [vmem:[#allocation2 + $0x20] sm:$0xff] }
 0x7ca   :  { %3536 = vmatprep.subr.mxu0 %v9946_v22  ;;  %5790 = vmatprep.subr.mxu1 %v10980_v44  ;;  %11526 = vst [vmem:[#allocation55_spill] sm:$0xff] %v9960_v49  ;;  %v9963_v22 = vld [vmem:[#allocation2 + $0x40] sm:$0xff]  ;;  %11528 = vst [vmem:[#allocation57_spill] sm:$0xff] %v9966_v27 }
 0x7cb   :  { %3537 = vmatpush1.msra.mxu0 %v9950_v4  ;;  %5791 = vmatpush3.msra.mxu1 %v9953_v28  ;;  %11527 = vst [vmem:[#allocation56_spill] sm:$0xff] %v9963_v22  ;;  %v9970_v28 = vld [vmem:[#allocation2 + $0x18] sm:$0xff]  ;;  %v9976_v4 = vld [vmem:[#allocation2 + $0x8] sm:$0xff] }
 0x7cc   :  { %3538 = vmatprep.subr.mxu0 %v9956_v29  ;;  %5792 = vmatprep.subr.mxu1 %v10980_v44  ;;  %11529 = vst [vmem:[#allocation58_spill] sm:$0xff] %v9970_v28  ;;  %v9973_v29 = vld [vmem:[#allocation2 + $0x28] sm:$0xff]  ;;  %11531 = vst [vmem:[#allocation60_spill] sm:$0xff] %v9976_v4 }
 0x7cd   :  { %3539 = vmatpush1.msra.mxu0 %v9960_v49  ;;  %5793 = vmatpush3.msra.mxu1 %v9963_v22  ;;  %11530 = vst [vmem:[#allocation59_spill] sm:$0xff] %v9973_v29  ;;  %v9980_v22 = vld [vmem:[#allocation2] sm:$0xff] }
 0x7ce   :  { %3540 = vmatprep.subr.mxu0 %v9966_v27  ;;  %5794 = vmatprep.subr.mxu1 %v10980_v44  ;;  %11532 = vst [vmem:[#allocation61_spill] sm:$0xff] %v9980_v22  ;;  %v9983_v27 = vld [vmem:[#allocation2 + $0x10] sm:$0xff] }
 0x7cf   :  { %3541 = vmatpush1.msra.mxu0 %v9970_v28  ;;  %5795 = vmatpush3.msra.mxu1 %v9973_v29  ;;  %11533 = vst [vmem:[#allocation62_spill] sm:$0xff] %v9983_v27  ;;  %v9989_v29 = vld [vmem:[#allocation4 + $0x170] sm:$0xff] }
 0x7d0   :  { %3542 = vmatprep.subr.mxu0 %v9976_v4  ;;  %5796 = vmatprep.subr.mxu1 %v10980_v44  ;;  %11534 = vst [vmem:[#allocation63_spill] sm:$0xff] %v9989_v29 }
 0x7d1   :  { %3543 = vmatpush1.msra.mxu0 %v9980_v22  ;;  %5797 = vmatpush3.msra.mxu1 %v9983_v27 }
 0x7d2   :  { %3576 = vmatprep.mubr.f32.mxu0 %v10980_v44  ;;  %5798 = vmatprep.mubr.msk.f32.mxu1 %vm6630_vm2, %v10980_v44 }
 0x7d3   :  { %3653 = vmatprep.subr.mxu0 %v9989_v29  ;;  %5801 = vmatprep.subr.mxu1 %v10980_v44 }
 0x82e   :  { %v3182_v4 = vpop.f32.mrf.mxu1  ;;  %v3111_v49 = vpop.f32.mrf.mxu0 }
 0x82f   :  { %v3112_v22 = vadd.f32 %v3111_v49, %v11441_v52 }
 0x830   :  { %v5695_v28 = vpop.f32.mrf.mxu1  ;;  %v3113_v56 = vpop.f32.mrf.mxu0 }
 0x831   :  { %v3183_v28 = vadd.f32 %v3182_v4, %v7657_v40  ;;  %v11537_v4 = vld [vmem:[#allocation86_spill] sm:$0xff] }
 0x84f   :  { %v3252_v5 = vpop.f32.mrf.mxu0  ;;  %v3323_v11 = vpop.f32.mrf.mxu1 }
 0x850   :  { %v3327_v27 = vadd.f32 %v3252_v5, %v3112_v22  ;;  %v3341_v29 = vadd.f32 %v9433_v10, %v3323_v11 }
 0x851   :  { %v5730_v12 = vpop.f32.mrf.mxu1  ;;  %v3254_v25 = vpop.f32.mrf.mxu0 }
 0x852   :  { %v4623_v7 = vmul.f32 -1.442695, %v3327_v27 }
 0x854   :  { %6064 = vpow2.f32 %v4623_v7  ;;  %v11536_v7 = vld [vmem:[#allocation78_spill] sm:$0xff] }
 0x861   :  { %v6065_v42 = vpop.eup %6064 }
 0x862   :  { %v3331_v63 = vadd.f32 1.0, %v6065_v42 }
 0x864   :  { %6066 = vrcp.f32 %v3331_v63 }
 0x871   :  { %v6067_v30 = vpop.eup %6066  ;;  %v3415_v18 = vpop.f32.mrf.mxu0 }
 0x872   :  { %v3486_v58 = vpop.f32.mrf.mxu1  ;;  %v3342_v59 = vmul.f32 %v6067_v30, %v3341_v29  ;;  %v3490_v49 = vadd.f32 %v3415_v18, %v11535_v54  ;;  %v10003_v30 = vld [vmem:[%s10526_s5] ss:$0 sm:$0xff]  ;;  %v3114_v18 = vadd.f32 %v3113_v56, %v7664_v14 }
 0x873   :  { %v3417_v5 = vpop.f32.mrf.mxu0 }
 0x874   :  { %v5765_v52 = vpop.f32.mrf.mxu1  ;;  %v9997_v53 = vadd.f32 %v3342_v59, %v3183_v28  ;;  %v4625_v12 = vmul.f32 -1.442695, %v3490_v49  ;;  %v3497_v42 = vadd.f32 %v3417_v5, %v11536_v7  ;;  %v3334_v28 = vadd.f32 %v3254_v25, %v3114_v18  ;;  %v10016_v25 = vld [vmem:[#allocation4 + $0x178] sm:$0xff]  ;;  %v10039_v18 = vld [vmem:[#allocation4 + $0x128] sm:$0xff] }
 0x875   :  { %v3504_v52 = vadd.f32 %v10003_v30, %v3486_v58  ;;  %v10013_v58 = vld [vmem:[#allocation4 + $0x168] sm:$0xff] }
 0x876   :  { %6068 = vpow2.f32 %v4625_v12  ;;  %v4626_v63 = vmul.f32 -1.442695, %v3497_v42  ;;  %v4624_v49 = vmul.f32 -1.442695, %v3334_v28  ;;  %v10049_v28 = vld [vmem:[#allocation4 + $0x110] sm:$0xff] }
 0x877   :  { %11538 = vst [vmem:[#allocation66_spill] sm:$0xff] %v10049_v28 }
 0x878   :  { %6070 = vpow2.f32 %v4626_v63 }
 0x883   :  { %v6069_v22 = vpop.eup %6068 }
 0x884   :  { %v3494_v10 = vadd.f32 1.0, %v6069_v22 }
 0x885   :  { %v6071_v11 = vpop.eup %6070 }
 0x886   :  { %6072 = vrcp.f32 %v3494_v10  ;;  %v3501_v27 = vadd.f32 1.0, %v6071_v11  ;;  %v10019_v10 = vld [vmem:[#allocation4 + $0x158] sm:$0xff]  ;;  %v10026_v11 = vld [vmem:[#allocation4 + $0x160] sm:$0xff] }
 0x888   :  { %6074 = vrcp.f32 %v3501_v27  ;;  %v10029_v27 = vld [vmem:[#allocation4 + $0x140] sm:$0xff] }
 0x893   :  { %v6073_v54 = vpop.eup %6072 }
 0x894   :  { %v3505_v59 = vmul.f32 %v6073_v54, %v3504_v52  ;;  %v10033_v54 = vld [vmem:[#allocation4 + $0x138] sm:$0xff] }
 0x895   :  { %v6075_v12 = vpop.eup %6074 }
 0x896   :  { %v3506_v29 = vadd.f32 %v3505_v59, %v11537_v4  ;;  %v3508_v5 = vsub.f32 1.0, %v6075_v12  ;;  %v3510_v63 = vmul.f32 %v6075_v12, %v9443_v6  ;;  %v10023_v6 = vld [vmem:[#allocation4 + $0x150] sm:$0xff]  ;;  %v10036_v59 = vld [vmem:[#allocation4 + $0x148] sm:$0xff]  ;;  %v10043_v4 = vld [vmem:[#allocation4 + $0x120] sm:$0xff] }
 0x897   :  { %v10056_v12 = vld [vmem:[#allocation4 + $0x118] sm:$0xff] }
 0x898   :  { %6076 = vtanh.f32 %v3506_v29  ;;  %v10046_v29 = vld [vmem:[#allocation4 + $0x130] sm:$0xff]  ;;  %11540 = vst [vmem:[#allocation74_spill] sm:$0xff] %v10056_v12 }
 0x899   :  { %6078 = vpow2.f32 %v4624_v49  ;;  %v10053_v49 = vld [vmem:[#allocation4 + $0x108] sm:$0xff] }
 0x89a   :  { %11539 = vst [vmem:[#allocation67_spill] sm:$0xff] %v10053_v49 }
 0x8a5   :  { %v6077_v7 = vpop.eup %6076 }
 0x8a6   :  { %v3509_v42 = vmul.f32 %v6077_v7, %v3508_v5  ;;  %v6079_v56 = vpop.eup %6078  ;;  %v10059_v5 = vld [vmem:[#allocation4 + $0xf8] sm:$0xff]  ;;  %v10064_v7 = vld [vmem:[#allocation4 + $0xf0] sm:$0xff] }
 0x8a7   :  { %v3338_v52 = vadd.f32 1.0, %v6079_v56  ;;  %11541 = vst [vmem:[#allocation87_spill] sm:$0xff] %v10059_v5  ;;  %11542 = vst [vmem:[#allocation88_spill] sm:$0xff] %v10064_v7  ;;  %v10074_v56 = vld [vmem:[#allocation4 + $0xd8] sm:$0xff] }
 0x8a8   :  { %v10009_v22 = vadd.f32 %v3510_v63, %v3509_v42  ;;  %v10067_v42 = vld [vmem:[#allocation4 + $0x100] sm:$0xff]  ;;  %11545 = vst [vmem:[#allocation76_spill] sm:$0xff] %v10074_v56 }
 0x8a9   :  { %6080 = vrcp.f32 %v3338_v52  ;;  %11543 = vst [vmem:[#allocation89_spill] sm:$0xff] %v10067_v42  ;;  %v10070_v63 = vld [vmem:[#allocation4 + $0xe0] sm:$0xff]  ;;  %v10077_v52 = vld [vmem:[#allocation4 + $0xe8] sm:$0xff] }
 0x8aa   :  { %3577 = vmatmul.mubr.f32.vlgmr.msra.gmra.mxu0 %v10009_v22  ;;  %5799 = vmatmul.mubr.f32.vlgmr.msra.gmra.mxu1 %v10009_v22  ;;  %6082 = vtanh.f32 %v9997_v53  ;;  %11544 = vst [vmem:[#allocation75_spill] sm:$0xff] %v10070_v63  ;;  %11546 = vst [vmem:[#allocation83_spill] sm:$0xff] %v10077_v52  ;;  %v10080_v53 = vld [vmem:[#allocation4 + $0xc8] sm:$0xff] }
 0x8ab   :  { %3654 = vmatpush1.msra.mxu0 %v10013_v58  ;;  %5802 = vmatpush3.msra.mxu1 %v10016_v25  ;;  %11547 = vst [vmem:[#allocation70_spill] sm:$0xff] %v10080_v53 }
 0x8ac   :  { %3655 = vmatprep.subr.mxu0 %v10019_v10  ;;  %5803 = vmatprep.subr.mxu1 %v10980_v44 }
 0x8ad   :  { %3656 = vmatpush1.msra.mxu0 %v10023_v6  ;;  %5804 = vmatpush3.msra.mxu1 %v10026_v11 }
 0x8ae   :  { %3657 = vmatprep.subr.mxu0 %v10029_v27  ;;  %5805 = vmatprep.subr.mxu1 %v10980_v44 }
 0x8af   :  { %3658 = vmatpush1.msra.mxu0 %v10033_v54  ;;  %5806 = vmatpush3.msra.mxu1 %v10036_v59 }
 0x8b0   :  { %3659 = vmatprep.subr.mxu0 %v10039_v18  ;;  %5807 = vmatprep.subr.mxu1 %v10980_v44 }
 0x8b1   :  { %3660 = vmatpush1.msra.mxu0 %v10043_v4  ;;  %5808 = vmatpush3.msra.mxu1 %v10046_v29 }
 0x8b2   :  { %3661 = vmatprep.subr.mxu0 %v10049_v28  ;;  %5809 = vmatprep.subr.mxu1 %v10980_v44  ;;  %v10161_v28 = vld [vmem:[#allocation4 + $0x8] sm:$0xff] }
 0x8b3   :  { %3662 = vmatpush1.msra.mxu0 %v10053_v49  ;;  %5810 = vmatpush3.msra.mxu1 %v10056_v12  ;;  %v10140_v12 = vld [vmem:[#allocation4 + $0x38] sm:$0xff]  ;;  %v10150_v49 = vld [vmem:[#allocation4 + $0x20] sm:$0xff] }
 0x8b4   :  { %3663 = vmatprep.subr.mxu0 %v10059_v5  ;;  %5811 = vmatprep.subr.mxu1 %v10980_v44  ;;  %v10130_v5 = vld [vmem:[#allocation4 + $0x50] sm:$0xff]  ;;  %11565 = vst [vmem:[#allocation105_spill] sm:$0xff] %v10140_v12 }
 0x8b5   :  { %3664 = vmatpush1.msra.mxu0 %v10064_v7  ;;  %5812 = vmatpush3.msra.mxu1 %v10067_v42  ;;  %v10084_v42 = vld [vmem:[#allocation4 + $0xc0] sm:$0xff]  ;;  %v10090_v7 = vld [vmem:[#allocation4 + $0xb0] sm:$0xff]  ;;  %11562 = vst [vmem:[#allocation102_spill] sm:$0xff] %v10130_v5 }
 0x8b6   :  { %3665 = vmatprep.subr.mxu0 %v10070_v63  ;;  %5813 = vmatprep.subr.mxu1 %v10980_v44  ;;  %11548 = vst [vmem:[#allocation71_spill] sm:$0xff] %v10084_v42  ;;  %v10087_v63 = vld [vmem:[#allocation4 + $0xd0] sm:$0xff]  ;;  %11550 = vst [vmem:[#allocation90_spill] sm:$0xff] %v10090_v7 }
 0x8b7   :  { %3666 = vmatpush1.msra.mxu0 %v10074_v56  ;;  %5814 = vmatpush3.msra.mxu1 %v10077_v52  ;;  %11549 = vst [vmem:[#allocation81_spill] sm:$0xff] %v10087_v63  ;;  %v10094_v52 = vld [vmem:[#allocation4 + $0xa8] sm:$0xff]  ;;  %v10100_v56 = vld [vmem:[#allocation4 + $0x98] sm:$0xff] }
 0x8b8   :  { %3667 = vmatprep.subr.mxu0 %v10080_v53  ;;  %5815 = vmatprep.subr.mxu1 %v10980_v44  ;;  %11551 = vst [vmem:[#allocation91_spill] sm:$0xff] %v10094_v52  ;;  %v10097_v53 = vld [vmem:[#allocation4 + $0xb8] sm:$0xff]  ;;  %11553 = vst [vmem:[#allocation93_spill] sm:$0xff] %v10100_v56 }
 0x8b9   :  { %3668 = vmatpush1.msra.mxu0 %v10084_v42  ;;  %5816 = vmatpush3.msra.mxu1 %v10087_v63  ;;  %11552 = vst [vmem:[#allocation92_spill] sm:$0xff] %v10097_v53  ;;  %v10104_v63 = vld [vmem:[#allocation4 + $0x90] sm:$0xff]  ;;  %v10110_v42 = vld [vmem:[#allocation4 + $0x80] sm:$0xff] }
 0x8ba   :  { %3669 = vmatprep.subr.mxu0 %v10090_v7  ;;  %5817 = vmatprep.subr.mxu1 %v10980_v44  ;;  %11554 = vst [vmem:[#allocation94_spill] sm:$0xff] %v10104_v63  ;;  %v10107_v7 = vld [vmem:[#allocation4 + $0xa0] sm:$0xff]  ;;  %11556 = vst [vmem:[#allocation96_spill] sm:$0xff] %v10110_v42 }
 0x8bb   :  { %3670 = vmatpush1.msra.mxu0 %v10094_v52  ;;  %5818 = vmatpush3.msra.mxu1 %v10097_v53  ;;  %11555 = vst [vmem:[#allocation95_spill] sm:$0xff] %v10107_v7  ;;  %v10114_v53 = vld [vmem:[#allocation4 + $0x78] sm:$0xff]  ;;  %v6081_v52 = vpop.eup %6080 }
 0x8bc   :  { %3671 = vmatprep.subr.mxu0 %v10100_v56  ;;  %5819 = vmatprep.subr.mxu1 %v10980_v44  ;;  %11557 = vst [vmem:[#allocation97_spill] sm:$0xff] %v10114_v53  ;;  %v10117_v56 = vld [vmem:[#allocation4 + $0x88] sm:$0xff] }
 0x8bd   :  { %3672 = vmatpush1.msra.mxu0 %v10104_v63  ;;  %5820 = vmatpush3.msra.mxu1 %v10107_v7  ;;  %11558 = vst [vmem:[#allocation98_spill] sm:$0xff] %v10117_v56  ;;  %v10120_v63 = vld [vmem:[#allocation4 + $0x68] sm:$0xff]  ;;  %v10124_v7 = vld [vmem:[#allocation4 + $0x60] sm:$0xff] }
 0x8be   :  { %3673 = vmatprep.subr.mxu0 %v10110_v42  ;;  %5821 = vmatprep.subr.mxu1 %v10980_v44  ;;  %11559 = vst [vmem:[#allocation99_spill] sm:$0xff] %v10120_v63  ;;  %11560 = vst [vmem:[#allocation100_spill] sm:$0xff] %v10124_v7  ;;  %v10127_v42 = vld [vmem:[#allocation4 + $0x70] sm:$0xff] }
 0x8bf   :  { %3674 = vmatpush1.msra.mxu0 %v10114_v53  ;;  %5822 = vmatpush3.msra.mxu1 %v10117_v56  ;;  %11561 = vst [vmem:[#allocation101_spill] sm:$0xff] %v10127_v42  ;;  %v6083_v53 = vpop.eup %6082  ;;  %v10134_v56 = vld [vmem:[#allocation4 + $0x48] sm:$0xff] }
 0x8c0   :  { %3675 = vmatprep.subr.mxu0 %v10120_v63  ;;  %5823 = vmatprep.subr.mxu1 %v10980_v44  ;;  %11563 = vst [vmem:[#allocation103_spill] sm:$0xff] %v10134_v56  ;;  %v10137_v63 = vld [vmem:[#allocation4 + $0x58] sm:$0xff] }
 0x8c1   :  { %3676 = vmatpush1.msra.mxu0 %v10124_v7  ;;  %5824 = vmatpush3.msra.mxu1 %v10127_v42  ;;  %11564 = vst [vmem:[#allocation104_spill] sm:$0xff] %v10137_v63  ;;  %v3345_v7 = vsub.f32 1.0, %v6081_v52  ;;  %v10144_v42 = vld [vmem:[#allocation4 + $0x30] sm:$0xff] }
 0x8c2   :  { %3677 = vmatprep.subr.mxu0 %v10130_v5  ;;  %5825 = vmatprep.subr.mxu1 %v10980_v44  ;;  %11566 = vst [vmem:[#allocation106_spill] sm:$0xff] %v10144_v42  ;;  %v10147_v5 = vld [vmem:[#allocation4 + $0x40] sm:$0xff] }
 0x8c3   :  { %3678 = vmatpush1.msra.mxu0 %v10134_v56  ;;  %5826 = vmatpush3.msra.mxu1 %v10137_v63  ;;  %v3346_v56 = vmul.f32 %v6083_v53, %v3345_v7  ;;  %v10154_v63 = vld [vmem:[#allocation4 + $0x18] sm:$0xff]  ;;  %v10165_v7 = vld [vmem:[#allocation4] sm:$0xff] }
 0x8c4   :  { %3679 = vmatprep.subr.mxu0 %v10140_v12  ;;  %5827 = vmatprep.subr.mxu1 %v10980_v44  ;;  %11567 = vst [vmem:[#allocation107_spill] sm:$0xff] %v10154_v63  ;;  %v10157_v12 = vld [vmem:[#allocation4 + $0x28] sm:$0xff] }
 0x8c5   :  { %3680 = vmatpush1.msra.mxu0 %v10144_v42  ;;  %5828 = vmatpush3.msra.mxu1 %v10147_v5  ;;  %v3347_v42 = vmul.f32 %v6081_v52, %v9510_v13  ;;  %v11568_v13 = vld [vmem:[#allocation69_spill] sm:$0xff]  ;;  %v11608_v52 = vld [vmem:[#allocation44_spill] sm:$0xff] }
 0x8c6   :  { %3681 = vmatprep.subr.mxu0 %v10150_v49  ;;  %5829 = vmatprep.subr.mxu1 %v10980_v44 }
 0x8c7   :  { %3682 = vmatpush1.msra.mxu0 %v10154_v63  ;;  %5830 = vmatpush3.msra.mxu1 %v10157_v12  ;;  %v10169_v53 = vadd.f32 %v3347_v42, %v3346_v56  ;;  %v10171_v63 = vld [vmem:[#allocation4 + $0x10] sm:$0xff]  ;;  %v11606_v42 = vld [vmem:[#allocation42_spill] sm:$0xff] }
 0x8c8   :  { %3683 = vmatprep.subr.mxu0 %v10161_v28  ;;  %5831 = vmatprep.subr.mxu1 %v10980_v44  ;;  %v11607_v56 = vld [vmem:[#allocation43_spill] sm:$0xff] }
 0x8c9   :  { %3684 = vmatpush1.msra.mxu0 %v10165_v7  ;;  %3717 = vmatprep.mubr.f32.mxu0 %v10980_v44 }
 0x8ca   :  { %5832 = vmatpush3.msra.mxu1 %v10171_v63  ;;  %5833 = vmatprep.mubr.msk.f32.mxu1 %vm6630_vm2, %v10980_v44 }
 0x8cb   :  { %3718 = vmatmul.mubr.f32.vlgmr.msra.gmra.mxu0 %v10169_v53  ;;  %5834 = vmatmul.mubr.f32.vlgmr.msra.gmra.mxu1 %v10169_v53 }
 0x8cc   :  { %3816 = vmatprep.subr.mxu0 %v9520_v17  ;;  %5836 = vmatprep.subr.mxu1 %v10980_v44  ;;  %v11569_v17 = vld [vmem:[#allocation82_spill] sm:$0xff] }
 0x8cd   :  { %3817 = vmatpush1.msra.mxu0 %v9527_v0  ;;  %5837 = vmatpush3.msra.mxu1 %v9533_v46  ;;  %v11570_v0 = vld [vmem:[#allocation116_spill] sm:$0xff] }
 0x8ce   :  { %3818 = vmatprep.subr.mxu0 %v9539_v9  ;;  %5838 = vmatprep.subr.mxu1 %v10980_v44  ;;  %v11571_v46 = vld [vmem:[#allocation72_spill] sm:$0xff]  ;;  %v11572_v9 = vld [vmem:[#allocation73_spill] sm:$0xff] }
 0x8cf   :  { %3819 = vmatpush1.msra.mxu0 %v9546_v60  ;;  %5839 = vmatpush3.msra.mxu1 %v9552_v26  ;;  %v11573_v60 = vld [vmem:[#allocation84_spill] sm:$0xff] }
 0x8d0   :  { %3820 = vmatprep.subr.mxu0 %v9558_v31  ;;  %5840 = vmatprep.subr.mxu1 %v10980_v44  ;;  %v11574_v26 = vld [vmem:[#allocation12_spill] sm:$0xff]  ;;  %v11575_v31 = vld [vmem:[#allocation10_spill] sm:$0xff] }
 0x8d1   :  { %3821 = vmatpush1.msra.mxu0 %v9565_v32  ;;  %5841 = vmatpush3.msra.mxu1 %v9571_v33  ;;  %v11576_v32 = vld [vmem:[#allocation11_spill] sm:$0xff]  ;;  %v11577_v33 = vld [vmem:[#allocation13_spill] sm:$0xff] }
 0x8d2   :  { %3822 = vmatprep.subr.mxu0 %v9577_v34  ;;  %5842 = vmatprep.subr.mxu1 %v10980_v44  ;;  %v11578_v34 = vld [vmem:[#allocation14_spill] sm:$0xff] }
 0x8d3   :  { %3823 = vmatpush1.msra.mxu0 %v9584_v20  ;;  %5843 = vmatpush3.msra.mxu1 %v9590_v45  ;;  %v11579_v20 = vld [vmem:[#allocation15_spill] sm:$0xff]  ;;  %v11580_v45 = vld [vmem:[#allocation16_spill] sm:$0xff] }
 0x8d4   :  { %3824 = vmatprep.subr.mxu0 %v9596_v2  ;;  %5844 = vmatprep.subr.mxu1 %v10980_v44  ;;  %v11581_v2 = vld [vmem:[#allocation17_spill] sm:$0xff] }
 0x8d5   :  { %3825 = vmatpush1.msra.mxu0 %v9603_v8  ;;  %5845 = vmatpush3.msra.mxu1 %v9609_v24  ;;  %v11582_v8 = vld [vmem:[#allocation18_spill] sm:$0xff]  ;;  %v11583_v24 = vld [vmem:[#allocation19_spill] sm:$0xff] }
 0x8d6   :  { %3826 = vmatprep.subr.mxu0 %v9615_v61  ;;  %5846 = vmatprep.subr.mxu1 %v10980_v44  ;;  %v11584_v61 = vld [vmem:[#allocation20_spill] sm:$0xff] }
 0x8d7   :  { %3827 = vmatpush1.msra.mxu0 %v9622_v23  ;;  %5847 = vmatpush3.msra.mxu1 %v9628_v55  ;;  %v11585_v23 = vld [vmem:[#allocation22_spill] sm:$0xff]  ;;  %v11586_v55 = vld [vmem:[#allocation21_spill] sm:$0xff] }
 0x8d8   :  { %3828 = vmatprep.subr.mxu0 %v9634_v37  ;;  %5848 = vmatprep.subr.mxu1 %v10980_v44  ;;  %v11587_v37 = vld [vmem:[#allocation23_spill] sm:$0xff] }
 0x8d9   :  { %3829 = vmatpush1.msra.mxu0 %v9641_v35  ;;  %5849 = vmatpush3.msra.mxu1 %v9647_v48  ;;  %v11588_v35 = vld [vmem:[#allocation24_spill] sm:$0xff]  ;;  %v11589_v48 = vld [vmem:[#allocation25_spill] sm:$0xff] }
 0x8da   :  { %3830 = vmatprep.subr.mxu0 %v9653_v36  ;;  %5850 = vmatprep.subr.mxu1 %v10980_v44  ;;  %v11590_v36 = vld [vmem:[#allocation26_spill] sm:$0xff] }
 0x8db   :  { %3831 = vmatpush1.msra.mxu0 %v9660_v43  ;;  %5851 = vmatpush3.msra.mxu1 %v9666_v57  ;;  %v11591_v43 = vld [vmem:[#allocation27_spill] sm:$0xff]  ;;  %v11592_v57 = vld [vmem:[#allocation28_spill] sm:$0xff] }
 0x8dc   :  { %3832 = vmatprep.subr.mxu0 %v9672_v39  ;;  %5852 = vmatprep.subr.mxu1 %v10980_v44  ;;  %v11593_v39 = vld [vmem:[#allocation29_spill] sm:$0xff] }
 0x8dd   :  { %3833 = vmatpush1.msra.mxu0 %v9679_v1  ;;  %5853 = vmatpush3.msra.mxu1 %v9685_v21  ;;  %v11594_v1 = vld [vmem:[#allocation30_spill] sm:$0xff]  ;;  %v11595_v21 = vld [vmem:[#allocation31_spill] sm:$0xff] }
 0x8de   :  { %3834 = vmatprep.subr.mxu0 %v9691_v16  ;;  %5854 = vmatprep.subr.mxu1 %v10980_v44  ;;  %v11596_v16 = vld [vmem:[#allocation32_spill] sm:$0xff] }
 0x8df   :  { %3835 = vmatpush1.msra.mxu0 %v9698_v38  ;;  %5855 = vmatpush3.msra.mxu1 %v9704_v41  ;;  %v11597_v38 = vld [vmem:[#allocation33_spill] sm:$0xff]  ;;  %v11598_v41 = vld [vmem:[#allocation34_spill] sm:$0xff] }
 0x8e0   :  { %3836 = vmatprep.subr.mxu0 %v9710_v47  ;;  %5856 = vmatprep.subr.mxu1 %v10980_v44  ;;  %v11599_v47 = vld [vmem:[#allocation35_spill] sm:$0xff] }
 0x8e1   :  { %3837 = vmatpush1.msra.mxu0 %v9717_v62  ;;  %5857 = vmatpush3.msra.mxu1 %v9723_v19  ;;  %v11600_v62 = vld [vmem:[#allocation36_spill] sm:$0xff]  ;;  %v11601_v19 = vld [vmem:[#allocation37_spill] sm:$0xff] }
 0x8e2   :  { %3838 = vmatprep.subr.mxu0 %v9729_v15  ;;  %5858 = vmatprep.subr.mxu1 %v10980_v44  ;;  %v11602_v15 = vld [vmem:[#allocation38_spill] sm:$0xff] }
 0x8e3   :  { %3839 = vmatpush1.msra.mxu0 %v9736_v3  ;;  %5859 = vmatpush3.msra.mxu1 %v9742_v50  ;;  %v11603_v3 = vld [vmem:[#allocation39_spill] sm:$0xff]  ;;  %v11604_v50 = vld [vmem:[#allocation40_spill] sm:$0xff] }
 0x8e4   :  { %3840 = vmatprep.subr.mxu0 %v9748_v51  ;;  %5860 = vmatprep.subr.mxu1 %v10980_v44  ;;  %v11605_v51 = vld [vmem:[#allocation41_spill] sm:$0xff] }
 0x8e5   :  { %3841 = vmatpush1.msra.mxu0 %v11568_v13  ;;  %5861 = vmatpush3.msra.mxu1 %v11569_v17  ;;  %v11609_v13 = vld [vmem:[#allocation45_spill] sm:$0xff]  ;;  %v11610_v17 = vld [vmem:[#allocation46_spill] sm:$0xff] }
 0x8e6   :  { %3842 = vmatprep.subr.mxu0 %v11570_v0  ;;  %5862 = vmatprep.subr.mxu1 %v10980_v44  ;;  %v11611_v0 = vld [vmem:[#allocation47_spill] sm:$0xff] }
 0x8e7   :  { %3843 = vmatpush1.msra.mxu0 %v11571_v46  ;;  %5863 = vmatpush3.msra.mxu1 %v11572_v9  ;;  %v11612_v46 = vld [vmem:[#allocation48_spill] sm:$0xff]  ;;  %v11613_v9 = vld [vmem:[#allocation49_spill] sm:$0xff] }
 0x8e8   :  { %3844 = vmatprep.subr.mxu0 %v11573_v60  ;;  %5864 = vmatprep.subr.mxu1 %v10980_v44  ;;  %v11614_v60 = vld [vmem:[#allocation50_spill] sm:$0xff] }
 0x8e9   :  { %3845 = vmatpush1.msra.mxu0 %v11574_v26  ;;  %5865 = vmatpush3.msra.mxu1 %v11575_v31  ;;  %v11615_v26 = vld [vmem:[#allocation51_spill] sm:$0xff]  ;;  %v11616_v31 = vld [vmem:[#allocation52_spill] sm:$0xff] }
 0x8ea   :  { %3846 = vmatprep.subr.mxu0 %v11576_v32  ;;  %5866 = vmatprep.subr.mxu1 %v10980_v44  ;;  %v11617_v32 = vld [vmem:[#allocation53_spill] sm:$0xff] }
 0x8eb   :  { %3847 = vmatpush1.msra.mxu0 %v11577_v33  ;;  %3880 = vmatprep.mubr.f32.mxu0 %v10980_v44  ;;  %v11618_v33 = vld [vmem:[#allocation54_spill] sm:$0xff] }
 0x8ec   :  { %5867 = vmatpush3.msra.mxu1 %v11578_v34  ;;  %5868 = vmatprep.mubr.msk.f32.mxu1 %vm6630_vm2, %v10980_v44  ;;  %v11619_v34 = vld [vmem:[#allocation55_spill] sm:$0xff] }
 0x8ed   :  { %3881 = vmatmul.mubr.f32.vlgmr.msra.gmra.mxu0 %v10009_v22  ;;  %5869 = vmatmul.mubr.f32.vlgmr.msra.gmra.mxu1 %v10009_v22 }
 0x8ee   :  { %3979 = vmatprep.subr.mxu0 %v11579_v20  ;;  %5871 = vmatprep.subr.mxu1 %v10980_v44  ;;  %v11620_v20 = vld [vmem:[#allocation56_spill] sm:$0xff] }
 0x8ef   :  { %3980 = vmatpush1.msra.mxu0 %v11580_v45  ;;  %5872 = vmatpush3.msra.mxu1 %v11581_v2  ;;  %v11621_v45 = vld [vmem:[#allocation57_spill] sm:$0xff]  ;;  %v11622_v2 = vld [vmem:[#allocation58_spill] sm:$0xff] }
 0x8f0   :  { %3981 = vmatprep.subr.mxu0 %v11582_v8  ;;  %5873 = vmatprep.subr.mxu1 %v10980_v44  ;;  %v11623_v8 = vld [vmem:[#allocation59_spill] sm:$0xff] }
 0x8f1   :  { %3982 = vmatpush1.msra.mxu0 %v11583_v24  ;;  %5874 = vmatpush3.msra.mxu1 %v11584_v61  ;;  %v11624_v24 = vld [vmem:[#allocation60_spill] sm:$0xff]  ;;  %v11625_v61 = vld [vmem:[#allocation61_spill] sm:$0xff] }
 0x8f2   :  { %3983 = vmatprep.subr.mxu0 %v11585_v23  ;;  %5875 = vmatprep.subr.mxu1 %v10980_v44  ;;  %v11626_v23 = vld [vmem:[#allocation62_spill] sm:$0xff] }
 0x8f3   :  { %3984 = vmatpush1.msra.mxu0 %v11586_v55  ;;  %5876 = vmatpush3.msra.mxu1 %v11587_v37  ;;  %v11627_v55 = vld [vmem:[#allocation63_spill] sm:$0xff] }
 0x8f4   :  { %3985 = vmatprep.subr.mxu0 %v11588_v35  ;;  %5877 = vmatprep.subr.mxu1 %v10980_v44 }
 0x8f5   :  { %3986 = vmatpush1.msra.mxu0 %v11589_v48  ;;  %5878 = vmatpush3.msra.mxu1 %v11590_v36 }
 0x8f6   :  { %3987 = vmatprep.subr.mxu0 %v11591_v43  ;;  %5879 = vmatprep.subr.mxu1 %v10980_v44  ;;  %v11628_v43 = vld [vmem:[#allocation9_spill] sm:$0xff] }
 0x8f7   :  { %3988 = vmatpush1.msra.mxu0 %v11592_v57  ;;  %5880 = vmatpush3.msra.mxu1 %v11593_v39 }
 0x8f8   :  { %3989 = vmatprep.subr.mxu0 %v11594_v1  ;;  %5881 = vmatprep.subr.mxu1 %v10980_v44 }
 0x8f9   :  { %3990 = vmatpush1.msra.mxu0 %v11595_v21  ;;  %5882 = vmatpush3.msra.mxu1 %v11596_v16 }
 0x8fa   :  { %3991 = vmatprep.subr.mxu0 %v11597_v38  ;;  %5883 = vmatprep.subr.mxu1 %v10980_v44 }
 0x8fb   :  { %3992 = vmatpush1.msra.mxu0 %v11598_v41  ;;  %5884 = vmatpush3.msra.mxu1 %v11599_v47 }
 0x8fc   :  { %3993 = vmatprep.subr.mxu0 %v11600_v62  ;;  %5885 = vmatprep.subr.mxu1 %v10980_v44 }
 0x8fd   :  { %3994 = vmatpush1.msra.mxu0 %v11601_v19  ;;  %5886 = vmatpush3.msra.mxu1 %v11602_v15  ;;  %v10320_v19 = vld [vmem:[%s10530_s9] ss:$0 sm:$0xff] }
 0x8fe   :  { %3995 = vmatprep.subr.mxu0 %v11603_v3  ;;  %5887 = vmatprep.subr.mxu1 %v10980_v44 }
 0x8ff   :  { %3996 = vmatpush1.msra.mxu0 %v11604_v50  ;;  %5888 = vmatpush3.msra.mxu1 %v11605_v51 }
 0x900   :  { %3997 = vmatprep.subr.mxu0 %v11606_v42  ;;  %5889 = vmatprep.subr.mxu1 %v10980_v44 }
 0x901   :  { %3998 = vmatpush1.msra.mxu0 %v11607_v56  ;;  %5890 = vmatpush3.msra.mxu1 %v11608_v52  ;;  %v11629_v52 = vld [vmem:[#allocation79_spill] sm:$0xff] }
 0x902   :  { %3999 = vmatprep.subr.mxu0 %v11609_v13  ;;  %5891 = vmatprep.subr.mxu1 %v10980_v44 }
 0x903   :  { %4000 = vmatpush1.msra.mxu0 %v11610_v17  ;;  %5892 = vmatpush3.msra.mxu1 %v11611_v0 }
 0x904   :  { %4001 = vmatprep.subr.mxu0 %v11612_v46  ;;  %5893 = vmatprep.subr.mxu1 %v10980_v44 }
 0x905   :  { %4002 = vmatpush1.msra.mxu0 %v11613_v9  ;;  %5894 = vmatpush3.msra.mxu1 %v11614_v60  ;;  %v11630_v60 = vld [vmem:[#allocation80_spill] sm:$0xff] }
 0x906   :  { %4003 = vmatprep.subr.mxu0 %v11615_v26  ;;  %5895 = vmatprep.subr.mxu1 %v10980_v44 }
 0x907   :  { %4004 = vmatpush1.msra.mxu0 %v11616_v31  ;;  %5896 = vmatpush3.msra.mxu1 %v11617_v32 }
 0x908   :  { %4005 = vmatprep.subr.mxu0 %v11618_v33  ;;  %5897 = vmatprep.subr.mxu1 %v10980_v44 }
 0x909   :  { %4006 = vmatpush1.msra.mxu0 %v11619_v34  ;;  %5898 = vmatpush3.msra.mxu1 %v11620_v20 }
 0x90a   :  { %4007 = vmatprep.subr.mxu0 %v11621_v45  ;;  %5899 = vmatprep.subr.mxu1 %v10980_v44 }
 0x90b   :  { %4008 = vmatpush1.msra.mxu0 %v11622_v2  ;;  %5900 = vmatpush3.msra.mxu1 %v11623_v8 }
 0x90c   :  { %4009 = vmatprep.subr.mxu0 %v11624_v24  ;;  %5901 = vmatprep.subr.mxu1 %v10980_v44 }
 0x90d   :  { %4010 = vmatpush1.msra.mxu0 %v11625_v61  ;;  %5902 = vmatpush3.msra.mxu1 %v11626_v23  ;;  %v11631_v61 = vld [vmem:[#allocation85_spill] sm:$0xff] }
 0x90e   :  { %4043 = vmatprep.mubr.f32.mxu0 %v10980_v44  ;;  %5903 = vmatprep.mubr.msk.f32.mxu1 %vm6630_vm2, %v10980_v44 }
 0x90f   :  { %4120 = vmatprep.subr.mxu0 %v11627_v55  ;;  %5906 = vmatprep.subr.mxu1 %v10980_v44 }
 0x96a   :  { %v3649_v37 = vpop.f32.mrf.mxu1  ;;  %v3578_v48 = vpop.f32.mrf.mxu0 }
 0x96b   :  { %v3579_v57 = vadd.f32 %v3578_v48, %v11628_v43  ;;  %v3650_v42 = vadd.f32 %v3649_v37, %v7657_v40 }
 0x96c   :  { %v5800_v35 = vpop.f32.mrf.mxu1  ;;  %v3580_v36 = vpop.f32.mrf.mxu0 }
 0x96d   :  { %v3581_v24 = vadd.f32 %v3580_v36, %v7664_v14  ;;  %v11643_v36 = vld [vmem:[#allocation81_spill] sm:$0xff] }
 0x98b   :  { %v3719_v39 = vpop.f32.mrf.mxu0  ;;  %v3790_v1 = vpop.f32.mrf.mxu1 }
 0x98c   :  { %v3794_v21 = vadd.f32 %v3719_v39, %v3579_v57  ;;  %v3808_v15 = vadd.f32 %v10320_v19, %v3790_v1 }
 0x98d   :  { %v5835_v16 = vpop.f32.mrf.mxu1  ;;  %v3721_v62 = vpop.f32.mrf.mxu0 }
 0x98e   :  { %v4627_v38 = vmul.f32 -1.442695, %v3794_v21  ;;  %v3801_v55 = vadd.f32 %v3721_v62, %v3581_v24  ;;  %v11644_v16 = vld [vmem:[#allocation90_spill] sm:$0xff]  ;;  %v4304_v24 = vld [vmem:[#allocation6 + $0xa0] sm:$0xff] }
 0x98f   :  { %v11648_v62 = vld [vmem:[#allocation94_spill] sm:$0xff] }
 0x990   :  { %6084 = vpow2.f32 %v4627_v38  ;;  %v4628_v37 = vmul.f32 -1.442695, %v3801_v55  ;;  %v11645_v38 = vld [vmem:[#allocation91_spill] sm:$0xff]  ;;  %v4301_v55 = vld [vmem:[#allocation6 + $0x88] sm:$0xff] }
 0x99d   :  { %v6085_v41 = vpop.eup %6084 }
 0x99e   :  { %v3798_v47 = vadd.f32 1.0, %v6085_v41  ;;  %v11646_v41 = vld [vmem:[#allocation92_spill] sm:$0xff] }
 0x9a0   :  { %6086 = vrcp.f32 %v3798_v47  ;;  %v11647_v47 = vld [vmem:[#allocation93_spill] sm:$0xff] }
 0x9ad   :  { %v6087_v3 = vpop.eup %6086  ;;  %v3882_v50 = vpop.f32.mrf.mxu0 }
 0x9ae   :  { %v3953_v51 = vpop.f32.mrf.mxu1  ;;  %v3809_v56 = vmul.f32 %v6087_v3, %v3808_v15  ;;  %v3957_v13 = vadd.f32 %v3882_v50, %v11629_v52  ;;  %v11649_v15 = vld [vmem:[#allocation95_spill] sm:$0xff]  ;;  %v11650_v3 = vld [vmem:[#allocation96_spill] sm:$0xff]  ;;  %v11651_v50 = vld [vmem:[#allocation97_spill] sm:$0xff] }
 0x9af   :  { %v3884_v9 = vpop.f32.mrf.mxu0  ;;  %v3971_v45 = vadd.f32 %v10003_v30, %v3953_v51  ;;  %v11652_v51 = vld [vmem:[#allocation98_spill] sm:$0xff]  ;;  %v11654_v52 = vld [vmem:[#allocation100_spill] sm:$0xff] }
 0x9b0   :  { %v5870_v17 = vpop.f32.mrf.mxu1  ;;  %v3810_v0 = vadd.f32 %v3809_v56, %v3650_v42  ;;  %v4629_v46 = vmul.f32 -1.442695, %v3957_v13  ;;  %v3964_v26 = vadd.f32 %v3884_v9, %v11630_v60  ;;  %v11653_v56 = vld [vmem:[#allocation99_spill] sm:$0xff]  ;;  %v11655_v13 = vld [vmem:[#allocation101_spill] sm:$0xff]  ;;  %v11658_v9 = vld [vmem:[#allocation104_spill] sm:$0xff] }
 0x9b2   :  { %6088 = vpow2.f32 %v4629_v46  ;;  %v4630_v31 = vmul.f32 -1.442695, %v3964_v26  ;;  %v11657_v46 = vld [vmem:[#allocation103_spill] sm:$0xff]  ;;  %v11659_v26 = vld [vmem:[#allocation105_spill] sm:$0xff] }
 0x9b4   :  { %6090 = vpow2.f32 %v4630_v31  ;;  %v11660_v31 = vld [vmem:[#allocation106_spill] sm:$0xff] }
 0x9bf   :  { %v6089_v32 = vpop.eup %6088 }
 0x9c0   :  { %v3961_v33 = vadd.f32 1.0, %v6089_v32 }
 0x9c1   :  { %v6091_v34 = vpop.eup %6090 }
 0x9c2   :  { %6092 = vrcp.f32 %v3961_v33  ;;  %v3968_v20 = vadd.f32 1.0, %v6091_v34  ;;  %v11661_v33 = vld [vmem:[#allocation107_spill] sm:$0xff] }
 0x9c4   :  { %6094 = vrcp.f32 %v3968_v20  ;;  %v4309_v20 = vld [vmem:[#allocation6 + $0xc8] sm:$0xff] }
 0x9cf   :  { %v6093_v2 = vpop.eup %6092 }
 0x9d0   :  { %v3972_v8 = vmul.f32 %v6093_v2, %v3971_v45  ;;  %v4308_v45 = vld [vmem:[#allocation6 + $0xc0] sm:$0xff]  ;;  %v4307_v2 = vld [vmem:[#allocation6 + $0xb8] sm:$0xff] }
 0x9d1   :  { %v6095_v35 = vpop.eup %6094 }
 0x9d2   :  { %v3973_v23 = vadd.f32 %v3972_v8, %v11631_v61  ;;  %v3975_v48 = vsub.f32 1.0, %v6095_v35  ;;  %v3977_v1 = vmul.f32 %v6095_v35, %v10009_v22  ;;  %v4306_v8 = vld [vmem:[#allocation6 + $0xb0] sm:$0xff]  ;;  %v4303_v61 = vld [vmem:[#allocation6 + $0x98] sm:$0xff] }
 0x9d3   :  { %v4299_v35 = vld [vmem:[#allocation6 + $0x78] sm:$0xff] }
 0x9d4   :  { %6096 = vtanh.f32 %v3973_v23  ;;  %v4302_v23 = vld [vmem:[#allocation6 + $0x90] sm:$0xff] }
 0x9d5   :  { %6098 = vpow2.f32 %v4628_v37  ;;  %v4300_v37 = vld [vmem:[#allocation6 + $0x80] sm:$0xff] }
 0x9e1   :  { %v6097_v57 = vpop.eup %6096 }
 0x9e2   :  { %v3976_v39 = vmul.f32 %v6097_v57, %v3975_v48  ;;  %v6099_v30 = vpop.eup %6098  ;;  %v4298_v48 = vld [vmem:[#allocation6 + $0x70] sm:$0xff]  ;;  %v4297_v57 = vld [vmem:[#allocation6 + $0x68] sm:$0xff] }
 0x9e3   :  { %v3805_v22 = vadd.f32 1.0, %v6099_v30  ;;  %v4293_v30 = vld [vmem:[#allocation6 + $0x48] sm:$0xff] }
 0x9e4   :  { %v3978_v21 = vadd.f32 %v3977_v1, %v3976_v39  ;;  %v4296_v39 = vld [vmem:[#allocation6 + $0x60] sm:$0xff]  ;;  %v4295_v1 = vld [vmem:[#allocation6 + $0x58] sm:$0xff] }
 0x9e5   :  { %6100 = vrcp.f32 %v3805_v22  ;;  %v4292_v22 = vld [vmem:[#allocation6 + $0x40] sm:$0xff] }
 0x9e6   :  { %4044 = vmatmul.mubr.f32.vlgmr.msra.gmra.mxu0 %v3978_v21  ;;  %5904 = vmatmul.mubr.f32.vlgmr.msra.gmra.mxu1 %v3978_v21  ;;  %6102 = vtanh.f32 %v3810_v0  ;;  %v11656_v0 = vld [vmem:[#allocation102_spill] sm:$0xff]  ;;  %v4294_v21 = vld [vmem:[#allocation6 + $0x50] sm:$0xff] }
 0x9e7   :  { %4121 = vmatpush1.msra.mxu0 %v10013_v58  ;;  %5907 = vmatpush3.msra.mxu1 %v10016_v25  ;;  %v11632_v58 = vld [vmem:[#allocation66_spill] sm:$0xff]  ;;  %v11633_v25 = vld [vmem:[#allocation67_spill] sm:$0xff] }
 0x9e8   :  { %4122 = vmatprep.subr.mxu0 %v10019_v10  ;;  %5908 = vmatprep.subr.mxu1 %v10980_v44  ;;  %v11634_v10 = vld [vmem:[#allocation74_spill] sm:$0xff] }
 0x9e9   :  { %4123 = vmatpush1.msra.mxu0 %v10023_v6  ;;  %5909 = vmatpush3.msra.mxu1 %v10026_v11  ;;  %v11635_v6 = vld [vmem:[#allocation87_spill] sm:$0xff]  ;;  %v11636_v11 = vld [vmem:[#allocation88_spill] sm:$0xff] }
 0x9ea   :  { %4124 = vmatprep.subr.mxu0 %v10029_v27  ;;  %5910 = vmatprep.subr.mxu1 %v10980_v44  ;;  %v11637_v27 = vld [vmem:[#allocation89_spill] sm:$0xff] }
 0x9eb   :  { %4125 = vmatpush1.msra.mxu0 %v10033_v54  ;;  %5911 = vmatpush3.msra.mxu1 %v10036_v59  ;;  %v11638_v54 = vld [vmem:[#allocation75_spill] sm:$0xff]  ;;  %v11639_v59 = vld [vmem:[#allocation76_spill] sm:$0xff] }
 0x9ec   :  { %4126 = vmatprep.subr.mxu0 %v10039_v18  ;;  %5912 = vmatprep.subr.mxu1 %v10980_v44  ;;  %v11640_v18 = vld [vmem:[#allocation83_spill] sm:$0xff] }
 0x9ed   :  { %4127 = vmatpush1.msra.mxu0 %v10043_v4  ;;  %5913 = vmatpush3.msra.mxu1 %v10046_v29  ;;  %v11641_v4 = vld [vmem:[#allocation70_spill] sm:$0xff]  ;;  %v11642_v29 = vld [vmem:[#allocation71_spill] sm:$0xff] }
 0x9ee   :  { %4128 = vmatprep.subr.mxu0 %v11632_v58  ;;  %5914 = vmatprep.subr.mxu1 %v10980_v44  ;;  %v4291_v58 = vld [vmem:[#allocation6 + $0x38] sm:$0xff] }
 0x9ef   :  { %4129 = vmatpush1.msra.mxu0 %v11633_v25  ;;  %5915 = vmatpush3.msra.mxu1 %v11634_v10  ;;  %v4290_v25 = vld [vmem:[#allocation6 + $0x30] sm:$0xff]  ;;  %v4289_v10 = vld [vmem:[#allocation6 + $0x28] sm:$0xff] }
 0x9f0   :  { %4130 = vmatprep.subr.mxu0 %v11635_v6  ;;  %5916 = vmatprep.subr.mxu1 %v10980_v44  ;;  %v4288_v6 = vld [vmem:[#allocation6 + $0x20] sm:$0xff] }
 0x9f1   :  { %4131 = vmatpush1.msra.mxu0 %v11636_v11  ;;  %5917 = vmatpush3.msra.mxu1 %v11637_v27  ;;  %v4287_v11 = vld [vmem:[#allocation6 + $0x18] sm:$0xff]  ;;  %v4286_v27 = vld [vmem:[#allocation6 + $0x10] sm:$0xff] }
 0x9f2   :  { %4132 = vmatprep.subr.mxu0 %v11638_v54  ;;  %5918 = vmatprep.subr.mxu1 %v10980_v44  ;;  %v6101_v42 = vpop.eup %6100  ;;  %v4285_v54 = vld [vmem:[#allocation6 + $0x8] sm:$0xff] }
 0x9f3   :  { %4133 = vmatpush1.msra.mxu0 %v11639_v59  ;;  %5919 = vmatpush3.msra.mxu1 %v11640_v18  ;;  %v6103_v17 = vpop.eup %6102  ;;  %v3812_v60 = vsub.f32 1.0, %v6101_v42  ;;  %v3814_v34 = vmul.f32 %v6101_v42, %v10169_v53  ;;  %v4311_v53 = vld [vmem:[#allocation6 + $0xd8] sm:$0xff]  ;;  %v4284_v59 = vld [vmem:[#allocation6] sm:$0xff]  ;;  %v4432_v42 = vld [vmem:[%s10534_s13 + $0x50] sm:$0xff] }
 0x9f4   :  { %4134 = vmatprep.subr.mxu0 %v11641_v4  ;;  %5920 = vmatprep.subr.mxu1 %v10980_v44  ;;  %v4283_v18 = vld [vmem:[%s10522_s1] sm:$0xff]  ;;  %v4453_v4 = vld [vmem:[%s10534_s13 + $0xf8] sm:$0xff] }
 0x9f5   :  { %4135 = vmatpush1.msra.mxu0 %v11642_v29  ;;  %5921 = vmatpush3.msra.mxu1 %v11643_v36  ;;  %v3813_v32 = vmul.f32 %v6103_v17, %v3812_v60  ;;  %v4437_v29 = vld [vmem:[%s10534_s13 + $0x78] sm:$0xff]  ;;  %v6631_v36 = vmov 0   ;;  %v4430_v17 = vld [vmem:[%s10534_s13 + $0x40] sm:$0xff]  ;;  %v4428_v60 = vld [vmem:[%s10534_s13 + $0x30] sm:$0xff] }
 0x9f6   :  { %4136 = vmatprep.subr.mxu0 %v11644_v16  ;;  %5922 = vmatprep.subr.mxu1 %v10980_v44  ;;  %v4452_v16 = vld [vmem:[%s10534_s13 + $0xf0] sm:$0xff] }
 0x9f7   :  { %4137 = vmatpush1.msra.mxu0 %v11645_v38  ;;  %5923 = vmatpush3.msra.mxu1 %v11646_v41  ;;  %v4436_v38 = vld [vmem:[%s10534_s13 + $0x70] sm:$0xff]  ;;  %v4451_v41 = vld [vmem:[%s10534_s13 + $0xe8] sm:$0xff] }
 0x9f8   :  { %4138 = vmatprep.subr.mxu0 %v11647_v47  ;;  %5924 = vmatprep.subr.mxu1 %v10980_v44  ;;  %v4435_v47 = vld [vmem:[%s10534_s13 + $0x68] sm:$0xff] }
 0x9f9   :  { %4139 = vmatpush1.msra.mxu0 %v11648_v62  ;;  %5925 = vmatpush3.msra.mxu1 %v11649_v15  ;;  %v4450_v62 = vld [vmem:[%s10534_s13 + $0xe0] sm:$0xff] }
 0x9fa   :  { %4140 = vmatprep.subr.mxu0 %v11650_v3  ;;  %5926 = vmatprep.subr.mxu1 %v10980_v44  ;;  %v4434_v15 = vld [vmem:[%s10534_s13 + $0x60] sm:$0xff]  ;;  %v4449_v3 = vld [vmem:[%s10534_s13 + $0xd8] sm:$0xff] }
 0x9fb   :  { %4141 = vmatpush1.msra.mxu0 %v11651_v50  ;;  %5927 = vmatpush3.msra.mxu1 %v11652_v51  ;;  %v4433_v50 = vld [vmem:[%s10534_s13 + $0x58] sm:$0xff]  ;;  %v4448_v51 = vld [vmem:[%s10534_s13 + $0xd0] sm:$0xff] }
 0x9fc   :  { %4142 = vmatprep.subr.mxu0 %v11653_v56  ;;  %5928 = vmatprep.subr.mxu1 %v10980_v44  ;;  %v4447_v56 = vld [vmem:[%s10534_s13 + $0xc8] sm:$0xff] }
 0x9fd   :  { %4143 = vmatpush1.msra.mxu0 %v11654_v52  ;;  %5929 = vmatpush3.msra.mxu1 %v11655_v13  ;;  %v4431_v52 = vld [vmem:[%s10534_s13 + $0x48] sm:$0xff]  ;;  %v4446_v13 = vld [vmem:[%s10534_s13 + $0xc0] sm:$0xff] }
 0x9fe   :  { %4144 = vmatprep.subr.mxu0 %v11656_v0  ;;  %5930 = vmatprep.subr.mxu1 %v10980_v44  ;;  %v4445_v0 = vld [vmem:[%s10534_s13 + $0xb8] sm:$0xff] }
 0x9ff   :  { %4145 = vmatpush1.msra.mxu0 %v11657_v46  ;;  %5931 = vmatpush3.msra.mxu1 %v11658_v9  ;;  %v4429_v46 = vld [vmem:[%s10534_s13 + $0x38] sm:$0xff]  ;;  %v4444_v9 = vld [vmem:[%s10534_s13 + $0xb0] sm:$0xff] }
 0xa00   :  { %4146 = vmatprep.subr.mxu0 %v11659_v26  ;;  %5932 = vmatprep.subr.mxu1 %v10980_v44  ;;  %v4443_v26 = vld [vmem:[%s10534_s13 + $0xa8] sm:$0xff] }
 0xa01   :  { %4147 = vmatpush1.msra.mxu0 %v11660_v31  ;;  %5933 = vmatpush3.msra.mxu1 %v10147_v5  ;;  %v10393_v5 = vadd.f32 %v3814_v34, %v3813_v32  ;;  %v4427_v31 = vld [vmem:[%s10534_s13 + $0x28] sm:$0xff] }
 0xa02   :  { %4148 = vmatprep.subr.mxu0 %v10150_v49  ;;  %5934 = vmatprep.subr.mxu1 %v10980_v44  ;;  %v4314_v49 = vld [vmem:[#allocation6 + $0xf0] sm:$0xff] }
 0xa03   :  { %4149 = vmatpush1.msra.mxu0 %v11661_v33  ;;  %5935 = vmatpush3.msra.mxu1 %v10157_v12  ;;  %v4313_v12 = vld [vmem:[#allocation6 + $0xe8] sm:$0xff] }
 0xa04   :  { %4150 = vmatprep.subr.mxu0 %v10161_v28  ;;  %5936 = vmatprep.subr.mxu1 %v10980_v44  ;;  %v4315_v28 = vld [vmem:[#allocation6 + $0xf8] sm:$0xff] }
 0xa05   :  { %4151 = vmatpush1.msra.mxu0 %v10165_v7  ;;  %4184 = vmatprep.mubr.f32.mxu0 %v10980_v44  ;;  %v4312_v7 = vld [vmem:[#allocation6 + $0xe0] sm:$0xff] }
 0xa06   :  { %5937 = vmatpush3.msra.mxu1 %v10171_v63  ;;  %5938 = vmatprep.mubr.msk.f32.mxu1 %vm6630_vm2, %v10980_v44  ;;  %v4310_v63 = vld [vmem:[#allocation6 + $0xd0] sm:$0xff] }
 0xa07   :  { %4185 = vmatmul.mubr.f32.vlgmr.msra.gmra.mxu0 %v10393_v5  ;;  %5939 = vmatmul.mubr.f32.vlgmr.msra.gmra.mxu1 %v10393_v5 }
 0xa08   :  { %4399 = vmatprep.mubr.f32.mxu0 %v10980_v44  ;;  %4335 = vmatprep.subr.mxu0 %v4315_v28  ;;  %v4305_v44 = vld [vmem:[#allocation6 + $0xa8] sm:$0xff] }
 0xa09   :  { %4336 = vmatpush1.msra.mxu0 %v4314_v49  ;;  %5953 = vset.pattern.permute.xlu0 %v6631_v36  ;;  %v11663_v36 = vld [vmem:[#allocation65_spill] sm:$0xff] }
 0xa0a   :  { %4337 = vmatprep.subr.mxu0 %v4313_v12  ;;  %5052 = vmatprep.subr.mxu1 %v4453_v4 }
 0xa0b   :  { %4338 = vmatpush1.msra.mxu0 %v4312_v7  ;;  %4319 = vperm.xlu0 %5953, %v4283_v18   ;;  %v11662_v18 = vld [vmem:[#allocation64_spill] sm:$0xff] }
 0xa0c   :  { %4339 = vmatprep.subr.mxu0 %v4311_v53  ;;  %5053 = vmatpush3.msra.mxu1 %v4437_v29 }
 0xa0d   :  { %4340 = vmatpush1.msra.mxu0 %v4310_v63  ;;  %5054 = vmatprep.subr.mxu1 %v4452_v16 }
 0xa0e   :  { %4341 = vmatprep.subr.mxu0 %v4309_v20  ;;  %5055 = vmatpush3.msra.mxu1 %v4436_v38 }
 0xa0f   :  { %4342 = vmatpush1.msra.mxu0 %v4308_v45  ;;  %5056 = vmatprep.subr.mxu1 %v4451_v41  ;;  %v4406_v41 = vld [vmem:[%s10533_s12] sm:$0x3]  ;;  %s6632_s12 = smov 4  }
 0xa10   :  { %4343 = vmatprep.subr.mxu0 %v4307_v2  ;;  %5057 = vmatpush3.msra.mxu1 %v4435_v47 }
 0xa11   :  { %4344 = vmatpush1.msra.mxu0 %v4306_v8  ;;  %5058 = vmatprep.subr.mxu1 %v4450_v62 }
 0xa12   :  { %4345 = vmatprep.subr.mxu0 %v4305_v44  ;;  %5059 = vmatpush3.msra.mxu1 %v4434_v15  ;;  %v4411_v15 = vrot.slane %v4406_v41, %v11662_v18 }
 0xa13   :  { %4346 = vmatpush1.msra.mxu0 %v4304_v24  ;;  %5060 = vmatprep.subr.mxu1 %v4449_v3 }
 0xa14   :  { %4347 = vmatprep.subr.mxu0 %v4303_v61  ;;  %5061 = vmatpush3.msra.mxu1 %v4433_v50  ;;  %v4415_v50 = vrot.slane %v4406_v41, %v11663_v36 }
 0xa15   :  { %4348 = vmatpush1.msra.mxu0 %v4302_v23  ;;  %5062 = vmatprep.subr.mxu1 %v4448_v51 }
 0xa16   :  { %4349 = vmatprep.subr.mxu0 %v4301_v55  ;;  %5063 = vmatpush3.msra.mxu1 %v4432_v42 }
 0xa17   :  { %4350 = vmatpush1.msra.mxu0 %v4300_v37  ;;  %5064 = vmatprep.subr.mxu1 %v4447_v56 }
 0xa18   :  { %4351 = vmatprep.subr.mxu0 %v4299_v35  ;;  %5065 = vmatpush3.msra.mxu1 %v4431_v52 }
 0xa19   :  { %4352 = vmatpush1.msra.mxu0 %v4298_v48  ;;  %5066 = vmatprep.subr.mxu1 %v4446_v13 }
 0xa1a   :  { %4353 = vmatprep.subr.mxu0 %v4297_v57  ;;  %5067 = vmatpush3.msra.mxu1 %v4430_v17 }
 0xa1b   :  { %4354 = vmatpush1.msra.mxu0 %v4296_v39  ;;  %5068 = vmatprep.subr.mxu1 %v4445_v0 }
 0xa1c   :  { %4355 = vmatprep.subr.mxu0 %v4295_v1  ;;  %5069 = vmatpush3.msra.mxu1 %v4429_v46  ;;  %v4633_v46 = vld [vmem:[%s10535_s14] ss:$0 sm:$0xff]  ;;  %s6633_s14 = smov 124  }
 0xa1d   :  { %4356 = vmatpush1.msra.mxu0 %v4294_v21  ;;  %5070 = vmatprep.subr.mxu1 %v4444_v9 }
 0xa1e   :  { %4357 = vmatprep.subr.mxu0 %v4293_v30  ;;  %5071 = vmatpush3.msra.mxu1 %v4428_v60 }
 0xa1f   :  { %4358 = vmatpush1.msra.mxu0 %v4292_v22  ;;  %5072 = vmatprep.subr.mxu1 %v4443_v26 }
 0xa20   :  { %4359 = vmatprep.subr.mxu0 %v4291_v58  ;;  %5073 = vmatpush3.msra.mxu1 %v4427_v31  ;;  %v4442_v58 = vld [vmem:[%s10534_s13 + $0xa0] sm:$0xff] }
 0xa21   :  { %4360 = vmatpush1.msra.mxu0 %v4290_v25  ;;  %5074 = vmatprep.subr.mxu1 %v4442_v58  ;;  %v4440_v25 = vld [vmem:[%s10534_s13 + $0x90] sm:$0xff] }
 0xa22   :  { %4361 = vmatprep.subr.mxu0 %v4289_v10  ;;  %v4424_v10 = vld [vmem:[%s10534_s13 + $0x10] sm:$0xff] }
 0xa23   :  { %4362 = vmatpush1.msra.mxu0 %v4288_v6  ;;  %v4439_v6 = vld [vmem:[%s10534_s13 + $0x88] sm:$0xff] }
 0xa24   :  { %4363 = vmatprep.subr.mxu0 %v4287_v11  ;;  %v4423_v11 = vld [vmem:[%s10534_s13 + $0x8] sm:$0xff] }
 0xa25   :  { %4364 = vmatpush1.msra.mxu0 %v4286_v27  ;;  %v4438_v27 = vld [vmem:[%s10534_s13 + $0x80] sm:$0xff] }
 0xa26   :  { %4365 = vmatprep.subr.mxu0 %v4285_v54  ;;  %v4422_v54 = vld [vmem:[%s10534_s13] sm:$0xff] }
 0xa27   :  { %4366 = vmatpush1.msra.mxu0 %v4284_v59  ;;  %v4316_v59 = vld [vmem:[%s10532_s11] sm:$0x3] }
 0xa28   :  { %v4326_v4 = vrot.slane %v4316_v59, %v11662_v18  ;;  %v4330_v16 = vrot.slane %v4316_v59, %v11663_v36 }
 0xa86   :  { %v4320_v29 = vpop.permute.xlu0 %4319 }
 0xa87   :  { %v4333_v38 = vmul.f32 %v4326_v4, %v4320_v29  ;;  %v4334_v47 = vmul.f32 %v4330_v16, %v4320_v29 }
 0xaa6   :  { %v4116_v32 = vpop.f32.mrf.mxu1  ;;  %v4045_v34 = vpop.f32.mrf.mxu0 }
 0xaa7   :  { %v4046_v49 = vadd.f32 %v4045_v34, %v11628_v43  ;;  %v4117_v35 = vadd.f32 %v4116_v32, %v7657_v40  ;;  %v4426_v40 = vld [vmem:[%s10534_s13 + $0x20] sm:$0xff] }
 0xaa8   :  { %v5905_v33 = vpop.f32.mrf.mxu1  ;;  %v4047_v28 = vpop.f32.mrf.mxu0  ;;  %5075 = vmatpush3.msra.mxu1 %v4426_v40 }
 0xaa9   :  { %v4048_v2 = vadd.f32 %v4047_v28, %v7664_v14 }
 0xac7   :  { %v4186_v12 = vpop.f32.mrf.mxu0  ;;  %v4257_v7 = vpop.f32.mrf.mxu1 }
 0xac8   :  { %v4261_v53 = vadd.f32 %v4186_v12, %v4046_v49  ;;  %v4275_v37 = vadd.f32 %v10320_v19, %v4257_v7  ;;  %v4441_v19 = vld [vmem:[%s10534_s13 + $0x98] sm:$0xff] }
 0xac9   :  { %v5940_v63 = vpop.f32.mrf.mxu1  ;;  %v4188_v45 = vpop.f32.mrf.mxu0  ;;  %5076 = vmatprep.subr.mxu1 %v4441_v19 }
 0xaca   :  { %v4631_v20 = vmul.f32 -1.442695, %v4261_v53  ;;  %v4268_v8 = vadd.f32 %v4188_v45, %v4048_v2 }
 0xacc   :  { %6104 = vpow2.f32 %v4631_v20  ;;  %v4632_v44 = vmul.f32 -1.442695, %v4268_v8 }
 0xace   :  { %6106 = vpow2.f32 %v4632_v44 }
 0xad9   :  { %v6105_v24 = vpop.eup %6104 }
 0xada   :  { %v4265_v61 = vadd.f32 1.0, %v6105_v24 }
 0xadb   :  { %v6107_v23 = vpop.eup %6106 }
 0xadc   :  { %6108 = vrcp.f32 %v4265_v61  ;;  %v4272_v55 = vadd.f32 1.0, %v6107_v23 }
 0xade   :  { %6110 = vrcp.f32 %v4272_v55 }
 0xae9   :  { %v6109_v43 = vpop.eup %6108 }
 0xaea   :  { %v4276_v48 = vmul.f32 %v6109_v43, %v4275_v37 }
 0xaeb   :  { %v6111_v39 = vpop.eup %6110 }
 0xaec   :  { %v4277_v57 = vadd.f32 %v4276_v48, %v4117_v35  ;;  %v4279_v14 = vsub.f32 1.0, %v6111_v39  ;;  %v4281_v30 = vmul.f32 %v6111_v39, %v10393_v5  ;;  %v4425_v5 = vld [vmem:[%s10534_s13 + $0x18] sm:$0xff] }
 0xaed   :  { %5077 = vmatpush3.msra.mxu1 %v4425_v5 }
 0xaee   :  { %6112 = vtanh.f32 %v4277_v57  ;;  %5078 = vmatprep.subr.mxu1 %v4440_v25 }
 0xaef   :  { %5079 = vmatpush3.msra.mxu1 %v4424_v10 }
 0xaf0   :  { %5080 = vmatprep.subr.mxu1 %v4439_v6 }
 0xaf1   :  { %5081 = vmatpush3.msra.mxu1 %v4423_v11 }
 0xaf2   :  { %5082 = vmatprep.subr.mxu1 %v4438_v27 }
 0xaf3   :  { %5083 = vmatpush3.msra.mxu1 %v4422_v54 }
 0xafb   :  { %v6113_v1 = vpop.eup %6112 }
 0xafc   :  { %v4280_v21 = vmul.f32 %v6113_v1, %v4279_v14 }
 0xafe   :  { %v4282_v22 = vadd.f32 %v4281_v30, %v4280_v21 }
 0xb00   :  { %4400 = vmatmul.mubr.f32.vlgmr.msra.gmra.mxu0 %v4282_v22 }
 0xbc0   :  { %v4401_v62 = vpop.f32.mrf.mxu0 }
 0xbc1   :  { %v4402_v3 = vadd.f32 %v4401_v62, %v4333_v38 }
 0xbc2   :  { %v4403_v51 = vpop.f32.mrf.mxu0 }
 0xbc3   :  { %v4404_v42 = vadd.f32 %v4403_v51, %v4334_v47  ;;  %v4418_v56 = vadd.f32 %v4411_v15, %v4402_v3 }
 0xbc5   :  { %v4419_v52 = vadd.f32 %v4415_v50, %v4404_v42  ;;  %v4420_v17 = vmax.f32 %v4418_v56, 0.0 }
 0xbc7   :  { %v4421_v13 = vmax.f32 %v4419_v52, 0.0 }
 0xbc9   :  { %4525 = vmatprep.mubr.f32.mxu1 %v4421_v13 }
 0xbca   :  { %4526 = vmatmul.mubr.f32.vlgmr.msra.gmra.mxu1 %v4420_v17 }
 0xc8a   :  { %v5084_v0 = vpop.f32.mrf.mxu1 }
 0xc8c   :  { %v5085_v9 = vpop.f32.mrf.mxu1 }
 0xc8d   :  { %v5086_v60 = vadd.f32 %v5085_v9, %v5084_v0 }
 0xc8f   :  { %v4528_v26 = vadd.f32 %v5086_v60, %v4633_v46 }
 0xc91   :  { %6114 = vtanh.f32 %v4528_v26 }
 0xc9e   :  { %v6115_v31 = vpop.eup %6114 }
 0xc9f   :  { %v4535_v32 = vmul.f32 -2.0, %v6115_v31  ;;  %v4534_v23 = vsub.f32 0.6931472, %v6115_v31  ;;  %v4532_v35 = vsub.f32 0.0, %v6115_v31 }
 0xca1   :  { %v4537_v33 = vsub.f32 0.0, %v4535_v32  ;;  %v4536_v44 = vmax.f32 %v4535_v32, 0.0  ;;  %v4634_v48 = vadd.f32 -0.9189385, %v4532_v35 }
 0xca3   :  { %v4540_v34 = vand.u32 2147483647, %v4537_v33  ;;  %vm4538_vm4 = vcmp.ne.f32.partialorder %v4537_v33, %v4537_v33 }
 0xca5   :  { %v4541_v28 = vsub.f32 0.0, %v4540_v34 }
 0xca7   :  { %v4542_v49 = vmul.f32 1.442695, %v4541_v28 }
 0xca9   :  { %6116 = vpow2.f32 %v4542_v49 }
 0xcb6   :  { %v6117_v12 = vpop.eup %6116 }
 0xcb7   :  { %v4544_v7 = vadd.f32 1.0, %v6117_v12  ;;  %v4547_v53 = vmul.f32 -0.5, %v6117_v12  ;;  %v4550_v20 = vand.u32 2147483647, %v6117_v12 }
 0xcb9   :  { %6118 = vlog2.f32 %v4544_v7  ;;  %v4548_v63 = vadd.f32 1.0, %v4547_v53  ;;  %vm4551_vm3 = vcmp.lt.f32.partialorder %v4550_v20, 0.0004427343 }
 0xcbb   :  { %v4549_v8 = vmul.f32 %v6117_v12, %v4548_v63 }
 0xcc6   :  { %v6119_v45 = vpop.eup %6118 }
 0xcc7   :  { %v4546_v2 = vmul.f32 0.6931472, %v6119_v45 }
 0xcc9   :  { %v4552_v24 = vsel %vm4551_vm3, %v4549_v8, %v4546_v2 }
 0xcca   :  { %v4553_v61 = vadd.f32 %v4552_v24, %v4536_v44 }
 0xccc   :  { %v4554_v55 = vsel %vm4538_vm4, %v4535_v32, %v4553_v61 }
 0xccd   :  { %v4555_v37 = vsub.f32 %v4534_v23, %v4554_v55 }
 0xccf   :  { %v4556_v43 = vmul.f32 2.0, %v4555_v37 }
 0xcd1   :  { %4558 = vrot.lane.b32.xlu0 %v4556_v43, %s6632_s12 }
 0xd43   :  { %v4559_v57 = vpop.permute.xlu0 %4558 }
 0xd44   :  { %v4561_v39 = vsub.f32 %v4634_v48, %v4559_v57 }
 0xd46   :  { %4563 = vrot.lane.b32.xlu1 %v4561_v39, %s6633_s14 }
 0xdb8   :  { %v4564_v14 = vpop.permute.xlu1 %4563 }
 0xdb9   :  { %v4567_v1 = vsel %vm4566_vm5, %v4564_v14, 0.0 }
 0xdba   :  { %4568 = vadd.xlane.f32.xlu1 %v4567_v1 }
 0xe43   :  { %v4569_v21 = vpop.xlane.xlu1 %4568 }
 0xe44   :  { %v4570_v30 = vsel %vm4566_vm5, %v6115_v31, %v4569_v21 }
 0xe45   :  { %v4572_v22 = vsel %vm4571_vm6, %v4570_v30, 0.0 }
 0xe46   :  { %4573 = vst [vmem:[%s10536_s15] sm:$0xff] %v4572_v22 }
 0xe47   :  { %4578 = vsyncpa [#allocation3], 1 }
 0xe48   :  { %4579 = vsyncpa [#allocation5], 1 }

</bundles_post_ra>
